<compile_context>
chip_gen: v7x
topology: tpu7x:2x2x1
jax: 0.10.0
libtpu: 0.0.40
codegen_flags: <defaults>
</compile_context>

<pallas_src>
import functools

import jax
import jax.numpy as jnp
from jax.experimental import pallas as pl
from jax.experimental.pallas import tpu as pltpu


IMAGENET_MEAN = (0.485, 0.456, 0.406)
IMAGENET_STD = (0.229, 0.224, 0.225)
LANE = 128


def _round_up(x, m):
    return (x + m - 1) // m * m


# ----------------------------------------------------------------------------
# Pallas kernel: fused conv3x3/stride-2 + bias + ReLU over a space-to-depth
# ("phase") input.  One grid step = one image.  The four 2x2 taps are
# unit-stride row shifts {0, 1, W+1, W+2} of the flattened phase tensor, each
# contracted against a (4*Cin_pad, Cout_pad) weight slice on the MXU.
# ----------------------------------------------------------------------------
def _conv_s2_kernel(a_ref, w_ref, b_ref, o_ref, *, m_out, row_stride, tile_m,
                    tap_dtype):
    bias = b_ref[...]                               # (1, Cout_pad), f32
    offs = (0, 1, row_stride, row_stride + 1)       # (di, dj) = (0,0),(0,1),(1,0),(1,1)
    # Static (unrolled) tiling over output rows: big lane-dense tiles, no
    # divisibility requirement on m_out (last tile is simply ragged).
    for m0 in range(0, m_out, tile_m):
        mt = min(tile_m, m_out - m0)
        # One aligned load covering all four shifted taps for this tile; the
        # +row_stride+1 slack is covered by the guard row appended in the prep.
        span = a_ref[0, m0:m0 + mt + row_stride + 1, :]
        if span.dtype != tap_dtype:
            span = span.astype(tap_dtype)           # uint8 -> f32 happens here
        acc = jnp.zeros((mt, bias.shape[1]), jnp.float32)
        for t, off in enumerate(offs):
            acc += jnp.dot(span[off:off + mt, :], w_ref[t],
                           preferred_element_type=jnp.float32)
        out = jnp.maximum(acc + bias, 0.0)          # f32 epilogue (v5e-safe)
        o_ref[0, m0:m0 + mt, :] = out.astype(o_ref.dtype)


def conv3x3_s2_fused(a, w4, b2, *, m_out, row_stride, out_dtype):
    """a: (N, m_out + row_stride + 1, 4*Cin_pad) phase input (uint8/bf16/f32),
    w4: (4, 4*Cin_pad, Cout_pad), b2: (1, Cout_pad) f32."""
    N, Ma, Kc = a.shape
    taps, Kc2, coutp = w4.shape
    assert taps == 4 and Kc2 == Kc and Ma == m_out + row_stride + 1
    tile_m = min(m_out, 1024)
    kern = functools.partial(_conv_s2_kernel, m_out=m_out,
                             row_stride=row_stride, tile_m=tile_m,
                             tap_dtype=w4.dtype)
    return pl.pallas_call(
        kern,
        out_shape=jax.ShapeDtypeStruct((N, m_out, coutp), out_dtype),
        grid=(N,),
        in_specs=[
            pl.BlockSpec((1, Ma, Kc), lambda n: (n, 0, 0)),
            # Constant block index: weights/bias stay resident (no re-DMA).
            pl.BlockSpec((4, Kc, coutp), lambda n: (0, 0, 0)),
            pl.BlockSpec((1, coutp), lambda n: (0, 0)),
        ],
        out_specs=pl.BlockSpec((1, m_out, coutp), lambda n: (n, 0, 0)),
        compiler_params=pltpu.CompilerParams(
            dimension_semantics=("parallel",),       # v7x megacore over images
            vmem_limit_bytes=48 * 1024 * 1024,       # > v5e default, < v7x phys
        ),
    )(a, w4, b2)


# ----------------------------------------------------------------------------
# Glue (single fused XLA pass per layer): pad + space-to-depth + flatten.
# ----------------------------------------------------------------------------
def _space_to_depth_flatten(xp, ho, wo):
    # xp: (N, 2*ho+2, 2*wo+2, C) -> (N, (ho+1)*(wo+1) + 1, 4*C)
    # Channel order of the last dim: (row_phase a, col_phase b, c).
    n, _, _, c = xp.shape
    a = xp.reshape(n, ho + 1, 2, wo + 1, 2, c)
    a = jnp.transpose(a, (0, 1, 3, 2, 4, 5))
    a = a.reshape(n, (ho + 1) * (wo + 1), 4 * c)
    return jnp.pad(a, ((0, 0), (0, 1), (0, 0)))      # guard row for junk-column taps


def _prep_stage1(images_nchw, pad_vec):
    # NCHW image -> phase input; the transpose/pad/space-to-depth fuse into one
    # XLA pass over the (uint8-sized) image; no standalone transpose pass.
    n, c, h, w = images_nchw.shape
    x = jnp.transpose(images_nchw, (0, 2, 3, 1))
    border = jnp.broadcast_to(pad_vec.astype(images_nchw.dtype),
                              (n, h + 2, w + 2, c))
    xp = jax.lax.dynamic_update_slice(border, x, (0, 1, 1, 0))
    return _space_to_depth_flatten(xp, h // 2, w // 2)


def _prep_next_stage(y_flat, h, w_sp):
    # y_flat: (N, h*(w_sp+1), Cp) previous kernel output (one junk column per
    # spatial row).  Drop the junk column, zero-pad, space-to-depth, flatten.
    n, _, cp = y_flat.shape
    y = y_flat.reshape(n, h, w_sp + 1, cp)[:, :, :w_sp, :]
    yp = jnp.pad(y, ((0, 0), (1, 1), (1, 1), (0, 0)))
    return _space_to_depth_flatten(yp, h // 2, w_sp // 2)


def _fold_phase_weights(w, b, cin_pad, cout_pad, dtype):
    """(3,3,Cin,Cout) conv weights -> 4 tap matrices (4*cin_pad, cout_pad) for
    the space-to-depth reformulation; channels zero-padded to 128 lanes."""
    cin, cout = w.shape[2], w.shape[3]
    wp = jnp.zeros((3, 3, cin_pad, cout_pad), jnp.float32)
    wp = wp.at[:, :, :cin, :cout].set(w)
    wt = jnp.zeros((2, 2, 2, 2, cin_pad, cout_pad), jnp.float32)
    for kh in range(3):
        di, a = divmod(kh, 2)
        for kw in range(3):
            dj, bb = divmod(kw, 2)
            wt = wt.at[di, dj, a, bb].set(wp[kh, kw])
    w4 = wt.reshape(4, 4 * cin_pad, cout_pad).astype(dtype)
    b2 = jnp.zeros((1, cout_pad), jnp.float32).at[0, :cout].set(b)
    return w4, b2


# ----------------------------------------------------------------------------
# ImageEncoder: folded normalization + 5-stage stride-2 backbone -> c5 (NCHW).
# ----------------------------------------------------------------------------
class ImageEncoderPallas:
    # stem + block1..block4 output widths (scaled-down stand-in for RegNet-X
    # 400MF's [32, 32, 64, 160, 400]); c5 = output of the last stage.
    STAGE_WIDTHS = (8, 16, 32, 32, 64)

    def __init__(self, key):
        mean = jnp.array(IMAGENET_MEAN, jnp.float32)
        std = jnp.array(IMAGENET_STD, jnp.float32)
        widths = (3,) + self.STAGE_WIDTHS
        self.layers = []
        prev_pad = 3
        for i in range(len(self.STAGE_WIDTHS)):
            cin, cout = widths[i], widths[i + 1]
            key, kw, kb = jax.random.split(key, 3)
            w = jax.random.normal(kw, (3, 3, cin, cout), jnp.float32)
            w = w * (2.0 / (9 * cin)) ** 0.5
            # Bias stands in for the folded inference-time BatchNorm affine.
            b = jax.random.normal(kb, (cout,), jnp.float32) * 0.01
            cout_pad = _round_up(cout, LANE)
            if i == 0:
                # Fold (x*scale - mean)/std into conv1 (uint8 and float paths).
                b_fold = b - jnp.einsum("hwio,i->o", w, mean / std)
                w_u8 = w / (255.0 * std)[None, None, :, None]
                w_fl = w / std[None, None, :, None]
                self._layer0_u8 = _fold_phase_weights(
                    w_u8, b_fold, prev_pad, cout_pad, jnp.float32)
                self._layer0_float = _fold_phase_weights(
                    w_fl, b_fold, prev_pad, cout_pad, jnp.float32)
                self.layers.append(self._layer0_u8)
            else:
                self.layers.append(
                    _fold_phase_weights(w, b, prev_pad, cout_pad, jnp.bfloat16))
            prev_pad = cout_pad
        # uint8 border value = pre-image of 0 under the folded normalization.
        self._pad_u8 = jnp.array(
            [round(255.0 * m) for m in IMAGENET_MEAN], jnp.uint8)
        self._pad_float = mean
        self._out_channels = self.STAGE_WIDTHS[-1]

    @property
    def out_channels(self):
        return self._out_channels

    def __call__(self, images):
        # images: (N, 3, H, W), uint8 (scaled by 1/255) or float (already [0,1]).
        n, c, h_in, w_in = images.shape
        assert c == 3 and h_in % 32 == 0 and w_in % 32 == 0
        if images.dtype == jnp.uint8:
            layer0 = self._layer0_u8
            a = _prep_stage1(images, self._pad_u8)
        else:
            layer0 = self._layer0_float
            a = _prep_stage1(images.astype(jnp.float32), self._pad_float)
        layers = [layer0] + self.layers[1:]

        h, w_sp = h_in // 2, w_in // 2          # output spatial of layer 0
        y = None
        for i, (w4, b2) in enumerate(layers):
            last = i == len(layers) - 1
            y = conv3x3_s2_fused(
                a, w4, b2, m_out=h * (w_sp + 1), row_stride=w_sp + 1,
                out_dtype=jnp.float32 if last else jnp.bfloat16)
            if not last:
                a = _prep_next_stage(y, h, w_sp)
                h, w_sp = h // 2, w_sp // 2
        # Drop the per-row junk column and the channel padding; return NCHW c5.
        y = y.reshape(n, h, w_sp + 1, -1)[:, :, :w_sp, :self._out_channels]
        return jnp.transpose(y, (0, 3, 1, 2))   # (N, out_channels, H/32, W/32)


if __name__ == "__main__":
    key = jax.random.PRNGKey(0)
    k_img, k_params = jax.random.split(key)

    # Small deterministic uint8 images, NCHW, exercising the /255 folded path.
    images = jax.random.randint(
        k_img, (2, 3, 64, 64), 0, 256, dtype=jnp.int32).astype(jnp.uint8)

    encoder = ImageEncoderPallas(k_params)
    forward = jax.jit(encoder.__call__)
    feats = jax.block_until_ready(forward(images))

    expected = (2, encoder.out_channels, 64 // 32, 64 // 32)
    assert feats.shape == expected, (feats.shape, expected)
    assert feats.dtype == jnp.float32
    assert bool(jnp.all(jnp.isfinite(feats)))
    print("KERNEL_OK")
</pallas_src>

<mosaic_0001>
module attributes {stable_mosaic.version = 11 : i64} {
  func.func @_conv_s2_kernel(%arg0: i32, %arg1: memref<1x1090x12xi8, #tpu.memory_space<vmem>>, %arg2: memref<4x12x128xf32, #tpu.memory_space<vmem>>, %arg3: memref<1x128xf32, #tpu.memory_space<vmem>>, %arg4: memref<1x1056x128xbf16, #tpu.memory_space<vmem>>) attributes {dimension_semantics = [#tpu.dimension_semantics<parallel>], iteration_bounds = array<i64: 2>, scalar_prefetch = 0 : i64, scratch_operands = 0 : i64, tpu.core_type = #tpu.core_type<tc>, window_params = [{transform_indices = @transform_0, window_bounds = array<i64: 1, 1090, 12>}, {pipeline_mode = #tpu.pipeline_mode<synchronous>, transform_indices = @transform_1, window_bounds = array<i64: 4, 12, 128>}, {pipeline_mode = #tpu.pipeline_mode<synchronous>, transform_indices = @transform_2, window_bounds = array<i64: 1, 128>}, {transform_indices = @transform_3, window_bounds = array<i64: 1, 1056, 128>}]} {
    %c0 = arith.constant 0 : index
    %c0_0 = arith.constant 0 : index
    %0 = vector.load %arg3[%c0, %c0_0] : memref<1x128xf32, #tpu.memory_space<vmem>>, vector<1x128xf32>
    %c0_1 = arith.constant 0 : index
    %c0_2 = arith.constant 0 : index
    %c0_3 = arith.constant 0 : index
    %1 = vector.load %arg1[%c0_1, %c0_2, %c0_3] : memref<1x1090x12xi8, #tpu.memory_space<vmem>>, vector<1x1058x12xi8>
    %2 = vector.shape_cast %1 : vector<1x1058x12xi8> to vector<1058x12xi8>
    %3 = arith.uitofp %2 : vector<1058x12xi8> to vector<1058x12xf32>
    %cst = arith.constant 0.000000e+00 : f32
    %4 = vector.broadcast %cst : f32 to vector<1024x128xf32>
    %5 = vector.extract_strided_slice %3 {offsets = [0, 0], sizes = [1024, 12], strides = [1, 1]} : vector<1058x12xf32> to vector<1024x12xf32>
    %c0_4 = arith.constant 0 : index
    %c0_5 = arith.constant 0 : index
    %c0_6 = arith.constant 0 : index
    %6 = vector.load %arg2[%c0_4, %c0_5, %c0_6] : memref<4x12x128xf32, #tpu.memory_space<vmem>>, vector<1x12x128xf32>
    %7 = vector.shape_cast %6 : vector<1x12x128xf32> to vector<12x128xf32>
    %cst_7 = arith.constant dense<0.000000e+00> : vector<1024x128xf32>
    %8 = tpu.matmul %5, %7, %cst_7 {dimension_numbers = #tpu.dot_dimension_numbers<[1], [0], [0], [1], [0, 0, 1, 1], [], []>} : vector<1024x12xf32>, vector<12x128xf32>, vector<1024x128xf32> -> vector<1024x128xf32>
    %9 = arith.addf %4, %8 : vector<1024x128xf32>
    %10 = vector.extract_strided_slice %3 {offsets = [1, 0], sizes = [1024, 12], strides = [1, 1]} : vector<1058x12xf32> to vector<1024x12xf32>
    %c1 = arith.constant 1 : index
    %c0_8 = arith.constant 0 : index
    %c0_9 = arith.constant 0 : index
    %11 = vector.load %arg2[%c1, %c0_8, %c0_9] : memref<4x12x128xf32, #tpu.memory_space<vmem>>, vector<1x12x128xf32>
    %12 = vector.shape_cast %11 : vector<1x12x128xf32> to vector<12x128xf32>
    %cst_10 = arith.constant dense<0.000000e+00> : vector<1024x128xf32>
    %13 = tpu.matmul %10, %12, %cst_10 {dimension_numbers = #tpu.dot_dimension_numbers<[1], [0], [0], [1], [0, 0, 1, 1], [], []>} : vector<1024x12xf32>, vector<12x128xf32>, vector<1024x128xf32> -> vector<1024x128xf32>
    %14 = arith.addf %9, %13 : vector<1024x128xf32>
    %15 = vector.extract_strided_slice %3 {offsets = [33, 0], sizes = [1024, 12], strides = [1, 1]} : vector<1058x12xf32> to vector<1024x12xf32>
    %c2 = arith.constant 2 : index
    %c0_11 = arith.constant 0 : index
    %c0_12 = arith.constant 0 : index
    %16 = vector.load %arg2[%c2, %c0_11, %c0_12] : memref<4x12x128xf32, #tpu.memory_space<vmem>>, vector<1x12x128xf32>
    %17 = vector.shape_cast %16 : vector<1x12x128xf32> to vector<12x128xf32>
    %cst_13 = arith.constant dense<0.000000e+00> : vector<1024x128xf32>
    %18 = tpu.matmul %15, %17, %cst_13 {dimension_numbers = #tpu.dot_dimension_numbers<[1], [0], [0], [1], [0, 0, 1, 1], [], []>} : vector<1024x12xf32>, vector<12x128xf32>, vector<1024x128xf32> -> vector<1024x128xf32>
    %19 = arith.addf %14, %18 : vector<1024x128xf32>
    %20 = vector.extract_strided_slice %3 {offsets = [34, 0], sizes = [1024, 12], strides = [1, 1]} : vector<1058x12xf32> to vector<1024x12xf32>
    %c3 = arith.constant 3 : index
    %c0_14 = arith.constant 0 : index
    %c0_15 = arith.constant 0 : index
    %21 = vector.load %arg2[%c3, %c0_14, %c0_15] : memref<4x12x128xf32, #tpu.memory_space<vmem>>, vector<1x12x128xf32>
    %22 = vector.shape_cast %21 : vector<1x12x128xf32> to vector<12x128xf32>
    %cst_16 = arith.constant dense<0.000000e+00> : vector<1024x128xf32>
    %23 = tpu.matmul %20, %22, %cst_16 {dimension_numbers = #tpu.dot_dimension_numbers<[1], [0], [0], [1], [0, 0, 1, 1], [], []>} : vector<1024x12xf32>, vector<12x128xf32>, vector<1024x128xf32> -> vector<1024x128xf32>
    %24 = arith.addf %19, %23 : vector<1024x128xf32>
    %25 = vector.broadcast %0 : vector<1x128xf32> to vector<1024x128xf32>
    %26 = arith.addf %24, %25 : vector<1024x128xf32>
    %cst_17 = arith.constant 0.000000e+00 : f32
    %27 = vector.broadcast %cst_17 : f32 to vector<1024x128xf32>
    %28 = arith.maximumf %26, %27 : vector<1024x128xf32>
    %29 = arith.truncf %28 : vector<1024x128xf32> to vector<1024x128xbf16>
    %c0_18 = arith.constant 0 : index
    %c0_19 = arith.constant 0 : index
    %c0_20 = arith.constant 0 : index
    %30 = vector.load %arg4[%c0_18, %c0_19, %c0_20] : memref<1x1056x128xbf16, #tpu.memory_space<vmem>>, vector<1x1024x128xbf16>
    %31 = vector.shape_cast %30 : vector<1x1024x128xbf16> to vector<1024x128xbf16>
    %32 = vector.shape_cast %29 : vector<1024x128xbf16> to vector<1x1024x128xbf16>
    tpu.vector_store %arg4[%c0_18, %c0_19, %c0_20], %32 {strides = array<i32>} : memref<1x1056x128xbf16, #tpu.memory_space<vmem>>, vector<1x1024x128xbf16>,
    %c0_21 = arith.constant 0 : index
    %c1024 = arith.constant 1024 : index
    %c0_22 = arith.constant 0 : index
    %33 = vector.load %arg1[%c0_21, %c1024, %c0_22] : memref<1x1090x12xi8, #tpu.memory_space<vmem>>, vector<1x66x12xi8>
    %34 = vector.shape_cast %33 : vector<1x66x12xi8> to vector<66x12xi8>
    %35 = arith.uitofp %34 : vector<66x12xi8> to vector<66x12xf32>
    %cst_23 = arith.constant 0.000000e+00 : f32
    %36 = vector.broadcast %cst_23 : f32 to vector<32x128xf32>
    %37 = vector.extract_strided_slice %35 {offsets = [0, 0], sizes = [32, 12], strides = [1, 1]} : vector<66x12xf32> to vector<32x12xf32>
    %c0_24 = arith.constant 0 : index
    %c0_25 = arith.constant 0 : index
    %c0_26 = arith.constant 0 : index
    %38 = vector.load %arg2[%c0_24, %c0_25, %c0_26] : memref<4x12x128xf32, #tpu.memory_space<vmem>>, vector<1x12x128xf32>
    %39 = vector.shape_cast %38 : vector<1x12x128xf32> to vector<12x128xf32>
    %cst_27 = arith.constant dense<0.000000e+00> : vector<32x128xf32>
    %40 = tpu.matmul %37, %39, %cst_27 {dimension_numbers = #tpu.dot_dimension_numbers<[1], [0], [0], [1], [0, 0, 1, 1], [], []>} : vector<32x12xf32>, vector<12x128xf32>, vector<32x128xf32> -> vector<32x128xf32>
    %41 = arith.addf %36, %40 : vector<32x128xf32>
    %42 = vector.extract_strided_slice %35 {offsets = [1, 0], sizes = [32, 12], strides = [1, 1]} : vector<66x12xf32> to vector<32x12xf32>
    %c1_28 = arith.constant 1 : index
    %c0_29 = arith.constant 0 : index
    %c0_30 = arith.constant 0 : index
    %43 = vector.load %arg2[%c1_28, %c0_29, %c0_30] : memref<4x12x128xf32, #tpu.memory_space<vmem>>, vector<1x12x128xf32>
    %44 = vector.shape_cast %43 : vector<1x12x128xf32> to vector<12x128xf32>
    %cst_31 = arith.constant dense<0.000000e+00> : vector<32x128xf32>
    %45 = tpu.matmul %42, %44, %cst_31 {dimension_numbers = #tpu.dot_dimension_numbers<[1], [0], [0], [1], [0, 0, 1, 1], [], []>} : vector<32x12xf32>, vector<12x128xf32>, vector<32x128xf32> -> vector<32x128xf32>
    %46 = arith.addf %41, %45 : vector<32x128xf32>
    %47 = vector.extract_strided_slice %35 {offsets = [33, 0], sizes = [32, 12], strides = [1, 1]} : vector<66x12xf32> to vector<32x12xf32>
    %c2_32 = arith.constant 2 : index
    %c0_33 = arith.constant 0 : index
    %c0_34 = arith.constant 0 : index
    %48 = vector.load %arg2[%c2_32, %c0_33, %c0_34] : memref<4x12x128xf32, #tpu.memory_space<vmem>>, vector<1x12x128xf32>
    %49 = vector.shape_cast %48 : vector<1x12x128xf32> to vector<12x128xf32>
    %cst_35 = arith.constant dense<0.000000e+00> : vector<32x128xf32>
    %50 = tpu.matmul %47, %49, %cst_35 {dimension_numbers = #tpu.dot_dimension_numbers<[1], [0], [0], [1], [0, 0, 1, 1], [], []>} : vector<32x12xf32>, vector<12x128xf32>, vector<32x128xf32> -> vector<32x128xf32>
    %51 = arith.addf %46, %50 : vector<32x128xf32>
    %52 = vector.extract_strided_slice %35 {offsets = [34, 0], sizes = [32, 12], strides = [1, 1]} : vector<66x12xf32> to vector<32x12xf32>
    %c3_36 = arith.constant 3 : index
    %c0_37 = arith.constant 0 : index
    %c0_38 = arith.constant 0 : index
    %53 = vector.load %arg2[%c3_36, %c0_37, %c0_38] : memref<4x12x128xf32, #tpu.memory_space<vmem>>, vector<1x12x128xf32>
    %54 = vector.shape_cast %53 : vector<1x12x128xf32> to vector<12x128xf32>
    %cst_39 = arith.constant dense<0.000000e+00> : vector<32x128xf32>
    %55 = tpu.matmul %52, %54, %cst_39 {dimension_numbers = #tpu.dot_dimension_numbers<[1], [0], [0], [1], [0, 0, 1, 1], [], []>} : vector<32x12xf32>, vector<12x128xf32>, vector<32x128xf32> -> vector<32x128xf32>
    %56 = arith.addf %51, %55 : vector<32x128xf32>
    %57 = vector.broadcast %0 : vector<1x128xf32> to vector<32x128xf32>
    %58 = arith.addf %56, %57 : vector<32x128xf32>
    %cst_40 = arith.constant 0.000000e+00 : f32
    %59 = vector.broadcast %cst_40 : f32 to vector<32x128xf32>
    %60 = arith.maximumf %58, %59 : vector<32x128xf32>
    %61 = arith.truncf %60 : vector<32x128xf32> to vector<32x128xbf16>
    %c0_41 = arith.constant 0 : index
    %c1024_42 = arith.constant 1024 : index
    %c0_43 = arith.constant 0 : index
    %62 = vector.load %arg4[%c0_41, %c1024_42, %c0_43] : memref<1x1056x128xbf16, #tpu.memory_space<vmem>>, vector<1x32x128xbf16>
    %63 = vector.shape_cast %62 : vector<1x32x128xbf16> to vector<32x128xbf16>
    %64 = vector.shape_cast %61 : vector<32x128xbf16> to vector<1x32x128xbf16>
    tpu.vector_store %arg4[%c0_41, %c1024_42, %c0_43], %64 {strides = array<i32>} : memref<1x1056x128xbf16, #tpu.memory_space<vmem>>, vector<1x32x128xbf16>,
    return
  }
  func.func @transform_0(%arg0: i32) -> (i32, i32, i32) {
    %c0_i32 = arith.constant 0 : i32
    %c0_i32_0 = arith.constant 0 : i32
    %c0_i32_1 = arith.constant 0 : i32
    return %arg0, %c0_i32, %c0_i32_0 : i32, i32, i32
  }
  func.func @transform_1(%arg0: i32) -> (i32, i32, i32) {
    %c0_i32 = arith.constant 0 : i32
    %c0_i32_0 = arith.constant 0 : i32
    %c0_i32_1 = arith.constant 0 : i32
    %c0_i32_2 = arith.constant 0 : i32
    return %c0_i32, %c0_i32_0, %c0_i32_1 : i32, i32, i32
  }
  func.func @transform_2(%arg0: i32) -> (i32, i32) {
    %c0_i32 = arith.constant 0 : i32
    %c0_i32_0 = arith.constant 0 : i32
    %c0_i32_1 = arith.constant 0 : i32
    return %c0_i32, %c0_i32_0 : i32, i32
  }
  func.func @transform_3(%arg0: i32) -> (i32, i32, i32) {
    %c0_i32 = arith.constant 0 : i32
    %c0_i32_0 = arith.constant 0 : i32
    %c0_i32_1 = arith.constant 0 : i32
    return %arg0, %c0_i32, %c0_i32_0 : i32, i32, i32
  }
}

module attributes {stable_mosaic.version = 11 : i64} {
  func.func @_conv_s2_kernel(%arg0: i32, %arg1: memref<1x290x512xbf16, #tpu.memory_space<vmem>>, %arg2: memref<4x512x128xbf16, #tpu.memory_space<vmem>>, %arg3: memref<1x128xf32, #tpu.memory_space<vmem>>, %arg4: memref<1x272x128xbf16, #tpu.memory_space<vmem>>) attributes {dimension_semantics = [#tpu.dimension_semantics<parallel>], iteration_bounds = array<i64: 2>, scalar_prefetch = 0 : i64, scratch_operands = 0 : i64, tpu.core_type = #tpu.core_type<tc>, window_params = [{transform_indices = @transform_0, window_bounds = array<i64: 1, 290, 512>}, {pipeline_mode = #tpu.pipeline_mode<synchronous>, transform_indices = @transform_1, window_bounds = array<i64: 4, 512, 128>}, {pipeline_mode = #tpu.pipeline_mode<synchronous>, transform_indices = @transform_2, window_bounds = array<i64: 1, 128>}, {transform_indices = @transform_3, window_bounds = array<i64: 1, 272, 128>}]} {
    %c0 = arith.constant 0 : index
    %c0_0 = arith.constant 0 : index
    %0 = vector.load %arg3[%c0, %c0_0] : memref<1x128xf32, #tpu.memory_space<vmem>>, vector<1x128xf32>
    %c0_1 = arith.constant 0 : index
    %c0_2 = arith.constant 0 : index
    %c0_3 = arith.constant 0 : index
    %1 = vector.load %arg1[%c0_1, %c0_2, %c0_3] : memref<1x290x512xbf16, #tpu.memory_space<vmem>>, vector<1x290x512xbf16>
    %2 = vector.shape_cast %1 : vector<1x290x512xbf16> to vector<290x512xbf16>
    %cst = arith.constant 0.000000e+00 : f32
    %3 = vector.broadcast %cst : f32 to vector<272x128xf32>
    %4 = vector.extract_strided_slice %2 {offsets = [0, 0], sizes = [272, 512], strides = [1, 1]} : vector<290x512xbf16> to vector<272x512xbf16>
    %c0_4 = arith.constant 0 : index
    %c0_5 = arith.constant 0 : index
    %c0_6 = arith.constant 0 : index
    %5 = vector.load %arg2[%c0_4, %c0_5, %c0_6] : memref<4x512x128xbf16, #tpu.memory_space<vmem>>, vector<1x512x128xbf16>
    %6 = vector.shape_cast %5 : vector<1x512x128xbf16> to vector<512x128xbf16>
    %cst_7 = arith.constant dense<0.000000e+00> : vector<272x128xf32>
    %7 = tpu.matmul %4, %6, %cst_7 {dimension_numbers = #tpu.dot_dimension_numbers<[1], [0], [0], [1], [0, 0, 1, 1], [], []>} : vector<272x512xbf16>, vector<512x128xbf16>, vector<272x128xf32> -> vector<272x128xf32>
    %8 = arith.addf %3, %7 : vector<272x128xf32>
    %9 = vector.extract_strided_slice %2 {offsets = [1, 0], sizes = [272, 512], strides = [1, 1]} : vector<290x512xbf16> to vector<272x512xbf16>
    %c1 = arith.constant 1 : index
    %c0_8 = arith.constant 0 : index
    %c0_9 = arith.constant 0 : index
    %10 = vector.load %arg2[%c1, %c0_8, %c0_9] : memref<4x512x128xbf16, #tpu.memory_space<vmem>>, vector<1x512x128xbf16>
    %11 = vector.shape_cast %10 : vector<1x512x128xbf16> to vector<512x128xbf16>
    %cst_10 = arith.constant dense<0.000000e+00> : vector<272x128xf32>
    %12 = tpu.matmul %9, %11, %cst_10 {dimension_numbers = #tpu.dot_dimension_numbers<[1], [0], [0], [1], [0, 0, 1, 1], [], []>} : vector<272x512xbf16>, vector<512x128xbf16>, vector<272x128xf32> -> vector<272x128xf32>
    %13 = arith.addf %8, %12 : vector<272x128xf32>
    %14 = vector.extract_strided_slice %2 {offsets = [17, 0], sizes = [272, 512], strides = [1, 1]} : vector<290x512xbf16> to vector<272x512xbf16>
    %c2 = arith.constant 2 : index
    %c0_11 = arith.constant 0 : index
    %c0_12 = arith.constant 0 : index
    %15 = vector.load %arg2[%c2, %c0_11, %c0_12] : memref<4x512x128xbf16, #tpu.memory_space<vmem>>, vector<1x512x128xbf16>
    %16 = vector.shape_cast %15 : vector<1x512x128xbf16> to vector<512x128xbf16>
    %cst_13 = arith.constant dense<0.000000e+00> : vector<272x128xf32>
    %17 = tpu.matmul %14, %16, %cst_13 {dimension_numbers = #tpu.dot_dimension_numbers<[1], [0], [0], [1], [0, 0, 1, 1], [], []>} : vector<272x512xbf16>, vector<512x128xbf16>, vector<272x128xf32> -> vector<272x128xf32>
    %18 = arith.addf %13, %17 : vector<272x128xf32>
    %19 = vector.extract_strided_slice %2 {offsets = [18, 0], sizes = [272, 512], strides = [1, 1]} : vector<290x512xbf16> to vector<272x512xbf16>
    %c3 = arith.constant 3 : index
    %c0_14 = arith.constant 0 : index
    %c0_15 = arith.constant 0 : index
    %20 = vector.load %arg2[%c3, %c0_14, %c0_15] : memref<4x512x128xbf16, #tpu.memory_space<vmem>>, vector<1x512x128xbf16>
    %21 = vector.shape_cast %20 : vector<1x512x128xbf16> to vector<512x128xbf16>
    %cst_16 = arith.constant dense<0.000000e+00> : vector<272x128xf32>
    %22 = tpu.matmul %19, %21, %cst_16 {dimension_numbers = #tpu.dot_dimension_numbers<[1], [0], [0], [1], [0, 0, 1, 1], [], []>} : vector<272x512xbf16>, vector<512x128xbf16>, vector<272x128xf32> -> vector<272x128xf32>
    %23 = arith.addf %18, %22 : vector<272x128xf32>
    %24 = vector.broadcast %0 : vector<1x128xf32> to vector<272x128xf32>
    %25 = arith.addf %23, %24 : vector<272x128xf32>
    %cst_17 = arith.constant 0.000000e+00 : f32
    %26 = vector.broadcast %cst_17 : f32 to vector<272x128xf32>
    %27 = arith.maximumf %25, %26 : vector<272x128xf32>
    %28 = arith.truncf %27 : vector<272x128xf32> to vector<272x128xbf16>
    %c0_18 = arith.constant 0 : index
    %c0_19 = arith.constant 0 : index
    %c0_20 = arith.constant 0 : index
    %29 = vector.load %arg4[%c0_18, %c0_19, %c0_20] : memref<1x272x128xbf16, #tpu.memory_space<vmem>>, vector<1x272x128xbf16>
    %30 = vector.shape_cast %29 : vector<1x272x128xbf16> to vector<272x128xbf16>
    %31 = vector.shape_cast %28 : vector<272x128xbf16> to vector<1x272x128xbf16>
    tpu.vector_store %arg4[%c0_18, %c0_19, %c0_20], %31 {strides = array<i32>} : memref<1x272x128xbf16, #tpu.memory_space<vmem>>, vector<1x272x128xbf16>,
    return
  }
  func.func @transform_0(%arg0: i32) -> (i32, i32, i32) {
    %c0_i32 = arith.constant 0 : i32
    %c0_i32_0 = arith.constant 0 : i32
    %c0_i32_1 = arith.constant 0 : i32
    return %arg0, %c0_i32, %c0_i32_0 : i32, i32, i32
  }
  func.func @transform_1(%arg0: i32) -> (i32, i32, i32) {
    %c0_i32 = arith.constant 0 : i32
    %c0_i32_0 = arith.constant 0 : i32
    %c0_i32_1 = arith.constant 0 : i32
    %c0_i32_2 = arith.constant 0 : i32
    return %c0_i32, %c0_i32_0, %c0_i32_1 : i32, i32, i32
  }
  func.func @transform_2(%arg0: i32) -> (i32, i32) {
    %c0_i32 = arith.constant 0 : i32
    %c0_i32_0 = arith.constant 0 : i32
    %c0_i32_1 = arith.constant 0 : i32
    return %c0_i32, %c0_i32_0 : i32, i32
  }
  func.func @transform_3(%arg0: i32) -> (i32, i32, i32) {
    %c0_i32 = arith.constant 0 : i32
    %c0_i32_0 = arith.constant 0 : i32
    %c0_i32_1 = arith.constant 0 : i32
    return %arg0, %c0_i32, %c0_i32_0 : i32, i32, i32
  }
}

module attributes {stable_mosaic.version = 11 : i64} {
  func.func @_conv_s2_kernel(%arg0: i32, %arg1: memref<1x82x512xbf16, #tpu.memory_space<vmem>>, %arg2: memref<4x512x128xbf16, #tpu.memory_space<vmem>>, %arg3: memref<1x128xf32, #tpu.memory_space<vmem>>, %arg4: memref<1x72x128xbf16, #tpu.memory_space<vmem>>) attributes {dimension_semantics = [#tpu.dimension_semantics<parallel>], iteration_bounds = array<i64: 2>, scalar_prefetch = 0 : i64, scratch_operands = 0 : i64, tpu.core_type = #tpu.core_type<tc>, window_params = [{transform_indices = @transform_0, window_bounds = array<i64: 1, 82, 512>}, {pipeline_mode = #tpu.pipeline_mode<synchronous>, transform_indices = @transform_1, window_bounds = array<i64: 4, 512, 128>}, {pipeline_mode = #tpu.pipeline_mode<synchronous>, transform_indices = @transform_2, window_bounds = array<i64: 1, 128>}, {transform_indices = @transform_3, window_bounds = array<i64: 1, 72, 128>}]} {
    %c0 = arith.constant 0 : index
    %c0_0 = arith.constant 0 : index
    %0 = vector.load %arg3[%c0, %c0_0] : memref<1x128xf32, #tpu.memory_space<vmem>>, vector<1x128xf32>
    %c0_1 = arith.constant 0 : index
    %c0_2 = arith.constant 0 : index
    %c0_3 = arith.constant 0 : index
    %1 = vector.load %arg1[%c0_1, %c0_2, %c0_3] : memref<1x82x512xbf16, #tpu.memory_space<vmem>>, vector<1x82x512xbf16>
    %2 = vector.shape_cast %1 : vector<1x82x512xbf16> to vector<82x512xbf16>
    %cst = arith.constant 0.000000e+00 : f32
    %3 = vector.broadcast %cst : f32 to vector<72x128xf32>
    %4 = vector.extract_strided_slice %2 {offsets = [0, 0], sizes = [72, 512], strides = [1, 1]} : vector<82x512xbf16> to vector<72x512xbf16>
    %c0_4 = arith.constant 0 : index
    %c0_5 = arith.constant 0 : index
    %c0_6 = arith.constant 0 : index
    %5 = vector.load %arg2[%c0_4, %c0_5, %c0_6] : memref<4x512x128xbf16, #tpu.memory_space<vmem>>, vector<1x512x128xbf16>
    %6 = vector.shape_cast %5 : vector<1x512x128xbf16> to vector<512x128xbf16>
    %cst_7 = arith.constant dense<0.000000e+00> : vector<72x128xf32>
    %7 = tpu.matmul %4, %6, %cst_7 {dimension_numbers = #tpu.dot_dimension_numbers<[1], [0], [0], [1], [0, 0, 1, 1], [], []>} : vector<72x512xbf16>, vector<512x128xbf16>, vector<72x128xf32> -> vector<72x128xf32>
    %8 = arith.addf %3, %7 : vector<72x128xf32>
    %9 = vector.extract_strided_slice %2 {offsets = [1, 0], sizes = [72, 512], strides = [1, 1]} : vector<82x512xbf16> to vector<72x512xbf16>
    %c1 = arith.constant 1 : index
    %c0_8 = arith.constant 0 : index
    %c0_9 = arith.constant 0 : index
    %10 = vector.load %arg2[%c1, %c0_8, %c0_9] : memref<4x512x128xbf16, #tpu.memory_space<vmem>>, vector<1x512x128xbf16>
    %11 = vector.shape_cast %10 : vector<1x512x128xbf16> to vector<512x128xbf16>
    %cst_10 = arith.constant dense<0.000000e+00> : vector<72x128xf32>
    %12 = tpu.matmul %9, %11, %cst_10 {dimension_numbers = #tpu.dot_dimension_numbers<[1], [0], [0], [1], [0, 0, 1, 1], [], []>} : vector<72x512xbf16>, vector<512x128xbf16>, vector<72x128xf32> -> vector<72x128xf32>
    %13 = arith.addf %8, %12 : vector<72x128xf32>
    %14 = vector.extract_strided_slice %2 {offsets = [9, 0], sizes = [72, 512], strides = [1, 1]} : vector<82x512xbf16> to vector<72x512xbf16>
    %c2 = arith.constant 2 : index
    %c0_11 = arith.constant 0 : index
    %c0_12 = arith.constant 0 : index
    %15 = vector.load %arg2[%c2, %c0_11, %c0_12] : memref<4x512x128xbf16, #tpu.memory_space<vmem>>, vector<1x512x128xbf16>
    %16 = vector.shape_cast %15 : vector<1x512x128xbf16> to vector<512x128xbf16>
    %cst_13 = arith.constant dense<0.000000e+00> : vector<72x128xf32>
    %17 = tpu.matmul %14, %16, %cst_13 {dimension_numbers = #tpu.dot_dimension_numbers<[1], [0], [0], [1], [0, 0, 1, 1], [], []>} : vector<72x512xbf16>, vector<512x128xbf16>, vector<72x128xf32> -> vector<72x128xf32>
    %18 = arith.addf %13, %17 : vector<72x128xf32>
    %19 = vector.extract_strided_slice %2 {offsets = [10, 0], sizes = [72, 512], strides = [1, 1]} : vector<82x512xbf16> to vector<72x512xbf16>
    %c3 = arith.constant 3 : index
    %c0_14 = arith.constant 0 : index
    %c0_15 = arith.constant 0 : index
    %20 = vector.load %arg2[%c3, %c0_14, %c0_15] : memref<4x512x128xbf16, #tpu.memory_space<vmem>>, vector<1x512x128xbf16>
    %21 = vector.shape_cast %20 : vector<1x512x128xbf16> to vector<512x128xbf16>
    %cst_16 = arith.constant dense<0.000000e+00> : vector<72x128xf32>
    %22 = tpu.matmul %19, %21, %cst_16 {dimension_numbers = #tpu.dot_dimension_numbers<[1], [0], [0], [1], [0, 0, 1, 1], [], []>} : vector<72x512xbf16>, vector<512x128xbf16>, vector<72x128xf32> -> vector<72x128xf32>
    %23 = arith.addf %18, %22 : vector<72x128xf32>
    %24 = vector.broadcast %0 : vector<1x128xf32> to vector<72x128xf32>
    %25 = arith.addf %23, %24 : vector<72x128xf32>
    %cst_17 = arith.constant 0.000000e+00 : f32
    %26 = vector.broadcast %cst_17 : f32 to vector<72x128xf32>
    %27 = arith.maximumf %25, %26 : vector<72x128xf32>
    %28 = arith.truncf %27 : vector<72x128xf32> to vector<72x128xbf16>
    %c0_18 = arith.constant 0 : index
    %c0_19 = arith.constant 0 : index
    %c0_20 = arith.constant 0 : index
    %29 = vector.load %arg4[%c0_18, %c0_19, %c0_20] : memref<1x72x128xbf16, #tpu.memory_space<vmem>>, vector<1x72x128xbf16>
    %30 = vector.shape_cast %29 : vector<1x72x128xbf16> to vector<72x128xbf16>
    %31 = vector.shape_cast %28 : vector<72x128xbf16> to vector<1x72x128xbf16>
    tpu.vector_store %arg4[%c0_18, %c0_19, %c0_20], %31 {strides = array<i32>} : memref<1x72x128xbf16, #tpu.memory_space<vmem>>, vector<1x72x128xbf16>,
    return
  }
  func.func @transform_0(%arg0: i32) -> (i32, i32, i32) {
    %c0_i32 = arith.constant 0 : i32
    %c0_i32_0 = arith.constant 0 : i32
    %c0_i32_1 = arith.constant 0 : i32
    return %arg0, %c0_i32, %c0_i32_0 : i32, i32, i32
  }
  func.func @transform_1(%arg0: i32) -> (i32, i32, i32) {
    %c0_i32 = arith.constant 0 : i32
    %c0_i32_0 = arith.constant 0 : i32
    %c0_i32_1 = arith.constant 0 : i32
    %c0_i32_2 = arith.constant 0 : i32
    return %c0_i32, %c0_i32_0, %c0_i32_1 : i32, i32, i32
  }
  func.func @transform_2(%arg0: i32) -> (i32, i32) {
    %c0_i32 = arith.constant 0 : i32
    %c0_i32_0 = arith.constant 0 : i32
    %c0_i32_1 = arith.constant 0 : i32
    return %c0_i32, %c0_i32_0 : i32, i32
  }
  func.func @transform_3(%arg0: i32) -> (i32, i32, i32) {
    %c0_i32 = arith.constant 0 : i32
    %c0_i32_0 = arith.constant 0 : i32
    %c0_i32_1 = arith.constant 0 : i32
    return %arg0, %c0_i32, %c0_i32_0 : i32, i32, i32
  }
}

module attributes {stable_mosaic.version = 11 : i64} {
  func.func @_conv_s2_kernel(%arg0: i32, %arg1: memref<1x26x512xbf16, #tpu.memory_space<vmem>>, %arg2: memref<4x512x128xbf16, #tpu.memory_space<vmem>>, %arg3: memref<1x128xf32, #tpu.memory_space<vmem>>, %arg4: memref<1x20x128xbf16, #tpu.memory_space<vmem>>) attributes {dimension_semantics = [#tpu.dimension_semantics<parallel>], iteration_bounds = array<i64: 2>, scalar_prefetch = 0 : i64, scratch_operands = 0 : i64, tpu.core_type = #tpu.core_type<tc>, window_params = [{transform_indices = @transform_0, window_bounds = array<i64: 1, 26, 512>}, {pipeline_mode = #tpu.pipeline_mode<synchronous>, transform_indices = @transform_1, window_bounds = array<i64: 4, 512, 128>}, {pipeline_mode = #tpu.pipeline_mode<synchronous>, transform_indices = @transform_2, window_bounds = array<i64: 1, 128>}, {transform_indices = @transform_3, window_bounds = array<i64: 1, 20, 128>}]} {
    %c0 = arith.constant 0 : index
    %c0_0 = arith.constant 0 : index
    %0 = vector.load %arg3[%c0, %c0_0] : memref<1x128xf32, #tpu.memory_space<vmem>>, vector<1x128xf32>
    %c0_1 = arith.constant 0 : index
    %c0_2 = arith.constant 0 : index
    %c0_3 = arith.constant 0 : index
    %1 = vector.load %arg1[%c0_1, %c0_2, %c0_3] : memref<1x26x512xbf16, #tpu.memory_space<vmem>>, vector<1x26x512xbf16>
    %2 = vector.shape_cast %1 : vector<1x26x512xbf16> to vector<26x512xbf16>
    %cst = arith.constant 0.000000e+00 : f32
    %3 = vector.broadcast %cst : f32 to vector<20x128xf32>
    %4 = vector.extract_strided_slice %2 {offsets = [0, 0], sizes = [20, 512], strides = [1, 1]} : vector<26x512xbf16> to vector<20x512xbf16>
    %c0_4 = arith.constant 0 : index
    %c0_5 = arith.constant 0 : index
    %c0_6 = arith.constant 0 : index
    %5 = vector.load %arg2[%c0_4, %c0_5, %c0_6] : memref<4x512x128xbf16, #tpu.memory_space<vmem>>, vector<1x512x128xbf16>
    %6 = vector.shape_cast %5 : vector<1x512x128xbf16> to vector<512x128xbf16>
    %cst_7 = arith.constant dense<0.000000e+00> : vector<20x128xf32>
    %7 = tpu.matmul %4, %6, %cst_7 {dimension_numbers = #tpu.dot_dimension_numbers<[1], [0], [0], [1], [0, 0, 1, 1], [], []>} : vector<20x512xbf16>, vector<512x128xbf16>, vector<20x128xf32> -> vector<20x128xf32>
    %8 = arith.addf %3, %7 : vector<20x128xf32>
    %9 = vector.extract_strided_slice %2 {offsets = [1, 0], sizes = [20, 512], strides = [1, 1]} : vector<26x512xbf16> to vector<20x512xbf16>
    %c1 = arith.constant 1 : index
    %c0_8 = arith.constant 0 : index
    %c0_9 = arith.constant 0 : index
    %10 = vector.load %arg2[%c1, %c0_8, %c0_9] : memref<4x512x128xbf16, #tpu.memory_space<vmem>>, vector<1x512x128xbf16>
    %11 = vector.shape_cast %10 : vector<1x512x128xbf16> to vector<512x128xbf16>
    %cst_10 = arith.constant dense<0.000000e+00> : vector<20x128xf32>
    %12 = tpu.matmul %9, %11, %cst_10 {dimension_numbers = #tpu.dot_dimension_numbers<[1], [0], [0], [1], [0, 0, 1, 1], [], []>} : vector<20x512xbf16>, vector<512x128xbf16>, vector<20x128xf32> -> vector<20x128xf32>
    %13 = arith.addf %8, %12 : vector<20x128xf32>
    %14 = vector.extract_strided_slice %2 {offsets = [5, 0], sizes = [20, 512], strides = [1, 1]} : vector<26x512xbf16> to vector<20x512xbf16>
    %c2 = arith.constant 2 : index
    %c0_11 = arith.constant 0 : index
    %c0_12 = arith.constant 0 : index
    %15 = vector.load %arg2[%c2, %c0_11, %c0_12] : memref<4x512x128xbf16, #tpu.memory_space<vmem>>, vector<1x512x128xbf16>
    %16 = vector.shape_cast %15 : vector<1x512x128xbf16> to vector<512x128xbf16>
    %cst_13 = arith.constant dense<0.000000e+00> : vector<20x128xf32>
    %17 = tpu.matmul %14, %16, %cst_13 {dimension_numbers = #tpu.dot_dimension_numbers<[1], [0], [0], [1], [0, 0, 1, 1], [], []>} : vector<20x512xbf16>, vector<512x128xbf16>, vector<20x128xf32> -> vector<20x128xf32>
    %18 = arith.addf %13, %17 : vector<20x128xf32>
    %19 = vector.extract_strided_slice %2 {offsets = [6, 0], sizes = [20, 512], strides = [1, 1]} : vector<26x512xbf16> to vector<20x512xbf16>
    %c3 = arith.constant 3 : index
    %c0_14 = arith.constant 0 : index
    %c0_15 = arith.constant 0 : index
    %20 = vector.load %arg2[%c3, %c0_14, %c0_15] : memref<4x512x128xbf16, #tpu.memory_space<vmem>>, vector<1x512x128xbf16>
    %21 = vector.shape_cast %20 : vector<1x512x128xbf16> to vector<512x128xbf16>
    %cst_16 = arith.constant dense<0.000000e+00> : vector<20x128xf32>
    %22 = tpu.matmul %19, %21, %cst_16 {dimension_numbers = #tpu.dot_dimension_numbers<[1], [0], [0], [1], [0, 0, 1, 1], [], []>} : vector<20x512xbf16>, vector<512x128xbf16>, vector<20x128xf32> -> vector<20x128xf32>
    %23 = arith.addf %18, %22 : vector<20x128xf32>
    %24 = vector.broadcast %0 : vector<1x128xf32> to vector<20x128xf32>
    %25 = arith.addf %23, %24 : vector<20x128xf32>
    %cst_17 = arith.constant 0.000000e+00 : f32
    %26 = vector.broadcast %cst_17 : f32 to vector<20x128xf32>
    %27 = arith.maximumf %25, %26 : vector<20x128xf32>
    %28 = arith.truncf %27 : vector<20x128xf32> to vector<20x128xbf16>
    %c0_18 = arith.constant 0 : index
    %c0_19 = arith.constant 0 : index
    %c0_20 = arith.constant 0 : index
    %29 = vector.load %arg4[%c0_18, %c0_19, %c0_20] : memref<1x20x128xbf16, #tpu.memory_space<vmem>>, vector<1x20x128xbf16>
    %30 = vector.shape_cast %29 : vector<1x20x128xbf16> to vector<20x128xbf16>
    %31 = vector.shape_cast %28 : vector<20x128xbf16> to vector<1x20x128xbf16>
    tpu.vector_store %arg4[%c0_18, %c0_19, %c0_20], %31 {strides = array<i32>} : memref<1x20x128xbf16, #tpu.memory_space<vmem>>, vector<1x20x128xbf16>,
    return
  }
  func.func @transform_0(%arg0: i32) -> (i32, i32, i32) {
    %c0_i32 = arith.constant 0 : i32
    %c0_i32_0 = arith.constant 0 : i32
    %c0_i32_1 = arith.constant 0 : i32
    return %arg0, %c0_i32, %c0_i32_0 : i32, i32, i32
  }
  func.func @transform_1(%arg0: i32) -> (i32, i32, i32) {
    %c0_i32 = arith.constant 0 : i32
    %c0_i32_0 = arith.constant 0 : i32
    %c0_i32_1 = arith.constant 0 : i32
    %c0_i32_2 = arith.constant 0 : i32
    return %c0_i32, %c0_i32_0, %c0_i32_1 : i32, i32, i32
  }
  func.func @transform_2(%arg0: i32) -> (i32, i32) {
    %c0_i32 = arith.constant 0 : i32
    %c0_i32_0 = arith.constant 0 : i32
    %c0_i32_1 = arith.constant 0 : i32
    return %c0_i32, %c0_i32_0 : i32, i32
  }
  func.func @transform_3(%arg0: i32) -> (i32, i32, i32) {
    %c0_i32 = arith.constant 0 : i32
    %c0_i32_0 = arith.constant 0 : i32
    %c0_i32_1 = arith.constant 0 : i32
    return %arg0, %c0_i32, %c0_i32_0 : i32, i32, i32
  }
}

module attributes {stable_mosaic.version = 11 : i64} {
  func.func @_conv_s2_kernel(%arg0: i32, %arg1: memref<1x10x512xbf16, #tpu.memory_space<vmem>>, %arg2: memref<4x512x128xbf16, #tpu.memory_space<vmem>>, %arg3: memref<1x128xf32, #tpu.memory_space<vmem>>, %arg4: memref<1x6x128xf32, #tpu.memory_space<vmem>>) attributes {dimension_semantics = [#tpu.dimension_semantics<parallel>], iteration_bounds = array<i64: 2>, scalar_prefetch = 0 : i64, scratch_operands = 0 : i64, tpu.core_type = #tpu.core_type<tc>, window_params = [{transform_indices = @transform_0, window_bounds = array<i64: 1, 10, 512>}, {pipeline_mode = #tpu.pipeline_mode<synchronous>, transform_indices = @transform_1, window_bounds = array<i64: 4, 512, 128>}, {pipeline_mode = #tpu.pipeline_mode<synchronous>, transform_indices = @transform_2, window_bounds = array<i64: 1, 128>}, {transform_indices = @transform_3, window_bounds = array<i64: 1, 6, 128>}]} {
    %c0 = arith.constant 0 : index
    %c0_0 = arith.constant 0 : index
    %0 = vector.load %arg3[%c0, %c0_0] : memref<1x128xf32, #tpu.memory_space<vmem>>, vector<1x128xf32>
    %c0_1 = arith.constant 0 : index
    %c0_2 = arith.constant 0 : index
    %c0_3 = arith.constant 0 : index
    %1 = vector.load %arg1[%c0_1, %c0_2, %c0_3] : memref<1x10x512xbf16, #tpu.memory_space<vmem>>, vector<1x10x512xbf16>
    %2 = vector.shape_cast %1 : vector<1x10x512xbf16> to vector<10x512xbf16>
    %cst = arith.constant 0.000000e+00 : f32
    %3 = vector.broadcast %cst : f32 to vector<6x128xf32>
    %4 = vector.extract_strided_slice %2 {offsets = [0, 0], sizes = [6, 512], strides = [1, 1]} : vector<10x512xbf16> to vector<6x512xbf16>
    %c0_4 = arith.constant 0 : index
    %c0_5 = arith.constant 0 : index
    %c0_6 = arith.constant 0 : index
    %5 = vector.load %arg2[%c0_4, %c0_5, %c0_6] : memref<4x512x128xbf16, #tpu.memory_space<vmem>>, vector<1x512x128xbf16>
    %6 = vector.shape_cast %5 : vector<1x512x128xbf16> to vector<512x128xbf16>
    %cst_7 = arith.constant dense<0.000000e+00> : vector<6x128xf32>
    %7 = tpu.matmul %4, %6, %cst_7 {dimension_numbers = #tpu.dot_dimension_numbers<[1], [0], [0], [1], [0, 0, 1, 1], [], []>} : vector<6x512xbf16>, vector<512x128xbf16>, vector<6x128xf32> -> vector<6x128xf32>
    %8 = arith.addf %3, %7 : vector<6x128xf32>
    %9 = vector.extract_strided_slice %2 {offsets = [1, 0], sizes = [6, 512], strides = [1, 1]} : vector<10x512xbf16> to vector<6x512xbf16>
    %c1 = arith.constant 1 : index
    %c0_8 = arith.constant 0 : index
    %c0_9 = arith.constant 0 : index
    %10 = vector.load %arg2[%c1, %c0_8, %c0_9] : memref<4x512x128xbf16, #tpu.memory_space<vmem>>, vector<1x512x128xbf16>
    %11 = vector.shape_cast %10 : vector<1x512x128xbf16> to vector<512x128xbf16>
    %cst_10 = arith.constant dense<0.000000e+00> : vector<6x128xf32>
    %12 = tpu.matmul %9, %11, %cst_10 {dimension_numbers = #tpu.dot_dimension_numbers<[1], [0], [0], [1], [0, 0, 1, 1], [], []>} : vector<6x512xbf16>, vector<512x128xbf16>, vector<6x128xf32> -> vector<6x128xf32>
    %13 = arith.addf %8, %12 : vector<6x128xf32>
    %14 = vector.extract_strided_slice %2 {offsets = [3, 0], sizes = [6, 512], strides = [1, 1]} : vector<10x512xbf16> to vector<6x512xbf16>
    %c2 = arith.constant 2 : index
    %c0_11 = arith.constant 0 : index
    %c0_12 = arith.constant 0 : index
    %15 = vector.load %arg2[%c2, %c0_11, %c0_12] : memref<4x512x128xbf16, #tpu.memory_space<vmem>>, vector<1x512x128xbf16>
    %16 = vector.shape_cast %15 : vector<1x512x128xbf16> to vector<512x128xbf16>
    %cst_13 = arith.constant dense<0.000000e+00> : vector<6x128xf32>
    %17 = tpu.matmul %14, %16, %cst_13 {dimension_numbers = #tpu.dot_dimension_numbers<[1], [0], [0], [1], [0, 0, 1, 1], [], []>} : vector<6x512xbf16>, vector<512x128xbf16>, vector<6x128xf32> -> vector<6x128xf32>
    %18 = arith.addf %13, %17 : vector<6x128xf32>
    %19 = vector.extract_strided_slice %2 {offsets = [4, 0], sizes = [6, 512], strides = [1, 1]} : vector<10x512xbf16> to vector<6x512xbf16>
    %c3 = arith.constant 3 : index
    %c0_14 = arith.constant 0 : index
    %c0_15 = arith.constant 0 : index
    %20 = vector.load %arg2[%c3, %c0_14, %c0_15] : memref<4x512x128xbf16, #tpu.memory_space<vmem>>, vector<1x512x128xbf16>
    %21 = vector.shape_cast %20 : vector<1x512x128xbf16> to vector<512x128xbf16>
    %cst_16 = arith.constant dense<0.000000e+00> : vector<6x128xf32>
    %22 = tpu.matmul %19, %21, %cst_16 {dimension_numbers = #tpu.dot_dimension_numbers<[1], [0], [0], [1], [0, 0, 1, 1], [], []>} : vector<6x512xbf16>, vector<512x128xbf16>, vector<6x128xf32> -> vector<6x128xf32>
    %23 = arith.addf %18, %22 : vector<6x128xf32>
    %24 = vector.broadcast %0 : vector<1x128xf32> to vector<6x128xf32>
    %25 = arith.addf %23, %24 : vector<6x128xf32>
    %cst_17 = arith.constant 0.000000e+00 : f32
    %26 = vector.broadcast %cst_17 : f32 to vector<6x128xf32>
    %27 = arith.maximumf %25, %26 : vector<6x128xf32>
    %c0_18 = arith.constant 0 : index
    %c0_19 = arith.constant 0 : index
    %c0_20 = arith.constant 0 : index
    %28 = vector.load %arg4[%c0_18, %c0_19, %c0_20] : memref<1x6x128xf32, #tpu.memory_space<vmem>>, vector<1x6x128xf32>
    %29 = vector.shape_cast %28 : vector<1x6x128xf32> to vector<6x128xf32>
    %30 = vector.shape_cast %27 : vector<6x128xf32> to vector<1x6x128xf32>
    tpu.vector_store %arg4[%c0_18, %c0_19, %c0_20], %30 {strides = array<i32>} : memref<1x6x128xf32, #tpu.memory_space<vmem>>, vector<1x6x128xf32>,
    return
  }
  func.func @transform_0(%arg0: i32) -> (i32, i32, i32) {
    %c0_i32 = arith.constant 0 : i32
    %c0_i32_0 = arith.constant 0 : i32
    %c0_i32_1 = arith.constant 0 : i32
    return %arg0, %c0_i32, %c0_i32_0 : i32, i32, i32
  }
  func.func @transform_1(%arg0: i32) -> (i32, i32, i32) {
    %c0_i32 = arith.constant 0 : i32
    %c0_i32_0 = arith.constant 0 : i32
    %c0_i32_1 = arith.constant 0 : i32
    %c0_i32_2 = arith.constant 0 : i32
    return %c0_i32, %c0_i32_0, %c0_i32_1 : i32, i32, i32
  }
  func.func @transform_2(%arg0: i32) -> (i32, i32) {
    %c0_i32 = arith.constant 0 : i32
    %c0_i32_0 = arith.constant 0 : i32
    %c0_i32_1 = arith.constant 0 : i32
    return %c0_i32, %c0_i32_0 : i32, i32
  }
  func.func @transform_3(%arg0: i32) -> (i32, i32, i32) {
    %c0_i32 = arith.constant 0 : i32
    %c0_i32_0 = arith.constant 0 : i32
    %c0_i32_1 = arith.constant 0 : i32
    return %arg0, %c0_i32, %c0_i32_0 : i32, i32, i32
  }
}

</mosaic_0001>

<bundles_post_ra>
// kernel: a_call__.5
= control target key start
LH: loop header
LB: loop body
LE: loop exit
PB: predicated region body
PF: predicated region fallthrough
CT: control target
= control target key end

     0   :  { %s10115_s12 = smov 0   ;;  %s12407_s0 = inlined_call_operand.vmem [shape: u8[2,1090,12], index: 0, kind: input, shape index: {}]   ;;  %s12408_s1 = inlined_call_operand.vmem [shape: f32[4,12,128], index: 1, kind: input, shape index: {}]   ;;  %s12409_s2 = inlined_call_operand.vmem [shape: f32[1,128], index: 2, kind: input, shape index: {}]   ;;  %s12410_s3 = inlined_call_operand.vmem [shape: bf16[2,1056,128], index: 3, kind: output, shape index: {}]  }
   0x1 LB: > { %s6694_s13 = sadd.s32 4294967295, %s10092_s12   ;;  %p6698_p0 = scmp.ge.s32.totalorder %s10092_s12, 1  ;;  %s10092_s12 = sphi %s10115_s12, %s13_s12  }
   0x2   : > { %p137_p1 = scmp.lt.s32.totalorder %s10092_s12, 3 }
   0x4   : > { %p138_p2 = pnand %p6698_p0, %p137_p1 }
   0x6   : > { %141 = sbr.rel (%p138_p2) target bundleno = 776 (0x308), region = 32 }
   0xd   : > { %v704_v0 = vld [vmem:[%s12408_s1] sm:$0xff]  ;;  %v705_v1 = vld [vmem:[%s12408_s1 + $0x8] sm:$0xf]  ;;  %vm1353_vm0 = vcmask 1043456   ;;  %v6701_v2 = vld [vmem:[%s12408_s1 + $0x10] sm:$0xff]  ;;  %vm10094_vm1 = vmmov 1  }
   0xe   : > { %vm10132_vm2 = vmpackc.low %vm1353_vm0, %vm10094_vm1  ;;  %v10136_v4 = vpack.c.bf16 %v705_v1, %v704_v0  ;;  %v6702_v5 = vld [vmem:[%s12408_s1 + $0x18] sm:$0xf]  ;;  %p161_p3 = scmp.lt.s32.totalorder %s6694_s13, 1  ;;  %v6961_v6 = vld [vmem:[%s12408_s1 + $0x20] sm:$0xff]  ;;  %vm1096_vm3 = vcmask 97280   ;;  %vm838_vm4 = vcmask 1046528  }
   0xf   : > { %v9559_v7 = vpack.c.bf16 %v6702_v5, %v6701_v2  ;;  %v6962_v8 = vld [vmem:[%s12408_s1 + $0x28] sm:$0xf]  ;;  %v7092_v10 = vld [vmem:[%s12408_s1 + $0x30] sm:$0xff]  ;;  %v7093_v11 = vld [vmem:[%s12408_s1 + $0x38] sm:$0xf]  ;;  %vm3888_vm5 = vcmask 1045504  }
  0x10   : > { %9567 = vmatprep.subr.msk.bf16.mxu0 %vm10132_vm2, %v10136_v4  ;;  %s12774_s13 = smov (!%p161_p3, %s6694_s13), 1  ;;  %v9571_v9 = vpack.c.bf16 %v6962_v8, %v6961_v6  ;;  %v10178_v14 = vpack.c.bf16 %v7093_v11, %v7092_v10 }
  0x11   : > { %9570 = vmatpush3.bf16.msk.msra.mxu0 %vm10132_vm2, %v10136_v4  ;;  %9561 = vmatprep.subr.msk.bf16.mxu1 %vm10132_vm2, %v9559_v7  ;;  %s10074_s26 = smul.u32 274, %s12774_s13 }
  0x12   : > { %9564 = vmatpush3.bf16.msk.msra.mxu1 %vm10132_vm2, %v9559_v7  ;;  %9573 = vmatprep.subr.msk.bf16.mxu0 %vm10132_vm2, %v9571_v9  ;;  %s10075_s19 = smul.u32 528, %s12774_s13 }
  0x13   : > { %9607 = vmatprep.subr.msk.bf16.mxu1 %vm10132_vm2, %v10136_v4  ;;  %s10174_s6 = scalar_lea.vmem %s12407_s0, %s10074_s26 }
  0x14   : > { %v7912_v12 = vld [vmem:[%s10174_s6] sm:$0xff]   ;;  %v10006_v13 = vld [vmem:[%s10174_s6 + $0x8] sm:$0xff]   ;;  %v10008_v39 = vld [vmem:[%s10174_s6 + $0x10] sm:$0xff]   ;;  %s11693_s21 = scalar_lea.vmem %s12410_s3, %s10075_s19 }
  0x15   : > { %v7913_v15 = vunpack.c.0.s8 %v7912_v12  ;;  %v7914_v16 = vunpack.c.1.s8 %v7912_v12  ;;  %v7917_v17 = vunpack.c.2.s8 %v7912_v12  ;;  %v7918_v18 = vunpack.c.3.s8 %v7912_v12  ;;  %v10010_v49 = vld [vmem:[%s10174_s6 + $0x18] sm:$0xff]  }
  0x16   : > { %v7921_v19 = vunpack.c.0.s8 %v10006_v13  ;;  %v7922_v20 = vunpack.c.1.s8 %v10006_v13  ;;  %v7925_v21 = vunpack.c.2.s8 %v10006_v13  ;;  %v7926_v22 = vunpack.c.3.s8 %v10006_v13  ;;  %v10012_v13 = vld [vmem:[%s10174_s6 + $0x20] sm:$0xff]  }
  0x17   : > { %v438_v23 = vand.u32 255, %v7913_v15  ;;  %v439_v24 = vand.u32 255, %v7914_v16  ;;  %v440_v25 = vand.u32 255, %v7917_v17  ;;  %v441_v26 = vand.u32 255, %v7918_v18 }
  0x18   : > { %v442_v27 = vand.u32 255, %v7921_v19  ;;  %v443_v28 = vand.u32 255, %v7922_v20  ;;  %v444_v29 = vand.u32 255, %v7925_v21  ;;  %v445_v30 = vand.u32 255, %v7926_v22 }
  0x19   : > { %v571_v31 = vcvt.s32.f32 %v438_v23  ;;  %v572_v32 = vcvt.s32.f32 %v439_v24  ;;  %v573_v33 = vcvt.s32.f32 %v440_v25  ;;  %v574_v34 = vcvt.s32.f32 %v441_v26 }
  0x1a   : > { %v10180_v35 = vcvt.s32.f32 %v442_v27  ;;  %v10182_v36 = vcvt.s32.f32 %v443_v28  ;;  %v10184_v37 = vcvt.s32.f32 %v444_v29  ;;  %v10186_v38 = vcvt.s32.f32 %v445_v30 }
  0x1b   : > { %v839_v40 = vrot.slane %v571_v31, 1  ;;  %8935 = vmatprep.mubr.msk.f32.mxu0 %vm1096_vm3, %v571_v31  ;;  %v840_v41 = vrot.slane %v572_v32, 1  ;;  %v842_v42 = vrot.slane %v573_v33, 1  ;;  %v844_v43 = vrot.slane %v574_v34, 1 }
  0x1c   : > { %8936 = vmatmul.mubr.msk.f32.vlgmr.msra.gmra.mrb[0].mxu0 %vm1096_vm3, %v572_v32  ;;  %v846_v44 = vrot.slane %v10180_v35, 1  ;;  %v848_v45 = vrot.slane %v10182_v36, 1  ;;  %v7929_v48 = vunpack.c.0.s8 %v10008_v39  ;;  %v850_v51 = vrot.slane %v10184_v37, 1 }
  0x1d   : > { %9576 = vmatpush3.bf16.msk.msra.mxu0 %vm10132_vm2, %v9571_v9  ;;  %v841_v46 = vsel %vm838_vm4, %v839_v40, %v840_v41  ;;  %v843_v47 = vsel %vm838_vm4, %v840_v41, %v842_v42  ;;  %8938 = vmatprep.mubr.msk.f32.mxu0 %vm1096_vm3, %v573_v33  ;;  %v845_v50 = vsel %vm838_vm4, %v842_v42, %v844_v43  ;;  %v852_v52 = vrot.slane %v10186_v38, 1 }
  0x1e   : > { %8739 = vmatprep.mubr.msk.f32.mxu1 %vm1096_vm3, %v841_v46  ;;  %v446_v53 = vand.u32 255, %v7929_v48  ;;  %9579 = vmatprep.subr.msk.bf16.mxu0 %vm10132_vm2, %v10178_v14  ;;  %v7930_v54 = vunpack.c.1.s8 %v10008_v39  ;;  %v7933_v55 = vunpack.c.2.s8 %v10008_v39  ;;  %v7934_v56 = vunpack.c.3.s8 %v10008_v39  ;;  %v10014_v39 = vld [vmem:[%s10174_s6 + $0x28] sm:$0xff]  }
  0x1f   : > { %8740 = vmatmul.mubr.msk.f32.vlgmr.msra.gmra.mrb[0].mxu1 %vm1096_vm3, %v843_v47  ;;  %v847_v57 = vsel %vm838_vm4, %v844_v43, %v846_v44  ;;  %v849_v58 = vsel %vm838_vm4, %v846_v44, %v848_v45  ;;  %v7937_v59 = vunpack.c.0.s8 %v10010_v49  ;;  %v7938_v60 = vunpack.c.1.s8 %v10010_v49 }
  0x20   : > { %9608 = vmatpush3.bf16.msk.msra.mxu1 %vm10132_vm2, %v10136_v4  ;;  %8939 = vmatmul.mubr.msk.f32.gmra.mrb[2].mxu0 %vm1096_vm3, %v574_v34  ;;  %v10216_v61 = vcvt.s32.f32 %v446_v53  ;;  %v447_v62 = vand.u32 255, %v7930_v54  ;;  %v448_v63 = vand.u32 255, %v7933_v55  ;;  %v449_v0 = vand.u32 255, %v7934_v56 }
  0x21   : > { %8742 = vmatprep.mubr.msk.f32.mxu1 %vm1096_vm3, %v845_v50  ;;  %8941 = vmatprep.mubr.msk.f32.mxu0 %vm1096_vm3, %v10180_v35  ;;  %v7941_v2 = vunpack.c.2.s8 %v10010_v49  ;;  %v7942_v4 = vunpack.c.3.s8 %v10010_v49  ;;  %v851_v5 = vsel %vm838_vm4, %v848_v45, %v850_v51  ;;  %v450_v8 = vand.u32 255, %v7937_v59  ;;  %v10016_v59 = vld [vmem:[%s10174_s6 + $0x30] sm:$0xff]  }
  0x22   : > { %v10219_v1 = vcvt.s32.f32 %v447_v62  ;;  %v854_v6 = vrot.slane %v10216_v61, 1  ;;  %v10226_v7 = vcvt.s32.f32 %v448_v63  ;;  %v853_v9 = vsel %vm838_vm4, %v850_v51, %v852_v52 }
  0x23   : > { %8743 = vmatmul.mubr.msk.f32.gmra.mrb[2].mxu1 %vm1096_vm3, %v847_v57  ;;  %v10232_v11 = vcvt.s32.f32 %v449_v0  ;;  %v451_v12 = vand.u32 255, %v7938_v60  ;;  %v452_v15 = vand.u32 255, %v7941_v2  ;;  %v453_v16 = vand.u32 255, %v7942_v4 }
  0x24   : > { %8942 = vmatmul.mubr.msk.f32.gmra.mrb[4].mxu0 %vm1096_vm3, %v10182_v36  ;;  %8745 = vmatprep.mubr.msk.f32.mxu1 %vm1096_vm3, %v849_v58  ;;  %v856_v10 = vrot.slane %v10219_v1, 1  ;;  %v855_v17 = vsel %vm838_vm4, %v852_v52, %v854_v6  ;;  %v858_v18 = vrot.slane %v10226_v7, 1  ;;  %v10241_v19 = vcvt.s32.f32 %v450_v8 }
  0x25   : > { %8944 = vmatprep.mubr.msk.f32.mxu0 %vm1096_vm3, %v10184_v37  ;;  %v7945_v20 = vunpack.c.0.s8 %v10012_v13  ;;  %v860_v22 = vrot.slane %v10232_v11, 1  ;;  %v10246_v23 = vcvt.s32.f32 %v451_v12  ;;  %v7946_v24 = vunpack.c.1.s8 %v10012_v13 }
  0x26   : > { %v857_v21 = vsel %vm838_vm4, %v854_v6, %v856_v10  ;;  %v10249_v25 = vcvt.s32.f32 %v452_v15  ;;  %v10251_v26 = vcvt.s32.f32 %v453_v16  ;;  %v859_v27 = vsel %vm838_vm4, %v856_v10, %v858_v18 }
  0x27   : > { %8746 = vmatmul.mubr.msk.f32.gmra.mrb[4].mxu1 %vm1096_vm3, %v851_v5  ;;  %v862_v28 = vrot.slane %v10241_v19, 1  ;;  %v454_v29 = vand.u32 255, %v7945_v20  ;;  %v7949_v30 = vunpack.c.2.s8 %v10012_v13  ;;  %v861_v31 = vsel %vm838_vm4, %v858_v18, %v860_v22 }
  0x28   : > { %8945 = vmatmul.mubr.msk.f32.gmra.mrb[6].mxu0 %vm1096_vm3, %v10186_v38  ;;  %8748 = vmatprep.mubr.msk.f32.mxu1 %vm1096_vm3, %v853_v9  ;;  %v864_v32 = vrot.slane %v10246_v23, 1  ;;  %v455_v33 = vand.u32 255, %v7946_v24  ;;  %v7950_v34 = vunpack.c.3.s8 %v10012_v13  ;;  %v866_v40 = vrot.slane %v10249_v25, 1  ;;  %v10018_v24 = vld [vmem:[%s10174_s6 + $0x38] sm:$0xff]  }
  0x29   : > { %9131 = vmatprep.mubr.msk.f32.mxu0 %vm1096_vm3, %v849_v58  ;;  %v868_v41 = vrot.slane %v10251_v26, 1  ;;  %v10270_v42 = vcvt.s32.f32 %v454_v29  ;;  %v456_v43 = vand.u32 255, %v7949_v30  ;;  %v7953_v44 = vunpack.c.0.s8 %v10014_v39 }
  0x2a   : > { %v865_v45 = vsel %vm838_vm4, %v862_v28, %v864_v32  ;;  %v10274_v46 = vcvt.s32.f32 %v455_v33  ;;  %v457_v47 = vand.u32 255, %v7950_v34  ;;  %v7954_v48 = vunpack.c.1.s8 %v10014_v39 }
  0x2b   : > { %8749 = vmatmul.mubr.msk.f32.gmra.mrb[6].mxu1 %vm1096_vm3, %v855_v17  ;;  %v7957_v49 = vunpack.c.2.s8 %v10014_v39  ;;  %v7958_v50 = vunpack.c.3.s8 %v10014_v39  ;;  %v867_v51 = vsel %vm838_vm4, %v864_v32, %v866_v40  ;;  %v870_v52 = vrot.slane %v10270_v42, 1 }
  0x2c   : > { %9132 = vmatmul.mubr.msk.f32.vlgmr.msra.gmra.mrb[0].mxu0 %vm1096_vm3, %v851_v5  ;;  %8751 = vmatprep.mubr.msk.f32.mxu1 %vm1096_vm3, %v857_v21  ;;  %v10281_v53 = vcvt.s32.f32 %v456_v43  ;;  %v458_v54 = vand.u32 255, %v7953_v44  ;;  %v869_v55 = vsel %vm838_vm4, %v866_v40, %v868_v41  ;;  %v872_v56 = vrot.slane %v10274_v46, 1 }
  0x2d   : > { %9582 = vmatpush3.bf16.msk.msra.mxu0 %vm10132_vm2, %v10178_v14  ;;  %9134 = vmatprep.mubr.msk.f32.mxu0 %vm1096_vm3, %v853_v9  ;;  %v863_v14 = vsel %vm838_vm4, %v860_v22, %v862_v28  ;;  %v10286_v57 = vcvt.s32.f32 %v457_v47  ;;  %v459_v58 = vand.u32 255, %v7954_v48  ;;  %v460_v60 = vand.u32 255, %v7957_v49 }
  0x2e   : > { %v461_v62 = vand.u32 255, %v7958_v50  ;;  %v871_v63 = vsel %vm838_vm4, %v868_v41, %v870_v52  ;;  %v874_v0 = vrot.slane %v10281_v53, 1  ;;  %v10294_v2 = vcvt.s32.f32 %v458_v54 }
  0x2f   : > { %8752 = vmatmul.mubr.msk.f32.gmra.mrb[8].mxu1 %vm1096_vm3, %v859_v27  ;;  %v7961_v4 = vunpack.c.0.s8 %v10016_v59  ;;  %v873_v5 = vsel %vm838_vm4, %v870_v52, %v872_v56  ;;  %v876_v6 = vrot.slane %v10286_v57, 1  ;;  %v10299_v8 = vcvt.s32.f32 %v459_v58  ;;  %v10020_v52 = vld [vmem:[%s10174_s6 + $0x40] sm:$0xff]  }
  0x30   : > { %9135 = vmatmul.mubr.msk.f32.gmra.mrb[2].mxu0 %vm1096_vm3, %v855_v17  ;;  %8754 = vmatprep.mubr.msk.f32.mxu1 %vm1096_vm3, %v861_v31  ;;  %v7962_v9 = vunpack.c.1.s8 %v10016_v59  ;;  %v10302_v10 = vcvt.s32.f32 %v460_v60  ;;  %v10304_v12 = vcvt.s32.f32 %v461_v62  ;;  %v875_v13 = vsel %vm838_vm4, %v872_v56, %v874_v0 }
  0x31   : > { %9137 = vmatprep.mubr.msk.f32.mxu0 %vm1096_vm3, %v857_v21  ;;  %v878_v15 = vrot.slane %v10294_v2, 1  ;;  %v462_v16 = vand.u32 255, %v7961_v4  ;;  %v7965_v17 = vunpack.c.2.s8 %v10016_v59  ;;  %v877_v18 = vsel %vm838_vm4, %v874_v0, %v876_v6 }
  0x32   : > { %v880_v20 = vrot.slane %v10299_v8, 1  ;;  %v463_v21 = vand.u32 255, %v7962_v9  ;;  %v7966_v22 = vunpack.c.3.s8 %v10016_v59  ;;  %v884_v28 = vrot.slane %v10304_v12, 1 }
  0x33   : > { %8755 = vmatmul.mubr.msk.f32.gmra.mrb[10].mxu1 %vm1096_vm3, %v863_v14  ;;  %v879_v29 = vsel %vm838_vm4, %v876_v6, %v878_v15  ;;  %v10320_v30 = vcvt.s32.f32 %v462_v16  ;;  %v7969_v32 = vunpack.c.0.s8 %v10018_v24  ;;  %v7970_v40 = vunpack.c.1.s8 %v10018_v24 }
  0x34   : > { %9138 = vmatmul.mubr.msk.f32.gmra.mrb[4].mxu0 %vm1096_vm3, %v859_v27  ;;  %8757 = vmatprep.mubr.msk.f32.mxu1 %vm1096_vm3, %v865_v45  ;;  %v882_v27 = vrot.slane %v10302_v10, 1  ;;  %v881_v33 = vsel %vm838_vm4, %v878_v15, %v880_v20  ;;  %v10324_v34 = vcvt.s32.f32 %v463_v21  ;;  %v465_v39 = vand.u32 255, %v7966_v22  ;;  %v10022_v22 = vld [vmem:[%s10174_s6 + $0x48] sm:$0xff]  }
  0x35   : > { %9140 = vmatprep.mubr.msk.f32.mxu0 %vm1096_vm3, %v861_v31  ;;  %v464_v31 = vand.u32 255, %v7965_v17  ;;  %v7973_v41 = vunpack.c.2.s8 %v10018_v24  ;;  %v886_v44 = vrot.slane %v10320_v30, 1  ;;  %v466_v47 = vand.u32 255, %v7969_v32 }
  0x36   : > { %v883_v43 = vsel %vm838_vm4, %v880_v20, %v882_v27  ;;  %v885_v48 = vsel %vm838_vm4, %v882_v27, %v884_v28  ;;  %v888_v49 = vrot.slane %v10324_v34, 1  ;;  %v10336_v50 = vcvt.s32.f32 %v465_v39 }
  0x37   : > { %8758 = vmatmul.mubr.msk.f32.gmra.mrb[12].mxu1 %vm1096_vm3, %v867_v51  ;;  %v468_v54 = vand.u32 255, %v7973_v41  ;;  %v887_v56 = vsel %vm838_vm4, %v884_v28, %v886_v44  ;;  %v10344_v59 = vcvt.s32.f32 %v466_v47  ;;  %v7977_v60 = vunpack.c.0.s8 %v10020_v52 }
  0x38   : > { %9141 = vmatmul.mubr.msk.f32.gmra.mrb[6].mxu0 %vm1096_vm3, %v863_v14  ;;  %8760 = vmatprep.mubr.msk.f32.mxu1 %vm1096_vm3, %v869_v55  ;;  %v7974_v14 = vunpack.c.3.s8 %v10018_v24  ;;  %v889_v62 = vsel %vm838_vm4, %v886_v44, %v888_v49  ;;  %v7978_v4 = vunpack.c.1.s8 %v10020_v52  ;;  %v7981_v16 = vunpack.c.2.s8 %v10020_v52 }
  0x39   : > { %9143 = vmatprep.mubr.msk.f32.mxu0 %vm1096_vm3, %v865_v45  ;;  %v10331_v45 = vcvt.s32.f32 %v464_v31  ;;  %v470_v15 = vand.u32 255, %v7977_v60  ;;  %v7982_v21 = vunpack.c.3.s8 %v10020_v52  ;;  %v7985_v32 = vunpack.c.0.s8 %v10022_v22 }
  0x3a   : > { %v471_v20 = vand.u32 255, %v7978_v4  ;;  %v472_v31 = vand.u32 255, %v7981_v16  ;;  %v7986_v41 = vunpack.c.1.s8 %v10022_v22 }
  0x3b   : > { %8761 = vmatmul.mubr.msk.f32.gmra.mrb[14].mxu1 %vm1096_vm3, %v871_v63  ;;  %v890_v58 = vrot.slane %v10331_v45, 1 }
  0x3c   : > { %9144 = vmatmul.mubr.msk.f32.gmra.mrb[8].mxu0 %vm1096_vm3, %v867_v51  ;;  %8763 = vmatprep.mubr.msk.f32.mxu1 %vm1096_vm3, %v873_v5  ;;  %v467_v51 = vand.u32 255, %v7970_v40  ;;  %v10374_v39 = vcvt.s32.f32 %v471_v20  ;;  %v473_v40 = vand.u32 255, %v7982_v21 }
  0x3d   : > { %9146 = vmatprep.mubr.msk.f32.mxu0 %vm1096_vm3, %v869_v55  ;;  %v469_v55 = vand.u32 255, %v7974_v14  ;;  %v891_v9 = vsel %vm838_vm4, %v888_v49, %v890_v58  ;;  %v7989_v14 = vunpack.c.2.s8 %v10022_v22  ;;  %v474_v49 = vand.u32 255, %v7985_v32 }
  0x3e   : > { %v10349_v0 = vcvt.s32.f32 %v467_v51  ;;  %v904_v52 = vrot.slane %v10374_v39, 1 }
  0x3f   : > { %8764 = vmatmul.mubr.msk.f32.gmra.mrb[16].mxu1 %vm1096_vm3, %v875_v13  ;;  %v10354_v6 = vcvt.s32.f32 %v469_v55  ;;  %v475_v55 = vand.u32 255, %v7986_v41  ;;  %v10394_v4 = vcvt.s32.f32 %v474_v49 }
  0x40   : > { %9147 = vmatmul.mubr.msk.f32.gmra.mrb[10].mxu0 %vm1096_vm3, %v871_v63  ;;  %8766 = vmatprep.mubr.msk.f32.mxu1 %vm1096_vm3, %v877_v18  ;;  %v892_v63 = vrot.slane %v10336_v50, 1 }
  0x41   : > { %9149 = vmatprep.mubr.msk.f32.mxu0 %vm1096_vm3, %v873_v5  ;;  %v10352_v5 = vcvt.s32.f32 %v468_v54  ;;  %v900_v27 = vrot.slane %v10354_v6, 1  ;;  %v10386_v54 = vcvt.s32.f32 %v473_v40  ;;  %v10399_v16 = vcvt.s32.f32 %v475_v55  ;;  %v10026_v40 = vld [vmem:[%s10174_s6 + $0x58] sm:$0xff]  }
  0x42   : > { %v893_v17 = vsel %vm838_vm4, %v890_v58, %v892_v63  ;;  %v476_v58 = vand.u32 255, %v7989_v14  ;;  %v8001_v49 = vunpack.c.0.s8 %v10026_v40 }
  0x43   : > { %8767 = vmatmul.mubr.msk.f32.gmra.mrb[18].mxu1 %vm1096_vm3, %v879_v29  ;;  %v898_v24 = vrot.slane %v10352_v5, 1 }
  0x44   : > { %9150 = vmatmul.mubr.msk.f32.gmra.mrb[12].mxu0 %vm1096_vm3, %v875_v13  ;;  %8769 = vmatprep.mubr.msk.f32.mxu1 %vm1096_vm3, %v881_v33  ;;  %v894_v13 = vrot.slane %v10344_v59, 1 }
  0x45   : > { %9152 = vmatprep.mubr.msk.f32.mxu0 %vm1096_vm3, %v877_v18  ;;  %v896_v18 = vrot.slane %v10349_v0, 1  ;;  %v901_v51 = vsel %vm838_vm4, %v898_v24, %v900_v27 }
  0x46   : > { %v895_v28 = vsel %vm838_vm4, %v892_v63, %v894_v13 }
  0x47   : > { %8770 = vmatmul.mubr.msk.f32.gmra.mrb[20].mxu1 %vm1096_vm3, %v883_v43  ;;  %v899_v44 = vsel %vm838_vm4, %v896_v18, %v898_v24 }
  0x48   : > { %9153 = vmatmul.mubr.msk.f32.gmra.mrb[14].mxu0 %vm1096_vm3, %v879_v29  ;;  %8772 = vmatprep.mubr.msk.f32.mxu1 %vm1096_vm3, %v885_v48  ;;  %v10370_v29 = vcvt.s32.f32 %v470_v15  ;;  %v908_v15 = vrot.slane %v10386_v54, 1 }
  0x49   : > { %9155 = vmatprep.mubr.msk.f32.mxu0 %vm1096_vm3, %v881_v33  ;;  %v897_v33 = vsel %vm838_vm4, %v894_v13, %v896_v18  ;;  %v10402_v18 = vcvt.s32.f32 %v476_v58  ;;  %v8005_v58 = vunpack.c.2.s8 %v10026_v40 }
  0x4a   : > { %v902_v47 = vrot.slane %v10370_v29, 1 }
  0x4b   : > { %8773 = vmatmul.mubr.msk.f32.gmra.mrb[22].mxu1 %vm1096_vm3, %v887_v56  ;;  %v914_v41 = vrot.slane %v10402_v18, 1 }
  0x4c   : > { %9156 = vmatmul.mubr.msk.f32.gmra.mrb[16].mxu0 %vm1096_vm3, %v883_v43  ;;  %8775 = vmatprep.mubr.msk.f32.mxu1 %vm1096_vm3, %v889_v62  ;;  %v7990_v43 = vunpack.c.3.s8 %v10022_v22  ;;  %v905_v13 = vsel %vm838_vm4, %v902_v47, %v904_v52  ;;  %v910_v22 = vrot.slane %v10394_v4, 1 }
  0x4d   : > { %9158 = vmatprep.mubr.msk.f32.mxu0 %vm1096_vm3, %v885_v48  ;;  %v10381_v48 = vcvt.s32.f32 %v472_v31  ;;  %v912_v31 = vrot.slane %v10399_v16, 1 }
  0x4e   : > { %v477_v60 = vand.u32 255, %v7990_v43  ;;  %v911_v43 = vsel %vm838_vm4, %v908_v15, %v910_v22 }
  0x4f   : > { %8776 = vmatmul.mubr.msk.f32.gmra.mrb[24].mxu1 %vm1096_vm3, %v891_v9  ;;  %v906_v63 = vrot.slane %v10381_v48, 1 }
  0x50   : > { %9159 = vmatmul.mubr.msk.f32.gmra.mrb[18].mxu0 %vm1096_vm3, %v887_v56  ;;  %8778 = vmatprep.mubr.msk.f32.mxu1 %vm1096_vm3, %v893_v17  ;;  %v10024_v56 = vld [vmem:[%s10174_s6 + $0x50] sm:$0xff]   ;;  %v10404_v20 = vcvt.s32.f32 %v477_v60  ;;  %v8006_v60 = vunpack.c.3.s8 %v10026_v40 }
  0x51   : > { %9161 = vmatprep.mubr.msk.f32.mxu0 %vm1096_vm3, %v889_v62  ;;  %v903_v62 = vsel %vm838_vm4, %v900_v27, %v902_v47  ;;  %v907_v21 = vsel %vm838_vm4, %v904_v52, %v906_v63  ;;  %v7997_v27 = vunpack.c.2.s8 %v10024_v56 }
  0x52   : > { %v916_v14 = vrot.slane %v10404_v20, 1 }
  0x53   : > { %8779 = vmatmul.mubr.msk.f32.gmra.mrb[26].mxu1 %vm1096_vm3, %v895_v28  ;;  %v480_v47 = vand.u32 255, %v7997_v27  ;;  %v10028_v27 = vld [vmem:[%s10174_s6 + $0x60] sm:$0xff]  }
  0x54   : > { %9162 = vmatmul.mubr.msk.f32.gmra.mrb[20].mxu0 %vm1096_vm3, %v891_v9  ;;  %8781 = vmatprep.mubr.msk.f32.mxu1 %vm1096_vm3, %v897_v33  ;;  %v7993_v9 = vunpack.c.0.s8 %v10024_v56 }
  0x55   : > { %9164 = vmatprep.mubr.msk.f32.mxu0 %vm1096_vm3, %v893_v17  ;;  %v7994_v17 = vunpack.c.1.s8 %v10024_v56 }
  0x56   : > { %v478_v24 = vand.u32 255, %v7993_v9  ;;  %v10431_v9 = vcvt.s32.f32 %v480_v47 }
  0x57   : > { %8782 = vmatmul.mubr.msk.f32.gmra.mrb[28].mxu1 %vm1096_vm3, %v899_v44  ;;  %v479_v32 = vand.u32 255, %v7994_v17 }
  0x58   : > { %9165 = vmatmul.mubr.msk.f32.gmra.mrb[22].mxu0 %vm1096_vm3, %v895_v28  ;;  %8784 = vmatprep.mubr.msk.f32.mxu1 %vm1096_vm3, %v901_v51  ;;  %v909_v28 = vsel %vm838_vm4, %v906_v63, %v908_v15  ;;  %12587 = vst [vmem:[#allocation4_spill] sm:$0xff] %v10431_v9  ;;  %v917_v15 = vsel %vm838_vm4, %v914_v41, %v916_v14 }
  0x59   : > { %9167 = vmatprep.mubr.msk.f32.mxu0 %vm1096_vm3, %v897_v33  ;;  %v7998_v33 = vunpack.c.3.s8 %v10024_v56  ;;  %v10424_v52 = vcvt.s32.f32 %v479_v32  ;;  %v8002_v56 = vunpack.c.1.s8 %v10026_v40  ;;  %v485_v32 = vand.u32 255, %v8006_v60 }
  0x5a   : > { %v8009_v40 = vunpack.c.0.s8 %v10028_v27  ;;  %v8013_v60 = vunpack.c.2.s8 %v10028_v27 }
  0x5b   : > { %8785 = vmatmul.mubr.msk.f32.gmra.mrb[30].mxu1 %vm1096_vm3, %v903_v62  ;;  %12586 = vst [vmem:[#allocation3_spill] sm:$0xff] %v10424_v52  ;;  %v481_v55 = vand.u32 255, %v7998_v33  ;;  %v920_v17 = vrot.slane %v10424_v52, 1  ;;  %v10048_v52 = vld [vmem:[%s10174_s6 + $0xb0] sm:$0xff]  }
  0x5c   : > { %9168 = vmatmul.mubr.msk.f32.gmra.mrb[24].mxu0 %vm1096_vm3, %v899_v44  ;;  %8787 = vmatprep.mubr.msk.f32.mxu1 %vm1096_vm3, %v905_v13  ;;  %v10420_v44 = vcvt.s32.f32 %v478_v24  ;;  %v483_v24 = vand.u32 255, %v8002_v56 }
  0x5d   : > { %9170 = vmatprep.mubr.msk.f32.mxu0 %vm1096_vm3, %v901_v51  ;;  %v913_v51 = vsel %vm838_vm4, %v910_v22, %v912_v31  ;;  %v10436_v22 = vcvt.s32.f32 %v481_v55  ;;  %v8010_v55 = vunpack.c.1.s8 %v10028_v27 }
  0x5e   : > { %12585 = vst [vmem:[#allocation2_spill] sm:$0xff] %v10420_v44  ;;  %v918_v63 = vrot.slane %v10420_v44, 1 }
  0x5f   : > { %8788 = vmatmul.mubr.msk.f32.gmra.mrb[32].mxu1 %vm1096_vm3, %v907_v21  ;;  %12588 = vst [vmem:[#allocation5_spill] sm:$0xff] %v10436_v22  ;;  %v924_v47 = vrot.slane %v10436_v22, 1 }
  0x60   : > { %9171 = vmatmul.mubr.msk.f32.gmra.mrb[26].mxu0 %vm1096_vm3, %v903_v62  ;;  %8790 = vmatprep.mubr.msk.f32.mxu1 %vm1096_vm3, %v909_v28  ;;  %v915_v62 = vsel %vm838_vm4, %v912_v31, %v914_v41  ;;  %v919_v31 = vsel %vm838_vm4, %v916_v14, %v918_v63  ;;  %v921_v41 = vsel %vm838_vm4, %v918_v63, %v920_v17  ;;  %v10454_v14 = vcvt.s32.f32 %v485_v32  ;;  %v10030_v32 = vld [vmem:[%s10174_s6 + $0x68] sm:$0xff]  }
  0x61   : > { %9173 = vmatprep.mubr.msk.f32.mxu0 %vm1096_vm3, %v905_v13  ;;  %v482_v13 = vand.u32 255, %v8001_v49  ;;  %v10449_v49 = vcvt.s32.f32 %v483_v24  ;;  %v487_v24 = vand.u32 255, %v8010_v55 }
  0x62   : > { %12592 = vst [vmem:[#allocation9_spill] sm:$0xff] %v10454_v14  ;;  %v932_v22 = vrot.slane %v10454_v14, 1  ;;  %v8022_v14 = vunpack.c.3.s8 %v10030_v32 }
  0x63   : > { %8791 = vmatmul.mubr.msk.f32.gmra.mrb[34].mxu1 %vm1096_vm3, %v911_v43  ;;  %v10444_v33 = vcvt.s32.f32 %v482_v13  ;;  %12590 = vst [vmem:[#allocation7_spill] sm:$0xff] %v10449_v49  ;;  %v928_v13 = vrot.slane %v10449_v49, 1  ;;  %v10474_v55 = vcvt.s32.f32 %v487_v24 }
  0x64   : > { %9174 = vmatmul.mubr.msk.f32.gmra.mrb[28].mxu0 %vm1096_vm3, %v907_v21  ;;  %8793 = vmatprep.mubr.msk.f32.mxu1 %vm1096_vm3, %v913_v51  ;;  %v484_v21 = vand.u32 255, %v8005_v58  ;;  %v486_v58 = vand.u32 255, %v8009_v40  ;;  %v8017_v40 = vunpack.c.0.s8 %v10030_v32 }
  0x65   : > { %9176 = vmatprep.mubr.msk.f32.mxu0 %vm1096_vm3, %v909_v28  ;;  %v922_v28 = vrot.slane %v10431_v9, 1  ;;  %12589 = vst [vmem:[#allocation6_spill] sm:$0xff] %v10444_v33  ;;  %v926_v56 = vrot.slane %v10444_v33, 1  ;;  %12594 = vst [vmem:[#allocation11_spill] sm:$0xff] %v10474_v55  ;;  %v936_v24 = vrot.slane %v10474_v55, 1  ;;  %v10032_v33 = vld [vmem:[%s10174_s6 + $0x70] sm:$0xff]  }
  0x66   : > { %v493_v9 = vand.u32 255, %v8022_v14  ;;  %v8026_v14 = vunpack.c.1.s8 %v10032_v33 }
  0x67   : > { %8794 = vmatmul.mubr.msk.f32.gmra.mrb[36].mxu1 %vm1096_vm3, %v915_v62  ;;  %v925_v63 = vsel %vm838_vm4, %v922_v28, %v924_v47 }
  0x68   : > { %9177 = vmatmul.mubr.msk.f32.gmra.mrb[30].mxu0 %vm1096_vm3, %v911_v43  ;;  %8796 = vmatprep.mubr.msk.f32.mxu1 %vm1096_vm3, %v917_v15  ;;  %v10452_v43 = vcvt.s32.f32 %v484_v21  ;;  %v8014_v21 = vunpack.c.3.s8 %v10028_v27  ;;  %v929_v27 = vsel %vm838_vm4, %v926_v56, %v928_v13 }
  0x69   : > { %9179 = vmatprep.mubr.msk.f32.mxu0 %vm1096_vm3, %v913_v51  ;;  %v923_v51 = vsel %vm838_vm4, %v920_v17, %v922_v28  ;;  %v927_v17 = vsel %vm838_vm4, %v924_v47, %v926_v56  ;;  %v488_v28 = vand.u32 255, %v8013_v60  ;;  %v490_v56 = vand.u32 255, %v8017_v40 }
  0x6a   : > { %12591 = vst [vmem:[#allocation8_spill] sm:$0xff] %v10452_v43  ;;  %v489_v49 = vand.u32 255, %v8014_v21 }
  0x6b   : > { %8797 = vmatmul.mubr.msk.f32.gmra.mrb[38].mxu1 %vm1096_vm3, %v919_v31 }
  0x6c   : > { %9180 = vmatmul.mubr.msk.f32.gmra.mrb[32].mxu0 %vm1096_vm3, %v915_v62  ;;  %8799 = vmatprep.mubr.msk.f32.mxu1 %vm1096_vm3, %v921_v41  ;;  %v930_v62 = vrot.slane %v10452_v43, 1  ;;  %v8018_v43 = vunpack.c.1.s8 %v10030_v32  ;;  %v10486_v21 = vcvt.s32.f32 %v489_v49 }
  0x6d   : > { %9182 = vmatprep.mubr.msk.f32.mxu0 %vm1096_vm3, %v917_v15  ;;  %v10470_v15 = vcvt.s32.f32 %v486_v58 }
  0x6e   : > { %v931_v47 = vsel %vm838_vm4, %v928_v13, %v930_v62  ;;  %v933_v60 = vsel %vm838_vm4, %v930_v62, %v932_v22  ;;  %12596 = vst [vmem:[#allocation13_spill] sm:$0xff] %v10486_v21  ;;  %v8025_v62 = vunpack.c.0.s8 %v10032_v33 }
  0x6f   : > { %8800 = vmatmul.mubr.msk.f32.gmra.mrb[40].mxu1 %vm1096_vm3, %v923_v51  ;;  %12593 = vst [vmem:[#allocation10_spill] sm:$0xff] %v10470_v15  ;;  %v934_v58 = vrot.slane %v10470_v15, 1 }
  0x70   : > { %9183 = vmatmul.mubr.msk.f32.gmra.mrb[34].mxu0 %vm1096_vm3, %v919_v31  ;;  %8802 = vmatprep.mubr.msk.f32.mxu1 %vm1096_vm3, %v925_v63  ;;  %v8021_v31 = vunpack.c.2.s8 %v10030_v32  ;;  %v491_v32 = vand.u32 255, %v8018_v43  ;;  %v940_v43 = vrot.slane %v10486_v21, 1 }
  0x71   : > { %9185 = vmatprep.mubr.msk.f32.mxu0 %vm1096_vm3, %v921_v41  ;;  %v10481_v41 = vcvt.s32.f32 %v488_v28  ;;  %v935_v13 = vsel %vm838_vm4, %v932_v22, %v934_v58  ;;  %v10494_v28 = vcvt.s32.f32 %v490_v56  ;;  %v937_v49 = vsel %vm838_vm4, %v934_v58, %v936_v24 }
  0x72   : > { %v10499_v40 = vcvt.s32.f32 %v491_v32  ;;  %v10504_v22 = vcvt.s32.f32 %v493_v9  ;;  %v494_v58 = vand.u32 255, %v8025_v62  ;;  %v8029_v56 = vunpack.c.2.s8 %v10032_v33  ;;  %v10034_v9 = vld [vmem:[%s10174_s6 + $0x78] sm:$0xff]  }
  0x73   : > { %8803 = vmatmul.mubr.msk.f32.gmra.mrb[42].mxu1 %vm1096_vm3, %v927_v17  ;;  %12595 = vst [vmem:[#allocation12_spill] sm:$0xff] %v10481_v41  ;;  %12597 = vst [vmem:[#allocation14_spill] sm:$0xff] %v10494_v28  ;;  %v8033_v62 = vunpack.c.0.s8 %v10034_v9 }
  0x74   : > { %9186 = vmatmul.mubr.msk.f32.gmra.mrb[36].mxu0 %vm1096_vm3, %v923_v51  ;;  %8805 = vmatprep.mubr.msk.f32.mxu1 %vm1096_vm3, %v929_v27  ;;  %v492_v51 = vand.u32 255, %v8021_v31  ;;  %12598 = vst [vmem:[#allocation15_spill] sm:$0xff] %v10499_v40  ;;  %12600 = vst [vmem:[#allocation17_spill] sm:$0xff] %v10504_v22  ;;  %v942_v31 = vrot.slane %v10494_v28, 1  ;;  %v944_v21 = vrot.slane %v10499_v40, 1  ;;  %v948_v55 = vrot.slane %v10504_v22, 1 }
  0x75   : > { %9188 = vmatprep.mubr.msk.f32.mxu0 %vm1096_vm3, %v925_v63  ;;  %v938_v63 = vrot.slane %v10481_v41, 1  ;;  %v8030_v41 = vunpack.c.3.s8 %v10032_v33  ;;  %v8038_v22 = vunpack.c.3.s8 %v10034_v9  ;;  %v10036_v28 = vld [vmem:[%s10174_s6 + $0x80] sm:$0xff]  }
  0x76   : > { %v945_v33 = vsel %vm838_vm4, %v942_v31, %v944_v21 }
  0x77   : > { %8806 = vmatmul.mubr.msk.f32.gmra.mrb[44].mxu1 %vm1096_vm3, %v931_v47  ;;  %v941_v32 = vsel %vm838_vm4, %v938_v63, %v940_v43  ;;  %v497_v40 = vand.u32 255, %v8030_v41  ;;  %v501_v15 = vand.u32 255, %v8038_v22  ;;  %v8042_v22 = vunpack.c.1.s8 %v10036_v28 }
  0x78   : > { %9189 = vmatmul.mubr.msk.f32.gmra.mrb[38].mxu0 %vm1096_vm3, %v927_v17  ;;  %8808 = vmatprep.mubr.msk.f32.mxu1 %vm1096_vm3, %v933_v60  ;;  %v10502_v17 = vcvt.s32.f32 %v492_v51  ;;  %v495_v51 = vand.u32 255, %v8026_v14 }
  0x79   : > { %9191 = vmatprep.mubr.msk.f32.mxu0 %vm1096_vm3, %v929_v27  ;;  %v939_v27 = vsel %vm838_vm4, %v936_v24, %v938_v63  ;;  %v943_v24 = vsel %vm838_vm4, %v940_v43, %v942_v31  ;;  %v496_v63 = vand.u32 255, %v8029_v56  ;;  %v498_v31 = vand.u32 255, %v8033_v62 }
  0x7a   : > { %12599 = vst [vmem:[#allocation16_spill] sm:$0xff] %v10502_v17  ;;  %v10524_v14 = vcvt.s32.f32 %v495_v51  ;;  %v10536_v51 = vcvt.s32.f32 %v497_v40 }
  0x7b   : > { %8809 = vmatmul.mubr.msk.f32.gmra.mrb[46].mxu1 %vm1096_vm3, %v935_v13 }
  0x7c   : > { %9192 = vmatmul.mubr.msk.f32.gmra.mrb[40].mxu0 %vm1096_vm3, %v931_v47  ;;  %8811 = vmatprep.mubr.msk.f32.mxu1 %vm1096_vm3, %v937_v49  ;;  %v946_v47 = vrot.slane %v10502_v17, 1  ;;  %12602 = vst [vmem:[#allocation19_spill] sm:$0xff] %v10524_v14  ;;  %v8034_v17 = vunpack.c.1.s8 %v10034_v9  ;;  %v952_v56 = vrot.slane %v10524_v14, 1  ;;  %12604 = vst [vmem:[#allocation21_spill] sm:$0xff] %v10536_v51 }
  0x7d   : > { %9194 = vmatprep.mubr.msk.f32.mxu0 %vm1096_vm3, %v933_v60  ;;  %v10520_v60 = vcvt.s32.f32 %v494_v58 }
  0x7e   : > { %v947_v43 = vsel %vm838_vm4, %v944_v21, %v946_v47  ;;  %v949_v41 = vsel %vm838_vm4, %v946_v47, %v948_v55  ;;  %v8041_v47 = vunpack.c.0.s8 %v10036_v28 }
  0x7f   : > { %8812 = vmatmul.mubr.msk.f32.gmra.mrb[48].mxu1 %vm1096_vm3, %v939_v27  ;;  %12601 = vst [vmem:[#allocation18_spill] sm:$0xff] %v10520_v60  ;;  %v950_v58 = vrot.slane %v10520_v60, 1 }
  0x80   : > { %9195 = vmatmul.mubr.msk.f32.gmra.mrb[42].mxu0 %vm1096_vm3, %v935_v13  ;;  %8814 = vmatprep.mubr.msk.f32.mxu1 %vm1096_vm3, %v941_v32  ;;  %v8037_v13 = vunpack.c.2.s8 %v10034_v9  ;;  %v499_v9 = vand.u32 255, %v8034_v17  ;;  %v956_v17 = vrot.slane %v10536_v51, 1 }
  0x81   : > { %9197 = vmatprep.mubr.msk.f32.mxu0 %vm1096_vm3, %v937_v49  ;;  %v10531_v49 = vcvt.s32.f32 %v496_v63  ;;  %v951_v21 = vsel %vm838_vm4, %v948_v55, %v950_v58  ;;  %v10544_v63 = vcvt.s32.f32 %v498_v31  ;;  %v953_v40 = vsel %vm838_vm4, %v950_v58, %v952_v56 }
  0x82   : > { %v10549_v62 = vcvt.s32.f32 %v499_v9  ;;  %v10554_v55 = vcvt.s32.f32 %v501_v15  ;;  %v502_v58 = vand.u32 255, %v8041_v47  ;;  %v8045_v31 = vunpack.c.2.s8 %v10036_v28  ;;  %v10038_v15 = vld [vmem:[%s10174_s6 + $0x88] sm:$0xff]  }
  0x83   : > { %8815 = vmatmul.mubr.msk.f32.gmra.mrb[50].mxu1 %vm1096_vm3, %v943_v24  ;;  %12603 = vst [vmem:[#allocation20_spill] sm:$0xff] %v10531_v49  ;;  %12605 = vst [vmem:[#allocation22_spill] sm:$0xff] %v10544_v63  ;;  %v8049_v47 = vunpack.c.0.s8 %v10038_v15 }
  0x84   : > { %9198 = vmatmul.mubr.msk.f32.gmra.mrb[44].mxu0 %vm1096_vm3, %v939_v27  ;;  %8817 = vmatprep.mubr.msk.f32.mxu1 %vm1096_vm3, %v945_v33  ;;  %v500_v27 = vand.u32 255, %v8037_v13  ;;  %12606 = vst [vmem:[#allocation23_spill] sm:$0xff] %v10549_v62  ;;  %12608 = vst [vmem:[#allocation25_spill] sm:$0xff] %v10554_v55  ;;  %v958_v13 = vrot.slane %v10544_v63, 1  ;;  %v960_v51 = vrot.slane %v10549_v62, 1  ;;  %v964_v14 = vrot.slane %v10554_v55, 1 }
  0x85   : > { %9200 = vmatprep.mubr.msk.f32.mxu0 %vm1096_vm3, %v941_v32  ;;  %v954_v32 = vrot.slane %v10531_v49, 1  ;;  %v8046_v49 = vunpack.c.3.s8 %v10036_v28  ;;  %v8054_v55 = vunpack.c.3.s8 %v10038_v15  ;;  %v10040_v63 = vld [vmem:[%s10174_s6 + $0x90] sm:$0xff]  }
  0x86   : > { %v961_v28 = vsel %vm838_vm4, %v958_v13, %v960_v51 }
  0x87   : > { %8818 = vmatmul.mubr.msk.f32.gmra.mrb[52].mxu1 %vm1096_vm3, %v947_v43  ;;  %v957_v9 = vsel %vm838_vm4, %v954_v32, %v956_v17  ;;  %v505_v62 = vand.u32 255, %v8046_v49  ;;  %v509_v60 = vand.u32 255, %v8054_v55  ;;  %v8058_v55 = vunpack.c.1.s8 %v10040_v63 }
  0x88   : > { %9201 = vmatmul.mubr.msk.f32.gmra.mrb[46].mxu0 %vm1096_vm3, %v943_v24  ;;  %8820 = vmatprep.mubr.msk.f32.mxu1 %vm1096_vm3, %v949_v41  ;;  %v10552_v24 = vcvt.s32.f32 %v500_v27  ;;  %v503_v27 = vand.u32 255, %v8042_v22 }
  0x89   : > { %9203 = vmatprep.mubr.msk.f32.mxu0 %vm1096_vm3, %v945_v33  ;;  %v955_v33 = vsel %vm838_vm4, %v952_v56, %v954_v32  ;;  %v959_v56 = vsel %vm838_vm4, %v956_v17, %v958_v13  ;;  %v504_v32 = vand.u32 255, %v8045_v31  ;;  %v506_v13 = vand.u32 255, %v8049_v47 }
  0x8a   : > { %12607 = vst [vmem:[#allocation24_spill] sm:$0xff] %v10552_v24  ;;  %v10574_v22 = vcvt.s32.f32 %v503_v27  ;;  %v10586_v27 = vcvt.s32.f32 %v505_v62 }
  0x8b   : > { %8821 = vmatmul.mubr.msk.f32.gmra.mrb[54].mxu1 %vm1096_vm3, %v951_v21 }
  0x8c   : > { %9204 = vmatmul.mubr.msk.f32.gmra.mrb[48].mxu0 %vm1096_vm3, %v947_v43  ;;  %8823 = vmatprep.mubr.msk.f32.mxu1 %vm1096_vm3, %v953_v40  ;;  %v962_v43 = vrot.slane %v10552_v24, 1  ;;  %12610 = vst [vmem:[#allocation27_spill] sm:$0xff] %v10574_v22  ;;  %v8050_v24 = vunpack.c.1.s8 %v10038_v15  ;;  %v968_v31 = vrot.slane %v10574_v22, 1  ;;  %12612 = vst [vmem:[#allocation29_spill] sm:$0xff] %v10586_v27 }
  0x8d   : > { %9206 = vmatprep.mubr.msk.f32.mxu0 %vm1096_vm3, %v949_v41  ;;  %v10570_v41 = vcvt.s32.f32 %v502_v58 }
  0x8e   : > { %v963_v17 = vsel %vm838_vm4, %v960_v51, %v962_v43  ;;  %v965_v49 = vsel %vm838_vm4, %v962_v43, %v964_v14  ;;  %v8057_v43 = vunpack.c.0.s8 %v10040_v63 }
  0x8f   : > { %8824 = vmatmul.mubr.msk.f32.gmra.mrb[56].mxu1 %vm1096_vm3, %v955_v33  ;;  %12609 = vst [vmem:[#allocation26_spill] sm:$0xff] %v10570_v41  ;;  %v966_v58 = vrot.slane %v10570_v41, 1 }
  0x90   : > { %9207 = vmatmul.mubr.msk.f32.gmra.mrb[50].mxu0 %vm1096_vm3, %v951_v21  ;;  %8826 = vmatprep.mubr.msk.f32.mxu1 %vm1096_vm3, %v957_v9  ;;  %v8053_v21 = vunpack.c.2.s8 %v10038_v15  ;;  %v507_v15 = vand.u32 255, %v8050_v24  ;;  %v972_v24 = vrot.slane %v10586_v27, 1 }
  0x91   : > { %9209 = vmatprep.mubr.msk.f32.mxu0 %vm1096_vm3, %v953_v40  ;;  %v10581_v40 = vcvt.s32.f32 %v504_v32  ;;  %v967_v51 = vsel %vm838_vm4, %v964_v14, %v966_v58  ;;  %v10594_v32 = vcvt.s32.f32 %v506_v13  ;;  %v969_v62 = vsel %vm838_vm4, %v966_v58, %v968_v31 }
  0x92   : > { %v10599_v47 = vcvt.s32.f32 %v507_v15  ;;  %v10604_v14 = vcvt.s32.f32 %v509_v60  ;;  %v510_v58 = vand.u32 255, %v8057_v43  ;;  %v8061_v13 = vunpack.c.2.s8 %v10040_v63  ;;  %v10042_v60 = vld [vmem:[%s10174_s6 + $0x98] sm:$0xff]  }
  0x93   : > { %8827 = vmatmul.mubr.msk.f32.gmra.mrb[58].mxu1 %vm1096_vm3, %v959_v56  ;;  %12611 = vst [vmem:[#allocation28_spill] sm:$0xff] %v10581_v40  ;;  %12613 = vst [vmem:[#allocation30_spill] sm:$0xff] %v10594_v32  ;;  %v8065_v43 = vunpack.c.0.s8 %v10042_v60 }
  0x94   : > { %9210 = vmatmul.mubr.msk.f32.gmra.mrb[52].mxu0 %vm1096_vm3, %v955_v33  ;;  %8829 = vmatprep.mubr.msk.f32.mxu1 %vm1096_vm3, %v961_v28  ;;  %v508_v33 = vand.u32 255, %v8053_v21  ;;  %12614 = vst [vmem:[#allocation31_spill] sm:$0xff] %v10599_v47  ;;  %12616 = vst [vmem:[#allocation33_spill] sm:$0xff] %v10604_v14  ;;  %v974_v21 = vrot.slane %v10594_v32, 1  ;;  %v976_v27 = vrot.slane %v10599_v47, 1  ;;  %v980_v22 = vrot.slane %v10604_v14, 1 }
  0x95   : > { %9212 = vmatprep.mubr.msk.f32.mxu0 %vm1096_vm3, %v957_v9  ;;  %v970_v9 = vrot.slane %v10581_v40, 1  ;;  %v8062_v40 = vunpack.c.3.s8 %v10040_v63  ;;  %v8070_v14 = vunpack.c.3.s8 %v10042_v60  ;;  %v10044_v32 = vld [vmem:[%s10174_s6 + $0xa0] sm:$0xff]  }
  0x96   : > { %v977_v63 = vsel %vm838_vm4, %v974_v21, %v976_v27 }
  0x97   : > { %8830 = vmatmul.mubr.msk.f32.gmra.mrb[60].mxu1 %vm1096_vm3, %v963_v17  ;;  %v973_v15 = vsel %vm838_vm4, %v970_v9, %v972_v24  ;;  %v513_v47 = vand.u32 255, %v8062_v40  ;;  %v517_v41 = vand.u32 255, %v8070_v14  ;;  %v8074_v14 = vunpack.c.1.s8 %v10044_v32 }
  0x98   : > { %9213 = vmatmul.mubr.msk.f32.gmra.mrb[54].mxu0 %vm1096_vm3, %v959_v56  ;;  %8832 = vmatprep.mubr.msk.f32.mxu1 %vm1096_vm3, %v965_v49  ;;  %v10602_v56 = vcvt.s32.f32 %v508_v33  ;;  %v511_v33 = vand.u32 255, %v8058_v55 }
  0x99   : > { %9215 = vmatprep.mubr.msk.f32.mxu0 %vm1096_vm3, %v961_v28  ;;  %v971_v28 = vsel %vm838_vm4, %v968_v31, %v970_v9  ;;  %v975_v31 = vsel %vm838_vm4, %v972_v24, %v974_v21  ;;  %v512_v9 = vand.u32 255, %v8061_v13  ;;  %v514_v21 = vand.u32 255, %v8065_v43 }
  0x9a   : > { %12615 = vst [vmem:[#allocation32_spill] sm:$0xff] %v10602_v56  ;;  %v10624_v55 = vcvt.s32.f32 %v511_v33  ;;  %v10636_v33 = vcvt.s32.f32 %v513_v47 }
  0x9b   : > { %8833 = vmatmul.mubr.msk.f32.gmra.mrb[62].mxu1 %vm1096_vm3, %v967_v51 }
  0x9c   : > { %9216 = vmatmul.mubr.msk.f32.gmra.mrb[56].mxu0 %vm1096_vm3, %v963_v17  ;;  %8835 = vmatprep.mubr.msk.f32.mxu1 %vm1096_vm3, %v969_v62  ;;  %v978_v17 = vrot.slane %v10602_v56, 1  ;;  %12618 = vst [vmem:[#allocation35_spill] sm:$0xff] %v10624_v55  ;;  %v8066_v56 = vunpack.c.1.s8 %v10042_v60  ;;  %v984_v13 = vrot.slane %v10624_v55, 1  ;;  %12620 = vst [vmem:[#allocation37_spill] sm:$0xff] %v10636_v33 }
  0x9d   : > { %9218 = vmatprep.mubr.msk.f32.mxu0 %vm1096_vm3, %v965_v49  ;;  %v10620_v49 = vcvt.s32.f32 %v510_v58 }
  0x9e   : > { %v979_v24 = vsel %vm838_vm4, %v976_v27, %v978_v17  ;;  %v981_v40 = vsel %vm838_vm4, %v978_v17, %v980_v22  ;;  %v8073_v17 = vunpack.c.0.s8 %v10044_v32 }
  0x9f   : > { %8836 = vmatmul.mubr.msk.f32.gmra.mrb[64].mxu1 %vm1096_vm3, %v971_v28  ;;  %12617 = vst [vmem:[#allocation34_spill] sm:$0xff] %v10620_v49  ;;  %v982_v58 = vrot.slane %v10620_v49, 1 }
  0xa0   : > { %9219 = vmatmul.mubr.msk.f32.gmra.mrb[58].mxu0 %vm1096_vm3, %v967_v51  ;;  %8838 = vmatprep.mubr.msk.f32.mxu1 %vm1096_vm3, %v973_v15  ;;  %v8069_v51 = vunpack.c.2.s8 %v10042_v60  ;;  %v515_v60 = vand.u32 255, %v8066_v56  ;;  %v988_v56 = vrot.slane %v10636_v33, 1 }
  0xa1   : > { %9221 = vmatprep.mubr.msk.f32.mxu0 %vm1096_vm3, %v969_v62  ;;  %v10631_v62 = vcvt.s32.f32 %v512_v9  ;;  %v983_v27 = vsel %vm838_vm4, %v980_v22, %v982_v58  ;;  %v10644_v9 = vcvt.s32.f32 %v514_v21  ;;  %v985_v47 = vsel %vm838_vm4, %v982_v58, %v984_v13 }
  0xa2   : > { %v10649_v43 = vcvt.s32.f32 %v515_v60  ;;  %v10654_v22 = vcvt.s32.f32 %v517_v41  ;;  %v518_v58 = vand.u32 255, %v8073_v17  ;;  %v8077_v21 = vunpack.c.2.s8 %v10044_v32  ;;  %v10046_v41 = vld [vmem:[%s10174_s6 + $0xa8] sm:$0xff]  }
  0xa3   : > { %8839 = vmatmul.mubr.msk.f32.gmra.mrb[66].mxu1 %vm1096_vm3, %v975_v31  ;;  %12619 = vst [vmem:[#allocation36_spill] sm:$0xff] %v10631_v62  ;;  %12621 = vst [vmem:[#allocation38_spill] sm:$0xff] %v10644_v9  ;;  %v8081_v17 = vunpack.c.0.s8 %v10046_v41 }
  0xa4   : > { %9222 = vmatmul.mubr.msk.f32.gmra.mrb[60].mxu0 %vm1096_vm3, %v971_v28  ;;  %8841 = vmatprep.mubr.msk.f32.mxu1 %vm1096_vm3, %v977_v63  ;;  %v516_v28 = vand.u32 255, %v8069_v51  ;;  %12622 = vst [vmem:[#allocation39_spill] sm:$0xff] %v10649_v43  ;;  %12624 = vst [vmem:[#allocation41_spill] sm:$0xff] %v10654_v22  ;;  %v990_v51 = vrot.slane %v10644_v9, 1  ;;  %v992_v33 = vrot.slane %v10649_v43, 1  ;;  %v996_v55 = vrot.slane %v10654_v22, 1 }
  0xa5   : > { %9224 = vmatprep.mubr.msk.f32.mxu0 %vm1096_vm3, %v973_v15  ;;  %v986_v15 = vrot.slane %v10631_v62, 1  ;;  %v8078_v62 = vunpack.c.3.s8 %v10044_v32  ;;  %v522_v22 = vand.u32 255, %v8081_v17 }
  0xa6   : > { %v993_v32 = vsel %vm838_vm4, %v990_v51, %v992_v33 }
  0xa7   : > { %8842 = vmatmul.mubr.msk.f32.gmra.mrb[68].mxu1 %vm1096_vm3, %v979_v24  ;;  %v989_v60 = vsel %vm838_vm4, %v986_v15, %v988_v56  ;;  %v521_v43 = vand.u32 255, %v8078_v62 }
  0xa8   : > { %9225 = vmatmul.mubr.msk.f32.gmra.mrb[62].mxu0 %vm1096_vm3, %v975_v31  ;;  %8844 = vmatprep.mubr.msk.f32.mxu1 %vm1096_vm3, %v981_v40  ;;  %v10652_v31 = vcvt.s32.f32 %v516_v28  ;;  %v519_v28 = vand.u32 255, %v8074_v14 }
  0xa9   : > { %9227 = vmatprep.mubr.msk.f32.mxu0 %vm1096_vm3, %v977_v63  ;;  %v987_v63 = vsel %vm838_vm4, %v984_v13, %v986_v15  ;;  %v991_v13 = vsel %vm838_vm4, %v988_v56, %v990_v51  ;;  %v520_v15 = vand.u32 255, %v8077_v21  ;;  %v7353_v56 = vld [vmem:[%s12408_s1 + $0x18] sm:$0xf]  ;;  %v8086_v21 = vunpack.c.3.s8 %v10046_v41 }
  0xaa   : > { %12623 = vst [vmem:[#allocation40_spill] sm:$0xff] %v10652_v31  ;;  %v10674_v14 = vcvt.s32.f32 %v519_v28  ;;  %v10692_v49 = vcvt.s32.f32 %v521_v43 }
  0xab   : > { %8845 = vmatmul.mubr.msk.f32.gmra.mrb[70].mxu1 %vm1096_vm3, %v983_v27  ;;  %v10688_v28 = vcvt.s32.f32 %v520_v15  ;;  %v525_v44 = vand.u32 255, %v8086_v21  ;;  %v8093_v21 = vunpack.c.2.s8 %v10048_v52 }
  0xac   : > { %9228 = vmatmul.mubr.msk.f32.gmra.mrb[64].mxu0 %vm1096_vm3, %v979_v24  ;;  %8847 = vmatprep.mubr.msk.f32.mxu1 %vm1096_vm3, %v985_v47  ;;  %v994_v24 = vrot.slane %v10652_v31, 1  ;;  %12625 = vst [vmem:[#allocation42_spill] sm:$0xff] %v10674_v14  ;;  %v8082_v31 = vunpack.c.1.s8 %v10046_v41  ;;  %v1000_v9 = vrot.slane %v10674_v14, 1  ;;  %12627 = vst [vmem:[#allocation44_spill] sm:$0xff] %v10692_v49  ;;  %v1004_v17 = vrot.slane %v10692_v49, 1 }
  0xad   : > { %9230 = vmatprep.mubr.msk.f32.mxu0 %vm1096_vm3, %v981_v40  ;;  %v10670_v40 = vcvt.s32.f32 %v518_v58  ;;  %12626 = vst [vmem:[#allocation43_spill] sm:$0xff] %v10688_v28  ;;  %v1002_v43 = vrot.slane %v10688_v28, 1  ;;  %v8094_v49 = vunpack.c.3.s8 %v10048_v52 }
  0xae   : > { %v995_v58 = vsel %vm838_vm4, %v992_v33, %v994_v24  ;;  %v997_v62 = vsel %vm838_vm4, %v994_v24, %v996_v55  ;;  %v523_v33 = vand.u32 255, %v8082_v31  ;;  %v10705_v31 = vcvt.s32.f32 %v522_v22 }
  0xaf   : > { %8848 = vmatmul.mubr.msk.f32.gmra.mrb[72].mxu1 %vm1096_vm3, %v987_v63  ;;  %v998_v51 = vrot.slane %v10670_v40, 1  ;;  %v8089_v24 = vunpack.c.0.s8 %v10048_v52  ;;  %v1003_v22 = vsel %vm838_vm4, %v1000_v9, %v1002_v43 }
  0xb0   : > { %9231 = vmatmul.mubr.msk.f32.gmra.mrb[66].mxu0 %vm1096_vm3, %v983_v27  ;;  %8850 = vmatprep.mubr.msk.f32.mxu1 %vm1096_vm3, %v989_v60  ;;  %v7352_v27 = vld [vmem:[%s12408_s1 + $0x10] sm:$0xff]  ;;  %12628 = vst [vmem:[#allocation45_spill] sm:$0xff] %v10705_v31 }
  0xb1   : > { %9233 = vmatprep.mubr.msk.f32.mxu0 %vm1096_vm3, %v985_v47  ;;  %v8085_v47 = vunpack.c.2.s8 %v10046_v41  ;;  %v10695_v41 = vpack.c.bf16 %v7353_v56, %v7352_v27  ;;  %v1001_v15 = vsel %vm838_vm4, %v998_v51, %v1000_v9  ;;  %v10710_v27 = vcvt.s32.f32 %v523_v33 }
  0xb2   : > { %v8090_v56 = vunpack.c.1.s8 %v10048_v52 }
  0xb3   : > { %8851 = vmatmul.mubr.msk.f32.gmra.mrb[74].mxu1 %vm1096_vm3, %v991_v13  ;;  %9585 = vmatprep.subr.msk.bf16.mxu1 %vm10132_vm2, %v10695_v41  ;;  %12629 = vst [vmem:[#allocation46_spill] sm:$0xff] %v10710_v27  ;;  %v1008_v33 = vrot.slane %v10710_v27, 1  ;;  %v529_v27 = vand.u32 255, %v8094_v49 }
  0xb4   : > { %9234 = vmatmul.mubr.msk.f32.gmra.mrb[68].mxu0 %vm1096_vm3, %v987_v63  ;;  %8853 = vmatprep.mubr.msk.f32.mxu1 %vm1096_vm3, %v993_v32  ;;  %v524_v63 = vand.u32 255, %v8085_v47  ;;  %v526_v47 = vand.u32 255, %v8089_v24 }
  0xb5   : > { %9236 = vmatprep.mubr.msk.f32.mxu0 %vm1096_vm3, %v989_v60  ;;  %v999_v60 = vsel %vm838_vm4, %v996_v55, %v998_v51  ;;  %v10715_v55 = vcvt.s32.f32 %v525_v44  ;;  %v1005_v51 = vsel %vm838_vm4, %v1002_v43, %v1004_v17  ;;  %v10050_v44 = vld [vmem:[%s10174_s6 + $0xb8] sm:$0xff]   ;;  %v528_v43 = vand.u32 255, %v8093_v21 }
  0xb6   : > { %v8097_v24 = vunpack.c.0.s8 %v10050_v44 }
  0xb7   : > { %8854 = vmatmul.mubr.msk.f32.gmra.mrb[76].mxu1 %vm1096_vm3, %v995_v58  ;;  %12631 = vst [vmem:[#allocation48_spill] sm:$0xff] %v10715_v55  ;;  %v1012_v28 = vrot.slane %v10715_v55, 1  ;;  %v8102_v55 = vunpack.c.3.s8 %v10050_v44 }
  0xb8   : > { %9237 = vmatmul.mubr.msk.f32.gmra.mrb[70].mxu0 %vm1096_vm3, %v991_v13  ;;  %8856 = vmatprep.mubr.msk.f32.mxu1 %vm1096_vm3, %v997_v62  ;;  %v10713_v13 = vcvt.s32.f32 %v524_v63  ;;  %v527_v63 = vand.u32 255, %v8090_v56 }
  0xb9   : > { %9239 = vmatprep.mubr.msk.f32.mxu0 %vm1096_vm3, %v993_v32  ;;  %v1006_v32 = vrot.slane %v10705_v31, 1  ;;  %v10052_v31 = vld [vmem:[%s10174_s6 + $0xc0] sm:$0xff]   ;;  %v533_v14 = vand.u32 255, %v8102_v55 }
  0xba   : > { %12630 = vst [vmem:[#allocation47_spill] sm:$0xff] %v10713_v13  ;;  %v10735_v56 = vcvt.s32.f32 %v527_v63  ;;  %v10747_v63 = vcvt.s32.f32 %v529_v27  ;;  %v8106_v55 = vunpack.c.1.s8 %v10052_v31 }
  0xbb   : > { %8857 = vmatmul.mubr.msk.f32.gmra.mrb[78].mxu1 %vm1096_vm3, %v999_v60  ;;  %v1007_v9 = vsel %vm838_vm4, %v1004_v17, %v1006_v32  ;;  %v1009_v52 = vsel %vm838_vm4, %v1006_v32, %v1008_v33  ;;  %v530_v32 = vand.u32 255, %v8097_v24 }
  0xbc   : > { %9240 = vmatmul.mubr.msk.f32.gmra.mrb[72].mxu0 %vm1096_vm3, %v995_v58  ;;  %8859 = vmatprep.mubr.msk.f32.mxu1 %vm1096_vm3, %v1001_v15  ;;  %v1010_v58 = vrot.slane %v10713_v13, 1  ;;  %12633 = vst [vmem:[#allocation50_spill] sm:$0xff] %v10735_v56  ;;  %v8098_v13 = vunpack.c.1.s8 %v10050_v44  ;;  %v1016_v21 = vrot.slane %v10735_v56, 1  ;;  %12635 = vst [vmem:[#allocation52_spill] sm:$0xff] %v10747_v63 }
  0xbd   : > { %9242 = vmatprep.mubr.msk.f32.mxu0 %vm1096_vm3, %v997_v62  ;;  %v10731_v62 = vcvt.s32.f32 %v526_v47 }
  0xbe   : > { %v1011_v17 = vsel %vm838_vm4, %v1008_v33, %v1010_v58  ;;  %v1013_v49 = vsel %vm838_vm4, %v1010_v58, %v1012_v28  ;;  %v8105_v58 = vunpack.c.0.s8 %v10052_v31 }
  0xbf   : > { %8860 = vmatmul.mubr.msk.f32.gmra.mrb[80].mxu1 %vm1096_vm3, %v1003_v22  ;;  %12632 = vst [vmem:[#allocation49_spill] sm:$0xff] %v10731_v62  ;;  %v1014_v47 = vrot.slane %v10731_v62, 1 }
  0xc0   : > { %9243 = vmatmul.mubr.msk.f32.gmra.mrb[74].mxu0 %vm1096_vm3, %v999_v60  ;;  %8862 = vmatprep.mubr.msk.f32.mxu1 %vm1096_vm3, %v1005_v51  ;;  %v8101_v60 = vunpack.c.2.s8 %v10050_v44  ;;  %v531_v44 = vand.u32 255, %v8098_v13  ;;  %v1020_v13 = vrot.slane %v10747_v63, 1 }
  0xc1   : > { %9245 = vmatprep.mubr.msk.f32.mxu0 %vm1096_vm3, %v1001_v15  ;;  %v10742_v15 = vcvt.s32.f32 %v528_v43  ;;  %v1015_v33 = vsel %vm838_vm4, %v1012_v28, %v1014_v47  ;;  %v10755_v43 = vcvt.s32.f32 %v530_v32  ;;  %v1017_v27 = vsel %vm838_vm4, %v1014_v47, %v1016_v21 }
  0xc2   : > { %v10760_v24 = vcvt.s32.f32 %v531_v44  ;;  %v10765_v28 = vcvt.s32.f32 %v533_v14  ;;  %v534_v47 = vand.u32 255, %v8105_v58  ;;  %v8109_v32 = vunpack.c.2.s8 %v10052_v31  ;;  %v10054_v14 = vld [vmem:[%s10174_s6 + $0xc8] sm:$0xff]  }
  0xc3   : > { %8863 = vmatmul.mubr.msk.f32.gmra.mrb[82].mxu1 %vm1096_vm3, %v1007_v9  ;;  %12634 = vst [vmem:[#allocation51_spill] sm:$0xff] %v10742_v15  ;;  %12636 = vst [vmem:[#allocation53_spill] sm:$0xff] %v10755_v43  ;;  %v8113_v58 = vunpack.c.0.s8 %v10054_v14 }
  0xc4   : > { %9246 = vmatmul.mubr.msk.f32.gmra.mrb[76].mxu0 %vm1096_vm3, %v1003_v22  ;;  %8865 = vmatprep.mubr.msk.f32.mxu1 %vm1096_vm3, %v1009_v52  ;;  %v532_v22 = vand.u32 255, %v8101_v60  ;;  %12637 = vst [vmem:[#allocation54_spill] sm:$0xff] %v10760_v24  ;;  %12639 = vst [vmem:[#allocation56_spill] sm:$0xff] %v10765_v28  ;;  %v1022_v60 = vrot.slane %v10755_v43, 1  ;;  %v1024_v63 = vrot.slane %v10760_v24, 1  ;;  %v1028_v56 = vrot.slane %v10765_v28, 1 }
  0xc5   : > { %9248 = vmatprep.mubr.msk.f32.mxu0 %vm1096_vm3, %v1005_v51  ;;  %v1018_v51 = vrot.slane %v10742_v15, 1  ;;  %v8110_v15 = vunpack.c.3.s8 %v10052_v31  ;;  %v8118_v28 = vunpack.c.3.s8 %v10054_v14  ;;  %v10056_v43 = vld [vmem:[%s10174_s6 + $0xd0] sm:$0xff]  }
  0xc6   : > { %v1025_v31 = vsel %vm838_vm4, %v1022_v60, %v1024_v63 }
  0xc7   : > { %8866 = vmatmul.mubr.msk.f32.gmra.mrb[84].mxu1 %vm1096_vm3, %v1011_v17  ;;  %v1021_v44 = vsel %vm838_vm4, %v1018_v51, %v1020_v13  ;;  %v537_v24 = vand.u32 255, %v8110_v15  ;;  %v541_v62 = vand.u32 255, %v8118_v28  ;;  %v8122_v28 = vunpack.c.1.s8 %v10056_v43 }
  0xc8   : > { %9249 = vmatmul.mubr.msk.f32.gmra.mrb[78].mxu0 %vm1096_vm3, %v1007_v9  ;;  %8868 = vmatprep.mubr.msk.f32.mxu1 %vm1096_vm3, %v1013_v49  ;;  %v10763_v9 = vcvt.s32.f32 %v532_v22  ;;  %v535_v22 = vand.u32 255, %v8106_v55 }
  0xc9   : > { %9251 = vmatprep.mubr.msk.f32.mxu0 %vm1096_vm3, %v1009_v52  ;;  %v1019_v52 = vsel %vm838_vm4, %v1016_v21, %v1018_v51  ;;  %v1023_v21 = vsel %vm838_vm4, %v1020_v13, %v1022_v60  ;;  %v536_v51 = vand.u32 255, %v8109_v32  ;;  %v538_v60 = vand.u32 255, %v8113_v58 }
  0xca   : > { %12638 = vst [vmem:[#allocation55_spill] sm:$0xff] %v10763_v9  ;;  %v10785_v55 = vcvt.s32.f32 %v535_v22  ;;  %v10797_v22 = vcvt.s32.f32 %v537_v24 }
  0xcb   : > { %8869 = vmatmul.mubr.msk.f32.gmra.mrb[86].mxu1 %vm1096_vm3, %v1015_v33 }
  0xcc   : > { %9252 = vmatmul.mubr.msk.f32.gmra.mrb[80].mxu0 %vm1096_vm3, %v1011_v17  ;;  %8871 = vmatprep.mubr.msk.f32.mxu1 %vm1096_vm3, %v1017_v27  ;;  %v1026_v17 = vrot.slane %v10763_v9, 1  ;;  %12641 = vst [vmem:[#allocation58_spill] sm:$0xff] %v10785_v55  ;;  %v8114_v9 = vunpack.c.1.s8 %v10054_v14  ;;  %v1032_v32 = vrot.slane %v10785_v55, 1  ;;  %12643 = vst [vmem:[#allocation60_spill] sm:$0xff] %v10797_v22 }
  0xcd   : > { %9254 = vmatprep.mubr.msk.f32.mxu0 %vm1096_vm3, %v1013_v49  ;;  %v10781_v49 = vcvt.s32.f32 %v534_v47 }
  0xce   : > { %v1027_v13 = vsel %vm838_vm4, %v1024_v63, %v1026_v17  ;;  %v1029_v15 = vsel %vm838_vm4, %v1026_v17, %v1028_v56  ;;  %v8121_v17 = vunpack.c.0.s8 %v10056_v43 }
  0xcf   : > { %8872 = vmatmul.mubr.msk.f32.gmra.mrb[88].mxu1 %vm1096_vm3, %v1019_v52  ;;  %12640 = vst [vmem:[#allocation57_spill] sm:$0xff] %v10781_v49  ;;  %v1030_v47 = vrot.slane %v10781_v49, 1 }
  0xd0   : > { %9255 = vmatmul.mubr.msk.f32.gmra.mrb[82].mxu0 %vm1096_vm3, %v1015_v33  ;;  %8874 = vmatprep.mubr.msk.f32.mxu1 %vm1096_vm3, %v1021_v44  ;;  %v8117_v33 = vunpack.c.2.s8 %v10054_v14  ;;  %v539_v14 = vand.u32 255, %v8114_v9  ;;  %v1036_v9 = vrot.slane %v10797_v22, 1 }
  0xd1   : > { %9257 = vmatprep.mubr.msk.f32.mxu0 %vm1096_vm3, %v1017_v27  ;;  %v10792_v27 = vcvt.s32.f32 %v536_v51  ;;  %v1031_v63 = vsel %vm838_vm4, %v1028_v56, %v1030_v47  ;;  %v10805_v51 = vcvt.s32.f32 %v538_v60  ;;  %v1033_v24 = vsel %vm838_vm4, %v1030_v47, %v1032_v32 }
  0xd2   : > { %v10810_v58 = vcvt.s32.f32 %v539_v14  ;;  %v10815_v56 = vcvt.s32.f32 %v541_v62  ;;  %v542_v47 = vand.u32 255, %v8121_v17  ;;  %v8125_v60 = vunpack.c.2.s8 %v10056_v43  ;;  %v10058_v62 = vld [vmem:[%s10174_s6 + $0xd8] sm:$0xff]  }
  0xd3   : > { %8875 = vmatmul.mubr.msk.f32.gmra.mrb[90].mxu1 %vm1096_vm3, %v1023_v21  ;;  %12642 = vst [vmem:[#allocation59_spill] sm:$0xff] %v10792_v27  ;;  %12644 = vst [vmem:[#allocation61_spill] sm:$0xff] %v10805_v51  ;;  %v8129_v17 = vunpack.c.0.s8 %v10058_v62 }
  0xd4   : > { %9258 = vmatmul.mubr.msk.f32.gmra.mrb[84].mxu0 %vm1096_vm3, %v1019_v52  ;;  %8877 = vmatprep.mubr.msk.f32.mxu1 %vm1096_vm3, %v1025_v31  ;;  %v540_v52 = vand.u32 255, %v8117_v33  ;;  %12645 = vst [vmem:[#allocation62_spill] sm:$0xff] %v10810_v58  ;;  %12647 = vst [vmem:[#allocation64_spill] sm:$0xff] %v10815_v56  ;;  %v1038_v33 = vrot.slane %v10805_v51, 1  ;;  %v1040_v22 = vrot.slane %v10810_v58, 1  ;;  %v1044_v55 = vrot.slane %v10815_v56, 1 }
  0xd5   : > { %9260 = vmatprep.mubr.msk.f32.mxu0 %vm1096_vm3, %v1021_v44  ;;  %v1034_v44 = vrot.slane %v10792_v27, 1  ;;  %v8126_v27 = vunpack.c.3.s8 %v10056_v43  ;;  %v8134_v56 = vunpack.c.3.s8 %v10058_v62  ;;  %v10060_v51 = vld [vmem:[%s10174_s6 + $0xe0] sm:$0xff]  }
  0xd6   : > { %v1041_v43 = vsel %vm838_vm4, %v1038_v33, %v1040_v22 }
  0xd7   : > { %8878 = vmatmul.mubr.msk.f32.gmra.mrb[92].mxu1 %vm1096_vm3, %v1027_v13  ;;  %v1037_v14 = vsel %vm838_vm4, %v1034_v44, %v1036_v9  ;;  %v545_v58 = vand.u32 255, %v8126_v27  ;;  %v549_v49 = vand.u32 255, %v8134_v56  ;;  %v8138_v56 = vunpack.c.1.s8 %v10060_v51 }
  0xd8   : > { %9261 = vmatmul.mubr.msk.f32.gmra.mrb[86].mxu0 %vm1096_vm3, %v1023_v21  ;;  %8880 = vmatprep.mubr.msk.f32.mxu1 %vm1096_vm3, %v1029_v15  ;;  %v10813_v21 = vcvt.s32.f32 %v540_v52  ;;  %v543_v52 = vand.u32 255, %v8122_v28 }
  0xd9   : > { %9263 = vmatprep.mubr.msk.f32.mxu0 %vm1096_vm3, %v1025_v31  ;;  %v1035_v31 = vsel %vm838_vm4, %v1032_v32, %v1034_v44  ;;  %v1039_v32 = vsel %vm838_vm4, %v1036_v9, %v1038_v33  ;;  %v544_v44 = vand.u32 255, %v8125_v60  ;;  %v546_v33 = vand.u32 255, %v8129_v17 }
  0xda   : > { %12646 = vst [vmem:[#allocation63_spill] sm:$0xff] %v10813_v21  ;;  %v10835_v28 = vcvt.s32.f32 %v543_v52  ;;  %v10847_v52 = vcvt.s32.f32 %v545_v58 }
  0xdb   : > { %8881 = vmatmul.mubr.msk.f32.gmra.mrb[94].mxu1 %vm1096_vm3, %v1031_v63 }
  0xdc   : > { %9264 = vmatmul.mubr.msk.f32.gmra.mrb[88].mxu0 %vm1096_vm3, %v1027_v13  ;;  %8883 = vmatprep.mubr.msk.f32.mxu1 %vm1096_vm3, %v1033_v24  ;;  %v1042_v13 = vrot.slane %v10813_v21, 1  ;;  %12649 = vst [vmem:[#allocation66_spill] sm:$0xff] %v10835_v28  ;;  %v8130_v21 = vunpack.c.1.s8 %v10058_v62  ;;  %v1048_v60 = vrot.slane %v10835_v28, 1  ;;  %12651 = vst [vmem:[#allocation68_spill] sm:$0xff] %v10847_v52 }
  0xdd   : > { %9266 = vmatprep.mubr.msk.f32.mxu0 %vm1096_vm3, %v1029_v15  ;;  %v10831_v15 = vcvt.s32.f32 %v542_v47 }
  0xde   : > { %v1043_v9 = vsel %vm838_vm4, %v1040_v22, %v1042_v13  ;;  %v1045_v27 = vsel %vm838_vm4, %v1042_v13, %v1044_v55  ;;  %v8137_v13 = vunpack.c.0.s8 %v10060_v51 }
  0xdf   : > { %8884 = vmatmul.mubr.msk.f32.gmra.mrb[96].mxu1 %vm1096_vm3, %v1035_v31  ;;  %12648 = vst [vmem:[#allocation65_spill] sm:$0xff] %v10831_v15  ;;  %v1046_v47 = vrot.slane %v10831_v15, 1 }
  0xe0   : > { %9267 = vmatmul.mubr.msk.f32.gmra.mrb[90].mxu0 %vm1096_vm3, %v1031_v63  ;;  %8886 = vmatprep.mubr.msk.f32.mxu1 %vm1096_vm3, %v1037_v14  ;;  %v8133_v63 = vunpack.c.2.s8 %v10058_v62  ;;  %v547_v62 = vand.u32 255, %v8130_v21  ;;  %v1052_v21 = vrot.slane %v10847_v52, 1 }
  0xe1   : > { %9269 = vmatprep.mubr.msk.f32.mxu0 %vm1096_vm3, %v1033_v24  ;;  %v10842_v24 = vcvt.s32.f32 %v544_v44  ;;  %v1047_v22 = vsel %vm838_vm4, %v1044_v55, %v1046_v47  ;;  %v10855_v44 = vcvt.s32.f32 %v546_v33  ;;  %v1049_v58 = vsel %vm838_vm4, %v1046_v47, %v1048_v60 }
  0xe2   : > { %v10860_v17 = vcvt.s32.f32 %v547_v62  ;;  %v10865_v55 = vcvt.s32.f32 %v549_v49  ;;  %v550_v47 = vand.u32 255, %v8137_v13  ;;  %v8141_v33 = vunpack.c.2.s8 %v10060_v51  ;;  %v10062_v49 = vld [vmem:[%s10174_s6 + $0xe8] sm:$0xff]  }
  0xe3   : > { %8887 = vmatmul.mubr.msk.f32.gmra.mrb[98].mxu1 %vm1096_vm3, %v1039_v32  ;;  %12650 = vst [vmem:[#allocation67_spill] sm:$0xff] %v10842_v24  ;;  %12652 = vst [vmem:[#allocation69_spill] sm:$0xff] %v10855_v44  ;;  %v8145_v13 = vunpack.c.0.s8 %v10062_v49 }
  0xe4   : > { %9270 = vmatmul.mubr.msk.f32.gmra.mrb[92].mxu0 %vm1096_vm3, %v1035_v31  ;;  %8889 = vmatprep.mubr.msk.f32.mxu1 %vm1096_vm3, %v1041_v43  ;;  %v548_v31 = vand.u32 255, %v8133_v63  ;;  %12653 = vst [vmem:[#allocation70_spill] sm:$0xff] %v10860_v17  ;;  %12655 = vst [vmem:[#allocation72_spill] sm:$0xff] %v10865_v55  ;;  %v1054_v63 = vrot.slane %v10855_v44, 1  ;;  %v1056_v52 = vrot.slane %v10860_v17, 1  ;;  %v1060_v28 = vrot.slane %v10865_v55, 1 }
  0xe5   : > { %9272 = vmatprep.mubr.msk.f32.mxu0 %vm1096_vm3, %v1037_v14  ;;  %v1050_v14 = vrot.slane %v10842_v24, 1  ;;  %v8142_v24 = vunpack.c.3.s8 %v10060_v51  ;;  %v10064_v55 = vld [vmem:[%s10174_s6 + $0xf0] sm:$0xff]  }
  0xe6   : > { %v1057_v51 = vsel %vm838_vm4, %v1054_v63, %v1056_v52 }
  0xe7   : > { %8890 = vmatmul.mubr.msk.f32.gmra.mrb[100].mxu1 %vm1096_vm3, %v1043_v9  ;;  %v1053_v62 = vsel %vm838_vm4, %v1050_v14, %v1052_v21  ;;  %v553_v17 = vand.u32 255, %v8142_v24  ;;  %v554_v24 = vand.u32 255, %v8145_v13 }
  0xe8   : > { %9273 = vmatmul.mubr.msk.f32.gmra.mrb[94].mxu0 %vm1096_vm3, %v1039_v32  ;;  %8892 = vmatprep.mubr.msk.f32.mxu1 %vm1096_vm3, %v1045_v27  ;;  %v10863_v32 = vcvt.s32.f32 %v548_v31  ;;  %v551_v31 = vand.u32 255, %v8138_v56 }
  0xe9   : > { %9275 = vmatprep.mubr.msk.f32.mxu0 %vm1096_vm3, %v1041_v43  ;;  %v1051_v43 = vsel %vm838_vm4, %v1048_v60, %v1050_v14  ;;  %v1055_v60 = vsel %vm838_vm4, %v1052_v21, %v1054_v63  ;;  %v552_v14 = vand.u32 255, %v8141_v33  ;;  %v8149_v21 = vunpack.c.2.s8 %v10062_v49 }
  0xea   : > { %12654 = vst [vmem:[#allocation71_spill] sm:$0xff] %v10863_v32  ;;  %v10885_v56 = vcvt.s32.f32 %v551_v31 }
  0xeb   : > { %8893 = vmatmul.mubr.msk.f32.gmra.mrb[102].mxu1 %vm1096_vm3, %v1047_v22  ;;  %v10896_v33 = vcvt.s32.f32 %v552_v14 }
  0xec   : > { %9276 = vmatmul.mubr.msk.f32.gmra.mrb[96].mxu0 %vm1096_vm3, %v1043_v9  ;;  %8895 = vmatprep.mubr.msk.f32.mxu1 %vm1096_vm3, %v1049_v58  ;;  %v1058_v9 = vrot.slane %v10863_v32, 1  ;;  %12656 = vst [vmem:[#allocation73_spill] sm:$0xff] %v10885_v56  ;;  %v8146_v32 = vunpack.c.1.s8 %v10062_v49 }
  0xed   : > { %9278 = vmatprep.mubr.msk.f32.mxu0 %vm1096_vm3, %v1045_v27  ;;  %v10881_v27 = vcvt.s32.f32 %v550_v47  ;;  %v8150_v47 = vunpack.c.3.s8 %v10062_v49  ;;  %12659 = vst [vmem:[#allocation76_spill] sm:$0xff] %v10896_v33 }
  0xee   : > { %v1061_v31 = vsel %vm838_vm4, %v1058_v9, %v1060_v28  ;;  %v555_v49 = vand.u32 255, %v8146_v32  ;;  %v8153_v32 = vunpack.c.0.s8 %v10064_v55 }
  0xef   : > { %8896 = vmatmul.mubr.msk.f32.gmra.mrb[104].mxu1 %vm1096_vm3, %v1051_v43  ;;  %v1062_v63 = vrot.slane %v10881_v27, 1  ;;  %v557_v14 = vand.u32 255, %v8150_v47 }
  0xf0   : > { %9279 = vmatmul.mubr.msk.f32.gmra.mrb[98].mxu0 %vm1096_vm3, %v1047_v22  ;;  %8898 = vmatprep.mubr.msk.f32.mxu1 %vm1096_vm3, %v1053_v62 }
  0xf1   : > { %9281 = vmatprep.mubr.msk.f32.mxu0 %vm1096_vm3, %v1049_v58  ;;  %v1059_v58 = vsel %vm838_vm4, %v1056_v52, %v1058_v9  ;;  %v556_v52 = vand.u32 255, %v8149_v21  ;;  %v1066_v9 = vrot.slane %v10896_v33, 1  ;;  %v8154_v21 = vunpack.c.1.s8 %v10064_v55 }
  0xf2   : > { %v10887_v44 = vpop.f32.mrb[0].mxu1  ;;  %v8158_v33 = vunpack.c.3.s8 %v10064_v55 }
  0xf3   : > { %12657 = vst [vmem:[#allocation74_spill] sm:$0xff] %v10887_v44  ;;  %v10889_v22 = vpop.f32.mrb[1].mxu1  ;;  %8899 = vmatmul.mubr.msk.f32.gmra.mrb[106].mxu1 %vm1096_vm3, %v1055_v60  ;;  %v10901_v44 = vcvt.s32.f32 %v553_v17  ;;  %v10913_v17 = vcvt.s32.f32 %v554_v24  ;;  %v10927_v24 = vcvt.s32.f32 %v557_v14  ;;  %v10066_v14 = vld [vmem:[%s10174_s6 + $0xf8] sm:$0xff]  }
  0xf4   : > { %12658 = vst [vmem:[#allocation75_spill] sm:$0xff] %v10889_v22  ;;  %9282 = vmatmul.mubr.msk.f32.gmra.mrb[100].mxu0 %vm1096_vm3, %v1051_v43  ;;  %8901 = vmatprep.mubr.msk.f32.mxu1 %vm1096_vm3, %v1057_v51  ;;  %v1064_v22 = vrot.slane %v10885_v56, 1 }
  0xf5   : > { %9284 = vmatprep.mubr.msk.f32.mxu0 %vm1096_vm3, %v1053_v62  ;;  %12660 = vst [vmem:[#allocation77_spill] sm:$0xff] %v10901_v44  ;;  %v1063_v62 = vsel %vm838_vm4, %v1060_v28, %v1062_v63  ;;  %12663 = vst [vmem:[#allocation80_spill] sm:$0xff] %v10913_v17  ;;  %v10925_v28 = vcvt.s32.f32 %v556_v52  ;;  %v559_v52 = vand.u32 255, %v8154_v21  ;;  %v8161_v21 = vunpack.c.0.s8 %v10066_v14 }
  0xf6   : > { %v10904_v43 = vpop.f32.mrb[2].mxu1  ;;  %v1065_v13 = vsel %vm838_vm4, %v1062_v63, %v1064_v22  ;;  %12668 = vst [vmem:[#allocation85_spill] sm:$0xff] %v10927_v24  ;;  %v1070_v63 = vrot.slane %v10913_v17, 1  ;;  %v10068_v17 = vld [vmem:[%s10174_s6 + $0x100] sm:$0xff]  }
  0xf7   : > { %12661 = vst [vmem:[#allocation78_spill] sm:$0xff] %v10904_v43  ;;  %v10906_v15 = vpop.f32.mrb[3].mxu1  ;;  %8902 = vmatmul.mubr.msk.f32.gmra.mrb[108].mxu1 %vm1096_vm3, %v1059_v58  ;;  %v10918_v43 = vcvt.s32.f32 %v555_v49  ;;  %12667 = vst [vmem:[#allocation84_spill] sm:$0xff] %v10925_v28  ;;  %v558_v49 = vand.u32 255, %v8153_v32  ;;  %v1076_v32 = vrot.slane %v10927_v24, 1  ;;  %v8165_v24 = vunpack.c.2.s8 %v10066_v14 }
  0xf8   : > { %12662 = vst [vmem:[#allocation79_spill] sm:$0xff] %v10906_v15  ;;  %9285 = vmatmul.mubr.msk.f32.gmra.mrb[102].mxu0 %vm1096_vm3, %v1055_v60  ;;  %8904 = vmatprep.mubr.msk.f32.mxu1 %vm1096_vm3, %v1061_v31  ;;  %v1068_v15 = vrot.slane %v10901_v44, 1  ;;  %v8157_v44 = vunpack.c.2.s8 %v10064_v55 }
  0xf9   : > { %9287 = vmatprep.mubr.msk.f32.mxu0 %vm1096_vm3, %v1057_v51  ;;  %12664 = vst [vmem:[#allocation81_spill] sm:$0xff] %v10918_v43  ;;  %v1067_v51 = vsel %vm838_vm4, %v1064_v22, %v1066_v9  ;;  %v1074_v22 = vrot.slane %v10925_v28, 1  ;;  %v8162_v28 = vunpack.c.1.s8 %v10066_v14 }
  0xfa   : > { %v10920_v47 = vpop.f32.mrb[4].mxu1  ;;  %v560_v55 = vand.u32 255, %v8157_v44 }
  0xfb   : > { %12665 = vst [vmem:[#allocation82_spill] sm:$0xff] %v10920_v47  ;;  %v10922_v60 = vpop.f32.mrb[5].mxu1  ;;  %8905 = vmatmul.mubr.msk.f32.gmra.mrb[110].mxu1 %vm1096_vm3, %v1063_v62  ;;  %v1072_v47 = vrot.slane %v10918_v43, 1  ;;  %v561_v43 = vand.u32 255, %v8158_v33 }
  0xfc   : > { %12666 = vst [vmem:[#allocation83_spill] sm:$0xff] %v10922_v60  ;;  %9288 = vmatmul.mubr.msk.f32.gmra.mrb[104].mxu0 %vm1096_vm3, %v1059_v58  ;;  %8907 = vmatprep.mubr.msk.f32.mxu1 %vm1096_vm3, %v1065_v13  ;;  %v1069_v60 = vsel %vm838_vm4, %v1066_v9, %v1068_v15  ;;  %v10947_v9 = vcvt.s32.f32 %v558_v49 }
  0xfd   : > { %9290 = vmatprep.mubr.msk.f32.mxu0 %vm1096_vm3, %v1061_v31  ;;  %v1071_v31 = vsel %vm838_vm4, %v1068_v15, %v1070_v63  ;;  %v1077_v15 = vsel %vm838_vm4, %v1074_v22, %v1076_v32  ;;  %v10963_v49 = vcvt.s32.f32 %v561_v43 }
  0xfe   : > { %v10937_v56 = vpop.f32.mrb[6].mxu1  ;;  %v1078_v44 = vrot.slane %v10947_v9, 1 }
  0xff   : > { %12669 = vst [vmem:[#allocation86_spill] sm:$0xff] %v10937_v56  ;;  %v10939_v58 = vpop.f32.mrb[7].mxu1  ;;  %8908 = vmatmul.mubr.msk.f32.gmra.mrb[112].mxu1 %vm1096_vm3, %v1067_v51  ;;  %v10951_v56 = vcvt.s32.f32 %v559_v52  ;;  %12671 = vst [vmem:[#allocation88_spill] sm:$0xff] %v10963_v49  ;;  %v563_v52 = vand.u32 255, %v8162_v28  ;;  %v1084_v28 = vrot.slane %v10963_v49, 1 }
 0x100   : > { %12670 = vst [vmem:[#allocation87_spill] sm:$0xff] %v10939_v58  ;;  %9291 = vmatmul.mubr.msk.f32.gmra.mrb[106].mxu0 %vm1096_vm3, %v1063_v62  ;;  %8910 = vmatprep.mubr.msk.f32.mxu1 %vm1096_vm3, %v1069_v60  ;;  %v1073_v58 = vsel %vm838_vm4, %v1070_v63, %v1072_v47  ;;  %v1075_v62 = vsel %vm838_vm4, %v1072_v47, %v1074_v22  ;;  %v562_v63 = vand.u32 255, %v8161_v21  ;;  %v8166_v47 = vunpack.c.3.s8 %v10066_v14  ;;  %v304_v49 = vld [vmem:[%s10174_s6 + $0x108] sm:$0x1] }
 0x101   : > { %9293 = vmatprep.mubr.msk.f32.mxu0 %vm1096_vm3, %v1065_v13  ;;  %v10959_v13 = vcvt.s32.f32 %v560_v55  ;;  %v1080_v33 = vrot.slane %v10951_v56, 1  ;;  %v1079_v22 = vsel %vm838_vm4, %v1076_v32, %v1078_v44  ;;  %v10976_v14 = vcvt.s32.f32 %v563_v52 }
 0x102   : > { %v10971_v21 = vcvt.s32.f32 %v562_v63 }
 0x103   : > { %8911 = vmatmul.mubr.msk.f32.gmra.mrb[114].mxu1 %vm1096_vm3, %v1071_v31  ;;  %v1082_v55 = vrot.slane %v10959_v13, 1  ;;  %v1081_v43 = vsel %vm838_vm4, %v1078_v44, %v1080_v33  ;;  %12673 = vst [vmem:[#allocation90_spill] sm:$0xff] %v10976_v14  ;;  %v1088_v52 = vrot.slane %v10976_v14, 1 }
 0x104   : > { %9294 = vmatmul.mubr.msk.f32.gmra.mrb[108].mxu0 %vm1096_vm3, %v1067_v51  ;;  %8913 = vmatprep.mubr.msk.f32.mxu1 %vm1096_vm3, %v1073_v58  ;;  %v564_v51 = vand.u32 255, %v8165_v24  ;;  %12672 = vst [vmem:[#allocation89_spill] sm:$0xff] %v10971_v21  ;;  %v565_v24 = vand.u32 255, %v8166_v47 }
 0x105   : > { %9296 = vmatprep.mubr.msk.f32.mxu0 %vm1096_vm3, %v1069_v60  ;;  %v8169_v60 = vunpack.c.0.s8 %v10068_v17  ;;  %v1083_v32 = vsel %vm838_vm4, %v1080_v33, %v1082_v55  ;;  %v1085_v44 = vsel %vm838_vm4, %v1082_v55, %v1084_v28 }
 0x106   : > { %v10983_v63 = vcvt.s32.f32 %v564_v51  ;;  %v10990_v47 = vcvt.s32.f32 %v565_v24  ;;  %v8173_v24 = vunpack.c.2.s8 %v10068_v17 }
 0x107   : > { %8914 = vmatmul.mubr.msk.f32.gmra.mrb[116].mxu1 %vm1096_vm3, %v1075_v62 }
 0x108   : > { %9297 = vmatmul.mubr.msk.f32.gmra.mrb[110].mxu0 %vm1096_vm3, %v1071_v31  ;;  %8916 = vmatprep.mubr.msk.f32.mxu1 %vm1096_vm3, %v1077_v15  ;;  %v1086_v31 = vrot.slane %v10971_v21, 1  ;;  %12674 = vst [vmem:[#allocation91_spill] sm:$0xff] %v10990_v47  ;;  %v1090_v51 = vrot.slane %v10983_v63, 1  ;;  %v8174_v21 = vunpack.c.3.s8 %v10068_v17 }
 0x109   : > { %9299 = vmatprep.mubr.msk.f32.mxu0 %vm1096_vm3, %v1073_v58  ;;  %v10985_v58 = vand.u32 255, %v8169_v60  ;;  %v1092_v60 = vrot.slane %v10990_v47, 1 }
 0x10a   : > { %v1087_v33 = vsel %vm838_vm4, %v1084_v28, %v1086_v31  ;;  %v1089_v55 = vsel %vm838_vm4, %v1086_v31, %v1088_v52  ;;  %v11012_v31 = vand.u32 255, %v8173_v24  ;;  %v11015_v47 = vand.u32 255, %v8174_v21 }
 0x10b   : > { %8917 = vmatmul.mubr.msk.f32.gmra.mrb[118].mxu1 %vm1096_vm3, %v1079_v22  ;;  %v1093_v28 = vsel %vm838_vm4, %v1090_v51, %v1092_v60 }
 0x10c   : > { %9300 = vmatmul.mubr.msk.f32.gmra.mrb[112].mxu0 %vm1096_vm3, %v1075_v62  ;;  %8919 = vmatprep.mubr.msk.f32.mxu1 %vm1096_vm3, %v1081_v43  ;;  %v8170_v62 = vunpack.c.1.s8 %v10068_v17  ;;  %v12576_v21 = vcvt.s32.f32 %v11015_v47 }
 0x10d   : > { %9302 = vmatprep.mubr.msk.f32.mxu0 %vm1096_vm3, %v1077_v15  ;;  %v12581_v15 = vcvt.s32.f32 %v10985_v58 }
 0x10e   : > { %v11001_v14 = vand.u32 255, %v8170_v62  ;;  %v437_v62 = vunpack.c.0.s8 %v304_v49 }
 0x10f   : > { %8920 = vmatmul.mubr.msk.f32.gmra.mrb[120].mxu1 %vm1096_vm3, %v1083_v32 }
 0x110   : > { %9303 = vmatmul.mubr.msk.f32.gmra.mrb[114].mxu0 %vm1096_vm3, %v1079_v22  ;;  %8922 = vmatprep.mubr.msk.f32.mxu1 %vm1096_vm3, %v1085_v44  ;;  %v1091_v22 = vsel %vm838_vm4, %v1088_v52, %v1090_v51  ;;  %v12580_v17 = vcvt.s32.f32 %v11001_v14  ;;  %v11023_v52 = vand.u32 255, %v437_v62  ;;  %v3890_v62 = vrot.slane %v10182_v36, 2 }
 0x111   : > { %9305 = vmatprep.mubr.msk.f32.mxu0 %vm1096_vm3, %v1081_v43  ;;  %v1094_v43 = vrot.slane %v12581_v15, 1  ;;  %v12764_v15 = vld [vmem:[#allocation87_spill] sm:$0xff] }
 0x112   : > { %v3033_v49 = vrot.slane %v12580_v17, 1  ;;  %v12575_v51 = vcvt.s32.f32 %v11023_v52 }
 0x113   : > { %8923 = vmatmul.mubr.msk.f32.gmra.mrb[122].mxu1 %vm1096_vm3, %v1087_v33 }
 0x114   : > { %9306 = vmatmul.mubr.msk.f32.gmra.mrb[116].mxu0 %vm1096_vm3, %v1083_v32  ;;  %8925 = vmatprep.mubr.msk.f32.mxu1 %vm1096_vm3, %v1089_v55  ;;  %v1095_v32 = vsel %vm838_vm4, %v1092_v60, %v1094_v43  ;;  %v3037_v60 = vrot.slane %v12576_v21, 1 }
 0x115   : > { %9308 = vmatprep.mubr.msk.f32.mxu0 %vm1096_vm3, %v1085_v44  ;;  %v12577_v44 = vcvt.s32.f32 %v11012_v31 }
 0x117   : > { %8926 = vmatmul.mubr.msk.f32.gmra.mrb[124].mxu1 %vm1096_vm3, %v1091_v22 }
 0x118   : > { %9309 = vmatmul.mubr.msk.f32.gmra.mrb[118].mxu0 %vm1096_vm3, %v1087_v33  ;;  %8928 = vmatprep.mubr.msk.f32.mxu1 %vm1096_vm3, %v1093_v28  ;;  %v3035_v33 = vrot.slane %v12577_v44, 1 }
 0x119   : > { %9311 = vmatprep.mubr.msk.f32.mxu0 %vm1096_vm3, %v1089_v55  ;;  %v3034_v55 = vsel %vm838_vm4, %v1094_v43, %v3033_v49 }
 0x11a   : > { %v3036_v24 = vsel %vm838_vm4, %v3033_v49, %v3035_v33  ;;  %v3038_v43 = vsel %vm838_vm4, %v3035_v33, %v3037_v60  ;;  %v3896_v33 = vrot.slane %v10216_v61, 2 }
 0x11b   : > { %8929 = vmatmul.mubr.msk.f32.gmra.mrb[126].mxu1 %vm1096_vm3, %v1095_v32 }
 0x11c   : > { %9312 = vmatmul.mubr.msk.f32.gmra.mrb[120].mxu0 %vm1096_vm3, %v1091_v22  ;;  %8947 = vmatprep.mubr.msk.f32.mxu1 %vm1096_vm3, %v10216_v61  ;;  %v3039_v22 = vrot.slane %v12575_v51, 1 }
 0x11d   : > { %9314 = vmatprep.mubr.msk.f32.mxu0 %vm1096_vm3, %v1093_v28  ;;  %v3889_v28 = vrot.slane %v10180_v35, 2  ;;  %v3894_v35 = vrot.slane %v10186_v38, 2 }
 0x11f   : > { %8948 = vmatmul.mubr.msk.f32.vlgmr.msra.gmra.mrb[8].mxu1 %vm1096_vm3, %v10219_v1  ;;  %v3891_v49 = vsel %vm3888_vm5, %v3889_v28, %v3890_v62  ;;  %v3897_v38 = vsel %vm3888_vm5, %v3894_v35, %v3896_v33  ;;  %v3908_v28 = vrot.slane %v10249_v25, 2 }
 0x120   : > { %9588 = vmatpush3.bf16.msk.msra.mxu1 %vm10132_vm2, %v10695_v41  ;;  %9315 = vmatmul.mubr.msk.f32.gmra.mrb[122].mxu0 %vm1096_vm3, %v1095_v32  ;;  %v3040_v41 = vsel %vm838_vm4, %v3037_v60, %v3039_v22  ;;  %v3892_v32 = vrot.slane %v10184_v37, 2  ;;  %v3900_v60 = vrot.slane %v10226_v7, 2  ;;  %v3904_v22 = vrot.slane %v10241_v19, 2 }
 0x121   : > { %8950 = vmatprep.mubr.msk.f32.mxu1 %vm1096_vm3, %v10226_v7  ;;  %9317 = vmatprep.mubr.msk.f32.mxu0 %vm1096_vm3, %v3034_v55  ;;  %v3898_v55 = vrot.slane %v10219_v1, 2 }
 0x122   : > { %v3893_v36 = vsel %vm3888_vm5, %v3890_v62, %v3892_v32  ;;  %v3895_v37 = vsel %vm3888_vm5, %v3892_v32, %v3894_v35  ;;  %v3910_v62 = vrot.slane %v10251_v26, 2  ;;  %v3914_v32 = vrot.slane %v10274_v46, 2 }
 0x123   : > { %8951 = vmatmul.mubr.msk.f32.gmra.mrb[10].mxu1 %vm1096_vm3, %v10232_v11  ;;  %v3899_v61 = vsel %vm3888_vm5, %v3896_v33, %v3898_v55  ;;  %v3901_v1 = vsel %vm3888_vm5, %v3898_v55, %v3900_v60  ;;  %v3918_v35 = vrot.slane %v10286_v57, 2  ;;  %v3922_v33 = vrot.slane %v10299_v8, 2 }
 0x124   : > { %9318 = vmatmul.mubr.msk.f32.gmra.mrb[124].mxu0 %vm1096_vm3, %v3036_v24  ;;  %8953 = vmatprep.mubr.msk.f32.mxu1 %vm1096_vm3, %v10241_v19  ;;  %v3902_v24 = vrot.slane %v10232_v11, 2  ;;  %v3926_v55 = vrot.slane %v10304_v12, 2 }
 0x125   : > { %9320 = vmatprep.mubr.msk.f32.mxu0 %vm1096_vm3, %v3038_v43  ;;  %v3906_v43 = vrot.slane %v10246_v23, 2 }
 0x126   : > { %v3903_v7 = vsel %vm3888_vm5, %v3900_v60, %v3902_v24  ;;  %v3905_v11 = vsel %vm3888_vm5, %v3902_v24, %v3904_v22  ;;  %v3930_v60 = vrot.slane %v10324_v34, 2  ;;  %v3934_v24 = vrot.slane %v10336_v50, 2 }
 0x127   : > { %8954 = vmatmul.mubr.msk.f32.gmra.mrb[12].mxu1 %vm1096_vm3, %v10246_v23  ;;  %v3907_v19 = vsel %vm3888_vm5, %v3904_v22, %v3906_v43  ;;  %v3909_v23 = vsel %vm3888_vm5, %v3906_v43, %v3908_v28  ;;  %v3938_v22 = vrot.slane %v10349_v0, 2  ;;  %v3942_v43 = vrot.slane %v10354_v6, 2 }
 0x128   : > { %9321 = vmatmul.mubr.msk.f32.gmra.mrb[126].mxu0 %vm1096_vm3, %v3040_v41  ;;  %8956 = vmatprep.mubr.msk.f32.mxu1 %vm1096_vm3, %v10249_v25  ;;  %v3912_v41 = vrot.slane %v10270_v42, 2  ;;  %v3911_v25 = vsel %vm3888_vm5, %v3908_v28, %v3910_v62  ;;  %v3946_v28 = vrot.slane %v10374_v39, 2 }
 0x129   : > { %9327 = vmatprep.mubr.msk.f32.mxu0 %vm1096_vm3, %v3891_v49  ;;  %v3916_v49 = vrot.slane %v10281_v53, 2 }
 0x12b   : > { %8957 = vmatmul.mubr.msk.f32.gmra.mrb[14].mxu1 %vm1096_vm3, %v10251_v26  ;;  %v3913_v26 = vsel %vm3888_vm5, %v3910_v62, %v3912_v41  ;;  %v3948_v62 = vrot.slane %v10381_v48, 2 }
 0x12c   : > { %9328 = vmatmul.mubr.msk.f32.vlgmr.msra.gmra.mrb[0].mxu0 %vm1096_vm3, %v3893_v36  ;;  %8959 = vmatprep.mubr.msk.f32.mxu1 %vm1096_vm3, %v10270_v42  ;;  %v3915_v42 = vsel %vm3888_vm5, %v3912_v41, %v3914_v32  ;;  %v3920_v36 = vrot.slane %v10294_v2, 2  ;;  %v12676_v41 = vld [vmem:[#allocation3_spill] sm:$0xff] }
 0x12d   : > { %9330 = vmatprep.mubr.msk.f32.mxu0 %vm1096_vm3, %v3895_v37  ;;  %v3924_v37 = vrot.slane %v10302_v10, 2 }
 0x12f   : > { %8960 = vmatmul.mubr.msk.f32.gmra.mrb[16].mxu1 %vm1096_vm3, %v10274_v46  ;;  %v3917_v46 = vsel %vm3888_vm5, %v3914_v32, %v3916_v49  ;;  %v3952_v32 = vrot.slane %v10394_v4, 2 }
 0x130   : > { %9331 = vmatmul.mubr.msk.f32.gmra.mrb[2].mxu0 %vm1096_vm3, %v3897_v38  ;;  %8962 = vmatprep.mubr.msk.f32.mxu1 %vm1096_vm3, %v10281_v53  ;;  %v3919_v53 = vsel %vm3888_vm5, %v3916_v49, %v3918_v35  ;;  %v3928_v38 = vrot.slane %v10320_v30, 2  ;;  %v12678_v49 = vld [vmem:[#allocation5_spill] sm:$0xff] }
 0x131   : > { %9333 = vmatprep.mubr.msk.f32.mxu0 %vm1096_vm3, %v3899_v61  ;;  %v3932_v61 = vrot.slane %v10331_v45, 2 }
 0x133   : > { %8963 = vmatmul.mubr.msk.f32.gmra.mrb[18].mxu1 %vm1096_vm3, %v10286_v57  ;;  %v3921_v57 = vsel %vm3888_vm5, %v3918_v35, %v3920_v36  ;;  %v3956_v35 = vrot.slane %v10402_v18, 2 }
 0x134   : > { %9334 = vmatmul.mubr.msk.f32.gmra.mrb[4].mxu0 %vm1096_vm3, %v3901_v1  ;;  %8965 = vmatprep.mubr.msk.f32.mxu1 %vm1096_vm3, %v10294_v2  ;;  %v3923_v2 = vsel %vm3888_vm5, %v3920_v36, %v3922_v33  ;;  %v3936_v1 = vrot.slane %v10344_v59, 2  ;;  %v12680_v36 = vld [vmem:[#allocation7_spill] sm:$0xff] }
 0x135   : > { %9336 = vmatprep.mubr.msk.f32.mxu0 %vm1096_vm3, %v3903_v7  ;;  %v3940_v7 = vrot.slane %v10352_v5, 2 }
 0x137   : > { %8966 = vmatmul.mubr.msk.f32.gmra.mrb[20].mxu1 %vm1096_vm3, %v10299_v8  ;;  %v3925_v8 = vsel %vm3888_vm5, %v3922_v33, %v3924_v37 }
 0x138   : > { %9337 = vmatmul.mubr.msk.f32.gmra.mrb[6].mxu0 %vm1096_vm3, %v3905_v11  ;;  %8968 = vmatprep.mubr.msk.f32.mxu1 %vm1096_vm3, %v10302_v10  ;;  %v3927_v10 = vsel %vm3888_vm5, %v3924_v37, %v3926_v55  ;;  %v3944_v11 = vrot.slane %v10370_v29, 2  ;;  %v12682_v37 = vld [vmem:[#allocation9_spill] sm:$0xff] }
 0x139   : > { %9339 = vmatprep.mubr.msk.f32.mxu0 %vm1096_vm3, %v3907_v19 }
 0x13a   : > { %v3945_v19 = vsel %vm3888_vm5, %v3942_v43, %v3944_v11 }
 0x13b   : > { %8969 = vmatmul.mubr.msk.f32.gmra.mrb[22].mxu1 %vm1096_vm3, %v10304_v12  ;;  %v3929_v12 = vsel %vm3888_vm5, %v3926_v55, %v3928_v38 }
 0x13c   : > { %9340 = vmatmul.mubr.msk.f32.gmra.mrb[8].mxu0 %vm1096_vm3, %v3909_v23  ;;  %8971 = vmatprep.mubr.msk.f32.mxu1 %vm1096_vm3, %v10320_v30  ;;  %v3931_v30 = vsel %vm3888_vm5, %v3928_v38, %v3930_v60  ;;  %v3950_v23 = vrot.slane %v10386_v54, 2  ;;  %v3966_v38 = vrot.slane %v12678_v49, 2 }
 0x13d   : > { %9342 = vmatprep.mubr.msk.f32.mxu0 %vm1096_vm3, %v3911_v25  ;;  %v3949_v25 = vsel %vm3888_vm5, %v3946_v28, %v3948_v62 }
 0x13f   : > { %8972 = vmatmul.mubr.msk.f32.gmra.mrb[24].mxu1 %vm1096_vm3, %v10324_v34  ;;  %v3933_v34 = vsel %vm3888_vm5, %v3930_v60, %v3932_v61  ;;  %v12685_v60 = vld [vmem:[#allocation12_spill] sm:$0xff] }
 0x140   : > { %9343 = vmatmul.mubr.msk.f32.gmra.mrb[10].mxu0 %vm1096_vm3, %v3913_v26  ;;  %8974 = vmatprep.mubr.msk.f32.mxu1 %vm1096_vm3, %v10331_v45  ;;  %v3935_v45 = vsel %vm3888_vm5, %v3932_v61, %v3934_v24  ;;  %v3954_v26 = vrot.slane %v10399_v16, 2 }
 0x141   : > { %9345 = vmatprep.mubr.msk.f32.mxu0 %vm1096_vm3, %v3915_v42  ;;  %v3953_v42 = vsel %vm3888_vm5, %v3950_v23, %v3952_v32 }
 0x143   : > { %8975 = vmatmul.mubr.msk.f32.gmra.mrb[26].mxu1 %vm1096_vm3, %v10336_v50  ;;  %v3937_v50 = vsel %vm3888_vm5, %v3934_v24, %v3936_v1  ;;  %v3970_v24 = vrot.slane %v12680_v36, 2 }
 0x144   : > { %9346 = vmatmul.mubr.msk.f32.gmra.mrb[12].mxu0 %vm1096_vm3, %v3917_v46  ;;  %8977 = vmatprep.mubr.msk.f32.mxu1 %vm1096_vm3, %v10344_v59  ;;  %v3939_v59 = vsel %vm3888_vm5, %v3936_v1, %v3938_v22  ;;  %v3958_v46 = vrot.slane %v10404_v20, 2  ;;  %v12687_v1 = vld [vmem:[#allocation14_spill] sm:$0xff] }
 0x145   : > { %9348 = vmatprep.mubr.msk.f32.mxu0 %vm1096_vm3, %v3919_v53  ;;  %v3957_v53 = vsel %vm3888_vm5, %v3954_v26, %v3956_v35 }
 0x147   : > { %8978 = vmatmul.mubr.msk.f32.gmra.mrb[28].mxu1 %vm1096_vm3, %v10349_v0  ;;  %v3941_v0 = vsel %vm3888_vm5, %v3938_v22, %v3940_v7 }
 0x148   : > { %9349 = vmatmul.mubr.msk.f32.gmra.mrb[14].mxu0 %vm1096_vm3, %v3921_v57  ;;  %8980 = vmatprep.mubr.msk.f32.mxu1 %vm1096_vm3, %v10352_v5  ;;  %v3943_v5 = vsel %vm3888_vm5, %v3940_v7, %v3942_v43  ;;  %v3962_v57 = vrot.slane %v12676_v41, 2  ;;  %v3974_v7 = vrot.slane %v12682_v37, 2  ;;  %v12689_v43 = vld [vmem:[#allocation16_spill] sm:$0xff] }
 0x149   : > { %9351 = vmatprep.mubr.msk.f32.mxu0 %vm1096_vm3, %v3923_v2 }
 0x14b   : > { %8981 = vmatmul.mubr.msk.f32.gmra.mrb[30].mxu1 %vm1096_vm3, %v10354_v6  ;;  %v12675_v6 = vld [vmem:[#allocation2_spill] sm:$0xff] }
 0x14c   : > { %9352 = vmatmul.mubr.msk.f32.gmra.mrb[16].mxu0 %vm1096_vm3, %v3925_v8  ;;  %8983 = vmatprep.mubr.msk.f32.mxu1 %vm1096_vm3, %v10370_v29  ;;  %v3947_v29 = vsel %vm3888_vm5, %v3944_v11, %v3946_v28  ;;  %v3960_v33 = vrot.slane %v12675_v6, 2 }
 0x14d   : > { %9354 = vmatprep.mubr.msk.f32.mxu0 %vm1096_vm3, %v3927_v10  ;;  %v12684_v10 = vld [vmem:[#allocation11_spill] sm:$0xff] }
 0x14e   : > { %v3961_v2 = vsel %vm3888_vm5, %v3958_v46, %v3960_v33  ;;  %v3963_v8 = vsel %vm3888_vm5, %v3960_v33, %v3962_v57  ;;  %v3978_v28 = vrot.slane %v12684_v10, 2 }
 0x14f   : > { %8984 = vmatmul.mubr.msk.f32.gmra.mrb[32].mxu1 %vm1096_vm3, %v10374_v39  ;;  %v12677_v39 = vld [vmem:[#allocation4_spill] sm:$0xff] }
 0x150   : > { %9355 = vmatmul.mubr.msk.f32.gmra.mrb[18].mxu0 %vm1096_vm3, %v3929_v12  ;;  %8986 = vmatprep.mubr.msk.f32.mxu1 %vm1096_vm3, %v10381_v48  ;;  %v3951_v48 = vsel %vm3888_vm5, %v3948_v62, %v3950_v23  ;;  %v3964_v55 = vrot.slane %v12677_v39, 2 }
 0x151   : > { %9357 = vmatprep.mubr.msk.f32.mxu0 %vm1096_vm3, %v3931_v30 }
 0x152   : > { %v3965_v12 = vsel %vm3888_vm5, %v3962_v57, %v3964_v55  ;;  %v3967_v30 = vsel %vm3888_vm5, %v3964_v55, %v3966_v38 }
 0x153   : > { %8987 = vmatmul.mubr.msk.f32.gmra.mrb[34].mxu1 %vm1096_vm3, %v10386_v54  ;;  %v12679_v54 = vld [vmem:[#allocation6_spill] sm:$0xff] }
 0x154   : > { %9358 = vmatmul.mubr.msk.f32.gmra.mrb[20].mxu0 %vm1096_vm3, %v3933_v34  ;;  %8989 = vmatprep.mubr.msk.f32.mxu1 %vm1096_vm3, %v10394_v4  ;;  %v3955_v4 = vsel %vm3888_vm5, %v3952_v32, %v3954_v26  ;;  %v3968_v61 = vrot.slane %v12679_v54, 2  ;;  %v12686_v34 = vld [vmem:[#allocation13_spill] sm:$0xff] }
 0x155   : > { %9360 = vmatprep.mubr.msk.f32.mxu0 %vm1096_vm3, %v3935_v45 }
 0x156   : > { %v3969_v45 = vsel %vm3888_vm5, %v3966_v38, %v3968_v61 }
 0x157   : > { %8990 = vmatmul.mubr.msk.f32.gmra.mrb[36].mxu1 %vm1096_vm3, %v10399_v16  ;;  %v12681_v16 = vld [vmem:[#allocation8_spill] sm:$0xff] }
 0x158   : > { %9361 = vmatmul.mubr.msk.f32.gmra.mrb[22].mxu0 %vm1096_vm3, %v3937_v50  ;;  %8992 = vmatprep.mubr.msk.f32.mxu1 %vm1096_vm3, %v10402_v18  ;;  %v3959_v18 = vsel %vm3888_vm5, %v3956_v35, %v3958_v46  ;;  %v3972_v22 = vrot.slane %v12681_v16, 2  ;;  %v3971_v50 = vsel %vm3888_vm5, %v3968_v61, %v3970_v24  ;;  %v6176_v61 = vld [vmem:[%s12408_s1] sm:$0xff] }
 0x159   : > { %9363 = vmatprep.mubr.msk.f32.mxu0 %vm1096_vm3, %v3939_v59  ;;  %v12688_v59 = vld [vmem:[#allocation15_spill] sm:$0xff] }
 0x15b   : > { %8993 = vmatmul.mubr.msk.f32.gmra.mrb[38].mxu1 %vm1096_vm3, %v10404_v20  ;;  %v12683_v20 = vld [vmem:[#allocation10_spill] sm:$0xff] }
 0x15c   : > { %9364 = vmatmul.mubr.msk.f32.gmra.mrb[24].mxu0 %vm1096_vm3, %v3941_v0  ;;  %8995 = vmatprep.mubr.msk.f32.mxu1 %vm1096_vm3, %v12675_v6  ;;  %v3973_v0 = vsel %vm3888_vm5, %v3970_v24, %v3972_v22  ;;  %v3976_v11 = vrot.slane %v12683_v20, 2  ;;  %v12690_v6 = vld [vmem:[#allocation17_spill] sm:$0xff] }
 0x15d   : > { %9366 = vmatprep.mubr.msk.f32.mxu0 %vm1096_vm3, %v3943_v5  ;;  %v3975_v5 = vsel %vm3888_vm5, %v3972_v22, %v3974_v7 }
 0x15e   : > { %v3977_v62 = vsel %vm3888_vm5, %v3974_v7, %v3976_v11  ;;  %v3979_v23 = vsel %vm3888_vm5, %v3976_v11, %v3978_v28  ;;  %v12703_v7 = vld [vmem:[#allocation30_spill] sm:$0xff] }
 0x15f   : > { %8996 = vmatmul.mubr.msk.f32.gmra.mrb[40].mxu1 %vm1096_vm3, %v12676_v41  ;;  %v3982_v41 = vrot.slane %v12686_v34, 2 }
 0x160   : > { %9367 = vmatmul.mubr.msk.f32.gmra.mrb[26].mxu0 %vm1096_vm3, %v3945_v19  ;;  %8998 = vmatprep.mubr.msk.f32.mxu1 %vm1096_vm3, %v12677_v39  ;;  %v12691_v19 = vld [vmem:[#allocation18_spill] sm:$0xff]  ;;  %v12692_v39 = vld [vmem:[#allocation19_spill] sm:$0xff] }
 0x161   : > { %9369 = vmatprep.mubr.msk.f32.mxu0 %vm1096_vm3, %v3947_v29  ;;  %v3980_v29 = vrot.slane %v12685_v60, 2 }
 0x163   : > { %8999 = vmatmul.mubr.msk.f32.gmra.mrb[42].mxu1 %vm1096_vm3, %v12678_v49  ;;  %v3981_v32 = vsel %vm3888_vm5, %v3978_v28, %v3980_v29  ;;  %v3983_v26 = vsel %vm3888_vm5, %v3980_v29, %v3982_v41  ;;  %v3986_v49 = vrot.slane %v12688_v59, 2  ;;  %v12705_v28 = vld [vmem:[#allocation32_spill] sm:$0xff] }
 0x164   : > { %9370 = vmatmul.mubr.msk.f32.gmra.mrb[28].mxu0 %vm1096_vm3, %v3949_v25  ;;  %9001 = vmatprep.mubr.msk.f32.mxu1 %vm1096_vm3, %v12679_v54  ;;  %v12693_v25 = vld [vmem:[#allocation20_spill] sm:$0xff]  ;;  %v12694_v54 = vld [vmem:[#allocation21_spill] sm:$0xff] }
 0x165   : > { %9372 = vmatprep.mubr.msk.f32.mxu0 %vm1096_vm3, %v3951_v48  ;;  %v3984_v48 = vrot.slane %v12687_v1, 2 }
 0x167   : > { %9002 = vmatmul.mubr.msk.f32.gmra.mrb[44].mxu1 %vm1096_vm3, %v12680_v36  ;;  %v3985_v35 = vsel %vm3888_vm5, %v3982_v41, %v3984_v48  ;;  %v3987_v46 = vsel %vm3888_vm5, %v3984_v48, %v3986_v49  ;;  %v3990_v36 = vrot.slane %v12690_v6, 2  ;;  %v12707_v41 = vld [vmem:[#allocation34_spill] sm:$0xff] }
 0x168   : > { %9373 = vmatmul.mubr.msk.f32.gmra.mrb[30].mxu0 %vm1096_vm3, %v3953_v42  ;;  %9004 = vmatprep.mubr.msk.f32.mxu1 %vm1096_vm3, %v12681_v16  ;;  %v12695_v42 = vld [vmem:[#allocation22_spill] sm:$0xff]  ;;  %v12696_v16 = vld [vmem:[#allocation23_spill] sm:$0xff] }
 0x169   : > { %9375 = vmatprep.mubr.msk.f32.mxu0 %vm1096_vm3, %v3955_v4  ;;  %v3988_v4 = vrot.slane %v12689_v43, 2  ;;  %v4002_v22 = vrot.slane %v12696_v16, 2 }
 0x16b   : > { %9005 = vmatmul.mubr.msk.f32.gmra.mrb[46].mxu1 %vm1096_vm3, %v12682_v37  ;;  %v3989_v33 = vsel %vm3888_vm5, %v3986_v49, %v3988_v4  ;;  %v3991_v57 = vsel %vm3888_vm5, %v3988_v4, %v3990_v36  ;;  %v3994_v37 = vrot.slane %v12692_v39, 2  ;;  %v12709_v49 = vld [vmem:[#allocation36_spill] sm:$0xff] }
 0x16c   : > { %9376 = vmatmul.mubr.msk.f32.gmra.mrb[32].mxu0 %vm1096_vm3, %v3957_v53  ;;  %9007 = vmatprep.mubr.msk.f32.mxu1 %vm1096_vm3, %v12683_v20  ;;  %v12697_v53 = vld [vmem:[#allocation24_spill] sm:$0xff]  ;;  %v12698_v20 = vld [vmem:[#allocation25_spill] sm:$0xff] }
 0x16d   : > { %9378 = vmatprep.mubr.msk.f32.mxu0 %vm1096_vm3, %v3959_v18  ;;  %v3992_v18 = vrot.slane %v12691_v19, 2  ;;  %v4006_v11 = vrot.slane %v12698_v20, 2 }
 0x16f   : > { %9008 = vmatmul.mubr.msk.f32.gmra.mrb[48].mxu1 %vm1096_vm3, %v12684_v10  ;;  %v3993_v55 = vsel %vm3888_vm5, %v3990_v36, %v3992_v18  ;;  %v3995_v38 = vsel %vm3888_vm5, %v3992_v18, %v3994_v37  ;;  %v3998_v10 = vrot.slane %v12694_v54, 2  ;;  %v12711_v36 = vld [vmem:[#allocation38_spill] sm:$0xff] }
 0x170   : > { %9379 = vmatmul.mubr.msk.f32.gmra.mrb[34].mxu0 %vm1096_vm3, %v3961_v2  ;;  %9010 = vmatprep.mubr.msk.f32.mxu1 %vm1096_vm3, %v12685_v60  ;;  %v12699_v2 = vld [vmem:[#allocation26_spill] sm:$0xff]  ;;  %v12700_v60 = vld [vmem:[#allocation27_spill] sm:$0xff] }
 0x171   : > { %9381 = vmatprep.mubr.msk.f32.mxu0 %vm1096_vm3, %v3963_v8  ;;  %v3996_v8 = vrot.slane %v12693_v25, 2  ;;  %v4010_v29 = vrot.slane %v12700_v60, 2 }
 0x173   : > { %9011 = vmatmul.mubr.msk.f32.gmra.mrb[50].mxu1 %vm1096_vm3, %v12686_v34  ;;  %v3997_v24 = vsel %vm3888_vm5, %v3994_v37, %v3996_v8  ;;  %v4000_v34 = vrot.slane %v12695_v42, 2  ;;  %v12713_v37 = vld [vmem:[#allocation40_spill] sm:$0xff] }
 0x174   : > { %9382 = vmatmul.mubr.msk.f32.gmra.mrb[36].mxu0 %vm1096_vm3, %v3965_v12  ;;  %9013 = vmatprep.mubr.msk.f32.mxu1 %vm1096_vm3, %v12687_v1  ;;  %v12701_v12 = vld [vmem:[#allocation28_spill] sm:$0xff] }
 0x175   : > { %9384 = vmatprep.mubr.msk.f32.mxu0 %vm1096_vm3, %v3967_v30  ;;  %v6177_v30 = vld [vmem:[%s12408_s1 + $0x8] sm:$0xf] }
 0x176   : > { %v11338_v1 = vpack.c.bf16 %v6177_v30, %v6176_v61  ;;  %v12715_v30 = vld [vmem:[#allocation42_spill] sm:$0xff] }
 0x177   : > { %9014 = vmatmul.mubr.msk.f32.gmra.mrb[52].mxu1 %vm1096_vm3, %v12688_v59  ;;  %v4001_v59 = vsel %vm3888_vm5, %v3998_v10, %v4000_v34 }
 0x178   : > { %9385 = vmatmul.mubr.msk.f32.gmra.mrb[38].mxu0 %vm1096_vm3, %v3969_v45  ;;  %9016 = vmatprep.mubr.msk.f32.mxu1 %vm1096_vm3, %v12689_v43  ;;  %v3999_v45 = vsel %vm3888_vm5, %v3996_v8, %v3998_v10  ;;  %v4004_v43 = vrot.slane %v12697_v53, 2 }
 0x179   : > { %9387 = vmatprep.mubr.msk.f32.mxu0 %vm1096_vm3, %v3971_v50  ;;  %v12702_v50 = vld [vmem:[#allocation29_spill] sm:$0xff]  ;;  %9591 = vmatprep.subr.msk.bf16.mxu1 %vm10132_vm2, %v11338_v1 }
 0x17a   : > { %v4014_v48 = vrot.slane %v12702_v50, 2 }
 0x17b   : > { %9017 = vmatmul.mubr.msk.f32.gmra.mrb[54].mxu1 %vm1096_vm3, %v12690_v6  ;;  %v4005_v6 = vsel %vm3888_vm5, %v4002_v22, %v4004_v43 }
 0x17c   : > { %9388 = vmatmul.mubr.msk.f32.gmra.mrb[40].mxu0 %vm1096_vm3, %v3973_v0  ;;  %9019 = vmatprep.mubr.msk.f32.mxu1 %vm1096_vm3, %v12691_v19  ;;  %v4003_v0 = vsel %vm3888_vm5, %v4000_v34, %v4002_v22  ;;  %v4008_v19 = vrot.slane %v12699_v2, 2 }
 0x17d   : > { %9390 = vmatprep.mubr.msk.f32.mxu0 %vm1096_vm3, %v3975_v5  ;;  %v12704_v5 = vld [vmem:[#allocation31_spill] sm:$0xff] }
 0x17e   : > { %v4018_v4 = vrot.slane %v12704_v5, 2 }
 0x17f   : > { %9020 = vmatmul.mubr.msk.f32.gmra.mrb[56].mxu1 %vm1096_vm3, %v12692_v39  ;;  %v4009_v39 = vsel %vm3888_vm5, %v4006_v11, %v4008_v19 }
 0x180   : > { %9391 = vmatmul.mubr.msk.f32.gmra.mrb[42].mxu0 %vm1096_vm3, %v3977_v62  ;;  %9022 = vmatprep.mubr.msk.f32.mxu1 %vm1096_vm3, %v12693_v25  ;;  %v4007_v62 = vsel %vm3888_vm5, %v4004_v43, %v4006_v11  ;;  %v4012_v25 = vrot.slane %v12701_v12, 2 }
 0x181   : > { %9393 = vmatprep.mubr.msk.f32.mxu0 %vm1096_vm3, %v3979_v23  ;;  %v12706_v23 = vld [vmem:[#allocation33_spill] sm:$0xff] }
 0x182   : > { %v4022_v18 = vrot.slane %v12706_v23, 2 }
 0x183   : > { %9023 = vmatmul.mubr.msk.f32.gmra.mrb[58].mxu1 %vm1096_vm3, %v12694_v54  ;;  %v4013_v54 = vsel %vm3888_vm5, %v4010_v29, %v4012_v25 }
 0x184   : > { %9394 = vmatmul.mubr.msk.f32.gmra.mrb[44].mxu0 %vm1096_vm3, %v3981_v32  ;;  %9025 = vmatprep.mubr.msk.f32.mxu1 %vm1096_vm3, %v12695_v42  ;;  %v4011_v32 = vsel %vm3888_vm5, %v4008_v19, %v4010_v29  ;;  %v4016_v42 = vrot.slane %v12703_v7, 2 }
 0x185   : > { %9396 = vmatprep.mubr.msk.f32.mxu0 %vm1096_vm3, %v3983_v26  ;;  %v12708_v26 = vld [vmem:[#allocation35_spill] sm:$0xff] }
 0x186   : > { %v4026_v8 = vrot.slane %v12708_v26, 2 }
 0x187   : > { %9026 = vmatmul.mubr.msk.f32.gmra.mrb[60].mxu1 %vm1096_vm3, %v12696_v16  ;;  %v4017_v16 = vsel %vm3888_vm5, %v4014_v48, %v4016_v42 }
 0x188   : > { %9397 = vmatmul.mubr.msk.f32.gmra.mrb[46].mxu0 %vm1096_vm3, %v3985_v35  ;;  %9028 = vmatprep.mubr.msk.f32.mxu1 %vm1096_vm3, %v12697_v53  ;;  %v4015_v35 = vsel %vm3888_vm5, %v4012_v25, %v4014_v48  ;;  %v4020_v53 = vrot.slane %v12705_v28, 2 }
 0x189   : > { %9399 = vmatprep.mubr.msk.f32.mxu0 %vm1096_vm3, %v3987_v46  ;;  %v12710_v46 = vld [vmem:[#allocation37_spill] sm:$0xff] }
 0x18a   : > { %v4030_v61 = vrot.slane %v12710_v46, 2 }
 0x18b   : > { %9029 = vmatmul.mubr.msk.f32.gmra.mrb[62].mxu1 %vm1096_vm3, %v12698_v20  ;;  %v4021_v20 = vsel %vm3888_vm5, %v4018_v4, %v4020_v53 }
 0x18c   : > { %9400 = vmatmul.mubr.msk.f32.gmra.mrb[48].mxu0 %vm1096_vm3, %v3989_v33  ;;  %9031 = vmatprep.mubr.msk.f32.mxu1 %vm1096_vm3, %v12699_v2  ;;  %v4019_v33 = vsel %vm3888_vm5, %v4016_v42, %v4018_v4  ;;  %v4024_v2 = vrot.slane %v12707_v41, 2 }
 0x18d   : > { %9402 = vmatprep.mubr.msk.f32.mxu0 %vm1096_vm3, %v3991_v57  ;;  %v12712_v57 = vld [vmem:[#allocation39_spill] sm:$0xff] }
 0x18e   : > { %v4025_v10 = vsel %vm3888_vm5, %v4022_v18, %v4024_v2 }
 0x18f   : > { %9032 = vmatmul.mubr.msk.f32.gmra.mrb[64].mxu1 %vm1096_vm3, %v12700_v60  ;;  %v4028_v60 = vrot.slane %v12709_v49, 2 }
 0x190   : > { %9403 = vmatmul.mubr.msk.f32.gmra.mrb[50].mxu0 %vm1096_vm3, %v3993_v55  ;;  %9034 = vmatprep.mubr.msk.f32.mxu1 %vm1096_vm3, %v12701_v12  ;;  %v4023_v55 = vsel %vm3888_vm5, %v4020_v53, %v4022_v18  ;;  %v4027_v12 = vsel %vm3888_vm5, %v4024_v2, %v4026_v8 }
 0x191   : > { %9405 = vmatprep.mubr.msk.f32.mxu0 %vm1096_vm3, %v3995_v38  ;;  %v12714_v38 = vld [vmem:[#allocation41_spill] sm:$0xff]  ;;  %v4029_v34 = vsel %vm3888_vm5, %v4026_v8, %v4028_v60  ;;  %v4031_v22 = vsel %vm3888_vm5, %v4028_v60, %v4030_v61 }
 0x193   : > { %9035 = vmatmul.mubr.msk.f32.gmra.mrb[66].mxu1 %vm1096_vm3, %v12702_v50  ;;  %v4034_v50 = vrot.slane %v12712_v57, 2 }
 0x194   : > { %9406 = vmatmul.mubr.msk.f32.gmra.mrb[52].mxu0 %vm1096_vm3, %v3997_v24  ;;  %9037 = vmatprep.mubr.msk.f32.mxu1 %vm1096_vm3, %v12703_v7  ;;  %v12716_v24 = vld [vmem:[#allocation43_spill] sm:$0xff]  ;;  %v12717_v7 = vld [vmem:[#allocation44_spill] sm:$0xff] }
 0x195   : > { %9408 = vmatprep.mubr.msk.f32.mxu0 %vm1096_vm3, %v3999_v45  ;;  %v4032_v45 = vrot.slane %v12711_v36, 2  ;;  %v4046_v48 = vrot.slane %v12717_v7, 2 }
 0x197   : > { %9038 = vmatmul.mubr.msk.f32.gmra.mrb[68].mxu1 %vm1096_vm3, %v12704_v5  ;;  %v4033_v43 = vsel %vm3888_vm5, %v4030_v61, %v4032_v45  ;;  %v4035_v11 = vsel %vm3888_vm5, %v4032_v45, %v4034_v50  ;;  %v4038_v5 = vrot.slane %v12714_v38, 2 }
 0x198   : > { %9409 = vmatmul.mubr.msk.f32.gmra.mrb[54].mxu0 %vm1096_vm3, %v4001_v59  ;;  %9040 = vmatprep.mubr.msk.f32.mxu1 %vm1096_vm3, %v12705_v28  ;;  %v12718_v59 = vld [vmem:[#allocation45_spill] sm:$0xff]  ;;  %v12719_v28 = vld [vmem:[#allocation46_spill] sm:$0xff] }
 0x199   : > { %9411 = vmatprep.mubr.msk.f32.mxu0 %vm1096_vm3, %v4003_v0  ;;  %v4036_v0 = vrot.slane %v12713_v37, 2  ;;  %v4048_v42 = vrot.slane %v12718_v59, 2  ;;  %v4050_v4 = vrot.slane %v12719_v28, 2 }
 0x19b   : > { %9041 = vmatmul.mubr.msk.f32.gmra.mrb[70].mxu1 %vm1096_vm3, %v12706_v23  ;;  %v4037_v19 = vsel %vm3888_vm5, %v4034_v50, %v4036_v0  ;;  %v4039_v29 = vsel %vm3888_vm5, %v4036_v0, %v4038_v5  ;;  %v4042_v23 = vrot.slane %v12715_v30, 2 }
 0x19c   : > { %9412 = vmatmul.mubr.msk.f32.gmra.mrb[56].mxu0 %vm1096_vm3, %v4005_v6  ;;  %9043 = vmatprep.mubr.msk.f32.mxu1 %vm1096_vm3, %v12707_v41  ;;  %v12720_v6 = vld [vmem:[#allocation47_spill] sm:$0xff]  ;;  %v12721_v41 = vld [vmem:[#allocation48_spill] sm:$0xff] }
 0x19d   : > { %9414 = vmatprep.mubr.msk.f32.mxu0 %vm1096_vm3, %v4007_v62  ;;  %v4040_v62 = vrot.slane %v10670_v40, 2  ;;  %v4052_v53 = vrot.slane %v12720_v6, 2  ;;  %v4054_v18 = vrot.slane %v12721_v41, 2 }
 0x19f   : > { %9044 = vmatmul.mubr.msk.f32.gmra.mrb[72].mxu1 %vm1096_vm3, %v12708_v26  ;;  %v4041_v25 = vsel %vm3888_vm5, %v4038_v5, %v4040_v62  ;;  %v12723_v26 = vld [vmem:[#allocation50_spill] sm:$0xff] }
 0x1a0   : > { %9415 = vmatmul.mubr.msk.f32.gmra.mrb[58].mxu0 %vm1096_vm3, %v4009_v39  ;;  %9046 = vmatprep.mubr.msk.f32.mxu1 %vm1096_vm3, %v12709_v49  ;;  %v12722_v39 = vld [vmem:[#allocation49_spill] sm:$0xff]  ;;  %v12724_v49 = vld [vmem:[#allocation51_spill] sm:$0xff]  ;;  %v4058_v8 = vrot.slane %v12723_v26, 2 }
 0x1a1   : > { %9417 = vmatprep.mubr.msk.f32.mxu0 %vm1096_vm3, %v4011_v32  ;;  %v4044_v32 = vrot.slane %v12716_v24, 2  ;;  %v4056_v2 = vrot.slane %v12722_v39, 2 }
 0x1a3   : > { %9047 = vmatmul.mubr.msk.f32.gmra.mrb[74].mxu1 %vm1096_vm3, %v12710_v46  ;;  %v12725_v46 = vld [vmem:[#allocation52_spill] sm:$0xff]  ;;  %v4057_v60 = vsel %vm3888_vm5, %v4054_v18, %v4056_v2  ;;  %v4059_v61 = vsel %vm3888_vm5, %v4056_v2, %v4058_v8 }
 0x1a4   : > { %9418 = vmatmul.mubr.msk.f32.gmra.mrb[60].mxu0 %vm1096_vm3, %v4013_v54  ;;  %9049 = vmatprep.mubr.msk.f32.mxu1 %vm1096_vm3, %v12711_v36  ;;  %v4045_v54 = vsel %vm3888_vm5, %v4042_v23, %v4044_v32  ;;  %v12726_v36 = vld [vmem:[#allocation53_spill] sm:$0xff] }
 0x1a5   : > { %9420 = vmatprep.mubr.msk.f32.mxu0 %vm1096_vm3, %v4015_v35  ;;  %v4047_v35 = vsel %vm3888_vm5, %v4044_v32, %v4046_v48 }
 0x1a7   : > { %9050 = vmatmul.mubr.msk.f32.gmra.mrb[76].mxu1 %vm1096_vm3, %v12712_v57  ;;  %v12727_v57 = vld [vmem:[#allocation54_spill] sm:$0xff] }
 0x1a8   : > { %9421 = vmatmul.mubr.msk.f32.gmra.mrb[62].mxu0 %vm1096_vm3, %v4017_v16  ;;  %9052 = vmatprep.mubr.msk.f32.mxu1 %vm1096_vm3, %v12713_v37  ;;  %v4049_v16 = vsel %vm3888_vm5, %v4046_v48, %v4048_v42  ;;  %v12728_v37 = vld [vmem:[#allocation55_spill] sm:$0xff] }
 0x1a9   : > { %9423 = vmatprep.mubr.msk.f32.mxu0 %vm1096_vm3, %v4019_v33  ;;  %v4051_v33 = vsel %vm3888_vm5, %v4048_v42, %v4050_v4 }
 0x1ab   : > { %9053 = vmatmul.mubr.msk.f32.gmra.mrb[78].mxu1 %vm1096_vm3, %v12714_v38  ;;  %v12729_v38 = vld [vmem:[#allocation56_spill] sm:$0xff] }
 0x1ac   : > { %9424 = vmatmul.mubr.msk.f32.gmra.mrb[64].mxu0 %vm1096_vm3, %v4021_v20  ;;  %9055 = vmatprep.mubr.msk.f32.mxu1 %vm1096_vm3, %v10670_v40  ;;  %v4043_v40 = vsel %vm3888_vm5, %v4040_v62, %v4042_v23  ;;  %v4053_v20 = vsel %vm3888_vm5, %v4050_v4, %v4052_v53 }
 0x1ad   : > { %9426 = vmatprep.mubr.msk.f32.mxu0 %vm1096_vm3, %v4023_v55  ;;  %v4055_v55 = vsel %vm3888_vm5, %v4052_v53, %v4054_v18 }
 0x1af   : > { %9056 = vmatmul.mubr.msk.f32.gmra.mrb[80].mxu1 %vm1096_vm3, %v12715_v30  ;;  %v4062_v30 = vrot.slane %v12725_v46, 2 }
 0x1b0   : > { %9427 = vmatmul.mubr.msk.f32.gmra.mrb[66].mxu0 %vm1096_vm3, %v4025_v10  ;;  %9058 = vmatprep.mubr.msk.f32.mxu1 %vm1096_vm3, %v12716_v24  ;;  %v12730_v10 = vld [vmem:[#allocation57_spill] sm:$0xff]  ;;  %v12731_v24 = vld [vmem:[#allocation58_spill] sm:$0xff] }
 0x1b1   : > { %9429 = vmatprep.mubr.msk.f32.mxu0 %vm1096_vm3, %v4027_v12  ;;  %v4060_v12 = vrot.slane %v12724_v49, 2 }
 0x1b3   : > { %9059 = vmatmul.mubr.msk.f32.gmra.mrb[82].mxu1 %vm1096_vm3, %v12717_v7  ;;  %v4061_v45 = vsel %vm3888_vm5, %v4058_v8, %v4060_v12  ;;  %v4063_v50 = vsel %vm3888_vm5, %v4060_v12, %v4062_v30  ;;  %v4066_v7 = vrot.slane %v12727_v57, 2 }
 0x1b4   : > { %9430 = vmatmul.mubr.msk.f32.gmra.mrb[68].mxu0 %vm1096_vm3, %v4029_v34  ;;  %9061 = vmatprep.mubr.msk.f32.mxu1 %vm1096_vm3, %v12718_v59  ;;  %v12732_v34 = vld [vmem:[#allocation59_spill] sm:$0xff]  ;;  %v12733_v59 = vld [vmem:[#allocation60_spill] sm:$0xff] }
 0x1b5   : > { %9432 = vmatprep.mubr.msk.f32.mxu0 %vm1096_vm3, %v4031_v22  ;;  %v4064_v22 = vrot.slane %v12726_v36, 2 }
 0x1b7   : > { %9062 = vmatmul.mubr.msk.f32.gmra.mrb[84].mxu1 %vm1096_vm3, %v12719_v28  ;;  %v4065_v0 = vsel %vm3888_vm5, %v4062_v30, %v4064_v22  ;;  %v4067_v5 = vsel %vm3888_vm5, %v4064_v22, %v4066_v7  ;;  %v4070_v28 = vrot.slane %v12729_v38, 2 }
 0x1b8   : > { %9433 = vmatmul.mubr.msk.f32.gmra.mrb[70].mxu0 %vm1096_vm3, %v4033_v43  ;;  %9064 = vmatprep.mubr.msk.f32.mxu1 %vm1096_vm3, %v12720_v6  ;;  %v12734_v43 = vld [vmem:[#allocation61_spill] sm:$0xff]  ;;  %v12735_v6 = vld [vmem:[#allocation62_spill] sm:$0xff] }
 0x1b9   : > { %9435 = vmatprep.mubr.msk.f32.mxu0 %vm1096_vm3, %v4035_v11  ;;  %v4068_v11 = vrot.slane %v12728_v37, 2 }
 0x1bb   : > { %9065 = vmatmul.mubr.msk.f32.gmra.mrb[86].mxu1 %vm1096_vm3, %v12721_v41  ;;  %v4069_v62 = vsel %vm3888_vm5, %v4066_v7, %v4068_v11  ;;  %v4071_v23 = vsel %vm3888_vm5, %v4068_v11, %v4070_v28  ;;  %v4074_v41 = vrot.slane %v12731_v24, 2  ;;  %v12749_v11 = vld [vmem:[#allocation80_spill] sm:$0xff] }
 0x1bc   : > { %9436 = vmatmul.mubr.msk.f32.gmra.mrb[72].mxu0 %vm1096_vm3, %v4037_v19  ;;  %9067 = vmatprep.mubr.msk.f32.mxu1 %vm1096_vm3, %v12722_v39  ;;  %v12736_v19 = vld [vmem:[#allocation63_spill] sm:$0xff]  ;;  %v12737_v39 = vld [vmem:[#allocation64_spill] sm:$0xff] }
 0x1bd   : > { %9438 = vmatprep.mubr.msk.f32.mxu0 %vm1096_vm3, %v4039_v29  ;;  %v4072_v29 = vrot.slane %v12730_v10, 2 }
 0x1bf   : > { %9068 = vmatmul.mubr.msk.f32.gmra.mrb[88].mxu1 %vm1096_vm3, %v12723_v26  ;;  %v4073_v32 = vsel %vm3888_vm5, %v4070_v28, %v4072_v29  ;;  %v4075_v48 = vsel %vm3888_vm5, %v4072_v29, %v4074_v41  ;;  %v4078_v26 = vrot.slane %v12733_v59, 2 }
 0x1c0   : > { %9439 = vmatmul.mubr.msk.f32.gmra.mrb[74].mxu0 %vm1096_vm3, %v4041_v25  ;;  %9070 = vmatprep.mubr.msk.f32.mxu1 %vm1096_vm3, %v12724_v49  ;;  %v12738_v25 = vld [vmem:[#allocation65_spill] sm:$0xff]  ;;  %v12739_v49 = vld [vmem:[#allocation66_spill] sm:$0xff] }
 0x1c1   : > { %9441 = vmatprep.mubr.msk.f32.mxu0 %vm1096_vm3, %v4043_v40  ;;  %v4076_v40 = vrot.slane %v12732_v34, 2 }
 0x1c3   : > { %9071 = vmatmul.mubr.msk.f32.gmra.mrb[90].mxu1 %vm1096_vm3, %v12725_v46  ;;  %v4077_v42 = vsel %vm3888_vm5, %v4074_v41, %v4076_v40  ;;  %v4079_v4 = vsel %vm3888_vm5, %v4076_v40, %v4078_v26  ;;  %v4082_v46 = vrot.slane %v12735_v6, 2  ;;  %v12750_v41 = vld [vmem:[#allocation81_spill] sm:$0xff] }
 0x1c4   : > { %9442 = vmatmul.mubr.msk.f32.gmra.mrb[76].mxu0 %vm1096_vm3, %v4045_v54  ;;  %9073 = vmatprep.mubr.msk.f32.mxu1 %vm1096_vm3, %v12726_v36  ;;  %v12740_v54 = vld [vmem:[#allocation67_spill] sm:$0xff]  ;;  %v12741_v36 = vld [vmem:[#allocation68_spill] sm:$0xff] }
 0x1c5   : > { %9444 = vmatprep.mubr.msk.f32.mxu0 %vm1096_vm3, %v4047_v35  ;;  %v4080_v35 = vrot.slane %v12734_v43, 2  ;;  %v4092_v12 = vrot.slane %v12740_v54, 2  ;;  %v4094_v30 = vrot.slane %v12741_v36, 2 }
 0x1c7   : > { %9074 = vmatmul.mubr.msk.f32.gmra.mrb[92].mxu1 %vm1096_vm3, %v12727_v57  ;;  %v4081_v53 = vsel %vm3888_vm5, %v4078_v26, %v4080_v35  ;;  %v4083_v18 = vsel %vm3888_vm5, %v4080_v35, %v4082_v46  ;;  %v4086_v57 = vrot.slane %v12737_v39, 2  ;;  %v4095_v7 = vsel %vm3888_vm5, %v4092_v12, %v4094_v30 }
 0x1c8   : > { %9445 = vmatmul.mubr.msk.f32.gmra.mrb[78].mxu0 %vm1096_vm3, %v4049_v16  ;;  %9076 = vmatprep.mubr.msk.f32.mxu1 %vm1096_vm3, %v12728_v37  ;;  %v12742_v16 = vld [vmem:[#allocation69_spill] sm:$0xff]  ;;  %v12743_v37 = vld [vmem:[#allocation70_spill] sm:$0xff] }
 0x1c9   : > { %9447 = vmatprep.mubr.msk.f32.mxu0 %vm1096_vm3, %v4051_v33  ;;  %v4084_v33 = vrot.slane %v12736_v19, 2  ;;  %v4096_v22 = vrot.slane %v12742_v16, 2 }
 0x1cb   : > { %9077 = vmatmul.mubr.msk.f32.gmra.mrb[94].mxu1 %vm1096_vm3, %v12729_v38  ;;  %v4085_v2 = vsel %vm3888_vm5, %v4082_v46, %v4084_v33  ;;  %v4087_v8 = vsel %vm3888_vm5, %v4084_v33, %v4086_v57  ;;  %v4090_v38 = vrot.slane %v12739_v49, 2 }
 0x1cc   : > { %9448 = vmatmul.mubr.msk.f32.gmra.mrb[80].mxu0 %vm1096_vm3, %v4053_v20  ;;  %9079 = vmatprep.mubr.msk.f32.mxu1 %vm1096_vm3, %v12730_v10  ;;  %v12744_v20 = vld [vmem:[#allocation71_spill] sm:$0xff]  ;;  %v12745_v10 = vld [vmem:[#allocation72_spill] sm:$0xff] }
 0x1cd   : > { %9450 = vmatprep.mubr.msk.f32.mxu0 %vm1096_vm3, %v4055_v55  ;;  %v4088_v55 = vrot.slane %v12738_v25, 2  ;;  %v4100_v28 = vrot.slane %v12744_v20, 2  ;;  %v4102_v29 = vrot.slane %v12745_v10, 2 }
 0x1cf   : > { %9080 = vmatmul.mubr.msk.f32.gmra.mrb[96].mxu1 %vm1096_vm3, %v12731_v24  ;;  %v12746_v24 = vld [vmem:[#allocation73_spill] sm:$0xff] }
 0x1d0   : > { %9451 = vmatmul.mubr.msk.f32.gmra.mrb[82].mxu0 %vm1096_vm3, %v4057_v60  ;;  %9082 = vmatprep.mubr.msk.f32.mxu1 %vm1096_vm3, %v12732_v34  ;;  %v4089_v60 = vsel %vm3888_vm5, %v4086_v57, %v4088_v55  ;;  %v12747_v34 = vld [vmem:[#allocation76_spill] sm:$0xff] }
 0x1d1   : > { %9453 = vmatprep.mubr.msk.f32.mxu0 %vm1096_vm3, %v4059_v61  ;;  %v4091_v61 = vsel %vm3888_vm5, %v4088_v55, %v4090_v38  ;;  %v4108_v33 = vrot.slane %v12747_v34, 2  ;;  %v11646_v55 = vld [vmem:[%s12409_s2] ss:$0 sm:$0xff] }
 0x1d3   : > { %9083 = vmatmul.mubr.msk.f32.gmra.mrb[98].mxu1 %vm1096_vm3, %v12733_v59  ;;  %v4098_v59 = vrot.slane %v12743_v37, 2 }
 0x1d4   : > { %9454 = vmatmul.mubr.msk.f32.gmra.mrb[84].mxu0 %vm1096_vm3, %v4061_v45  ;;  %9085 = vmatprep.mubr.msk.f32.mxu1 %vm1096_vm3, %v12734_v43  ;;  %v4093_v45 = vsel %vm3888_vm5, %v4090_v38, %v4092_v12  ;;  %v4112_v38 = vrot.slane %v12749_v11, 2  ;;  %v12753_v12 = vld [vmem:[#allocation74_spill] sm:$0xff] }
 0x1d5   : > { %9456 = vmatprep.mubr.msk.f32.mxu0 %vm1096_vm3, %v4063_v50  ;;  %v4101_v40 = vsel %vm3888_vm5, %v4098_v59, %v4100_v28 }
 0x1d7   : > { %9086 = vmatmul.mubr.msk.f32.gmra.mrb[100].mxu1 %vm1096_vm3, %v12735_v6  ;;  %v10070_v6 = vld [vmem:[%s10174_s6 + $0x100] sm:$0xff]  }
 0x1d8   : > { %9457 = vmatmul.mubr.msk.f32.gmra.mrb[86].mxu0 %vm1096_vm3, %v4065_v0  ;;  %9088 = vmatprep.mubr.msk.f32.mxu1 %vm1096_vm3, %v12736_v19  ;;  %v12748_v0 = vld [vmem:[#allocation77_spill] sm:$0xff]  ;;  %v8182_v46 = vunpack.c.3.s8 %v10070_v6 }
 0x1d9   : > { %9459 = vmatprep.mubr.msk.f32.mxu0 %vm1096_vm3, %v4067_v5  ;;  %v4097_v5 = vsel %vm3888_vm5, %v4094_v30, %v4096_v22 }
 0x1db   : > { %9089 = vmatmul.mubr.msk.f32.gmra.mrb[102].mxu1 %vm1096_vm3, %v12737_v39  ;;  %v12751_v39 = vld [vmem:[#allocation84_spill] sm:$0xff] }
 0x1dc   : > { %9460 = vmatmul.mubr.msk.f32.gmra.mrb[88].mxu0 %vm1096_vm3, %v4069_v62  ;;  %9091 = vmatprep.mubr.msk.f32.mxu1 %vm1096_vm3, %v12738_v25  ;;  %v4099_v62 = vsel %vm3888_vm5, %v4096_v22, %v4098_v59  ;;  %v8177_v25 = vunpack.c.0.s8 %v10070_v6  ;;  %v4114_v59 = vrot.slane %v12750_v41, 2 }
 0x1dd   : > { %9462 = vmatprep.mubr.msk.f32.mxu0 %vm1096_vm3, %v4071_v23 }
 0x1df   : > { %9092 = vmatmul.mubr.msk.f32.gmra.mrb[104].mxu1 %vm1096_vm3, %v12739_v49  ;;  %v4103_v49 = vsel %vm3888_vm5, %v4100_v28, %v4102_v29  ;;  %v4116_v28 = vrot.slane %v12751_v39, 2 }
 0x1e0   : > { %9463 = vmatmul.mubr.msk.f32.gmra.mrb[90].mxu0 %vm1096_vm3, %v4073_v32  ;;  %9094 = vmatprep.mubr.msk.f32.mxu1 %vm1096_vm3, %v12740_v54  ;;  %v8178_v32 = vunpack.c.1.s8 %v10070_v6  ;;  %v4106_v54 = vrot.slane %v12746_v24, 2 }
 0x1e1   : > { %9465 = vmatprep.mubr.msk.f32.mxu0 %vm1096_vm3, %v4075_v48  ;;  %v4104_v48 = vrot.slane %v10881_v27, 2 }
 0x1e3   : > { %9095 = vmatmul.mubr.msk.f32.gmra.mrb[106].mxu1 %vm1096_vm3, %v12741_v36  ;;  %v11623_v36 = vand.u32 255, %v8177_v25  ;;  %v4107_v57 = vsel %vm3888_vm5, %v4104_v48, %v4106_v54  ;;  %v12755_v25 = vld [vmem:[#allocation88_spill] sm:$0xff] }
 0x1e4   : > { %9466 = vmatmul.mubr.msk.f32.gmra.mrb[92].mxu0 %vm1096_vm3, %v4077_v42  ;;  %9097 = vmatprep.mubr.msk.f32.mxu1 %vm1096_vm3, %v12742_v16  ;;  %v8181_v42 = vunpack.c.2.s8 %v10070_v6  ;;  %v11628_v16 = vld [vmem:[%s10174_s6 + $0x108] sm:$0xff]  }
 0x1e5   : > { %9468 = vmatprep.mubr.msk.f32.mxu0 %vm1096_vm3, %v4079_v4  ;;  %v12752_v4 = vld [vmem:[#allocation85_spill] sm:$0xff]  ;;  %v8189_v44 = vunpack.c.2.s8 %v11628_v16 }
 0x1e7   : > { %9098 = vmatmul.mubr.msk.f32.gmra.mrb[108].mxu1 %vm1096_vm3, %v12743_v37  ;;  %v4110_v37 = vrot.slane %v12748_v0, 2 }
 0x1e8   : > { %9469 = vmatmul.mubr.msk.f32.gmra.mrb[94].mxu0 %vm1096_vm3, %v4081_v53  ;;  %9100 = vmatprep.mubr.msk.f32.mxu1 %vm1096_vm3, %v12744_v20  ;;  %v4105_v53 = vsel %vm3888_vm5, %v4102_v29, %v4104_v48  ;;  %v11637_v20 = vand.u32 255, %v8181_v42 }
 0x1e9   : > { %9471 = vmatprep.mubr.msk.f32.mxu0 %vm1096_vm3, %v4083_v18 }
 0x1ea   : > { %v12582_v6 = vcvt.s32.f32 %v11637_v20 }
 0x1eb   : > { %9101 = vmatmul.mubr.msk.f32.gmra.mrb[110].mxu1 %vm1096_vm3, %v12745_v10  ;;  %v11649_v10 = vand.u32 255, %v8182_v46  ;;  %v12757_v46 = vld [vmem:[#allocation89_spill] sm:$0xff] }
 0x1ec   : > { %9472 = vmatmul.mubr.msk.f32.gmra.mrb[96].mxu0 %vm1096_vm3, %v4085_v2  ;;  %9103 = vmatprep.mubr.msk.f32.mxu1 %vm1096_vm3, %v10881_v27  ;;  %v11625_v27 = vand.u32 255, %v8178_v32 }
 0x1ed   : > { %9474 = vmatprep.mubr.msk.f32.mxu0 %vm1096_vm3, %v4087_v8 }
 0x1ef   : > { %9104 = vmatmul.mubr.msk.f32.gmra.mrb[112].mxu1 %vm1096_vm3, %v12746_v24  ;;  %v6167_v24 = vcvt.s32.f32 %v11623_v36 }
 0x1f0   : > { %9475 = vmatmul.mubr.msk.f32.gmra.mrb[98].mxu0 %vm1096_vm3, %v4089_v60  ;;  %9106 = vmatprep.mubr.msk.f32.mxu1 %vm1096_vm3, %v12747_v34  ;;  %v8185_v60 = vunpack.c.0.s8 %v11628_v16  ;;  %v6168_v34 = vcvt.s32.f32 %v11625_v27 }
 0x1f1   : > { %9477 = vmatprep.mubr.msk.f32.mxu0 %vm1096_vm3, %v4091_v61 }
 0x1f2   : > { %v11583_v50 = vpop.f32.mrb[8].mxu1  ;;  %v11676_v48 = vand.u32 255, %v8185_v60  ;;  %v4115_v60 = vsel %vm3888_vm5, %v4112_v38, %v4114_v59 }
 0x1f3   : > { %v11587_v43 = vpop.f32.mrb[9].mxu1  ;;  %9107 = vmatmul.mubr.msk.f32.gmra.mrb[114].mxu1 %vm1096_vm3, %v12748_v0 }
 0x1f4   : > { %9478 = vmatmul.mubr.msk.f32.gmra.mrb[100].mxu0 %vm1096_vm3, %v4093_v45  ;;  %9109 = vmatprep.mubr.msk.f32.mxu1 %vm1096_vm3, %v12749_v11  ;;  %v12754_v45 = vld [vmem:[#allocation75_spill] sm:$0xff] }
 0x1f5   : > { %9480 = vmatprep.mubr.msk.f32.mxu0 %vm1096_vm3, %v4095_v7  ;;  %v4109_v7 = vsel %vm3888_vm5, %v4106_v54, %v4108_v33  ;;  %v12756_v54 = vld [vmem:[#allocation78_spill] sm:$0xff] }
 0x1f6   : > { %v11598_v19 = vpop.f32.mrb[10].mxu1 }
 0x1f7   : > { %v11602_v23 = vpop.f32.mrb[11].mxu1  ;;  %9110 = vmatmul.mubr.msk.f32.gmra.mrb[116].mxu1 %vm1096_vm3, %v12750_v41  ;;  %v4113_v41 = vsel %vm3888_vm5, %v4110_v37, %v4112_v38 }
 0x1f8   : > { %9481 = vmatmul.mubr.msk.f32.gmra.mrb[102].mxu0 %vm1096_vm3, %v4097_v5  ;;  %9112 = vmatprep.mubr.msk.f32.mxu1 %vm1096_vm3, %v12751_v39  ;;  %v4111_v5 = vsel %vm3888_vm5, %v4108_v33, %v4110_v37  ;;  %v6186_v33 = vrot.slane %v6168_v34, 1  ;;  %v12758_v37 = vld [vmem:[#allocation79_spill] sm:$0xff] }
 0x1f9   : > { %9483 = vmatprep.mubr.msk.f32.mxu0 %vm1096_vm3, %v4099_v62 }
 0x1fa   : > { %v11612_v26 = vpop.f32.mrb[12].mxu1 }
 0x1fb   : > { %v11616_v35 = vpop.f32.mrb[13].mxu1  ;;  %9113 = vmatmul.mubr.msk.f32.gmra.mrb[118].mxu1 %vm1096_vm3, %v12752_v4 }
 0x1fc   : > { %9484 = vmatmul.mubr.msk.f32.gmra.mrb[104].mxu0 %vm1096_vm3, %v4101_v40  ;;  %9115 = vmatprep.mubr.msk.f32.mxu1 %vm1096_vm3, %v10947_v9  ;;  %v12579_v40 = vcvt.s32.f32 %v11649_v10 }
 0x1fd   : > { %9486 = vmatprep.mubr.msk.f32.mxu0 %vm1096_vm3, %v4103_v49 }
 0x1fe   : > { %v11633_v18 = vpop.f32.mrb[14].mxu1 }
 0x1ff   : > { %v11639_v2 = vpop.f32.mrb[15].mxu1  ;;  %9116 = vmatmul.mubr.msk.f32.gmra.mrb[120].mxu1 %vm1096_vm3, %v10951_v56  ;;  %v9329_v8 = vpop.f32.mrb[0].mxu0 }
 0x200   : > { %v9609_v61 = vadd.f32 %v9329_v8, %v12753_v12  ;;  %v4471_v30 = vpop.f32.mrb[1].mxu0  ;;  %9487 = vmatmul.mubr.msk.f32.gmra.mrb[106].mxu0 %vm1096_vm3, %v4105_v53  ;;  %9118 = vmatprep.mubr.msk.f32.mxu1 %vm1096_vm3, %v10959_v13  ;;  %v6185_v53 = vrot.slane %v6167_v24, 1  ;;  %v4118_v12 = vrot.slane %v12752_v4, 2 }
 0x201   : > { %v9610_v22 = vadd.f32 %v4471_v30, %v12754_v45  ;;  %9489 = vmatprep.mubr.msk.f32.mxu0 %vm1096_vm3, %v4107_v57  ;;  %v4117_v45 = vsel %vm3888_vm5, %v4114_v59, %v4116_v28  ;;  %v12578_v59 = vcvt.s32.f32 %v11676_v48 }
 0x202   : > { %v5245_v0 = vadd.f32 %v9609_v61, %v11646_v55  ;;  %v11664_v11 = vpop.f32.mrb[16].mxu1 }
 0x203   : > { %v5244_v62 = vadd.f32 %v9610_v22, %v11646_v55  ;;  %v11670_v29 = vpop.f32.mrb[17].mxu1  ;;  %9119 = vmatmul.mubr.msk.f32.gmra.mrb[122].mxu1 %vm1096_vm3, %v12755_v25  ;;  %v9332_v32 = vpop.f32.mrb[2].mxu0  ;;  %v6188_v22 = vrot.slane %v12582_v6, 1 }
 0x204   : > { %v5373_v49 = vmax.f32 %v5245_v0, 0.0  ;;  %v9611_v42 = vadd.f32 %v9332_v32, %v12756_v54  ;;  %v4481_v39 = vpop.f32.mrb[3].mxu0  ;;  %9490 = vmatmul.mubr.msk.f32.gmra.mrb[108].mxu0 %vm1096_vm3, %v4109_v7  ;;  %9121 = vmatprep.mubr.msk.f32.mxu1 %vm1096_vm3, %v12757_v46  ;;  %v4120_v7 = vrot.slane %v10947_v9, 2  ;;  %v6190_v32 = vrot.slane %v12579_v40, 1  ;;  %v6148_v40 = vld [vmem:[%s10174_s6 + $0x110] sm:$0x1] }
 0x205   : > { %v5372_v57 = vmax.f32 %v5244_v62, 0.0  ;;  %v9612_v8 = vadd.f32 %v4481_v39, %v12758_v37  ;;  %9492 = vmatprep.mubr.msk.f32.mxu0 %vm1096_vm3, %v4111_v5  ;;  %v12759_v5 = vld [vmem:[#allocation90_spill] sm:$0xff]  ;;  %v6187_v9 = vsel %vm838_vm4, %v6185_v53, %v6186_v33  ;;  %v6189_v21 = vsel %vm838_vm4, %v6186_v33, %v6188_v22 }
 0x206   : > { %v5247_v61 = vadd.f32 %v9611_v42, %v11646_v55  ;;  %v11696_v30 = vpop.f32.mrb[18].mxu1  ;;  %v12760_v42 = vld [vmem:[#allocation82_spill] sm:$0xff]  ;;  %v4121_v53 = vsel %vm3888_vm5, %v4118_v12, %v4120_v7  ;;  %v11735_v33 = vrot.slane %v12578_v59, 1 }
 0x207   : > { %v7519_v38 = vpack.c.bf16 %v5373_v49, %v5372_v57  ;;  %v5246_v4 = vadd.f32 %v9612_v8, %v11646_v55  ;;  %v11703_v0 = vpop.f32.mrb[19].mxu1  ;;  %9122 = vmatmul.mubr.msk.f32.gmra.mrb[124].mxu1 %vm1096_vm3, %v12759_v5  ;;  %v9335_v62 = vpop.f32.mrb[4].mxu0  ;;  %v8186_v49 = vunpack.c.1.s8 %v11628_v16  ;;  %v12761_v8 = vld [vmem:[#allocation83_spill] sm:$0xff] }
 0x208   : > { %v5375_v54 = vmax.f32 %v5247_v61, 0.0  ;;  %v9613_v39 = vadd.f32 %v9335_v62, %v12760_v42  ;;  %v4491_v37 = vpop.f32.mrb[5].mxu0  ;;  %9493 = vmatmul.mubr.msk.f32.gmra.mrb[110].mxu0 %vm1096_vm3, %v4113_v41  ;;  %9124 = vmatprep.mubr.msk.f32.mxu1 %vm1096_vm3, %v10983_v63  ;;  %v4119_v61 = vsel %vm3888_vm5, %v4116_v28, %v4118_v12  ;;  %v4122_v62 = vrot.slane %v10951_v56, 2  ;;  %v12762_v28 = vld [vmem:[#allocation91_spill] sm:$0xff]  ;;  %v7364_v12 = vld [vmem:[%s12408_s1 + $0x20] sm:$0xff] }
 0x209   : > { %7520 = vst [vmem:[%s11693_s21] sm:$0xff] %v7519_v38   ;;  %v5374_v57 = vmax.f32 %v5246_v4, 0.0  ;;  %v9614_v51 = vadd.f32 %v4491_v37, %v12761_v8  ;;  %9495 = vmatprep.mubr.msk.f32.mxu0 %vm1096_vm3, %v4115_v60  ;;  %v12763_v37 = vld [vmem:[#allocation86_spill] sm:$0xff]  ;;  %v11747_v59 = vand.u32 255, %v8186_v49  ;;  %v8190_v49 = vunpack.c.3.s8 %v11628_v16 }
 0x20a   : > { %v5249_v42 = vadd.f32 %v9613_v39, %v11646_v55  ;;  %v11722_v41 = vpop.f32.mrb[20].mxu1  ;;  %v6191_v39 = vsel %vm838_vm4, %v6188_v22, %v6190_v32  ;;  %v4124_v22 = vrot.slane %v10959_v13, 2  ;;  %v11760_v13 = vand.u32 255, %v8189_v44 }
 0x20b   : > { %v7524_v38 = vpack.c.bf16 %v5375_v54, %v5374_v57  ;;  %v5248_v4 = vadd.f32 %v9614_v51, %v11646_v55  ;;  %v11728_v60 = vpop.f32.mrb[21].mxu1  ;;  %9125 = vmatmul.mubr.msk.f32.gmra.mrb[126].mxu1 %vm1096_vm3, %v12762_v28  ;;  %v9338_v56 = vpop.f32.mrb[6].mxu0  ;;  %v7365_v51 = vld [vmem:[%s12408_s1 + $0x28] sm:$0xf]  ;;  %v6172_v16 = vcvt.s32.f32 %v11747_v59 }
 0x20c   : > { %v5377_v54 = vmax.f32 %v5249_v42, 0.0  ;;  %v9615_v57 = vadd.f32 %v9338_v56, %v12763_v37  ;;  %v4501_v8 = vpop.f32.mrb[7].mxu0  ;;  %9496 = vmatmul.mubr.msk.f32.gmra.mrb[112].mxu0 %vm1096_vm3, %v4117_v45  ;;  %9523 = vmatprep.mubr.msk.f32.mxu1 %vm1096_vm3, %v6187_v9  ;;  %v4123_v42 = vsel %vm3888_vm5, %v4120_v7, %v4122_v62  ;;  %v4126_v56 = vrot.slane %v12755_v25, 2 }
 0x20d   : > { %7846 = vst [vmem:[%s11693_s21 + $0x8] sm:$0xff] %v7524_v38   ;;  %v5376_v17 = vmax.f32 %v5248_v4, 0.0  ;;  %v9616_v6 = vadd.f32 %v4501_v8, %v12764_v15  ;;  %9498 = vmatprep.mubr.msk.f32.mxu0 %vm1096_vm3, %v4119_v61  ;;  %v11758_v9 = vpack.c.bf16 %v7365_v51, %v7364_v12  ;;  %v4128_v25 = vrot.slane %v12757_v46, 2  ;;  %v7371_v8 = vld [vmem:[%s12408_s1 + $0x30] sm:$0xff] }
 0x20e   : > { %v5251_v37 = vadd.f32 %v9615_v57, %v11646_v55  ;;  %v11756_v45 = vpop.f32.mrb[22].mxu1  ;;  %v6157_v7 = vunpack.c.0.s8 %v6148_v40 }
 0x20f   : > { %v7529_v38 = vpack.c.bf16 %v5377_v54, %v5376_v17  ;;  %v5250_v15 = vadd.f32 %v9616_v6, %v11646_v55  ;;  %v11764_v4 = vpop.f32.mrb[23].mxu1  ;;  %v9341_v61 = vpop.f32.mrb[8].mxu0  ;;  %9524 = vmatmul.mubr.msk.f32.vlgmr.msra.gmra.mrb[128].mxu1 %vm1096_vm3, %v6189_v21  ;;  %v6193_v17 = vsel %vm838_vm4, %v6190_v32, %v11735_v33  ;;  %v4127_v32 = vsel %vm3888_vm5, %v4124_v22, %v4126_v56 }
 0x210   : > { %v5379_v57 = vmax.f32 %v5251_v37, 0.0  ;;  %v9617_v12 = vadd.f32 %v9341_v61, %v11583_v50  ;;  %9594 = vmatpush3.bf16.msk.msra.mxu1 %vm10132_vm2, %v11338_v1  ;;  %v4511_v44 = vpop.f32.mrb[9].mxu0  ;;  %9499 = vmatmul.mubr.msk.f32.gmra.mrb[114].mxu0 %vm1096_vm3, %v4121_v53  ;;  %v4125_v50 = vsel %vm3888_vm5, %v4122_v62, %v4124_v22  ;;  %v4130_v1 = vrot.slane %v12759_v5, 2  ;;  %v7372_v22 = vld [vmem:[%s12408_s1 + $0x38] sm:$0xf] }
 0x211   : > { %7847 = vst [vmem:[%s11693_s21 + $0x10] sm:$0xff] %v7529_v38   ;;  %v5378_v21 = vmax.f32 %v5250_v15, 0.0  ;;  %v9618_v6 = vadd.f32 %v4511_v44, %v11587_v43  ;;  %9526 = vmatprep.mubr.msk.f32.mxu1 %vm1096_vm3, %v6191_v39  ;;  %9501 = vmatprep.mubr.msk.f32.mxu0 %vm1096_vm3, %v4123_v42  ;;  %v6173_v43 = vcvt.s32.f32 %v11760_v13  ;;  %v11790_v53 = vand.u32 255, %v8190_v49 }
 0x212   : > { %v5253_v40 = vadd.f32 %v9617_v12, %v11646_v55  ;;  %v11783_v46 = vpop.f32.mrb[24].mxu1  ;;  %9597 = vmatprep.subr.msk.bf16.mxu1 %vm10132_vm2, %v11758_v9  ;;  %v4129_v54 = vsel %vm3888_vm5, %v4126_v56, %v4128_v25  ;;  %v11803_v42 = vand.u32 255, %v6157_v7  ;;  %v4132_v56 = vrot.slane %v10983_v63, 2 }
 0x213   : > { %v7534_v39 = vpack.c.bf16 %v5379_v57, %v5378_v21  ;;  %v5252_v62 = vadd.f32 %v9618_v6, %v11646_v55  ;;  %v11793_v51 = vpop.f32.mrb[25].mxu1  ;;  %v9344_v5 = vpop.f32.mrb[10].mxu0  ;;  %9527 = vmatmul.mubr.msk.f32.gmra.mrb[130].mxu1 %vm1096_vm3, %v6193_v17  ;;  %v6392_v15 = vrot.slane %v6172_v16, 1  ;;  %v4134_v57 = vrot.slane %v12762_v28, 2 }
 0x214   : > { %v5381_v37 = vmax.f32 %v5253_v40, 0.0  ;;  %v9619_v49 = vadd.f32 %v9344_v5, %v11598_v19  ;;  %v4521_v38 = vpop.f32.mrb[11].mxu0  ;;  %9502 = vmatmul.mubr.msk.f32.gmra.mrb[116].mxu0 %vm1096_vm3, %v4125_v50  ;;  %9533 = vmatprep.mubr.msk.f32.mxu1 %vm1096_vm3, %v6167_v24  ;;  %v4131_v19 = vsel %vm3888_vm5, %v4128_v25, %v4130_v1  ;;  %v9601_v24 = vpack.c.bf16 %v7372_v22, %v7371_v8 }
 0x215   : > { %7848 = vst [vmem:[%s11693_s21 + $0x18] sm:$0xff] %v7534_v39   ;;  %v5380_v61 = vmax.f32 %v5252_v62, 0.0  ;;  %v9620_v7 = vadd.f32 %v4521_v38, %v11602_v23  ;;  %9504 = vmatprep.mubr.msk.f32.mxu0 %vm1096_vm3, %v4127_v32  ;;  %v6394_v63 = vrot.slane %v6173_v43, 1  ;;  %v6174_v44 = vcvt.s32.f32 %v11790_v53 }
 0x216   : > { %v5255_v12 = vadd.f32 %v9619_v49, %v11646_v55  ;;  %v11819_v36 = vpop.f32.mrb[26].mxu1  ;;  %v6175_v28 = vcvt.s32.f32 %v11803_v42  ;;  %v4133_v32 = vsel %vm3888_vm5, %v4130_v1, %v4132_v56  ;;  %v6393_v39 = vsel %vm838_vm4, %v11735_v33, %v6392_v15 }
 0x217   : > { %v7539_v17 = vpack.c.bf16 %v5381_v37, %v5380_v61  ;;  %v5254_v23 = vadd.f32 %v9620_v7, %v11646_v55  ;;  %v11825_v21 = vpop.f32.mrb[27].mxu1  ;;  %v9347_v6 = vpop.f32.mrb[12].mxu0  ;;  %9534 = vmatmul.mubr.msk.f32.vlgmr.msra.gmra.mrb[128].mxu1 %vm1096_vm3, %v6168_v34  ;;  %v12765_v62 = vcvt.s32.f32 %v11637_v20  ;;  %v6396_v20 = vrot.slane %v6174_v44, 1 }
 0x218   : > { %v5383_v25 = vmax.f32 %v5255_v12, 0.0  ;;  %v9621_v50 = vadd.f32 %v9347_v6, %v11612_v26  ;;  %9600 = vmatpush3.bf16.msk.msra.mxu1 %vm10132_vm2, %v11758_v9  ;;  %v4531_v40 = vpop.f32.mrb[13].mxu0  ;;  %9505 = vmatmul.mubr.msk.f32.gmra.mrb[118].mxu0 %vm1096_vm3, %v4129_v54  ;;  %v4135_v26 = vsel %vm3888_vm5, %v4132_v56, %v4134_v57  ;;  %v12766_v9 = vcvt.s32.f32 %v10985_v58 }
 0x219   : > { %7849 = vst [vmem:[%s11693_s21 + $0x20] sm:$0xff] %v7539_v17   ;;  %v5382_v27 = vmax.f32 %v5254_v23, 0.0  ;;  %v9622_v34 = vadd.f32 %v4531_v40, %v11616_v35  ;;  %9536 = vmatprep.mubr.msk.f32.mxu1 %vm1096_vm3, %v12765_v62  ;;  %9507 = vmatprep.mubr.msk.f32.mxu0 %vm1096_vm3, %v4131_v19  ;;  %v6395_v35 = vsel %vm838_vm4, %v6392_v15, %v6394_v63  ;;  %v12767_v33 = vcvt.s32.f32 %v11001_v14 }
 0x21a   : > { %v4136_v5 = vrot.slane %v12766_v9, 2  ;;  %v5257_v1 = vadd.f32 %v9621_v50, %v11646_v55  ;;  %v11849_v54 = vpop.f32.mrb[28].mxu1  ;;  %9603 = vmatprep.subr.msk.bf16.mxu1 %vm10132_vm2, %v9601_v24  ;;  %v12768_v38 = vcvt.s32.f32 %v11649_v10  ;;  %v6398_v56 = vrot.slane %v6175_v28, 1 }
 0x21b   : > { %v4138_v8 = vrot.slane %v12767_v33, 2  ;;  %v7544_v22 = vpack.c.bf16 %v5383_v25, %v5382_v27  ;;  %v5256_v58 = vadd.f32 %v9622_v34, %v11646_v55  ;;  %v11859_v37 = vpop.f32.mrb[29].mxu1  ;;  %v9350_v49 = vpop.f32.mrb[14].mxu0  ;;  %v12769_v15 = vcvt.s32.f32 %v11012_v31 }
 0x21c   : > { %9537 = vmatmul.mubr.msk.f32.gmra.mrb[130].mxu1 %vm1096_vm3, %v12768_v38  ;;  %v5385_v7 = vmax.f32 %v5257_v1, 0.0  ;;  %v9623_v14 = vadd.f32 %v9350_v49, %v11633_v18  ;;  %v4541_v19 = vpop.f32.mrb[15].mxu0  ;;  %9508 = vmatmul.mubr.msk.f32.gmra.mrb[120].mxu0 %vm1096_vm3, %v4133_v32  ;;  %v12770_v12 = vcvt.s32.f32 %v11676_v48  ;;  %v6503_v10 = vrot.slane %v6172_v16, 2 }
 0x21d   : > { %v4140_v61 = vrot.slane %v12769_v15, 2  ;;  %9543 = vmatprep.mubr.msk.f32.mxu1 %vm1096_vm3, %v6393_v39  ;;  %7850 = vst [vmem:[%s11693_s21 + $0x28] sm:$0xff] %v7544_v22   ;;  %v5384_v23 = vmax.f32 %v5256_v58, 0.0  ;;  %v9624_v6 = vadd.f32 %v4541_v19, %v11639_v2  ;;  %9510 = vmatprep.mubr.msk.f32.mxu0 %vm1096_vm3, %v4135_v26  ;;  %v4137_v31 = vsel %vm3888_vm5, %v4134_v57, %v4136_v5 }
 0x21e   : > { %v6502_v17 = vrot.slane %v12770_v12, 2  ;;  %v5259_v18 = vadd.f32 %v9623_v14, %v11646_v55  ;;  %v11880_v25 = vpop.f32.mrb[30].mxu1  ;;  %v6397_v50 = vsel %vm838_vm4, %v6394_v63, %v6396_v20  ;;  %v4139_v48 = vsel %vm3888_vm5, %v4136_v5, %v4138_v8 }
 0x21f   : > { %v12771_v40 = vcvt.s32.f32 %v11015_v47  ;;  %v7549_v16 = vpack.c.bf16 %v5385_v7, %v5384_v23  ;;  %v5258_v32 = vadd.f32 %v9624_v6, %v11646_v55  ;;  %v11887_v2 = vpop.f32.mrb[31].mxu1  ;;  %v9353_v39 = vpop.f32.mrb[16].mxu0  ;;  %v6399_v57 = vsel %vm838_vm4, %v6396_v20, %v6398_v56 }
 0x220   : > { %9544 = vmatmul.mubr.msk.f32.vlgmr.msra.gmra.mrb[128].mxu1 %vm1096_vm3, %v6395_v35  ;;  %v4141_v27 = vsel %vm3888_vm5, %v4138_v8, %v4140_v61  ;;  %v5387_v34 = vmax.f32 %v5259_v18, 0.0  ;;  %v9625_v63 = vadd.f32 %v9353_v39, %v11664_v11  ;;  %v4551_v47 = vpop.f32.mrb[17].mxu0  ;;  %9511 = vmatmul.mubr.msk.f32.gmra.mrb[122].mxu0 %vm1096_vm3, %v4137_v31  ;;  %v6504_v62 = vsel %vm3888_vm5, %v6502_v17, %v6503_v10 }
 0x221   : > { %v4142_v59 = vrot.slane %v12771_v40, 2  ;;  %9606 = vmatpush3.bf16.msk.msra.mxu1 %vm10132_vm2, %v9601_v24  ;;  %v6505_v26 = vrot.slane %v6173_v43, 2  ;;  %7851 = vst [vmem:[%s11693_s21 + $0x30] sm:$0xff] %v7549_v16   ;;  %v5386_v9 = vmax.f32 %v5258_v32, 0.0  ;;  %v9626_v5 = vadd.f32 %v4551_v47, %v11670_v29  ;;  %9546 = vmatprep.mubr.msk.f32.mxu1 %vm1096_vm3, %v6397_v50 }
 0x222   : > { %9513 = vmatprep.mubr.msk.f32.mxu0 %vm1096_vm3, %v4139_v48  ;;  %v12772_v11 = vcvt.s32.f32 %v11023_v52  ;;  %v6507_v24 = vrot.slane %v6174_v44, 2  ;;  %v5261_v1 = vadd.f32 %v9625_v63, %v11646_v55  ;;  %v11908_v35 = vpop.f32.mrb[32].mxu1  ;;  %v6509_v22 = vrot.slane %v6175_v28, 2 }
 0x223   : > { %v4143_v13 = vsel %vm3888_vm5, %v4140_v61, %v4142_v59  ;;  %v7554_v43 = vpack.c.bf16 %v5387_v34, %v5386_v9  ;;  %v5260_v29 = vadd.f32 %v9626_v5, %v11646_v55  ;;  %v11912_v20 = vpop.f32.mrb[33].mxu1  ;;  %v9356_v33 = vpop.f32.mrb[18].mxu0  ;;  %v6506_v44 = vsel %vm3888_vm5, %v6503_v10, %v6505_v26 }
 0x224   : > { %v4144_v3 = vrot.slane %v12772_v11, 2  ;;  %9547 = vmatmul.mubr.msk.f32.gmra.mrb[130].mxu1 %vm1096_vm3, %v6399_v57  ;;  %v5389_v52 = vmax.f32 %v5261_v1, 0.0  ;;  %v9627_v8 = vadd.f32 %v9356_v33, %v11696_v30  ;;  %v4561_v53 = vpop.f32.mrb[19].mxu0  ;;  %9514 = vmatmul.mubr.msk.f32.gmra.mrb[124].mxu0 %vm1096_vm3, %v4141_v27  ;;  %v6508_v30 = vsel %vm3888_vm5, %v6505_v26, %v6507_v24 }
 0x225   : > { %9553 = vmatprep.mubr.msk.f32.mxu1 %vm1096_vm3, %v6504_v62  ;;  %7852 = vst [vmem:[%s11693_s21 + $0x38] sm:$0xff] %v7554_v43   ;;  %v5388_v58 = vmax.f32 %v5260_v29, 0.0  ;;  %v9628_v49 = vadd.f32 %v4561_v53, %v11703_v0  ;;  %9516 = vmatprep.mubr.msk.f32.mxu0 %vm1096_vm3, %v4143_v13  ;;  %v6510_v12 = vsel %vm3888_vm5, %v6507_v24, %v6509_v22 }
 0x226   : > { %v4145_v38 = vsel %vm3888_vm5, %v4142_v59, %v4144_v3  ;;  %v5263_v56 = vadd.f32 %v9627_v8, %v11646_v55  ;;  %v11927_v15 = vpop.f32.mrb[34].mxu1 }
 0x227   : > { %v7559_v61 = vpack.c.bf16 %v5389_v52, %v5388_v58  ;;  %v5262_v7 = vadd.f32 %v9628_v49, %v11646_v55  ;;  %v11930_v42 = vpop.f32.mrb[35].mxu1  ;;  %v9359_v28 = vpop.f32.mrb[20].mxu0 }
 0x228   : > { %9554 = vmatmul.mubr.msk.f32.vlgmr.msra.gmra.mrb[128].mxu1 %vm1096_vm3, %v6506_v44  ;;  %v5391_v0 = vmax.f32 %v5263_v56, 0.0  ;;  %v9629_v14 = vadd.f32 %v9359_v28, %v11722_v41  ;;  %v4571_v19 = vpop.f32.mrb[21].mxu0  ;;  %9517 = vmatmul.mubr.msk.f32.gmra.mrb[126].mxu0 %vm1096_vm3, %v4145_v38 }
 0x229   : > { %9556 = vmatprep.mubr.msk.f32.mxu1 %vm1096_vm3, %v6508_v30  ;;  %7853 = vst [vmem:[%s11693_s21 + $0x40] sm:$0xff] %v7559_v61   ;;  %v5390_v17 = vmax.f32 %v5262_v7, 0.0  ;;  %v9630_v10 = vadd.f32 %v4571_v19, %v11728_v60 }
 0x22a   : > { %v5265_v23 = vadd.f32 %v9629_v14, %v11646_v55  ;;  %v11940_v6 = vpop.f32.mrb[36].mxu1 }
 0x22b   : > { %v7564_v31 = vpack.c.bf16 %v5391_v0, %v5390_v17  ;;  %v5264_v18 = vadd.f32 %v9630_v10, %v11646_v55  ;;  %v11943_v41 = vpop.f32.mrb[37].mxu1  ;;  %v9362_v50 = vpop.f32.mrb[22].mxu0 }
 0x22c   : > { %9557 = vmatmul.mubr.msk.f32.gmra.mrb[130].mxu1 %vm1096_vm3, %v6510_v12  ;;  %v5393_v48 = vmax.f32 %v5265_v23, 0.0  ;;  %v9631_v40 = vadd.f32 %v9362_v50, %v11756_v45  ;;  %v4581_v59 = vpop.f32.mrb[23].mxu0 }
 0x22d   : > { %7854 = vst [vmem:[%s11693_s21 + $0x48] sm:$0xff] %v7564_v31   ;;  %v5392_v16 = vmax.f32 %v5264_v18, 0.0  ;;  %v9632_v60 = vadd.f32 %v4581_v59, %v11764_v4 }
 0x22e   : > { %v5267_v32 = vadd.f32 %v9631_v40, %v11646_v55  ;;  %v11950_v39 = vpop.f32.mrb[38].mxu1 }
 0x22f   : > { %v7569_v57 = vpack.c.bf16 %v5393_v48, %v5392_v16  ;;  %v5266_v27 = vadd.f32 %v9632_v60, %v11646_v55  ;;  %v11953_v34 = vpop.f32.mrb[39].mxu1  ;;  %v9365_v63 = vpop.f32.mrb[24].mxu0 }
 0x230   : > { %v5395_v47 = vmax.f32 %v5267_v32, 0.0  ;;  %v9633_v62 = vadd.f32 %v9365_v63, %v11783_v46  ;;  %v4591_v45 = vpop.f32.mrb[25].mxu0 }
 0x231   : > { %7855 = vst [vmem:[%s11693_s21 + $0x50] sm:$0xff] %v7569_v57   ;;  %v5394_v26 = vmax.f32 %v5266_v27, 0.0  ;;  %v9634_v9 = vadd.f32 %v4591_v45, %v11793_v51 }
 0x232   : > { %v5269_v4 = vadd.f32 %v9633_v62, %v11646_v55  ;;  %v11959_v5 = vpop.f32.mrb[40].mxu1 }
 0x233   : > { %v7574_v11 = vpack.c.bf16 %v5395_v47, %v5394_v26  ;;  %v5268_v3 = vadd.f32 %v9634_v9, %v11646_v55  ;;  %v11962_v24 = vpop.f32.mrb[41].mxu1  ;;  %v9368_v1 = vpop.f32.mrb[26].mxu0 }
 0x234   : > { %v5397_v13 = vmax.f32 %v5269_v4, 0.0  ;;  %v9635_v43 = vadd.f32 %v9368_v1, %v11819_v36  ;;  %v4601_v46 = vpop.f32.mrb[27].mxu0 }
 0x235   : > { %7856 = vst [vmem:[%s11693_s21 + $0x58] sm:$0xff] %v7574_v11   ;;  %v5396_v29 = vmax.f32 %v5268_v3, 0.0  ;;  %v9636_v33 = vadd.f32 %v4601_v46, %v11825_v21 }
 0x236   : > { %v5271_v51 = vadd.f32 %v9635_v43, %v11646_v55  ;;  %v11968_v52 = vpop.f32.mrb[42].mxu1 }
 0x237   : > { %v7579_v8 = vpack.c.bf16 %v5397_v13, %v5396_v29  ;;  %v5270_v53 = vadd.f32 %v9636_v33, %v11646_v55  ;;  %v11971_v44 = vpop.f32.mrb[43].mxu1  ;;  %v9371_v22 = vpop.f32.mrb[28].mxu0 }
 0x238   : > { %v5399_v58 = vmax.f32 %v5271_v51, 0.0  ;;  %v9637_v49 = vadd.f32 %v9371_v22, %v11849_v54  ;;  %v4611_v36 = vpop.f32.mrb[29].mxu0 }
 0x239   : > { %7857 = vst [vmem:[%s11693_s21 + $0x60] sm:$0xff] %v7579_v8   ;;  %v5398_v38 = vmax.f32 %v5270_v53, 0.0  ;;  %v9638_v30 = vadd.f32 %v4611_v36, %v11859_v37 }
 0x23a   : > { %v5273_v21 = vadd.f32 %v9637_v49, %v11646_v55  ;;  %v11977_v56 = vpop.f32.mrb[44].mxu1 }
 0x23b   : > { %v7584_v61 = vpack.c.bf16 %v5399_v58, %v5398_v38  ;;  %v5272_v7 = vadd.f32 %v9638_v30, %v11646_v55  ;;  %v11980_v28 = vpop.f32.mrb[45].mxu1  ;;  %v9374_v0 = vpop.f32.mrb[30].mxu0 }
 0x23c   : > { %v5401_v14 = vmax.f32 %v5273_v21, 0.0  ;;  %v9639_v19 = vadd.f32 %v9374_v0, %v11880_v25  ;;  %v4621_v54 = vpop.f32.mrb[31].mxu0 }
 0x23d   : > { %7858 = vst [vmem:[%s11693_s21 + $0x68] sm:$0xff] %v7584_v61   ;;  %v5400_v12 = vmax.f32 %v5272_v7, 0.0  ;;  %v9640_v17 = vadd.f32 %v4621_v54, %v11887_v2 }
 0x23e   : > { %v5275_v37 = vadd.f32 %v9639_v19, %v11646_v55  ;;  %v11986_v10 = vpop.f32.mrb[46].mxu1 }
 0x23f   : > { %v7589_v23 = vpack.c.bf16 %v5401_v14, %v5400_v12  ;;  %v5274_v31 = vadd.f32 %v9640_v17, %v11646_v55  ;;  %v11989_v18 = vpop.f32.mrb[47].mxu1  ;;  %v9377_v50 = vpop.f32.mrb[32].mxu0 }
 0x240   : > { %v5403_v48 = vmax.f32 %v5275_v37, 0.0  ;;  %v9641_v40 = vadd.f32 %v9377_v50, %v11908_v35  ;;  %v4631_v25 = vpop.f32.mrb[33].mxu0 }
 0x241   : > { %7859 = vst [vmem:[%s11693_s21 + $0x70] sm:$0xff] %v7589_v23   ;;  %v5402_v59 = vmax.f32 %v5274_v31, 0.0  ;;  %v9642_v16 = vadd.f32 %v4631_v25, %v11912_v20 }
 0x242   : > { %v5277_v2 = vadd.f32 %v9641_v40, %v11646_v55  ;;  %v11995_v60 = vpop.f32.mrb[48].mxu1 }
 0x243   : > { %v7594_v32 = vpack.c.bf16 %v5403_v48, %v5402_v59  ;;  %v5276_v57 = vadd.f32 %v9642_v16, %v11646_v55  ;;  %v11998_v27 = vpop.f32.mrb[49].mxu1  ;;  %v9380_v63 = vpop.f32.mrb[34].mxu0 }
 0x244   : > { %v5405_v47 = vmax.f32 %v5277_v2, 0.0  ;;  %v9643_v62 = vadd.f32 %v9380_v63, %v11927_v15  ;;  %v4641_v35 = vpop.f32.mrb[35].mxu0 }
 0x245   : > { %7860 = vst [vmem:[%s11693_s21 + $0x78] sm:$0xff] %v7594_v32   ;;  %v5404_v45 = vmax.f32 %v5276_v57, 0.0  ;;  %v9644_v26 = vadd.f32 %v4641_v35, %v11930_v42 }
 0x246   : > { %v5279_v20 = vadd.f32 %v9643_v62, %v11646_v55  ;;  %v12004_v9 = vpop.f32.mrb[50].mxu1 }
 0x247   : > { %v7599_v4 = vpack.c.bf16 %v5405_v47, %v5404_v45  ;;  %v5278_v11 = vadd.f32 %v9644_v26, %v11646_v55  ;;  %v12007_v3 = vpop.f32.mrb[51].mxu1  ;;  %v9383_v1 = vpop.f32.mrb[36].mxu0 }
 0x248   : > { %v5407_v13 = vmax.f32 %v5279_v20, 0.0  ;;  %v9645_v43 = vadd.f32 %v9383_v1, %v11940_v6  ;;  %v4651_v15 = vpop.f32.mrb[37].mxu0 }
 0x249   : > { %7861 = vst [vmem:[%s11693_s21 + $0x80] sm:$0xff] %v7599_v4   ;;  %v5406_v46 = vmax.f32 %v5278_v11, 0.0  ;;  %v9646_v29 = vadd.f32 %v4651_v15, %v11943_v41 }
 0x24a   : > { %v5281_v42 = vadd.f32 %v9645_v43, %v11646_v55  ;;  %v12013_v33 = vpop.f32.mrb[52].mxu1 }
 0x24b   : > { %v7604_v51 = vpack.c.bf16 %v5407_v13, %v5406_v46  ;;  %v5280_v8 = vadd.f32 %v9646_v29, %v11646_v55  ;;  %v12016_v53 = vpop.f32.mrb[53].mxu1  ;;  %v9386_v22 = vpop.f32.mrb[38].mxu0 }
 0x24c   : > { %v5409_v58 = vmax.f32 %v5281_v42, 0.0  ;;  %v9647_v49 = vadd.f32 %v9386_v22, %v11950_v39  ;;  %v4661_v6 = vpop.f32.mrb[39].mxu0 }
 0x24d   : > { %7862 = vst [vmem:[%s11693_s21 + $0x88] sm:$0xff] %v7604_v51   ;;  %v5408_v36 = vmax.f32 %v5280_v8, 0.0  ;;  %v9648_v38 = vadd.f32 %v4661_v6, %v11953_v34 }
 0x24e   : > { %v5283_v41 = vadd.f32 %v9647_v49, %v11646_v55  ;;  %v12022_v30 = vpop.f32.mrb[54].mxu1 }
 0x24f   : > { %v7609_v21 = vpack.c.bf16 %v5409_v58, %v5408_v36  ;;  %v5282_v61 = vadd.f32 %v9648_v38, %v11646_v55  ;;  %v12025_v7 = vpop.f32.mrb[55].mxu1  ;;  %v9389_v0 = vpop.f32.mrb[40].mxu0 }
 0x250   : > { %v5411_v14 = vmax.f32 %v5283_v41, 0.0  ;;  %v9649_v19 = vadd.f32 %v9389_v0, %v11959_v5  ;;  %v4671_v39 = vpop.f32.mrb[41].mxu0 }
 0x251   : > { %7863 = vst [vmem:[%s11693_s21 + $0x90] sm:$0xff] %v7609_v21   ;;  %v5410_v54 = vmax.f32 %v5282_v61, 0.0  ;;  %v9650_v12 = vadd.f32 %v4671_v39, %v11962_v24 }
 0x252   : > { %v5285_v34 = vadd.f32 %v9649_v19, %v11646_v55  ;;  %v12031_v17 = vpop.f32.mrb[56].mxu1 }
 0x253   : > { %v7614_v37 = vpack.c.bf16 %v5411_v14, %v5410_v54  ;;  %v5284_v23 = vadd.f32 %v9650_v12, %v11646_v55  ;;  %v12034_v31 = vpop.f32.mrb[57].mxu1  ;;  %v9392_v50 = vpop.f32.mrb[42].mxu0 }
 0x254   : > { %v5413_v48 = vmax.f32 %v5285_v34, 0.0  ;;  %v9651_v40 = vadd.f32 %v9392_v50, %v11968_v52  ;;  %v4681_v5 = vpop.f32.mrb[43].mxu0 }
 0x255   : > { %7864 = vst [vmem:[%s11693_s21 + $0x98] sm:$0xff] %v7614_v37   ;;  %v5412_v25 = vmax.f32 %v5284_v23, 0.0  ;;  %v9652_v59 = vadd.f32 %v4681_v5, %v11971_v44 }
 0x256   : > { %v5287_v24 = vadd.f32 %v9651_v40, %v11646_v55  ;;  %v12040_v16 = vpop.f32.mrb[58].mxu1 }
 0x257   : > { %v7619_v2 = vpack.c.bf16 %v5413_v48, %v5412_v25  ;;  %v5286_v32 = vadd.f32 %v9652_v59, %v11646_v55  ;;  %v12043_v57 = vpop.f32.mrb[59].mxu1  ;;  %v9395_v63 = vpop.f32.mrb[44].mxu0 }
 0x258   : > { %v5415_v47 = vmax.f32 %v5287_v24, 0.0  ;;  %v9653_v62 = vadd.f32 %v9395_v63, %v11977_v56  ;;  %v4691_v52 = vpop.f32.mrb[45].mxu0 }
 0x259   : > { %7865 = vst [vmem:[%s11693_s21 + $0xa0] sm:$0xff] %v7619_v2   ;;  %v5414_v35 = vmax.f32 %v5286_v32, 0.0  ;;  %v9654_v45 = vadd.f32 %v4691_v52, %v11980_v28 }
 0x25a   : > { %v5289_v44 = vadd.f32 %v9653_v62, %v11646_v55  ;;  %v12049_v26 = vpop.f32.mrb[60].mxu1 }
 0x25b   : > { %v7624_v20 = vpack.c.bf16 %v5415_v47, %v5414_v35  ;;  %v5288_v4 = vadd.f32 %v9654_v45, %v11646_v55  ;;  %v12052_v11 = vpop.f32.mrb[61].mxu1  ;;  %v9398_v1 = vpop.f32.mrb[46].mxu0 }
 0x25c   : > { %v5417_v13 = vmax.f32 %v5289_v44, 0.0  ;;  %v9655_v43 = vadd.f32 %v9398_v1, %v11986_v10  ;;  %v4701_v56 = vpop.f32.mrb[47].mxu0 }
 0x25d   : > { %7866 = vst [vmem:[%s11693_s21 + $0xa8] sm:$0xff] %v7624_v20   ;;  %v5416_v15 = vmax.f32 %v5288_v4, 0.0  ;;  %v9656_v46 = vadd.f32 %v4701_v56, %v11989_v18 }
 0x25e   : > { %v5291_v28 = vadd.f32 %v9655_v43, %v11646_v55  ;;  %v12058_v29 = vpop.f32.mrb[62].mxu1 }
 0x25f   : > { %v7629_v42 = vpack.c.bf16 %v5417_v13, %v5416_v15  ;;  %v5290_v51 = vadd.f32 %v9656_v46, %v11646_v55  ;;  %v12061_v8 = vpop.f32.mrb[63].mxu1  ;;  %v9401_v22 = vpop.f32.mrb[48].mxu0 }
 0x260   : > { %v5419_v58 = vmax.f32 %v5291_v28, 0.0  ;;  %v9657_v49 = vadd.f32 %v9401_v22, %v11995_v60  ;;  %v4711_v10 = vpop.f32.mrb[49].mxu0 }
 0x261   : > { %7867 = vst [vmem:[%s11693_s21 + $0xb0] sm:$0xff] %v7629_v42   ;;  %v5418_v6 = vmax.f32 %v5290_v51, 0.0  ;;  %v9658_v36 = vadd.f32 %v4711_v10, %v11998_v27 }
 0x262   : > { %v5293_v18 = vadd.f32 %v9657_v49, %v11646_v55  ;;  %v12067_v38 = vpop.f32.mrb[64].mxu1 }
 0x263   : > { %v7634_v41 = vpack.c.bf16 %v5419_v58, %v5418_v6  ;;  %v5292_v21 = vadd.f32 %v9658_v36, %v11646_v55  ;;  %v12070_v61 = vpop.f32.mrb[65].mxu1  ;;  %v9404_v0 = vpop.f32.mrb[50].mxu0 }
 0x264   : > { %v5421_v14 = vmax.f32 %v5293_v18, 0.0  ;;  %v9659_v19 = vadd.f32 %v9404_v0, %v12004_v9  ;;  %v4721_v60 = vpop.f32.mrb[51].mxu0 }
 0x265   : > { %7868 = vst [vmem:[%s11693_s21 + $0xb8] sm:$0xff] %v7634_v41   ;;  %v5420_v39 = vmax.f32 %v5292_v21, 0.0  ;;  %v9660_v54 = vadd.f32 %v4721_v60, %v12007_v3 }
 0x266   : > { %v5295_v27 = vadd.f32 %v9659_v19, %v11646_v55  ;;  %v12076_v12 = vpop.f32.mrb[66].mxu1 }
 0x267   : > { %v7639_v34 = vpack.c.bf16 %v5421_v14, %v5420_v39  ;;  %v5294_v37 = vadd.f32 %v9660_v54, %v11646_v55  ;;  %v12079_v23 = vpop.f32.mrb[67].mxu1  ;;  %v9407_v50 = vpop.f32.mrb[52].mxu0 }
 0x268   : > { %v5423_v48 = vmax.f32 %v5295_v27, 0.0  ;;  %v9661_v40 = vadd.f32 %v9407_v50, %v12013_v33  ;;  %v4731_v9 = vpop.f32.mrb[53].mxu0 }
 0x269   : > { %7869 = vst [vmem:[%s11693_s21 + $0xc0] sm:$0xff] %v7639_v34   ;;  %v5422_v5 = vmax.f32 %v5294_v37, 0.0  ;;  %v9662_v25 = vadd.f32 %v4731_v9, %v12016_v53 }
 0x26a   : > { %v5297_v3 = vadd.f32 %v9661_v40, %v11646_v55  ;;  %v12085_v59 = vpop.f32.mrb[68].mxu1 }
 0x26b   : > { %v7644_v24 = vpack.c.bf16 %v5423_v48, %v5422_v5  ;;  %v5296_v2 = vadd.f32 %v9662_v25, %v11646_v55  ;;  %v12088_v32 = vpop.f32.mrb[69].mxu1  ;;  %v9410_v63 = vpop.f32.mrb[54].mxu0 }
 0x26c   : > { %v5425_v47 = vmax.f32 %v5297_v3, 0.0  ;;  %v9663_v62 = vadd.f32 %v9410_v63, %v12022_v30  ;;  %v4741_v33 = vpop.f32.mrb[55].mxu0 }
 0x26d   : > { %7870 = vst [vmem:[%s11693_s21 + $0xc8] sm:$0xff] %v7644_v24   ;;  %v5424_v52 = vmax.f32 %v5296_v2, 0.0  ;;  %v9664_v35 = vadd.f32 %v4741_v33, %v12025_v7 }
 0x26e   : > { %v5299_v53 = vadd.f32 %v9663_v62, %v11646_v55  ;;  %v12094_v45 = vpop.f32.mrb[70].mxu1 }
 0x26f   : > { %v7649_v44 = vpack.c.bf16 %v5425_v47, %v5424_v52  ;;  %v5298_v20 = vadd.f32 %v9664_v35, %v11646_v55  ;;  %v12097_v4 = vpop.f32.mrb[71].mxu1  ;;  %v9413_v1 = vpop.f32.mrb[56].mxu0 }
 0x270   : > { %v5427_v13 = vmax.f32 %v5299_v53, 0.0  ;;  %v9665_v43 = vadd.f32 %v9413_v1, %v12031_v17  ;;  %v4751_v30 = vpop.f32.mrb[57].mxu0 }
 0x271   : > { %7871 = vst [vmem:[%s11693_s21 + $0xd0] sm:$0xff] %v7649_v44   ;;  %v5426_v56 = vmax.f32 %v5298_v20, 0.0  ;;  %v9666_v15 = vadd.f32 %v4751_v30, %v12034_v31 }
 0x272   : > { %v5301_v7 = vadd.f32 %v9665_v43, %v11646_v55  ;;  %v12103_v46 = vpop.f32.mrb[72].mxu1 }
 0x273   : > { %v7654_v28 = vpack.c.bf16 %v5427_v13, %v5426_v56  ;;  %v5300_v42 = vadd.f32 %v9666_v15, %v11646_v55  ;;  %v12106_v51 = vpop.f32.mrb[73].mxu1  ;;  %v9416_v22 = vpop.f32.mrb[58].mxu0 }
 0x274   : > { %v5429_v58 = vmax.f32 %v5301_v7, 0.0  ;;  %v9667_v49 = vadd.f32 %v9416_v22, %v12040_v16  ;;  %v4761_v17 = vpop.f32.mrb[59].mxu0 }
 0x275   : > { %7872 = vst [vmem:[%s11693_s21 + $0xd8] sm:$0xff] %v7654_v28   ;;  %v5428_v10 = vmax.f32 %v5300_v42, 0.0  ;;  %v9668_v6 = vadd.f32 %v4761_v17, %v12043_v57 }
 0x276   : > { %v5303_v31 = vadd.f32 %v9667_v49, %v11646_v55  ;;  %v12112_v36 = vpop.f32.mrb[74].mxu1 }
 0x277   : > { %v7659_v18 = vpack.c.bf16 %v5429_v58, %v5428_v10  ;;  %v5302_v41 = vadd.f32 %v9668_v6, %v11646_v55  ;;  %v12115_v21 = vpop.f32.mrb[75].mxu1  ;;  %v9419_v0 = vpop.f32.mrb[60].mxu0 }
 0x278   : > { %v5431_v14 = vmax.f32 %v5303_v31, 0.0  ;;  %v9669_v19 = vadd.f32 %v9419_v0, %v12049_v26  ;;  %v4771_v16 = vpop.f32.mrb[61].mxu0 }
 0x279   : > { %7873 = vst [vmem:[%s11693_s21 + $0xe0] sm:$0xff] %v7659_v18   ;;  %v5430_v60 = vmax.f32 %v5302_v41, 0.0  ;;  %v9670_v39 = vadd.f32 %v4771_v16, %v12052_v11  ;;  %v12132_v11 = vld [vmem:[%s12409_s2] ss:$0 sm:$0xff] }
 0x27a   : > { %v5305_v57 = vadd.f32 %v9669_v19, %v11646_v55  ;;  %v12121_v54 = vpop.f32.mrb[76].mxu1 }
 0x27b   : > { %v7664_v27 = vpack.c.bf16 %v5431_v14, %v5430_v60  ;;  %v5304_v34 = vadd.f32 %v9670_v39, %v11646_v55  ;;  %v12124_v37 = vpop.f32.mrb[77].mxu1  ;;  %v9422_v50 = vpop.f32.mrb[62].mxu0 }
 0x27c   : > { %v5433_v48 = vmax.f32 %v5305_v57, 0.0  ;;  %v9671_v40 = vadd.f32 %v9422_v50, %v12058_v29  ;;  %v4781_v26 = vpop.f32.mrb[63].mxu0 }
 0x27d   : > { %7874 = vst [vmem:[%s11693_s21 + $0xe8] sm:$0xff] %v7664_v27   ;;  %v5432_v9 = vmax.f32 %v5304_v34, 0.0  ;;  %v9672_v5 = vadd.f32 %v4781_v26, %v12061_v8 }
 0x27e   : > { %v5307_v25 = vadd.f32 %v12132_v11, %v9671_v40  ;;  %v12135_v55 = vpop.f32.mrb[78].mxu1 }
 0x27f   : > { %v7669_v3 = vpack.c.bf16 %v5433_v48, %v5432_v9  ;;  %v5306_v24 = vadd.f32 %v12132_v11, %v9672_v5  ;;  %v12138_v2 = vpop.f32.mrb[79].mxu1  ;;  %v9425_v29 = vpop.f32.mrb[64].mxu0 }
 0x280   : > { %v5435_v63 = vmax.f32 %v5307_v25, 0.0  ;;  %v9673_v47 = vadd.f32 %v9425_v29, %v12067_v38  ;;  %v4791_v8 = vpop.f32.mrb[65].mxu0 }
 0x281   : > { %7875 = vst [vmem:[%s11693_s21 + $0xf0] sm:$0xff] %v7669_v3   ;;  %v5434_v62 = vmax.f32 %v5306_v24, 0.0  ;;  %v9674_v33 = vadd.f32 %v4791_v8, %v12070_v61 }
 0x282   : > { %v5309_v52 = vadd.f32 %v12132_v11, %v9673_v47  ;;  %v12144_v35 = vpop.f32.mrb[80].mxu1 }
 0x283   : > { %v7674_v53 = vpack.c.bf16 %v5435_v63, %v5434_v62  ;;  %v5308_v44 = vadd.f32 %v12132_v11, %v9674_v33  ;;  %v12147_v20 = vpop.f32.mrb[81].mxu1  ;;  %v9428_v1 = vpop.f32.mrb[66].mxu0 }
 0x284   : > { %v5437_v13 = vmax.f32 %v5309_v52, 0.0  ;;  %v9675_v43 = vadd.f32 %v9428_v1, %v12076_v12  ;;  %v4801_v38 = vpop.f32.mrb[67].mxu0 }
 0x285   : > { %7876 = vst [vmem:[%s11693_s21 + $0xf8] sm:$0xff] %v7674_v53   ;;  %v5436_v30 = vmax.f32 %v5308_v44, 0.0  ;;  %v9676_v56 = vadd.f32 %v4801_v38, %v12079_v23 }
 0x286   : > { %v5311_v61 = vadd.f32 %v12132_v11, %v9675_v43  ;;  %v12153_v15 = vpop.f32.mrb[82].mxu1 }
 0x287   : > { %v7679_v7 = vpack.c.bf16 %v5437_v13, %v5436_v30  ;;  %v5310_v28 = vadd.f32 %v12132_v11, %v9676_v56  ;;  %v12156_v42 = vpop.f32.mrb[83].mxu1  ;;  %v9431_v22 = vpop.f32.mrb[68].mxu0 }
 0x288   : > { %v5439_v58 = vmax.f32 %v5311_v61, 0.0  ;;  %v9677_v49 = vadd.f32 %v9431_v22, %v12085_v59  ;;  %v4811_v12 = vpop.f32.mrb[69].mxu0 }
 0x289   : > { %7877 = vst [vmem:[%s11693_s21 + $0x100] sm:$0xff] %v7679_v7   ;;  %v5438_v17 = vmax.f32 %v5310_v28, 0.0  ;;  %v9678_v10 = vadd.f32 %v4811_v12, %v12088_v32 }
 0x28a   : > { %v5313_v23 = vadd.f32 %v12132_v11, %v9677_v49  ;;  %v12162_v6 = vpop.f32.mrb[84].mxu1 }
 0x28b   : > { %v7684_v31 = vpack.c.bf16 %v5439_v58, %v5438_v17  ;;  %v5312_v18 = vadd.f32 %v12132_v11, %v9678_v10  ;;  %v12165_v41 = vpop.f32.mrb[85].mxu1  ;;  %v9434_v0 = vpop.f32.mrb[70].mxu0 }
 0x28c   : > { %v5441_v14 = vmax.f32 %v5313_v23, 0.0  ;;  %v9679_v19 = vadd.f32 %v9434_v0, %v12094_v45  ;;  %v4821_v59 = vpop.f32.mrb[71].mxu0 }
 0x28d   : > { %7878 = vst [vmem:[%s11693_s21 + $0x108] sm:$0xff] %v7684_v31   ;;  %v5440_v16 = vmax.f32 %v5312_v18, 0.0  ;;  %v9680_v60 = vadd.f32 %v4821_v59, %v12097_v4 }
 0x28e   : > { %v5315_v32 = vadd.f32 %v12132_v11, %v9679_v19  ;;  %v12171_v39 = vpop.f32.mrb[86].mxu1 }
 0x28f   : > { %v7689_v57 = vpack.c.bf16 %v5441_v14, %v5440_v16  ;;  %v5314_v27 = vadd.f32 %v12132_v11, %v9680_v60  ;;  %v12174_v34 = vpop.f32.mrb[87].mxu1  ;;  %v9437_v50 = vpop.f32.mrb[72].mxu0 }
 0x290   : > { %v5443_v48 = vmax.f32 %v5315_v32, 0.0  ;;  %v9681_v40 = vadd.f32 %v9437_v50, %v12103_v46  ;;  %v4831_v45 = vpop.f32.mrb[73].mxu0 }
 0x291   : > { %7879 = vst [vmem:[%s11693_s21 + $0x110] sm:$0xff] %v7689_v57   ;;  %v5442_v26 = vmax.f32 %v5314_v27, 0.0  ;;  %v9682_v9 = vadd.f32 %v4831_v45, %v12106_v51 }
 0x292   : > { %v5317_v4 = vadd.f32 %v12132_v11, %v9681_v40  ;;  %v12180_v5 = vpop.f32.mrb[88].mxu1 }
 0x293   : > { %v7694_v25 = vpack.c.bf16 %v5443_v48, %v5442_v26  ;;  %v5316_v3 = vadd.f32 %v12132_v11, %v9682_v9  ;;  %v12183_v24 = vpop.f32.mrb[89].mxu1  ;;  %v9440_v29 = vpop.f32.mrb[74].mxu0 }
 0x294   : > { %v5445_v63 = vmax.f32 %v5317_v4, 0.0  ;;  %v9683_v47 = vadd.f32 %v9440_v29, %v12112_v36  ;;  %v4841_v46 = vpop.f32.mrb[75].mxu0 }
 0x295   : > { %7880 = vst [vmem:[%s11693_s21 + $0x118] sm:$0xff] %v7694_v25   ;;  %v5444_v8 = vmax.f32 %v5316_v3, 0.0  ;;  %v9684_v62 = vadd.f32 %v4841_v46, %v12115_v21 }
 0x296   : > { %v5319_v51 = vadd.f32 %v12132_v11, %v9683_v47  ;;  %v12189_v33 = vpop.f32.mrb[90].mxu1 }
 0x297   : > { %v7699_v52 = vpack.c.bf16 %v5445_v63, %v5444_v8  ;;  %v5318_v53 = vadd.f32 %v12132_v11, %v9684_v62  ;;  %v12192_v44 = vpop.f32.mrb[91].mxu1  ;;  %v9443_v1 = vpop.f32.mrb[76].mxu0 }
 0x298   : > { %v5447_v13 = vmax.f32 %v5319_v51, 0.0  ;;  %v9685_v43 = vadd.f32 %v9443_v1, %v12121_v54  ;;  %v4851_v36 = vpop.f32.mrb[77].mxu0 }
 0x299   : > { %7881 = vst [vmem:[%s11693_s21 + $0x120] sm:$0xff] %v7699_v52   ;;  %v5446_v38 = vmax.f32 %v5318_v53, 0.0  ;;  %v9686_v30 = vadd.f32 %v4851_v36, %v12124_v37 }
 0x29a   : > { %v5321_v21 = vadd.f32 %v12132_v11, %v9685_v43  ;;  %v12198_v56 = vpop.f32.mrb[92].mxu1 }
 0x29b   : > { %v7704_v61 = vpack.c.bf16 %v5447_v13, %v5446_v38  ;;  %v5320_v7 = vadd.f32 %v12132_v11, %v9686_v30  ;;  %v12201_v28 = vpop.f32.mrb[93].mxu1  ;;  %v9446_v22 = vpop.f32.mrb[78].mxu0 }
 0x29c   : > { %v5449_v58 = vmax.f32 %v5321_v21, 0.0  ;;  %v9687_v49 = vadd.f32 %v9446_v22, %v12135_v55  ;;  %v4861_v54 = vpop.f32.mrb[79].mxu0 }
 0x29d   : > { %7882 = vst [vmem:[%s11693_s21 + $0x128] sm:$0xff] %v7704_v61   ;;  %v5448_v12 = vmax.f32 %v5320_v7, 0.0  ;;  %v9688_v17 = vadd.f32 %v4861_v54, %v12138_v2 }
 0x29e   : > { %v5323_v37 = vadd.f32 %v12132_v11, %v9687_v49  ;;  %v12207_v10 = vpop.f32.mrb[94].mxu1 }
 0x29f   : > { %v7709_v23 = vpack.c.bf16 %v5449_v58, %v5448_v12  ;;  %v5322_v31 = vadd.f32 %v12132_v11, %v9688_v17  ;;  %v12210_v18 = vpop.f32.mrb[95].mxu1  ;;  %v9449_v0 = vpop.f32.mrb[80].mxu0 }
 0x2a0   : > { %v5451_v14 = vmax.f32 %v5323_v37, 0.0  ;;  %v9689_v19 = vadd.f32 %v9449_v0, %v12144_v35  ;;  %v4871_v55 = vpop.f32.mrb[81].mxu0 }
 0x2a1   : > { %7883 = vst [vmem:[%s11693_s21 + $0x130] sm:$0xff] %v7709_v23   ;;  %v5450_v59 = vmax.f32 %v5322_v31, 0.0  ;;  %v9690_v16 = vadd.f32 %v4871_v55, %v12147_v20 }
 0x2a2   : > { %v5325_v2 = vadd.f32 %v12132_v11, %v9689_v19  ;;  %v12216_v60 = vpop.f32.mrb[96].mxu1 }
 0x2a3   : > { %v7714_v32 = vpack.c.bf16 %v5451_v14, %v5450_v59  ;;  %v5324_v57 = vadd.f32 %v12132_v11, %v9690_v16  ;;  %v12219_v27 = vpop.f32.mrb[97].mxu1  ;;  %v9452_v50 = vpop.f32.mrb[82].mxu0 }
 0x2a4   : > { %v5453_v48 = vmax.f32 %v5325_v2, 0.0  ;;  %v9691_v40 = vadd.f32 %v9452_v50, %v12153_v15  ;;  %v4881_v35 = vpop.f32.mrb[83].mxu0 }
 0x2a5   : > { %7884 = vst [vmem:[%s11693_s21 + $0x138] sm:$0xff] %v7714_v32   ;;  %v5452_v45 = vmax.f32 %v5324_v57, 0.0  ;;  %v9692_v26 = vadd.f32 %v4881_v35, %v12156_v42 }
 0x2a6   : > { %v5327_v20 = vadd.f32 %v12132_v11, %v9691_v40  ;;  %v12225_v9 = vpop.f32.mrb[98].mxu1 }
 0x2a7   : > { %v7719_v4 = vpack.c.bf16 %v5453_v48, %v5452_v45  ;;  %v5326_v25 = vadd.f32 %v12132_v11, %v9692_v26  ;;  %v12228_v3 = vpop.f32.mrb[99].mxu1  ;;  %v9455_v29 = vpop.f32.mrb[84].mxu0 }
 0x2a8   : > { %v5455_v63 = vmax.f32 %v5327_v20, 0.0  ;;  %v9693_v47 = vadd.f32 %v9455_v29, %v12162_v6  ;;  %v4891_v15 = vpop.f32.mrb[85].mxu0 }
 0x2a9   : > { %7885 = vst [vmem:[%s11693_s21 + $0x140] sm:$0xff] %v7719_v4   ;;  %v5454_v46 = vmax.f32 %v5326_v25, 0.0  ;;  %v9694_v8 = vadd.f32 %v4891_v15, %v12165_v41 }
 0x2aa   : > { %v5329_v42 = vadd.f32 %v12132_v11, %v9693_v47  ;;  %v12234_v62 = vpop.f32.mrb[100].mxu1 }
 0x2ab   : > { %v7724_v51 = vpack.c.bf16 %v5455_v63, %v5454_v46  ;;  %v5328_v52 = vadd.f32 %v12132_v11, %v9694_v8  ;;  %v12237_v53 = vpop.f32.mrb[101].mxu1  ;;  %v9458_v1 = vpop.f32.mrb[86].mxu0 }
 0x2ac   : > { %v5457_v13 = vmax.f32 %v5329_v42, 0.0  ;;  %v9695_v43 = vadd.f32 %v9458_v1, %v12171_v39  ;;  %v4901_v6 = vpop.f32.mrb[87].mxu0 }
 0x2ad   : > { %7886 = vst [vmem:[%s11693_s21 + $0x148] sm:$0xff] %v7724_v51   ;;  %v5456_v36 = vmax.f32 %v5328_v52, 0.0  ;;  %v9696_v38 = vadd.f32 %v4901_v6, %v12174_v34 }
 0x2ae   : > { %v5331_v41 = vadd.f32 %v12132_v11, %v9695_v43  ;;  %v12243_v30 = vpop.f32.mrb[102].mxu1 }
 0x2af   : > { %v7729_v21 = vpack.c.bf16 %v5457_v13, %v5456_v36  ;;  %v5330_v61 = vadd.f32 %v12132_v11, %v9696_v38  ;;  %v12246_v7 = vpop.f32.mrb[103].mxu1  ;;  %v9461_v22 = vpop.f32.mrb[88].mxu0 }
 0x2b0   : > { %v5459_v58 = vmax.f32 %v5331_v41, 0.0  ;;  %v9697_v49 = vadd.f32 %v9461_v22, %v12180_v5  ;;  %v4911_v39 = vpop.f32.mrb[89].mxu0 }
 0x2b1   : > { %7887 = vst [vmem:[%s11693_s21 + $0x150] sm:$0xff] %v7729_v21   ;;  %v5458_v54 = vmax.f32 %v5330_v61, 0.0  ;;  %v9698_v12 = vadd.f32 %v4911_v39, %v12183_v24 }
 0x2b2   : > { %v5333_v34 = vadd.f32 %v12132_v11, %v9697_v49  ;;  %v12252_v17 = vpop.f32.mrb[104].mxu1 }
 0x2b3   : > { %v7734_v37 = vpack.c.bf16 %v5459_v58, %v5458_v54  ;;  %v5332_v23 = vadd.f32 %v12132_v11, %v9698_v12  ;;  %v12255_v31 = vpop.f32.mrb[105].mxu1  ;;  %v9464_v0 = vpop.f32.mrb[90].mxu0 }
 0x2b4   : > { %v5461_v14 = vmax.f32 %v5333_v34, 0.0  ;;  %v9699_v19 = vadd.f32 %v9464_v0, %v12189_v33  ;;  %v4921_v5 = vpop.f32.mrb[91].mxu0 }
 0x2b5   : > { %7888 = vst [vmem:[%s11693_s21 + $0x158] sm:$0xff] %v7734_v37   ;;  %v5460_v55 = vmax.f32 %v5332_v23, 0.0  ;;  %v9700_v59 = vadd.f32 %v4921_v5, %v12192_v44 }
 0x2b6   : > { %v5335_v24 = vadd.f32 %v12132_v11, %v9699_v19  ;;  %v12261_v16 = vpop.f32.mrb[106].mxu1 }
 0x2b7   : > { %v7739_v2 = vpack.c.bf16 %v5461_v14, %v5460_v55  ;;  %v5334_v32 = vadd.f32 %v12132_v11, %v9700_v59  ;;  %v12264_v57 = vpop.f32.mrb[107].mxu1  ;;  %v9467_v50 = vpop.f32.mrb[92].mxu0 }
 0x2b8   : > { %v5463_v48 = vmax.f32 %v5335_v24, 0.0  ;;  %v9701_v40 = vadd.f32 %v9467_v50, %v12198_v56  ;;  %v4931_v33 = vpop.f32.mrb[93].mxu0 }
 0x2b9   : > { %7889 = vst [vmem:[%s11693_s21 + $0x160] sm:$0xff] %v7739_v2   ;;  %v5462_v35 = vmax.f32 %v5334_v32, 0.0  ;;  %v9702_v45 = vadd.f32 %v4931_v33, %v12201_v28 }
 0x2ba   : > { %v5337_v44 = vadd.f32 %v12132_v11, %v9701_v40  ;;  %v12270_v26 = vpop.f32.mrb[108].mxu1 }
 0x2bb   : > { %v7744_v20 = vpack.c.bf16 %v5463_v48, %v5462_v35  ;;  %v5336_v4 = vadd.f32 %v12132_v11, %v9702_v45  ;;  %v12273_v25 = vpop.f32.mrb[109].mxu1  ;;  %v9470_v29 = vpop.f32.mrb[94].mxu0 }
 0x2bc   : > { %v5465_v63 = vmax.f32 %v5337_v44, 0.0  ;;  %v9703_v47 = vadd.f32 %v9470_v29, %v12207_v10  ;;  %v4941_v56 = vpop.f32.mrb[95].mxu0 }
 0x2bd   : > { %7890 = vst [vmem:[%s11693_s21 + $0x168] sm:$0xff] %v7744_v20   ;;  %v5464_v15 = vmax.f32 %v5336_v4, 0.0  ;;  %v9704_v46 = vadd.f32 %v4941_v56, %v12210_v18 }
 0x2be   : > { %v5339_v28 = vadd.f32 %v12132_v11, %v9703_v47  ;;  %v12279_v8 = vpop.f32.mrb[110].mxu1 }
 0x2bf   : > { %v7749_v42 = vpack.c.bf16 %v5465_v63, %v5464_v15  ;;  %v5338_v51 = vadd.f32 %v12132_v11, %v9704_v46  ;;  %v12282_v52 = vpop.f32.mrb[111].mxu1  ;;  %v9473_v1 = vpop.f32.mrb[96].mxu0 }
 0x2c0   : > { %v5467_v13 = vmax.f32 %v5339_v28, 0.0  ;;  %v9705_v43 = vadd.f32 %v9473_v1, %v12216_v60  ;;  %v4951_v10 = vpop.f32.mrb[97].mxu0 }
 0x2c1   : > { %7891 = vst [vmem:[%s11693_s21 + $0x170] sm:$0xff] %v7749_v42   ;;  %v5466_v6 = vmax.f32 %v5338_v51, 0.0  ;;  %v9706_v36 = vadd.f32 %v4951_v10, %v12219_v27 }
 0x2c2   : > { %v5341_v18 = vadd.f32 %v12132_v11, %v9705_v43  ;;  %v12288_v38 = vpop.f32.mrb[112].mxu1 }
 0x2c3   : > { %v7754_v41 = vpack.c.bf16 %v5467_v13, %v5466_v6  ;;  %v5340_v21 = vadd.f32 %v12132_v11, %v9706_v36  ;;  %v12291_v61 = vpop.f32.mrb[113].mxu1  ;;  %v9476_v22 = vpop.f32.mrb[98].mxu0 }
 0x2c4   : > { %v5469_v58 = vmax.f32 %v5341_v18, 0.0  ;;  %v9707_v49 = vadd.f32 %v9476_v22, %v12225_v9  ;;  %v4961_v60 = vpop.f32.mrb[99].mxu0 }
 0x2c5   : > { %7892 = vst [vmem:[%s11693_s21 + $0x178] sm:$0xff] %v7754_v41   ;;  %v5468_v39 = vmax.f32 %v5340_v21, 0.0  ;;  %v9708_v54 = vadd.f32 %v4961_v60, %v12228_v3 }
 0x2c6   : > { %v5343_v27 = vadd.f32 %v12132_v11, %v9707_v49  ;;  %v12297_v12 = vpop.f32.mrb[114].mxu1 }
 0x2c7   : > { %v7759_v34 = vpack.c.bf16 %v5469_v58, %v5468_v39  ;;  %v5342_v37 = vadd.f32 %v12132_v11, %v9708_v54  ;;  %v12300_v23 = vpop.f32.mrb[115].mxu1  ;;  %v9479_v0 = vpop.f32.mrb[100].mxu0 }
 0x2c8   : > { %v5471_v14 = vmax.f32 %v5343_v27, 0.0  ;;  %v9709_v19 = vadd.f32 %v9479_v0, %v12234_v62  ;;  %v4971_v9 = vpop.f32.mrb[101].mxu0 }
 0x2c9   : > { %7893 = vst [vmem:[%s11693_s21 + $0x180] sm:$0xff] %v7759_v34   ;;  %v5470_v5 = vmax.f32 %v5342_v37, 0.0  ;;  %v9710_v55 = vadd.f32 %v4971_v9, %v12237_v53 }
 0x2ca   : > { %v5345_v3 = vadd.f32 %v12132_v11, %v9709_v19  ;;  %v12306_v59 = vpop.f32.mrb[116].mxu1 }
 0x2cb   : > { %v7764_v24 = vpack.c.bf16 %v5471_v14, %v5470_v5  ;;  %v5344_v2 = vadd.f32 %v12132_v11, %v9710_v55  ;;  %v12309_v32 = vpop.f32.mrb[117].mxu1  ;;  %v9482_v50 = vpop.f32.mrb[102].mxu0 }
 0x2cc   : > { %v5473_v48 = vmax.f32 %v5345_v3, 0.0  ;;  %v9711_v40 = vadd.f32 %v9482_v50, %v12243_v30  ;;  %v4981_v62 = vpop.f32.mrb[103].mxu0 }
 0x2cd   : > { %7894 = vst [vmem:[%s11693_s21 + $0x188] sm:$0xff] %v7764_v24   ;;  %v5472_v33 = vmax.f32 %v5344_v2, 0.0  ;;  %v9712_v35 = vadd.f32 %v4981_v62, %v12246_v7 }
 0x2ce   : > { %v5347_v53 = vadd.f32 %v12132_v11, %v9711_v40  ;;  %v12315_v45 = vpop.f32.mrb[118].mxu1 }
 0x2cf   : > { %v7769_v44 = vpack.c.bf16 %v5473_v48, %v5472_v33  ;;  %v5346_v20 = vadd.f32 %v12132_v11, %v9712_v35  ;;  %v12318_v4 = vpop.f32.mrb[119].mxu1  ;;  %v9485_v29 = vpop.f32.mrb[104].mxu0 }
 0x2d0   : > { %v5475_v63 = vmax.f32 %v5347_v53, 0.0  ;;  %v9713_v47 = vadd.f32 %v9485_v29, %v12252_v17  ;;  %v4991_v30 = vpop.f32.mrb[105].mxu0 }
 0x2d1   : > { %7895 = vst [vmem:[%s11693_s21 + $0x190] sm:$0xff] %v7769_v44   ;;  %v5474_v56 = vmax.f32 %v5346_v20, 0.0  ;;  %v9714_v15 = vadd.f32 %v4991_v30, %v12255_v31 }
 0x2d2   : > { %v5349_v7 = vadd.f32 %v12132_v11, %v9713_v47  ;;  %v12324_v46 = vpop.f32.mrb[120].mxu1 }
 0x2d3   : > { %v7774_v28 = vpack.c.bf16 %v5475_v63, %v5474_v56  ;;  %v5348_v42 = vadd.f32 %v12132_v11, %v9714_v15  ;;  %v12327_v51 = vpop.f32.mrb[121].mxu1  ;;  %v9488_v1 = vpop.f32.mrb[106].mxu0 }
 0x2d4   : > { %v5477_v13 = vmax.f32 %v5349_v7, 0.0  ;;  %v9715_v43 = vadd.f32 %v9488_v1, %v12261_v16  ;;  %v5001_v17 = vpop.f32.mrb[107].mxu0 }
 0x2d5   : > { %7896 = vst [vmem:[%s11693_s21 + $0x198] sm:$0xff] %v7774_v28   ;;  %v5476_v10 = vmax.f32 %v5348_v42, 0.0  ;;  %v9716_v6 = vadd.f32 %v5001_v17, %v12264_v57 }
 0x2d6   : > { %v5351_v31 = vadd.f32 %v12132_v11, %v9715_v43  ;;  %v12333_v36 = vpop.f32.mrb[122].mxu1 }
 0x2d7   : > { %v7779_v18 = vpack.c.bf16 %v5477_v13, %v5476_v10  ;;  %v5350_v41 = vadd.f32 %v12132_v11, %v9716_v6  ;;  %v12336_v21 = vpop.f32.mrb[123].mxu1  ;;  %v9491_v22 = vpop.f32.mrb[108].mxu0 }
 0x2d8   : > { %v5479_v58 = vmax.f32 %v5351_v31, 0.0  ;;  %v9717_v49 = vadd.f32 %v9491_v22, %v12270_v26  ;;  %v5011_v16 = vpop.f32.mrb[109].mxu0 }
 0x2d9   : > { %7897 = vst [vmem:[%s11693_s21 + $0x1a0] sm:$0xff] %v7779_v18   ;;  %v5478_v60 = vmax.f32 %v5350_v41, 0.0  ;;  %v9718_v39 = vadd.f32 %v5011_v16, %v12273_v25 }
 0x2da   : > { %v5353_v57 = vadd.f32 %v12132_v11, %v9717_v49  ;;  %v12342_v54 = vpop.f32.mrb[124].mxu1 }
 0x2db   : > { %v7784_v27 = vpack.c.bf16 %v5479_v58, %v5478_v60  ;;  %v5352_v34 = vadd.f32 %v12132_v11, %v9718_v39  ;;  %v12345_v37 = vpop.f32.mrb[125].mxu1  ;;  %v9494_v0 = vpop.f32.mrb[110].mxu0 }
 0x2dc   : > { %v5481_v14 = vmax.f32 %v5353_v57, 0.0  ;;  %v9719_v19 = vadd.f32 %v9494_v0, %v12279_v8  ;;  %v5021_v26 = vpop.f32.mrb[111].mxu0 }
 0x2dd   : > { %7898 = vst [vmem:[%s11693_s21 + $0x1a8] sm:$0xff] %v7784_v27   ;;  %v5480_v9 = vmax.f32 %v5352_v34, 0.0  ;;  %v9720_v5 = vadd.f32 %v5021_v26, %v12282_v52 }
 0x2de   : > { %v5355_v25 = vadd.f32 %v12132_v11, %v9719_v19  ;;  %v12351_v55 = vpop.f32.mrb[126].mxu1 }
 0x2df   : > { %v7789_v3 = vpack.c.bf16 %v5481_v14, %v5480_v9  ;;  %v5354_v24 = vadd.f32 %v12132_v11, %v9720_v5  ;;  %v12354_v2 = vpop.f32.mrb[127].mxu1  ;;  %v9497_v50 = vpop.f32.mrb[112].mxu0 }
 0x2e0   : > { %v5483_v48 = vmax.f32 %v5355_v25, 0.0  ;;  %v9721_v40 = vadd.f32 %v9497_v50, %v12288_v38  ;;  %v5031_v8 = vpop.f32.mrb[113].mxu0 }
 0x2e1   : > { %7899 = vst [vmem:[%s11693_s21 + $0x1b0] sm:$0xff] %v7789_v3   ;;  %v5482_v62 = vmax.f32 %v5354_v24, 0.0  ;;  %v9722_v33 = vadd.f32 %v5031_v8, %v12291_v61 }
 0x2e2   : > { %v5357_v52 = vadd.f32 %v12132_v11, %v9721_v40 }
 0x2e3   : > { %v7794_v35 = vpack.c.bf16 %v5483_v48, %v5482_v62  ;;  %v5356_v53 = vadd.f32 %v12132_v11, %v9722_v33  ;;  %v9500_v44 = vpop.f32.mrb[114].mxu0 }
 0x2e4   : > { %v5485_v20 = vmax.f32 %v5357_v52, 0.0  ;;  %v9723_v29 = vadd.f32 %v9500_v44, %v12297_v12  ;;  %v5041_v63 = vpop.f32.mrb[115].mxu0 }
 0x2e5   : > { %7900 = vst [vmem:[%s11693_s21 + $0x1b8] sm:$0xff] %v7794_v35   ;;  %v5484_v47 = vmax.f32 %v5356_v53, 0.0  ;;  %v9724_v38 = vadd.f32 %v5041_v63, %v12300_v23 }
 0x2e6   : > { %v5359_v30 = vadd.f32 %v12132_v11, %v9723_v29 }
 0x2e7   : > { %v7799_v56 = vpack.c.bf16 %v5485_v20, %v5484_v47  ;;  %v5358_v61 = vadd.f32 %v12132_v11, %v9724_v38  ;;  %v9503_v15 = vpop.f32.mrb[116].mxu0 }
 0x2e8   : > { %v5487_v7 = vmax.f32 %v5359_v30, 0.0  ;;  %v9725_v28 = vadd.f32 %v9503_v15, %v12306_v59  ;;  %v5051_v42 = vpop.f32.mrb[117].mxu0 }
 0x2e9   : > { %7901 = vst [vmem:[%s11693_s21 + $0x1c0] sm:$0xff] %v7799_v56   ;;  %v5486_v1 = vmax.f32 %v5358_v61, 0.0  ;;  %v9726_v12 = vadd.f32 %v5051_v42, %v12309_v32 }
 0x2ea   : > { %v5361_v13 = vadd.f32 %v12132_v11, %v9725_v28 }
 0x2eb   : > { %v7804_v43 = vpack.c.bf16 %v5487_v7, %v5486_v1  ;;  %v5360_v23 = vadd.f32 %v12132_v11, %v9726_v12  ;;  %v9506_v17 = vpop.f32.mrb[118].mxu0 }
 0x2ec   : > { %v5489_v10 = vmax.f32 %v5361_v13, 0.0  ;;  %v9727_v6 = vadd.f32 %v9506_v17, %v12315_v45  ;;  %v5061_v31 = vpop.f32.mrb[119].mxu0 }
 0x2ed   : > { %7902 = vst [vmem:[%s11693_s21 + $0x1c8] sm:$0xff] %v7804_v43   ;;  %v5488_v18 = vmax.f32 %v5360_v23, 0.0  ;;  %v9728_v59 = vadd.f32 %v5061_v31, %v12318_v4 }
 0x2ee   : > { %v5363_v41 = vadd.f32 %v12132_v11, %v9727_v6 }
 0x2ef   : > { %v7809_v22 = vpack.c.bf16 %v5489_v10, %v5488_v18  ;;  %v5362_v32 = vadd.f32 %v12132_v11, %v9728_v59  ;;  %v9509_v58 = vpop.f32.mrb[120].mxu0 }
 0x2f0   : > { %v5491_v49 = vmax.f32 %v5363_v41, 0.0  ;;  %v9729_v16 = vadd.f32 %v9509_v58, %v12324_v46  ;;  %v5071_v60 = vpop.f32.mrb[121].mxu0 }
 0x2f1   : > { %7903 = vst [vmem:[%s11693_s21 + $0x1d0] sm:$0xff] %v7809_v22   ;;  %v5490_v39 = vmax.f32 %v5362_v32, 0.0  ;;  %v9730_v45 = vadd.f32 %v5071_v60, %v12327_v51 }
 0x2f2   : > { %v5365_v57 = vadd.f32 %v12132_v11, %v9729_v16 }
 0x2f3   : > { %v7814_v27 = vpack.c.bf16 %v5491_v49, %v5490_v39  ;;  %v5364_v4 = vadd.f32 %v12132_v11, %v9730_v45  ;;  %v9512_v34 = vpop.f32.mrb[122].mxu0 }
 0x2f4   : > { %v5493_v0 = vmax.f32 %v5365_v57, 0.0  ;;  %v9731_v14 = vadd.f32 %v9512_v34, %v12333_v36  ;;  %v5081_v19 = vpop.f32.mrb[123].mxu0 }
 0x2f5   : > { %7904 = vst [vmem:[%s11693_s21 + $0x1d8] sm:$0xff] %v7814_v27   ;;  %v5492_v26 = vmax.f32 %v5364_v4, 0.0  ;;  %v9732_v46 = vadd.f32 %v5081_v19, %v12336_v21 }
 0x2f6   : > { %v5367_v9 = vadd.f32 %v12132_v11, %v9731_v14 }
 0x2f7   : > { %v7819_v5 = vpack.c.bf16 %v5493_v0, %v5492_v26  ;;  %v5366_v51 = vadd.f32 %v12132_v11, %v9732_v46  ;;  %v9515_v25 = vpop.f32.mrb[124].mxu0 }
 0x2f8   : > { %v5495_v3 = vmax.f32 %v5367_v9, 0.0  ;;  %v9733_v24 = vadd.f32 %v9515_v25, %v12342_v54  ;;  %v5091_v50 = vpop.f32.mrb[125].mxu0 }
 0x2f9   : > { %7905 = vst [vmem:[%s11693_s21 + $0x1e0] sm:$0xff] %v7819_v5   ;;  %v5494_v48 = vmax.f32 %v5366_v51, 0.0  ;;  %v9734_v36 = vadd.f32 %v5091_v50, %v12345_v37 }
 0x2fa   : > { %v5369_v40 = vadd.f32 %v12132_v11, %v9733_v24 }
 0x2fb   : > { %v9555_v8 = vpop.f32.mrb[128].mxu1  ;;  %v7824_v62 = vpack.c.bf16 %v5495_v3, %v5494_v48  ;;  %v5368_v21 = vadd.f32 %v12132_v11, %v9734_v36  ;;  %v9518_v52 = vpop.f32.mrb[126].mxu0 }
 0x2fc   : > { %v6612_v33 = vadd.f32 %v12132_v11, %v9555_v8  ;;  %v6588_v35 = vpop.f32.mrb[129].mxu1  ;;  %v5497_v53 = vmax.f32 %v5369_v40, 0.0  ;;  %v9735_v44 = vadd.f32 %v9518_v52, %v12351_v55  ;;  %v5101_v20 = vpop.f32.mrb[127].mxu0 }
 0x2fd   : > { %v6611_v54 = vadd.f32 %v12132_v11, %v6588_v35  ;;  %7906 = vst [vmem:[%s11693_s21 + $0x1e8] sm:$0xff] %v7824_v62   ;;  %v5496_v29 = vmax.f32 %v5368_v21, 0.0  ;;  %v9736_v63 = vadd.f32 %v5101_v20, %v12354_v2 }
 0x2fe   : > { %v6616_v37 = vmax.f32 %v6612_v33, 0.0  ;;  %v5371_v47 = vadd.f32 %v12132_v11, %v9735_v44 }
 0x2ff   : > { %v6615_v38 = vmax.f32 %v6611_v54, 0.0  ;;  %v9558_v30 = vpop.f32.mrb[130].mxu1  ;;  %v7829_v56 = vpack.c.bf16 %v5497_v53, %v5496_v29  ;;  %v5370_v61 = vadd.f32 %v12132_v11, %v9736_v63 }
 0x300   : > { %v6614_v55 = vadd.f32 %v12132_v11, %v9558_v30  ;;  %v6598_v15 = vpop.f32.mrb[131].mxu1  ;;  %v5499_v7 = vmax.f32 %v5371_v47, 0.0 }
 0x301   : > { %v7839_v28 = vpack.c.bf16 %v6616_v37, %v6615_v38  ;;  %v6613_v42 = vadd.f32 %v12132_v11, %v6598_v15  ;;  %7907 = vst [vmem:[%s11693_s21 + $0x1f0] sm:$0xff] %v7829_v56   ;;  %v5498_v1 = vmax.f32 %v5370_v61, 0.0 }
 0x302   : > { %v6618_v12 = vmax.f32 %v6614_v55, 0.0 }
 0x303   : > { %7909 = vst [vmem:[%s11693_s21 + $0x200] sm:$0xff] %v7839_v28   ;;  %v6617_v2 = vmax.f32 %v6613_v42, 0.0  ;;  %v7834_v13 = vpack.c.bf16 %v5499_v7, %v5498_v1 }
 0x305   : > { %v7844_v43 = vpack.c.bf16 %v6618_v12, %v6617_v2  ;;  %7908 = vst [vmem:[%s11693_s21 + $0x1f8] sm:$0xff] %v7834_v13  }
 0x307   : > { %7910 = vst [vmem:[%s11693_s21 + $0x208] sm:$0xff] %v7844_v43  }
 0x308 PF: > { %s13_s12 = sadd.s32 1, %s10092_s12  }
 0x309   : > { %p10_p4 = scmp.ge.s32.totalorder %s13_s12, 4  }
 0x30b   :  { %12 = sbr.rel (!%p10_p4) target bundleno = 1 (0x1), region = 65 }

// kernel: a_call__.6
= control target key start
LH: loop header
LB: loop body
LE: loop exit
PB: predicated region body
PF: predicated region fallthrough
CT: control target
= control target key end

     0   :  { %s5247_s12 = smov 0   ;;  %s7310_s0 = inlined_call_operand.vmem [shape: bf16[2,290,512], index: 0, kind: input, shape index: {}]   ;;  %s7311_s1 = inlined_call_operand.vmem [shape: bf16[4,512,128], index: 1, kind: input, shape index: {}]   ;;  %s7312_s2 = inlined_call_operand.vmem [shape: f32[1,128], index: 2, kind: input, shape index: {}]   ;;  %s7313_s3 = inlined_call_operand.vmem [shape: bf16[2,272,128], index: 3, kind: output, shape index: {}]  }
   0x1 LB: > { %s4261_s13 = sadd.s32 4294967295, %s5224_s12   ;;  %p4265_p0 = scmp.ge.s32.totalorder %s5224_s12, 1  ;;  %s5224_s12 = sphi %s5247_s12, %s13_s12  }
   0x2   : > { %p137_p1 = scmp.lt.s32.totalorder %s5224_s12, 3 }
   0x4   : > { %p138_p2 = pnand %p4265_p0, %p137_p1 }
   0x6   : > { %141 = sbr.rel (%p138_p2) target bundleno = 839 (0x347), region = 32 }
   0xd   : > { %v4851_v0 = vld [vmem:[%s7311_s1 + $0x100] sm:$0xff]   ;;  %v7314_v1 = vmov 0   ;;  %v4853_v3 = vld [vmem:[%s7311_s1 + $0x108] sm:$0xff]   ;;  %v4855_v5 = vld [vmem:[%s7311_s1 + $0x110] sm:$0xff]   ;;  %p161_p3 = scmp.lt.s32.totalorder %s4261_s13, 1  ;;  %vm3189_vm1 = vcmask 1046528  }
   0xe   : > { %1479 = vmatprep.subr.bf16.mxu0 %v7314_v1  ;;  %1648 = vmatprep.subr.bf16.mxu1 %v7314_v1  ;;  %v4852_v2 = vld [vmem:[%s7311_s1 + $0x180] sm:$0xff]   ;;  %v4854_v4 = vld [vmem:[%s7311_s1 + $0x188] sm:$0xff]   ;;  %v4856_v6 = vld [vmem:[%s7311_s1 + $0x190] sm:$0xff]   ;;  %vm658_vm0 = vsmask.f32 7424 }
   0xf   : > { %1480 = vmatpush1.bf16.msra.mxu0 %v4851_v0  ;;  %1649 = vmatpush1.bf16.msra.mxu1 %v4852_v2  ;;  %v4857_v7 = vld [vmem:[%s7311_s1 + $0x118] sm:$0xff]   ;;  %v4859_v9 = vld [vmem:[%s7311_s1 + $0x120] sm:$0xff]   ;;  %v4861_v11 = vld [vmem:[%s7311_s1 + $0x128] sm:$0xff]   ;;  %s7457_s13 = smov (!%p161_p3, %s4261_s13), 1 }
  0x10   : > { %1481 = vmatprep.subr.bf16.mxu0 %v7314_v1  ;;  %1650 = vmatprep.subr.bf16.mxu1 %v7314_v1  ;;  %v4858_v8 = vld [vmem:[%s7311_s1 + $0x198] sm:$0xff]   ;;  %v4860_v10 = vld [vmem:[%s7311_s1 + $0x1a0] sm:$0xff]   ;;  %v4862_v12 = vld [vmem:[%s7311_s1 + $0x1a8] sm:$0xff]   ;;  %s4840_s19 = smul.u32 592, %s7457_s13 }
  0x11   : > { %v4863_v13 = vld [vmem:[%s7311_s1 + $0x130] sm:$0xff]   ;;  %v4865_v15 = vld [vmem:[%s7311_s1 + $0x138] sm:$0xff]   ;;  %v4867_v17 = vld [vmem:[%s7311_s1 + $0x140] sm:$0xff]   ;;  %s4841_s7 = smul.u32 136, %s7457_s13 }
  0x12   : > { %v4864_v14 = vld [vmem:[%s7311_s1 + $0x1b0] sm:$0xff]   ;;  %v4866_v16 = vld [vmem:[%s7311_s1 + $0x1b8] sm:$0xff]   ;;  %s5332_s26 = scalar_lea.vmem %s7310_s0, %s4840_s19  ;;  %v4868_v18 = vld [vmem:[%s7311_s1 + $0x1c0] sm:$0xff]  }
  0x13   : > { %1482 = vmatpush1.bf16.msra.mxu0 %v4853_v3  ;;  %1651 = vmatpush1.bf16.msra.mxu1 %v4854_v4  ;;  %v4869_v19 = vld [vmem:[%s7311_s1 + $0x148] sm:$0xff]   ;;  %v4883_v21 = vld [vmem:[%s5332_s26 + $0x4] ss:$16 sps:$4 sm:$0xff]   ;;  %v4873_v40 = vld [vmem:[%s7311_s1 + $0x158] sm:$0xff]   ;;  %s7224_s10 = scalar_lea.vmem %s7313_s3, %s4841_s7 }
  0x14   : > { %1483 = vmatprep.subr.bf16.mxu0 %v7314_v1  ;;  %1652 = vmatprep.subr.bf16.mxu1 %v7314_v1  ;;  %v4870_v20 = vld [vmem:[%s7311_s1 + $0x1c8] sm:$0xff]   ;;  %v5347_v22 = vld [vmem:[%s5332_s26 + $0x24] ss:$16 sps:$4 sm:$0xff]   ;;  %v672_v23 = vshrl.u32 %v4883_v21, 16  ;;  %v674_v24 = vshll.u32 %v4883_v21, 16  ;;  %v4874_v41 = vld [vmem:[%s7311_s1 + $0x1d8] sm:$0xff]  }
  0x15   : > { %v679_v25 = vshll.u32 %v5347_v22, 16  ;;  %v4887_v26 = vld [vmem:[%s5332_s26 + $0xc] ss:$16 sps:$4 sm:$0xff]   ;;  %v4871_v32 = vld [vmem:[%s7311_s1 + $0x150] sm:$0xff]   ;;  %v4875_v43 = vld [vmem:[%s7311_s1 + $0x160] sm:$0xff]   ;;  %v715_v63 = vshrl.u32 %v5347_v22, 16 }
  0x16   : > { %v5354_v27 = vld [vmem:[%s5332_s26 + $0x2c] ss:$16 sps:$4 sm:$0xff]   ;;  %v676_v28 = vrot.slane %v674_v24, 1  ;;  %v696_v30 = vshrl.u32 %v4887_v26, 16  ;;  %v698_v31 = vshll.u32 %v4887_v26, 16  ;;  %v4872_v34 = vld [vmem:[%s7311_s1 + $0x1d0] sm:$0xff]  }
  0x17   : > { %1484 = vmatpush1.bf16.msra.mxu0 %v4855_v5  ;;  %1653 = vmatpush1.bf16.msra.mxu1 %v4856_v6  ;;  %v5356_v29 = vrot.slane %v679_v25, 1  ;;  %v703_v33 = vshll.u32 %v5354_v27, 16  ;;  %v4876_v44 = vld [vmem:[%s7311_s1 + $0x1e0] sm:$0xff]   ;;  %v4893_v46 = vld [vmem:[%s5332_s26 + $0x8] ss:$16 sps:$4 sm:$0xff]   ;;  %v4879_v54 = vld [vmem:[%s7311_s1 + $0x170] sm:$0xff]  }
  0x18   : > { %1485 = vmatprep.subr.bf16.mxu0 %v7314_v1  ;;  %1654 = vmatprep.subr.bf16.mxu1 %v7314_v1  ;;  %v677_v35 = vor.u32 %v676_v28, %v672_v23  ;;  %v700_v36 = vrot.slane %v698_v31, 1  ;;  %v4891_v45 = vld [vmem:[%s5332_s26] ss:$16 sps:$4 sm:$0xff]   ;;  %v4877_v48 = vld [vmem:[%s7311_s1 + $0x168] sm:$0xff]   ;;  %v686_v52 = vshll.u32 %v4893_v46, 16  ;;  %v684_v60 = vshrl.u32 %v4893_v46, 16 }
  0x19   : > { %v5367_v37 = vrot.slane %v703_v33, 1  ;;  %v5392_v47 = vld [vmem:[%s5332_s26 + $0x20] ss:$16 sps:$4 sm:$0xff]   ;;  %v662_v49 = vshll.u32 %v4891_v45, 16  ;;  %v5398_v50 = vld [vmem:[%s5332_s26 + $0x28] ss:$16 sps:$4 sm:$0xff]  }
  0x1a   : > { %v682_v38 = vsel %vm658_vm0, %v677_v35, %v5356_v29  ;;  %v701_v39 = vor.u32 %v700_v36, %v696_v30  ;;  %v4878_v51 = vld [vmem:[%s7311_s1 + $0x1e8] sm:$0xff]   ;;  %v5405_v53 = vld [vmem:[%s5332_s26 + $0x44] ss:$16 sps:$4 sm:$0xff]   ;;  %v660_v57 = vshrl.u32 %v4891_v45, 16  ;;  %v667_v59 = vshll.u32 %v5392_v47, 16  ;;  %v4881_v3 = vld [vmem:[%s7311_s1 + $0x178] sm:$0xff]  }
  0x1b   : > { %1486 = vmatpush1.bf16.msra.mxu0 %v4857_v7  ;;  %1655 = vmatpush1.bf16.msra.mxu1 %v4858_v8  ;;  %v4880_v55 = vld [vmem:[%s7311_s1 + $0x1f0] sm:$0xff]   ;;  %v5415_v56 = vld [vmem:[%s5332_s26 + $0x4c] ss:$16 sps:$4 sm:$0xff]   ;;  %v664_v58 = vrot.slane %v662_v49, 1  ;;  %v688_v61 = vrot.slane %v686_v52, 1  ;;  %v691_v62 = vshll.u32 %v5398_v50, 16 }
  0x1c   : > { %1487 = vmatprep.subr.bf16.mxu0 %v7314_v1  ;;  %1656 = vmatprep.subr.bf16.mxu1 %v7314_v1  ;;  %v706_v42 = vsel %vm658_vm0, %v701_v39, %v5367_v37  ;;  %v719_v0 = vshll.u32 %v5405_v53, 16  ;;  %v5423_v2 = vld [vmem:[%s5332_s26 + $0x40] ss:$16 sps:$4 sm:$0xff]   ;;  %v5430_v4 = vld [vmem:[%s5332_s26 + $0x48] ss:$16 sps:$4 sm:$0xff]   ;;  %v731_v5 = vshrl.u32 %v5354_v27, 16 }
  0x1d   : > { %1511 = vmatprep.mubr.bf16.mxu0 %v682_v38  ;;  %1680 = vmatprep.mubr.bf16.mxu1 %v706_v42  ;;  %v735_v6 = vshll.u32 %v5415_v56, 16  ;;  %v5435_v7 = vld [vmem:[%s5332_s26 + $0x64] ss:$16 sps:$4 sm:$0xff]   ;;  %v665_v8 = vor.u32 %v664_v58, %v660_v57  ;;  %v747_v23 = vshrl.u32 %v5405_v53, 16  ;;  %v5456_v24 = vld [vmem:[%s5332_s26 + $0x60] ss:$16 sps:$4 sm:$0xff]  }
  0x1e   : > { %v733_v21 = vor.u32 %v731_v5, %v5367_v37  ;;  %v5459_v25 = vld [vmem:[%s5332_s26 + $0x68] ss:$16 sps:$4 sm:$0xff]   ;;  %v751_v27 = vshll.u32 %v5435_v7, 16  ;;  %v4896_v30 = vld [vmem:[%s7311_s1 + $0x80] sm:$0xff]   ;;  %v763_v31 = vshrl.u32 %v5415_v56, 16  ;;  %v739_v52 = vshrl.u32 %v5423_v2, 16 }
  0x1f   : > { %1488 = vmatpush1.bf16.msra.mxu0 %v4859_v9  ;;  %1657 = vmatpush1.bf16.msra.mxu1 %v4860_v10  ;;  %v669_v9 = vrot.slane %v667_v59, 1  ;;  %v5438_v10 = vld [vmem:[%s5332_s26 + $0x6c] ss:$16 sps:$4 sm:$0xff]   ;;  %v737_v22 = vrot.slane %v735_v6, 1  ;;  %v5487_v46 = vld [vmem:[%s5332_s26 + $0x84] ss:$16 sps:$4 sm:$0xff]  }
  0x20   : > { %1489 = vmatprep.subr.bf16.mxu0 %v7314_v1  ;;  %1658 = vmatprep.subr.bf16.mxu1 %v7314_v1  ;;  %v767_v28 = vshll.u32 %v5438_v10, 16  ;;  %v4903_v39 = vld [vmem:[%s7311_s1 + $0x8] sm:$0xff]   ;;  %v4911_v57 = vld [vmem:[%s7311_s1 + $0x10] sm:$0xff]  }
  0x21   : > { %v670_v26 = vsel %vm658_vm0, %v665_v8, %v669_v9  ;;  %v5475_v35 = vsel %vm658_vm0, %v733_v21, %v737_v22  ;;  %v765_v45 = vor.u32 %v763_v31, %v737_v22  ;;  %v5498_v49 = vld [vmem:[%s5332_s26 + $0x88] ss:$16 sps:$4 sm:$0xff]   ;;  %v4912_v59 = vld [vmem:[%s7311_s1 + $0x90] sm:$0xff]   ;;  %v5535_v5 = vld [vmem:[%s5332_s26 + $0xac] ss:$16 sps:$4 sm:$0xff]  }
  0x22   : > { %v769_v42 = vrot.slane %v767_v28, 1  ;;  %v5543_v8 = vld [vmem:[%s5332_s26 + $0xa8] ss:$16 sps:$4 sm:$0xff]   ;;  %v831_v22 = vshll.u32 %v5535_v5, 16  ;;  %v5575_v28 = vld [vmem:[%s5332_s26 + $0xcc] ss:$16 sps:$4 sm:$0xff]  }
  0x23   : > { %1490 = vmatpush1.bf16.msra.mxu0 %v4861_v11  ;;  %1659 = vmatpush1.bf16.msra.mxu1 %v4862_v12  ;;  %v4882_v11 = vld [vmem:[%s7311_s1 + $0x1f8] sm:$0xff]   ;;  %v689_v12 = vor.u32 %v688_v61, %v684_v60  ;;  %v779_v60 = vshrl.u32 %v5435_v7, 16  ;;  %v783_v61 = vshll.u32 %v5487_v46, 16  ;;  %v5540_v7 = vld [vmem:[%s5332_s26 + $0xa0] ss:$16 sps:$4 sm:$0xff]  }
  0x24   : > { %1491 = vmatprep.subr.bf16.mxu0 %v7314_v1  ;;  %1660 = vmatprep.subr.bf16.mxu1 %v7314_v1  ;;  %v5516_v58 = vsel %vm658_vm0, %v765_v45, %v769_v42  ;;  %v5584_v31 = vld [vmem:[%s5332_s26 + $0xc0] ss:$16 sps:$4 sm:$0xff]  }
  0x27   : > { %1492 = vmatpush1.bf16.msra.mxu0 %v4863_v13  ;;  %1661 = vmatpush1.bf16.msra.mxu1 %v4864_v14  ;;  %v693_v13 = vrot.slane %v691_v62, 1  ;;  %v717_v14 = vor.u32 %v715_v63, %v5356_v29  ;;  %v795_v62 = vshrl.u32 %v5438_v10, 16 }
  0x28   : > { %1493 = vmatprep.subr.bf16.mxu0 %v7314_v1  ;;  %1662 = vmatprep.subr.bf16.mxu1 %v7314_v1 }
  0x29   : > { %v694_v29 = vsel %vm658_vm0, %v689_v12, %v693_v13  ;;  %v787_v12 = vshrl.u32 %v5459_v25, 16 }
  0x2b   : > { %1494 = vmatpush1.bf16.msra.mxu0 %v4865_v15  ;;  %1663 = vmatpush1.bf16.msra.mxu1 %v4866_v16  ;;  %v707_v15 = vshrl.u32 %v5392_v47, 16  ;;  %v4895_v16 = vld [vmem:[%s7311_s1] sm:$0xff]   ;;  %v5490_v47 = vld [vmem:[%s5332_s26 + $0x8c] ss:$16 sps:$4 sm:$0xff]  }
  0x2c   : > { %1495 = vmatprep.subr.bf16.mxu0 %v7314_v1  ;;  %1664 = vmatprep.subr.bf16.mxu1 %v7314_v1  ;;  %v799_v63 = vshll.u32 %v5490_v47, 16  ;;  %v827_v21 = vshrl.u32 %v5490_v47, 16 }
  0x2d   : > { %v709_v33 = vor.u32 %v707_v15, %v669_v9 }
  0x2e   : > { %v801_v15 = vrot.slane %v799_v63, 1 }
  0x2f   : > { %1496 = vmatpush1.bf16.msra.mxu0 %v4867_v17  ;;  %1665 = vmatpush1.bf16.msra.mxu1 %v4868_v18  ;;  %v721_v17 = vrot.slane %v719_v0, 1  ;;  %v711_v18 = vshll.u32 %v5423_v2, 16  ;;  %v771_v0 = vshrl.u32 %v5456_v24, 16 }
  0x30   : > { %1497 = vmatprep.subr.bf16.mxu0 %v7314_v1  ;;  %1666 = vmatprep.subr.bf16.mxu1 %v7314_v1 }
  0x31   : > { %v713_v36 = vrot.slane %v711_v18, 1  ;;  %v749_v38 = vor.u32 %v747_v23, %v721_v17  ;;  %v811_v18 = vshrl.u32 %v5487_v46, 16  ;;  %v4927_v23 = vld [vmem:[%s7311_s1 + $0x20] sm:$0xff]  }
  0x33   : > { %1498 = vmatpush1.bf16.msra.mxu0 %v4869_v19  ;;  %1667 = vmatpush1.bf16.msra.mxu1 %v4870_v20  ;;  %v723_v19 = vshrl.u32 %v5398_v50, 16  ;;  %v727_v20 = vshll.u32 %v5430_v4, 16  ;;  %v5501_v50 = vsel %vm658_vm0, %v709_v33, %v713_v36  ;;  %v741_v6 = vor.u32 %v739_v52, %v713_v36 }
  0x34   : > { %1499 = vmatprep.subr.bf16.mxu0 %v7314_v1  ;;  %1668 = vmatprep.subr.bf16.mxu1 %v7314_v1  ;;  %v839_v52 = vshll.u32 %v5584_v31, 16 }
  0x35   : > { %v729_v37 = vrot.slane %v727_v20, 1 }
  0x37   : > { %1500 = vmatpush1.bf16.msra.mxu0 %v4871_v32  ;;  %1669 = vmatpush1.bf16.msra.mxu1 %v4872_v34  ;;  %v5472_v32 = vsel %vm658_vm0, %v717_v14, %v721_v17  ;;  %v725_v34 = vor.u32 %v723_v19, %v693_v13  ;;  %v4919_v13 = vld [vmem:[%s7311_s1 + $0x18] sm:$0xff]   ;;  %v797_v14 = vor.u32 %v795_v62, %v769_v42  ;;  %v819_v42 = vshrl.u32 %v5498_v49, 16 }
  0x38   : > { %1501 = vmatprep.subr.bf16.mxu0 %v7314_v1  ;;  %1670 = vmatprep.subr.bf16.mxu1 %v7314_v1  ;;  %v4920_v17 = vld [vmem:[%s7311_s1 + $0x98] sm:$0xff]  }
  0x39   : > { %v5587_v33 = vsel %vm658_vm0, %v797_v14, %v801_v15 }
  0x3a   : > { %7351 = vst [vmem:[#allocation3_spill] sm:$0xff] %v5587_v33 }
  0x3b   : > { %1502 = vmatpush1.bf16.msra.mxu0 %v4873_v40  ;;  %1671 = vmatpush1.bf16.msra.mxu1 %v4874_v41  ;;  %v4904_v40 = vld [vmem:[%s7311_s1 + $0x88] sm:$0xff]   ;;  %v753_v41 = vrot.slane %v751_v27, 1  ;;  %v5572_v27 = vld [vmem:[%s5332_s26 + $0xc4] ss:$16 sps:$4 sm:$0xff]  }
  0x3c   : > { %1503 = vmatprep.subr.bf16.mxu0 %v7314_v1  ;;  %1672 = vmatprep.subr.bf16.mxu1 %v7314_v1  ;;  %v847_v47 = vshll.u32 %v5572_v27, 16 }
  0x3d   : > { %v5509_v53 = vsel %vm658_vm0, %v749_v38, %v753_v41  ;;  %v781_v10 = vor.u32 %v779_v60, %v753_v41  ;;  %v5595_v38 = vld [vmem:[%s5332_s26 + $0xc8] ss:$16 sps:$4 sm:$0xff]   ;;  %v5623_v60 = vld [vmem:[%s5332_s26 + $0xec] ss:$16 sps:$4 sm:$0xff]  }
  0x3e   : > { %v895_v14 = vshll.u32 %v5623_v60, 16 }
  0x3f   : > { %1504 = vmatpush1.bf16.msra.mxu0 %v4875_v43  ;;  %1673 = vmatpush1.bf16.msra.mxu1 %v4876_v44  ;;  %v743_v43 = vshll.u32 %v5456_v24, 16  ;;  %v759_v44 = vshll.u32 %v5459_v25, 16  ;;  %v807_v25 = vshll.u32 %v5540_v7, 16 }
  0x40   : > { %1505 = vmatprep.subr.bf16.mxu0 %v7314_v1  ;;  %1674 = vmatprep.subr.bf16.mxu1 %v7314_v1 }
  0x41   : > { %v761_v56 = vrot.slane %v759_v44, 1  ;;  %v809_v44 = vrot.slane %v807_v25, 1  ;;  %v4951_v25 = vld [vmem:[%s7311_s1 + $0x38] sm:$0xff]  }
  0x43   : > { %1506 = vmatpush1.bf16.msra.mxu0 %v4877_v48  ;;  %1675 = vmatpush1.bf16.msra.mxu1 %v4878_v51  ;;  %v5495_v48 = vld [vmem:[%s5332_s26 + $0x80] ss:$16 sps:$4 sm:$0xff]   ;;  %v5504_v51 = vsel %vm658_vm0, %v725_v34, %v729_v37 }
  0x44   : > { %1507 = vmatprep.subr.bf16.mxu0 %v7314_v1  ;;  %1676 = vmatprep.subr.bf16.mxu1 %v7314_v1  ;;  %v775_v2 = vshll.u32 %v5495_v48, 16  ;;  %v803_v36 = vshrl.u32 %v5495_v48, 16  ;;  %v859_v48 = vshrl.u32 %v5535_v5, 16 }
  0x47   : > { %1508 = vmatpush1.bf16.msra.mxu0 %v4879_v54  ;;  %1677 = vmatpush1.bf16.msra.mxu1 %v4880_v55  ;;  %v745_v54 = vrot.slane %v743_v43, 1  ;;  %v755_v55 = vshrl.u32 %v5430_v4, 16  ;;  %v5531_v4 = vld [vmem:[%s5332_s26 + $0xa4] ss:$16 sps:$4 sm:$0xff]   ;;  %v833_v43 = vrot.slane %v831_v22, 1  ;;  %v891_v22 = vshrl.u32 %v5575_v28, 16 }
  0x48   : > { %1509 = vmatprep.subr.bf16.mxu0 %v7314_v1  ;;  %1678 = vmatprep.subr.bf16.mxu1 %v7314_v1  ;;  %v815_v20 = vshll.u32 %v5531_v4, 16  ;;  %v843_v46 = vshrl.u32 %v5531_v4, 16  ;;  %v5641_v4 = vrot.slane %v847_v47, 1  ;;  %v5709_v47 = vld [vmem:[%s5332_s26 + $0x124] ss:$16 sps:$4 sm:$0xff]  }
  0x49   : > { %v757_v9 = vor.u32 %v755_v55, %v729_v37  ;;  %v5567_v24 = vsel %vm658_vm0, %v741_v6, %v745_v54  ;;  %v773_v34 = vor.u32 %v771_v0, %v745_v54  ;;  %v4928_v37 = vld [vmem:[%s7311_s1 + $0xa0] sm:$0xff]   ;;  %v4935_v54 = vld [vmem:[%s7311_s1 + $0x28] sm:$0xff]   ;;  %v829_v55 = vor.u32 %v827_v21, %v801_v15 }
  0x4a   : > { %v817_v41 = vrot.slane %v815_v20, 1  ;;  %v835_v0 = vshrl.u32 %v5540_v7, 16  ;;  %v5645_v6 = vrot.slane %v839_v52, 1  ;;  %v5675_v20 = vld [vmem:[%s5332_s26 + $0x10c] ss:$16 sps:$4 sm:$0xff]  }
  0x4b   : > { %1510 = vmatpush1.bf16.msra.mxu0 %v4881_v3  ;;  %1679 = vmatpush1.bf16.msra.mxu1 %v4882_v11  ;;  %v791_v3 = vshll.u32 %v5498_v49, 16  ;;  %v785_v11 = vrot.slane %v783_v61, 1  ;;  %v863_v49 = vshll.u32 %v5575_v28, 16  ;;  %v5626_v61 = vld [vmem:[%s5332_s26 + $0xe0] ss:$16 sps:$4 sm:$0xff]   ;;  %v5651_v7 = vsel %vm658_vm0, %v829_v55, %v833_v43 }
  0x4c   : > { %2077 = vmatprep.subr.bf16.mxu0 %v7314_v1  ;;  %2246 = vmatprep.subr.bf16.mxu1 %v7314_v1  ;;  %7355 = vst [vmem:[#allocation7_spill] sm:$0xff] %v5651_v7  ;;  %v871_v15 = vshll.u32 %v5626_v61, 16  ;;  %v845_v21 = vor.u32 %v843_v46, %v817_v41  ;;  %v5721_v52 = vld [vmem:[%s5332_s26 + $0x12c] ss:$16 sps:$4 sm:$0xff]   ;;  %v4959_v55 = vld [vmem:[%s7311_s1 + $0x40] sm:$0xff]  }
  0x4d   : > { %v5557_v19 = vrot.slane %v791_v3, 1  ;;  %v5643_v5 = vrot.slane %v863_v49, 1 }
  0x4e   : > { %1512 = vmatmul.mubr.bf16.vlgmr.msra.gmra.mrb[0].mxu0 %v670_v26  ;;  %1681 = vmatmul.mubr.bf16.vlgmr.msra.gmra.mrb[0].mxu1 %v694_v29  ;;  %v823_v26 = vshll.u32 %v5543_v8, 16  ;;  %v5578_v29 = vsel %vm658_vm0, %v757_v9, %v761_v56  ;;  %v4943_v9 = vld [vmem:[%s7311_s1 + $0x30] sm:$0xff]  }
  0x4f   : > { %2078 = vmatpush1.bf16.msra.mxu0 %v4895_v16  ;;  %2247 = vmatpush1.bf16.msra.mxu1 %v4896_v30  ;;  %v5550_v16 = vrot.slane %v775_v2, 1  ;;  %v5581_v30 = vsel %vm658_vm0, %v781_v10, %v785_v11  ;;  %v851_v2 = vshrl.u32 %v5543_v8, 16  ;;  %v875_v10 = vshrl.u32 %v5572_v27, 16 }
  0x50   : > { %1519 = vmatprep.mubr.bf16.mxu0 %v5472_v32  ;;  %1688 = vmatprep.mubr.bf16.mxu1 %v5475_v35  ;;  %7350 = vst [vmem:[#allocation2_spill] sm:$0xff] %v5581_v30  ;;  %v5602_v45 = vrot.slane %v823_v26, 1  ;;  %v861_v26 = vor.u32 %v859_v48, %v833_v43  ;;  %v5717_v48 = vsel %vm658_vm0, %v845_v21, %v5641_v4  ;;  %v959_v21 = vshll.u32 %v5721_v52, 16 }
  0x51   : > { %2079 = vmatprep.subr.bf16.mxu0 %v7314_v1  ;;  %2248 = vmatprep.subr.bf16.mxu1 %v7314_v1  ;;  %v5630_v62 = vsel %vm658_vm0, %v773_v34, %v5550_v16  ;;  %v867_v34 = vshrl.u32 %v5584_v31, 16  ;;  %7358 = vst [vmem:[#allocation10_spill] sm:$0xff] %v5717_v48 }
  0x52   : > { %7352 = vst [vmem:[#allocation4_spill] sm:$0xff] %v5630_v62 }
  0x53   : > { %2080 = vmatpush1.bf16.msra.mxu0 %v4903_v39  ;;  %2249 = vmatpush1.bf16.msra.mxu1 %v4904_v40  ;;  %v789_v39 = vor.u32 %v787_v12, %v761_v56  ;;  %v813_v40 = vor.u32 %v811_v18, %v785_v11  ;;  %v855_v56 = vshll.u32 %v5595_v38, 16  ;;  %v4944_v12 = vld [vmem:[%s7311_s1 + $0xb0] sm:$0xff]  }
  0x54   : > { %2081 = vmatprep.subr.bf16.mxu0 %v7314_v1  ;;  %2250 = vmatprep.subr.bf16.mxu1 %v7314_v1  ;;  %v5670_v18 = vld [vmem:[%s5332_s26 + $0x104] ss:$16 sps:$4 sm:$0xff]  }
  0x55   : > { %v5634_v63 = vsel %vm658_vm0, %v789_v39, %v5557_v19  ;;  %v5639_v3 = vsel %vm658_vm0, %v813_v40, %v817_v41  ;;  %v5653_v8 = vrot.slane %v855_v56, 1  ;;  %v883_v39 = vshrl.u32 %v5595_v38, 16  ;;  %v5700_v40 = vld [vmem:[%s5332_s26 + $0x108] ss:$16 sps:$4 sm:$0xff]  }
  0x56   : > { %1520 = vmatmul.mubr.bf16.gmra.mrb[4].mxu0 %v5501_v50  ;;  %1689 = vmatmul.mubr.bf16.gmra.mrb[4].mxu1 %v5504_v51  ;;  %7353 = vst [vmem:[#allocation5_spill] sm:$0xff] %v5634_v63  ;;  %7354 = vst [vmem:[#allocation6_spill] sm:$0xff] %v5639_v3  ;;  %v853_v41 = vor.u32 %v851_v2, %v5602_v45  ;;  %v911_v49 = vshll.u32 %v5670_v18, 16  ;;  %v5731_v56 = vsel %vm658_vm0, %v861_v26, %v5643_v5  ;;  %v4967_v26 = vld [vmem:[%s7311_s1 + $0x48] sm:$0xff]  }
  0x57   : > { %1527 = vmatprep.mubr.bf16.mxu0 %v5509_v53  ;;  %1696 = vmatprep.mubr.bf16.mxu1 %v5516_v58  ;;  %7359 = vst [vmem:[#allocation11_spill] sm:$0xff] %v5731_v56  ;;  %v919_v2 = vshll.u32 %v5700_v40, 16  ;;  %v885_v46 = vor.u32 %v883_v39, %v5653_v8  ;;  %v4988_v39 = vld [vmem:[%s7311_s1 + $0xd8] sm:$0xff]  }
  0x58   : > { %2082 = vmatpush1.bf16.msra.mxu0 %v4911_v57  ;;  %2251 = vmatpush1.bf16.msra.mxu1 %v4912_v59  ;;  %v4936_v57 = vld [vmem:[%s7311_s1 + $0xa8] sm:$0xff]   ;;  %v5619_v59 = vld [vmem:[%s5332_s26 + $0xe4] ss:$16 sps:$4 sm:$0xff]  }
  0x59   : > { %2083 = vmatprep.subr.bf16.mxu0 %v7314_v1  ;;  %2252 = vmatprep.subr.bf16.mxu1 %v7314_v1  ;;  %v879_v11 = vshll.u32 %v5619_v59, 16  ;;  %v7364_v31 = vshrl.u32 %v5619_v59, 16 }
  0x5b   : > { %v5686_v27 = vrot.slane %v879_v11, 1 }
  0x5c   : > { %2084 = vmatpush1.bf16.msra.mxu0 %v4919_v13  ;;  %2253 = vmatpush1.bf16.msra.mxu1 %v4920_v17  ;;  %v805_v13 = vor.u32 %v803_v36, %v5550_v16  ;;  %v5666_v17 = vld [vmem:[%s5332_s26 + $0xe8] ss:$16 sps:$4 sm:$0xff]   ;;  %v821_v16 = vor.u32 %v819_v42, %v5557_v19  ;;  %v837_v36 = vor.u32 %v835_v0, %v809_v44  ;;  %v5704_v42 = vrot.slane %v871_v15, 1 }
  0x5d   : > { %2085 = vmatprep.subr.bf16.mxu0 %v7314_v1  ;;  %2254 = vmatprep.subr.bf16.mxu1 %v7314_v1  ;;  %v4952_v19 = vld [vmem:[%s7311_s1 + $0xb8] sm:$0xff]   ;;  %v887_v43 = vshll.u32 %v5666_v17, 16  ;;  %v877_v15 = vor.u32 %v875_v10, %v5641_v4  ;;  %v5772_v4 = vld [vmem:[%s5332_s26 + $0x144] ss:$16 sps:$4 sm:$0xff]  }
  0x5e   : > { %1528 = vmatmul.mubr.bf16.gmra.mrb[8].mxu0 %v5567_v24  ;;  %1697 = vmatmul.mubr.bf16.gmra.mrb[8].mxu1 %v5578_v29  ;;  %v5694_v28 = vsel %vm658_vm0, %v805_v13, %v809_v44  ;;  %v5713_v44 = vsel %vm658_vm0, %v821_v16, %v5602_v45  ;;  %v927_v45 = vshll.u32 %v5675_v20, 16  ;;  %v5749_v11 = vsel %vm658_vm0, %v837_v36, %v5645_v6 }
  0x5f   : > { %1535 = vmatprep.mubr.bf16.mxu0 %v5581_v30  ;;  %1704 = vmatprep.mubr.bf16.mxu1 %v5587_v33  ;;  %7356 = vst [vmem:[#allocation8_spill] sm:$0xff] %v5694_v28  ;;  %7357 = vst [vmem:[#allocation9_spill] sm:$0xff] %v5713_v44  ;;  %v5755_v13 = vrot.slane %v887_v43, 1  ;;  %v923_v16 = vshrl.u32 %v5623_v60, 16  ;;  %v5767_v36 = vrot.slane %v911_v49, 1  ;;  %v4968_v60 = vld [vmem:[%s7311_s1 + $0xc8] sm:$0xff]  }
  0x60   : > { %2086 = vmatpush1.bf16.msra.mxu0 %v4927_v23  ;;  %2255 = vmatpush1.bf16.msra.mxu1 %v4928_v37  ;;  %v5681_v23 = vld [vmem:[%s5332_s26 + $0x100] ss:$16 sps:$4 sm:$0xff]   ;;  %v5696_v37 = vrot.slane %v895_v14, 1  ;;  %7360 = vst [vmem:[#allocation12_spill] sm:$0xff] %v5749_v11  ;;  %v943_v14 = vshll.u32 %v5709_v47, 16  ;;  %v5778_v10 = vrot.slane %v927_v45, 1  ;;  %v5793_v45 = vsel %vm658_vm0, %v877_v15, %v5686_v27 }
  0x61   : > { %2087 = vmatprep.subr.bf16.mxu0 %v7314_v1  ;;  %2256 = vmatprep.subr.bf16.mxu1 %v7314_v1  ;;  %v903_v0 = vshll.u32 %v5681_v23, 16  ;;  %7362 = vst [vmem:[#allocation14_spill] sm:$0xff] %v5793_v45  ;;  %v4975_v43 = vld [vmem:[%s7311_s1 + $0x50] sm:$0xff]   ;;  %v975_v15 = vshll.u32 %v5772_v4, 16  ;;  %v5832_v49 = vld [vmem:[%s5332_s26 + $0x16c] ss:$16 sps:$4 sm:$0xff]  }
  0x64   : > { %2088 = vmatpush1.bf16.msra.mxu0 %v4935_v54  ;;  %2257 = vmatpush1.bf16.msra.mxu1 %v4936_v57  ;;  %v5724_v54 = vld [vmem:[%s5332_s26 + $0x120] ss:$16 sps:$4 sm:$0xff]  }
  0x65   : > { %2089 = vmatprep.subr.bf16.mxu0 %v7314_v1  ;;  %2258 = vmatprep.subr.bf16.mxu1 %v7314_v1  ;;  %v4960_v57 = vld [vmem:[%s7311_s1 + $0xc0] sm:$0xff]  }
  0x66   : > { %1536 = vmatmul.mubr.bf16.gmra.mrb[12].mxu0 %v5630_v62  ;;  %1705 = vmatmul.mubr.bf16.gmra.mrb[12].mxu1 %v5634_v63 }
  0x67   : > { %1543 = vmatprep.mubr.bf16.mxu0 %v5639_v3  ;;  %1712 = vmatprep.mubr.bf16.mxu1 %v5651_v7  ;;  %v7378_v3 = vshrl.u32 %v5700_v40, 16  ;;  %v7380_v40 = vshrl.u32 %v5721_v52, 16 }
  0x68   : > { %2090 = vmatpush1.bf16.msra.mxu0 %v4943_v9  ;;  %2259 = vmatpush1.bf16.msra.mxu1 %v4944_v12  ;;  %v5742_v9 = vld [vmem:[%s5332_s26 + $0x128] ss:$16 sps:$4 sm:$0xff]   ;;  %v5753_v12 = vsel %vm658_vm0, %v853_v41, %v5653_v8  ;;  %v899_v41 = vshrl.u32 %v5626_v61, 16 }
  0x69   : > { %2091 = vmatprep.subr.bf16.mxu0 %v7314_v1  ;;  %2260 = vmatprep.subr.bf16.mxu1 %v7314_v1  ;;  %7361 = vst [vmem:[#allocation13_spill] sm:$0xff] %v5753_v12  ;;  %v951_v61 = vshll.u32 %v5742_v9, 16 }
  0x6c   : > { %2092 = vmatpush1.bf16.msra.mxu0 %v4951_v25  ;;  %2261 = vmatpush1.bf16.msra.mxu1 %v4952_v19  ;;  %v935_v25 = vshll.u32 %v5724_v54, 16  ;;  %v893_v19 = vor.u32 %v891_v22, %v5643_v5  ;;  %v5782_v5 = vrot.slane %v919_v2, 1  ;;  %v5786_v22 = vrot.slane %v943_v14, 1  ;;  %v5801_v14 = vld [vmem:[%s5332_s26 + $0x14c] ss:$16 sps:$4 sm:$0xff]  }
  0x6d   : > { %2093 = vmatprep.subr.bf16.mxu0 %v7314_v1  ;;  %2262 = vmatprep.subr.bf16.mxu1 %v7314_v1  ;;  %v991_v8 = vshll.u32 %v5801_v14, 16 }
  0x6e   : > { %1544 = vmatmul.mubr.bf16.gmra.mrb[16].mxu0 %v5694_v28  ;;  %1713 = vmatmul.mubr.bf16.gmra.mrb[16].mxu1 %v5713_v44  ;;  %v5797_v2 = vrot.slane %v935_v25, 1  ;;  %v4976_v25 = vld [vmem:[%s7311_s1 + $0xd0] sm:$0xff]   ;;  %v949_v63 = vor.u32 %v7378_v3, %v5782_v5 }
  0x6f   : > { %1551 = vmatprep.mubr.bf16.mxu0 %v5717_v48  ;;  %1720 = vmatprep.mubr.bf16.mxu1 %v5731_v56 }
  0x70   : > { %2094 = vmatpush1.bf16.msra.mxu0 %v4959_v55  ;;  %2263 = vmatpush1.bf16.msra.mxu1 %v4960_v57  ;;  %v5780_v55 = vrot.slane %v903_v0, 1  ;;  %v5795_v0 = vrot.slane %v959_v21, 1  ;;  %v5808_v57 = vsel %vm658_vm0, %v893_v19, %v5696_v37  ;;  %v5812_v21 = vld [vmem:[%s5332_s26 + $0x140] ss:$16 sps:$4 sm:$0xff]   ;;  %v5823_v19 = vld [vmem:[%s5332_s26 + $0x148] ss:$16 sps:$4 sm:$0xff]  }
  0x71   : > { %2095 = vmatprep.subr.bf16.mxu0 %v7314_v1  ;;  %2264 = vmatprep.subr.bf16.mxu1 %v7314_v1  ;;  %7363 = vst [vmem:[#allocation15_spill] sm:$0xff] %v5808_v57  ;;  %v967_v59 = vshll.u32 %v5812_v21, 16 }
  0x72   : > { %v989_v3 = vor.u32 %v7380_v40, %v5795_v0 }
  0x73   : > { %v5894_v48 = vrot.slane %v967_v59, 1  ;;  %v5911_v59 = vld [vmem:[%s5332_s26 + $0x18c] ss:$16 sps:$4 sm:$0xff]  }
  0x74   : > { %2096 = vmatpush1.bf16.msra.mxu0 %v4967_v26  ;;  %2265 = vmatpush1.bf16.msra.mxu1 %v4968_v60  ;;  %v869_v26 = vor.u32 %v867_v34, %v5645_v6  ;;  %v5829_v60 = vld [vmem:[%s5332_s26 + $0x164] ss:$16 sps:$4 sm:$0xff]   ;;  %v909_v6 = vor.u32 %v7364_v31, %v5686_v27  ;;  %v5841_v34 = vrot.slane %v951_v61, 1  ;;  %v7365_v27 = vmov 0  }
  0x75   : > { %2097 = vmatprep.subr.bf16.mxu0 %v7314_v1  ;;  %2266 = vmatprep.subr.bf16.mxu1 %v7314_v1  ;;  %v983_v31 = vshll.u32 %v5823_v19, 16  ;;  %v1007_v38 = vshll.u32 %v5829_v60, 16  ;;  %v5874_v1 = vsel %vm658_vm0, %v885_v46, %v5755_v13  ;;  %v901_v61 = vor.u32 %v899_v41, %v5704_v42  ;;  %v4996_v41 = vld [vmem:[%s7311_s1 + $0xe0] sm:$0xff]  }
  0x76   : > { %1552 = vmatmul.mubr.bf16.gmra.mrb[20].mxu0 %v5749_v11  ;;  %1721 = vmatmul.mubr.bf16.gmra.mrb[20].mxu1 %v5753_v12  ;;  %v925_v12 = vor.u32 %v923_v16, %v5696_v37  ;;  %v5864_v37 = vld [vmem:[%s5332_s26 + $0x168] ss:$16 sps:$4 sm:$0xff]   ;;  %v5867_v16 = vrot.slane %v975_v15, 1  ;;  %7367 = vst [vmem:[#allocation17_spill] sm:$0xff] %v5874_v1  ;;  %v1023_v11 = vshll.u32 %v5832_v49, 16  ;;  %v4995_v15 = vld [vmem:[%s7311_s1 + $0x60] sm:$0xff]  }
  0x77   : > { %1559 = vmatprep.mubr.bf16.mxu0 %v5793_v45  ;;  %1728 = vmatprep.mubr.bf16.mxu1 %v5808_v57  ;;  %v5845_v45 = vld [vmem:[%s5332_s26 + $0x160] ss:$16 sps:$4 sm:$0xff]   ;;  %v4987_v57 = vld [vmem:[%s7311_s1 + $0x58] sm:$0xff]   ;;  %v7370_v46 = vshrl.u32 %v5666_v17, 16 }
  0x78   : > { %2098 = vmatpush1.bf16.msra.mxu0 %v4975_v43  ;;  %2267 = vmatpush1.bf16.msra.mxu1 %v4976_v25  ;;  %v5860_v43 = vsel %vm658_vm0, %v869_v26, %v5704_v42  ;;  %v5878_v26 = vsel %vm658_vm0, %v909_v6, %v5767_v36  ;;  %v5887_v25 = vsel %vm658_vm0, %v925_v12, %v5778_v10  ;;  %v5892_v6 = vrot.slane %v991_v8, 1  ;;  %v5897_v42 = vld [vmem:[%s5332_s26 + $0x184] ss:$16 sps:$4 sm:$0xff]  }
  0x79   : > { %2099 = vmatprep.subr.bf16.mxu0 %v7365_v27  ;;  %7366 = vst [vmem:[#allocation16_spill] sm:$0xff] %v5860_v43  ;;  %2268 = vmatprep.subr.bf16.mxu1 %v7365_v27  ;;  %7368 = vst [vmem:[#allocation18_spill] sm:$0xff] %v5878_v26  ;;  %v917_v56 = vor.u32 %v7370_v46, %v5755_v13  ;;  %v7371_v12 = vshrl.u32 %v5670_v18, 16  ;;  %v1015_v8 = vshll.u32 %v5864_v37, 16  ;;  %v5005_v46 = vld [vmem:[%s7311_s1 + $0x68] sm:$0xff]  }
  0x7a   : > { %7369 = vst [vmem:[#allocation19_spill] sm:$0xff] %v5887_v25  ;;  %v5938_v18 = vld [vmem:[%s5332_s26 + $0x188] ss:$16 sps:$4 sm:$0xff]   ;;  %v6058_v40 = vsel %vm658_vm0, %v989_v3, %v5892_v6  ;;  %v7383_v3 = vshrl.u32 %v5772_v4, 16 }
  0x7b   : > { %v941_v17 = vor.u32 %v7371_v12, %v5767_v36  ;;  %v7372_v12 = vshrl.u32 %v5675_v20, 16  ;;  %v1039_v36 = vshll.u32 %v5897_v42, 16  ;;  %v5941_v20 = vld [vmem:[%s5332_s26 + $0x1a4] ss:$16 sps:$4 sm:$0xff]   ;;  %v1047_v28 = vshll.u32 %v5938_v18, 16 }
  0x7c   : > { %2100 = vmatpush1.bf16.msra.mxu0 %v4987_v57  ;;  %2269 = vmatpush1.bf16.msra.mxu1 %v4988_v39  ;;  %v999_v57 = vshll.u32 %v5845_v45, 16  ;;  %v5916_v39 = vrot.slane %v983_v31, 1  ;;  %v5931_v31 = vld [vmem:[%s5332_s26 + $0x180] ss:$16 sps:$4 sm:$0xff]   ;;  %v1071_v7 = vshll.u32 %v5941_v20, 16  ;;  %v1005_v30 = vor.u32 %v7383_v3, %v5867_v16 }
  0x7d   : > { %2101 = vmatprep.subr.bf16.mxu0 %v7365_v27  ;;  %2270 = vmatprep.subr.bf16.mxu1 %v7365_v27  ;;  %v957_v13 = vor.u32 %v7372_v12, %v5778_v10  ;;  %v1055_v12 = vshll.u32 %v5911_v59, 16  ;;  %v5975_v44 = vrot.slane %v1039_v36, 1  ;;  %v7377_v36 = vshrl.u32 %v5681_v23, 16 }
  0x7e   : > { %1560 = vmatmul.mubr.bf16.gmra.mrb[24].mxu0 %v5860_v43  ;;  %1729 = vmatmul.mubr.bf16.gmra.mrb[24].mxu1 %v5874_v1  ;;  %v5925_v43 = vrot.slane %v1007_v38, 1  ;;  %v5927_v1 = vrot.slane %v1023_v11, 1  ;;  %v5006_v11 = vld [vmem:[%s7311_s1 + $0xe8] sm:$0xff]   ;;  %v5947_v10 = vrot.slane %v999_v57, 1  ;;  %v5949_v38 = vrot.slane %v1015_v8, 1 }
  0x7f   : > { %1567 = vmatprep.mubr.bf16.mxu0 %v5878_v26  ;;  %1736 = vmatprep.mubr.bf16.mxu1 %v5887_v25  ;;  %v5960_v26 = vsel %vm658_vm0, %v917_v56, %v5782_v5  ;;  %v5963_v57 = vld [vmem:[%s5332_s26 + $0x1ac] ss:$16 sps:$4 sm:$0xff]   ;;  %v5967_v8 = vsel %vm658_vm0, %v941_v17, %v5786_v22  ;;  %v5983_v17 = vld [vmem:[%s5332_s26 + $0x1a0] ss:$16 sps:$4 sm:$0xff]   ;;  %v5989_v25 = vld [vmem:[%s5332_s26 + $0x1c4] ss:$16 sps:$4 sm:$0xff]  }
  0x80   : > { %2102 = vmatpush1.bf16.msra.mxu0 %v4995_v15  ;;  %2271 = vmatpush1.bf16.msra.mxu1 %v4996_v41  ;;  %v5956_v41 = vsel %vm658_vm0, %v901_v61, %v5780_v55  ;;  %7374 = vst [vmem:[#allocation21_spill] sm:$0xff] %v5960_v26  ;;  %7375 = vst [vmem:[#allocation22_spill] sm:$0xff] %v5967_v8  ;;  %v5971_v15 = vsel %vm658_vm0, %v957_v13, %v5795_v0  ;;  %v1031_v61 = vshll.u32 %v5931_v31, 16  ;;  %v5986_v13 = vld [vmem:[%s5332_s26 + $0x1a8] ss:$16 sps:$4 sm:$0xff]  }
  0x81   : > { %2103 = vmatprep.subr.bf16.mxu0 %v7365_v27  ;;  %2272 = vmatprep.subr.bf16.mxu1 %v7365_v27  ;;  %7373 = vst [vmem:[#allocation20_spill] sm:$0xff] %v5956_v41  ;;  %7376 = vst [vmem:[#allocation23_spill] sm:$0xff] %v5971_v15  ;;  %v1087_v23 = vshll.u32 %v5963_v57, 16  ;;  %v6022_v5 = vrot.slane %v1047_v28, 1  ;;  %v6031_v56 = vld [vmem:[%s5332_s26 + $0x1c0] ss:$16 sps:$4 sm:$0xff]   ;;  %v6045_v0 = vsel %vm658_vm0, %v949_v63, %v5841_v34 }
  0x82   : > { %v6010_v62 = vrot.slane %v1031_v61, 1  ;;  %v1079_v61 = vshll.u32 %v5986_v13, 16  ;;  %v6096_v63 = vld [vmem:[%s5332_s26 + $0x1e4] ss:$16 sps:$4 sm:$0xff]   ;;  %v7391_v3 = vshrl.u32 %v5829_v60, 16 }
  0x84   : > { %2104 = vmatpush1.bf16.msra.mxu0 %v5005_v46  ;;  %2273 = vmatpush1.bf16.msra.mxu1 %v5006_v11  ;;  %v933_v46 = vor.u32 %v7377_v36, %v5780_v55  ;;  %v5997_v11 = vrot.slane %v1055_v12, 1  ;;  %v5013_v55 = vld [vmem:[%s7311_s1 + $0x70] sm:$0xff]   ;;  %v1103_v36 = vshll.u32 %v5989_v25, 16 }
  0x85   : > { %2105 = vmatprep.subr.bf16.mxu0 %v7365_v27  ;;  %2274 = vmatprep.subr.bf16.mxu1 %v7365_v27  ;;  %v5014_v12 = vld [vmem:[%s7311_s1 + $0xf0] sm:$0xff]  }
  0x86   : > { %1568 = vmatmul.mubr.bf16.gmra.mrb[28].mxu0 %v5956_v41  ;;  %1737 = vmatmul.mubr.bf16.gmra.mrb[28].mxu1 %v5960_v26  ;;  %v6001_v41 = vld [vmem:[%s5332_s26 + $0x1cc] ss:$16 sps:$4 sm:$0xff]   ;;  %v6035_v52 = vsel %vm658_vm0, %v933_v46, %v5797_v2  ;;  %v6051_v46 = vrot.slane %v1087_v23, 1  ;;  %v6068_v23 = vrot.slane %v1079_v61, 1  ;;  %v7382_v61 = vshrl.u32 %v5742_v9, 16 }
  0x87   : > { %1575 = vmatprep.mubr.bf16.mxu0 %v5967_v8  ;;  %1744 = vmatprep.mubr.bf16.mxu1 %v5971_v15  ;;  %v7379_v8 = vshrl.u32 %v5709_v47, 16  ;;  %v1119_v28 = vshll.u32 %v6001_v41, 16  ;;  %v7381_v47 = vshrl.u32 %v5724_v54, 16  ;;  %v6074_v54 = vrot.slane %v1103_v36, 1  ;;  %v6101_v9 = vld [vmem:[%s5332_s26 + $0x1ec] ss:$16 sps:$4 sm:$0xff]  }
  0x88   : > { %2106 = vmatpush1.bf16.msra.mxu0 %v5013_v55  ;;  %2275 = vmatpush1.bf16.msra.mxu1 %v5014_v12  ;;  %v5020_v12 = vld [vmem:[%s7311_s1 + $0xf8] sm:$0xff]   ;;  %v1095_v36 = vshll.u32 %v6031_v56, 16 }
  0x89   : > { %v973_v26 = vor.u32 %v7379_v8, %v5786_v22  ;;  %v6025_v22 = vrot.slane %v1071_v7, 1  ;;  %v1063_v8 = vshll.u32 %v5983_v17, 16  ;;  %2107 = vmatprep.subr.bf16.mxu0 %v7365_v27  ;;  %2276 = vmatprep.subr.bf16.mxu1 %v7365_v27  ;;  %v5019_v7 = vld [vmem:[%s7311_s1 + $0x78] sm:$0xff]   ;;  %v965_v15 = vor.u32 %v7381_v47, %v5797_v2 }
  0x8a   : > { %v6076_v2 = vrot.slane %v1119_v28, 1  ;;  %v6089_v28 = vld [vmem:[%s5332_s26 + $0x1c8] ss:$16 sps:$4 sm:$0xff]  }
  0x8b   : > { %v6049_v55 = vsel %vm658_vm0, %v973_v26, %v5867_v16  ;;  %v6066_v26 = vrot.slane %v1063_v8, 1  ;;  %v7384_v8 = vshrl.u32 %v5801_v14, 16  ;;  %v6105_v4 = vsel %vm658_vm0, %v965_v15, %v5894_v48  ;;  %v6116_v16 = vld [vmem:[%s5332_s26 + $0x1e0] ss:$16 sps:$4 sm:$0xff]  }
  0x8c   : > { %2277 = vmatpush1.bf16.msra.mxu1 %v5020_v12  ;;  %v981_v12 = vor.u32 %v7382_v61, %v5841_v34  ;;  %2108 = vmatpush1.bf16.msra.mxu0 %v5019_v7  ;;  %7385 = vst [vmem:[#allocation24_spill] sm:$0xff] %v6105_v4  ;;  %v6113_v14 = vsel %vm658_vm0, %v1005_v30, %v5925_v43  ;;  %v6123_v7 = vld [vmem:[%s5332_s26 + $0x1e8] ss:$16 sps:$4 sm:$0xff]   ;;  %v1111_v15 = vshll.u32 %v6089_v28, 16  ;;  %v7389_v30 = vshrl.u32 %v5812_v21, 16 }
  0x8d   : > { %v1021_v33 = vor.u32 %v7384_v8, %v5892_v6  ;;  %2752 = vmatprep.subr.bf16.mxu0 %v7365_v27  ;;  %2921 = vmatprep.subr.bf16.mxu1 %v7365_v27  ;;  %7387 = vst [vmem:[#allocation26_spill] sm:$0xff] %v6113_v14  ;;  %v6133_v61 = vrot.slane %v1095_v36, 1  ;;  %v1127_v36 = vshll.u32 %v6116_v16, 16 }
  0x8e   : > { %1576 = vmatmul.mubr.bf16.gmra.mrb[32].mxu0 %v6035_v52  ;;  %1745 = vmatmul.mubr.bf16.gmra.mrb[32].mxu1 %v6045_v0  ;;  %v6109_v34 = vsel %vm658_vm0, %v981_v12, %v5916_v39  ;;  %v997_v8 = vor.u32 %v7389_v30, %v5894_v48  ;;  %v7390_v12 = vshrl.u32 %v5823_v19, 16  ;;  %v7392_v48 = vshrl.u32 %v5832_v49, 16 }
  0x8f   : > { %1583 = vmatprep.mubr.bf16.mxu0 %v6049_v55  ;;  %1752 = vmatprep.mubr.bf16.mxu1 %v6058_v40  ;;  %7386 = vst [vmem:[#allocation25_spill] sm:$0xff] %v6109_v34  ;;  %v6120_v6 = vsel %vm658_vm0, %v1021_v33, %v5927_v1  ;;  %v1135_v33 = vshll.u32 %v6096_v63, 16  ;;  %v1143_v30 = vshll.u32 %v6123_v7, 16  ;;  %v7396_v19 = vshrl.u32 %v5864_v37, 16 }
  0x90   : > { %7388 = vst [vmem:[#allocation27_spill] sm:$0xff] %v6120_v6  ;;  %v1013_v47 = vor.u32 %v7390_v12, %v5916_v39  ;;  %v1053_v21 = vor.u32 %v7392_v48, %v5927_v1  ;;  %v6155_v60 = vsel %vm658_vm0, %v997_v8, %v5947_v10  ;;  %v6176_v8 = vrot.slane %v1127_v36, 1  ;;  %v6193_v36 = vld [vmem:[%s5332_s26 + $0x200] ss:$16 sps:$4 sm:$0xff]  }
  0x91   : > { %v6168_v39 = vrot.slane %v1135_v33, 1  ;;  %v6178_v12 = vrot.slane %v1143_v30, 1  ;;  %v1179_v48 = vshrl.u32 %v6101_v9, 16 }
  0x92   : > { %v6162_v49 = vsel %vm658_vm0, %v1013_v47, %v5949_v38  ;;  %v1163_v47 = vshrl.u32 %v6096_v63, 16 }
  0x93   : > { %7393 = vst [vmem:[#allocation28_spill] sm:$0xff] %v6162_v49 }
  0x96   : > { %1584 = vmatmul.mubr.bf16.gmra.mrb[36].mxu0 %v6105_v4  ;;  %1753 = vmatmul.mubr.bf16.gmra.mrb[36].mxu1 %v6109_v34  ;;  %v1037_v34 = vor.u32 %v7391_v3, %v5925_v43  ;;  %v6158_v43 = vld [vmem:[%s5332_s26 + $0x204] ss:$16 sps:$4 sm:$0xff]   ;;  %v6174_v3 = vsel %vm658_vm0, %v1053_v21, %v5997_v11  ;;  %v6190_v21 = vld [vmem:[%s5332_s26 + $0x20c] ss:$16 sps:$4 sm:$0xff]   ;;  %v1045_v4 = vor.u32 %v7396_v19, %v5949_v38  ;;  %v1159_v38 = vshll.u32 %v6193_v36, 16 }
  0x97   : > { %1591 = vmatprep.mubr.bf16.mxu0 %v6113_v14  ;;  %1760 = vmatprep.mubr.bf16.mxu1 %v6120_v6  ;;  %v1151_v14 = vshll.u32 %v6101_v9, 16  ;;  %v6150_v6 = vrot.slane %v1111_v15, 1  ;;  %v1167_v33 = vshll.u32 %v6158_v43, 16 }
  0x98   : > { %v6166_v1 = vsel %vm658_vm0, %v1037_v34, %v5975_v44  ;;  %v7395_v34 = vshrl.u32 %v5845_v45, 16  ;;  %v6212_v30 = vsel %vm658_vm0, %v1045_v4, %v6022_v5  ;;  %v7400_v4 = vshrl.u32 %v5931_v31, 16 }
  0x99   : > { %7394 = vst [vmem:[#allocation29_spill] sm:$0xff] %v6166_v1  ;;  %v6170_v15 = vrot.slane %v1151_v14, 1 }
  0x9a   : > { %v1029_v14 = vor.u32 %v7395_v34, %v5947_v10  ;;  %v7398_v10 = vshrl.u32 %v5911_v59, 16  ;;  %v1183_v59 = vshll.u32 %v6190_v21, 16  ;;  %v1061_v19 = vor.u32 %v7400_v4, %v6010_v62 }
  0x9b   : > { %v7404_v4 = vshrl.u32 %v5983_v17, 16 }
  0x9c   : > { %v1085_v34 = vor.u32 %v7398_v10, %v5997_v11  ;;  %v1171_v11 = vshrl.u32 %v6123_v7, 16  ;;  %v6246_v31 = vsel %vm658_vm0, %v1061_v19, %v6066_v26 }
  0x9d   : > { %v1093_v19 = vor.u32 %v7404_v4, %v6066_v26 }
  0x9e   : > { %1592 = vmatmul.mubr.bf16.gmra.mrb[40].mxu0 %v6155_v60  ;;  %1761 = vmatmul.mubr.bf16.gmra.mrb[40].mxu1 %v6162_v49  ;;  %v6208_v49 = vsel %vm658_vm0, %v1029_v14, %v6010_v62  ;;  %v7401_v14 = vshrl.u32 %v5938_v18, 16 }
  0x9f   : > { %1599 = vmatprep.mubr.bf16.mxu0 %v6166_v1  ;;  %1768 = vmatprep.mubr.bf16.mxu1 %v6174_v3  ;;  %v7397_v1 = vshrl.u32 %v5897_v42, 16  ;;  %v6220_v42 = vsel %vm658_vm0, %v1085_v34, %v6051_v46  ;;  %v7403_v34 = vshrl.u32 %v5963_v57, 16 }
  0xa1   : > { %v1069_v45 = vor.u32 %v7397_v1, %v5975_v44  ;;  %v1169_v44 = vrot.slane %v1167_v33, 1  ;;  %v6232_v1 = vld [vmem:[%s5332_s26 + $0x208] ss:$16 sps:$4 sm:$0xff]   ;;  %v1077_v33 = vor.u32 %v7401_v14, %v6022_v5  ;;  %v1185_v5 = vrot.slane %v1183_v59, 1 }
  0xa2   : > { %v1175_v57 = vshll.u32 %v6232_v1, 16 }
  0xa3   : > { %v6216_v37 = vsel %vm658_vm0, %v1069_v45, %v6025_v22  ;;  %v7402_v45 = vshrl.u32 %v5941_v20, 16  ;;  %v6250_v62 = vsel %vm658_vm0, %v1077_v33, %v6068_v23  ;;  %v7407_v33 = vshrl.u32 %v6001_v41, 16 }
  0xa4   : > { %7399 = vst [vmem:[#allocation30_spill] sm:$0xff] %v6216_v37  ;;  %v1195_v41 = vshrl.u32 %v6158_v43, 16 }
  0xa5   : > { %v1101_v10 = vor.u32 %v7402_v45, %v6025_v22  ;;  %v1161_v22 = vrot.slane %v1159_v38, 1  ;;  %v7406_v38 = vshrl.u32 %v5989_v25, 16  ;;  %v1149_v45 = vor.u32 %v7407_v33, %v6076_v2 }
  0xa6   : > { %1600 = vmatmul.mubr.bf16.gmra.mrb[44].mxu0 %v6208_v49  ;;  %1769 = vmatmul.mubr.bf16.gmra.mrb[44].mxu1 %v6212_v30 }
  0xa7   : > { %1607 = vmatprep.mubr.bf16.mxu0 %v6216_v37  ;;  %1776 = vmatprep.mubr.bf16.mxu1 %v6220_v42  ;;  %v1117_v37 = vor.u32 %v7403_v34, %v6051_v46  ;;  %v6254_v18 = vsel %vm658_vm0, %v1101_v10, %v6074_v54  ;;  %v241_v46 = vld [vmem:[%s5332_s26 + $0x220] sm:$0xff]  ;;  %v1133_v14 = vor.u32 %v7406_v38, %v6074_v54  ;;  %v1211_v54 = vshrl.u32 %v6190_v21, 16 }
  0xa8   : > { %v4401_v10 = vcombine.high %v241_v46, %v241_v46  ;;  %v6280_v34 = vsel %vm658_vm0, %v1093_v19, %v6133_v61  ;;  %v6292_v25 = vsel %vm658_vm0, %v1149_v45, %v6170_v15  ;;  %v7409_v19 = vshrl.u32 %v6089_v28, 16 }
  0xa9   : > { %v6258_v20 = vsel %vm658_vm0, %v1117_v37, %v6076_v2  ;;  %v7405_v37 = vshrl.u32 %v5986_v13, 16  ;;  %v6288_v13 = vsel %vm658_vm0, %v1133_v14, %v6168_v39  ;;  %v7408_v2 = vshrl.u32 %v6031_v56, 16 }
  0xaa   : > { %v1199_v26 = vshll.u32 %v4401_v10, 16  ;;  %v1181_v38 = vor.u32 %v1179_v48, %v6170_v15  ;;  %v7410_v15 = vshrl.u32 %v6116_v16, 16  ;;  %v4400_v48 = vcombine.low %v241_v46, %v241_v46 }
  0xab   : > { %v1109_v59 = vor.u32 %v7405_v37, %v6068_v23  ;;  %v242_v23 = vld [vmem:[%s5332_s26 + $0x228] sm:$0xff]  ;;  %v1125_v4 = vor.u32 %v7408_v2, %v6133_v61  ;;  %v1141_v37 = vor.u32 %v7409_v19, %v6150_v6  ;;  %v1173_v2 = vor.u32 %v1171_v11, %v6178_v12 }
  0xac   : > { %v4403_v14 = vcombine.high %v242_v23, %v242_v23  ;;  %v6321_v61 = vsel %vm658_vm0, %v1181_v38, %v1185_v5  ;;  %v1201_v10 = vrot.slane %v1199_v26, 1  ;;  %v6333_v26 = vor.u32 %v1211_v54, %v1185_v5 }
  0xad   : > { %v6284_v17 = vsel %vm658_vm0, %v1109_v59, %v6150_v6  ;;  %v1165_v59 = vor.u32 %v1163_v47, %v6168_v39  ;;  %v6311_v33 = vsel %vm658_vm0, %v1125_v4, %v6176_v8  ;;  %v6315_v45 = vsel %vm658_vm0, %v1141_v37, %v6178_v12 }
  0xae   : > { %1608 = vmatmul.mubr.bf16.gmra.mrb[48].mxu0 %v6246_v31  ;;  %1777 = vmatmul.mubr.bf16.gmra.mrb[48].mxu1 %v6250_v62  ;;  %v1177_v6 = vrot.slane %v1175_v57, 1  ;;  %v1215_v39 = vshll.u32 %v4403_v14, 16  ;;  %v1157_v47 = vor.u32 %v7410_v15, %v6176_v8  ;;  %v6331_v4 = vor.u32 %v1195_v41, %v1169_v44  ;;  %v5022_v15 = vld [vmem:[%s7311_s1 + $0x280] sm:$0xff]  }
  0xaf   : > { %1615 = vmatprep.mubr.bf16.mxu0 %v6254_v18  ;;  %1784 = vmatprep.mubr.bf16.mxu1 %v6258_v20  ;;  %v6318_v56 = vsel %vm658_vm0, %v1165_v59, %v1169_v44  ;;  %v4402_v57 = vcombine.low %v242_v23, %v242_v23  ;;  %v1187_v59 = vshrl.u32 %v6193_v36, 16  ;;  %v1191_v38 = vshll.u32 %v4400_v48, 16  ;;  %v5096_v48 = vld [vmem:[%s5332_s26 + $0x8] ss:$16 sps:$4 sm:$0xff]  }
  0xb0   : > { %v1217_v19 = vrot.slane %v1215_v39, 1  ;;  %v6336_v37 = vsel %vm658_vm0, %v1157_v47, %v1161_v22  ;;  %v6340_v14 = vsel %vm658_vm0, %v1173_v2, %v1177_v6  ;;  %v1202_v8 = vsel %vm658_vm0, %v6331_v4, %v1201_v10  ;;  %v5093_v39 = vld [vmem:[%s5332_s26 + $0x4] ss:$16 sps:$4 sm:$0xff]   ;;  %v5095_v47 = vld [vmem:[%s5332_s26] ss:$16 sps:$4 sm:$0xff]   ;;  %v5023_v2 = vld [vmem:[%s7311_s1 + $0x208] sm:$0xff]  }
  0xb1   : > { %7411 = vst [vmem:[#allocation31_spill] sm:$0xff] %v6340_v14  ;;  %v1203_v12 = vshrl.u32 %v6232_v1, 16  ;;  %v1207_v44 = vshll.u32 %v4402_v57, 16  ;;  %v6349_v5 = vor.u32 %v1187_v59, %v1161_v22  ;;  %v1193_v46 = vrot.slane %v1191_v38, 1  ;;  %v5094_v22 = vld [vmem:[%s5332_s26 + $0xc] ss:$16 sps:$4 sm:$0xff]  }
  0xb2   : > { %v1218_v11 = vsel %vm658_vm0, %v6333_v26, %v1217_v19  ;;  %v5097_v57 = vld [vmem:[%s5332_s26 + $0x24] ss:$16 sps:$4 sm:$0xff]   ;;  %v5024_v19 = vld [vmem:[%s7311_s1 + $0x288] sm:$0xff]  }
  0xb3   : > { %7412 = vst [vmem:[#allocation32_spill] sm:$0xff] %v6349_v5  ;;  %v6351_v41 = vor.u32 %v1203_v12, %v1177_v6  ;;  %v1209_v23 = vrot.slane %v1207_v44, 1  ;;  %v1194_v54 = vsel %vm658_vm0, %v6349_v5, %v1193_v46  ;;  %v5021_v6 = vld [vmem:[%s7311_s1 + $0x200] sm:$0xff]   ;;  %v5098_v59 = vld [vmem:[%s5332_s26 + $0x2c] ss:$16 sps:$4 sm:$0xff]   ;;  %v5025_v38 = vld [vmem:[%s7311_s1 + $0x210] sm:$0xff]  }
  0xb4   : > { %v5099_v12 = vld [vmem:[%s5332_s26 + $0x20] ss:$16 sps:$4 sm:$0xff]   ;;  %v5100_v44 = vld [vmem:[%s5332_s26 + $0x28] ss:$16 sps:$4 sm:$0xff]   ;;  %v5102_v46 = vld [vmem:[%s5332_s26 + $0x4c] ss:$16 sps:$4 sm:$0xff]  }
  0xb5   : > { %7413 = vst [vmem:[#allocation33_spill] sm:$0xff] %v6351_v41  ;;  %v1210_v10 = vsel %vm658_vm0, %v6351_v41, %v1209_v23  ;;  %v5027_v23 = vld [vmem:[%s7311_s1 + $0x218] sm:$0xff]  }
  0xb6   : > { %1616 = vmatmul.mubr.bf16.gmra.mrb[52].mxu0 %v6280_v34  ;;  %1785 = vmatmul.mubr.bf16.gmra.mrb[52].mxu1 %v6284_v17  ;;  %v5148_v41 = vld [vmem:[%s5332_s26 + $0x1a8] ss:$16 sps:$4 sm:$0xff]  }
  0xb7   : > { %1623 = vmatprep.mubr.bf16.mxu0 %v6288_v13  ;;  %1792 = vmatprep.mubr.bf16.mxu1 %v6292_v25 }
  0xbe   : > { %1624 = vmatmul.mubr.bf16.gmra.mrb[56].mxu0 %v6311_v33  ;;  %1793 = vmatmul.mubr.bf16.gmra.mrb[56].mxu1 %v6315_v45 }
  0xbf   : > { %1631 = vmatprep.mubr.bf16.mxu0 %v6318_v56  ;;  %1800 = vmatprep.mubr.bf16.mxu1 %v6321_v61 }
  0xc6   : > { %1632 = vmatmul.mubr.bf16.gmra.mrb[60].mxu0 %v6336_v37  ;;  %1801 = vmatmul.mubr.bf16.gmra.mrb[60].mxu1 %v6340_v14 }
  0xc7   : > { %1639 = vmatprep.mubr.bf16.mxu0 %v1202_v8  ;;  %1808 = vmatprep.mubr.bf16.mxu1 %v1218_v11  ;;  %v5026_v8 = vld [vmem:[%s7311_s1 + $0x290] sm:$0xff]  }
  0xc8   : > { %v5101_v11 = vld [vmem:[%s5332_s26 + $0x44] ss:$16 sps:$4 sm:$0xff]  }
  0xce   : > { %1640 = vmatmul.mubr.bf16.gmra.mrb[64].mxu0 %v1194_v54  ;;  %1809 = vmatmul.mubr.bf16.gmra.mrb[64].mxu1 %v1210_v10  ;;  %v5028_v54 = vld [vmem:[%s7311_s1 + $0x298] sm:$0xff]   ;;  %v5029_v10 = vld [vmem:[%s7311_s1 + $0x220] sm:$0xff]  }
  0xcf   : > { %2109 = vmatprep.mubr.bf16.mxu0 %v5093_v39  ;;  %2278 = vmatprep.mubr.bf16.mxu1 %v5094_v22  ;;  %v5030_v39 = vld [vmem:[%s7311_s1 + $0x2a0] sm:$0xff]  }
  0xd0   : > { %v5103_v22 = vld [vmem:[%s5332_s26 + $0x40] ss:$16 sps:$4 sm:$0xff]  }
  0xd6   : > { %2110 = vmatmul.mubr.bf16.vlgmr.msra.gmra.mrb[68].mxu0 %v5095_v47  ;;  %2279 = vmatmul.mubr.bf16.vlgmr.msra.gmra.mrb[68].mxu1 %v5096_v48  ;;  %v5106_v47 = vld [vmem:[%s5332_s26 + $0x6c] ss:$16 sps:$4 sm:$0xff]  }
  0xd7   : > { %2753 = vmatpush1.bf16.msra.mxu0 %v5021_v6  ;;  %2922 = vmatpush1.bf16.msra.mxu1 %v5022_v15  ;;  %v5104_v6 = vld [vmem:[%s5332_s26 + $0x48] ss:$16 sps:$4 sm:$0xff]   ;;  %v5105_v15 = vld [vmem:[%s5332_s26 + $0x64] ss:$16 sps:$4 sm:$0xff]  }
  0xd8   : > { %2117 = vmatprep.mubr.bf16.mxu0 %v5097_v57  ;;  %2286 = vmatprep.mubr.bf16.mxu1 %v5098_v59  ;;  %v5031_v48 = vld [vmem:[%s7311_s1 + $0x228] sm:$0xff]   ;;  %v5033_v57 = vld [vmem:[%s7311_s1 + $0x230] sm:$0xff]  }
  0xd9   : > { %2754 = vmatprep.subr.bf16.mxu0 %v7365_v27  ;;  %2923 = vmatprep.subr.bf16.mxu1 %v7365_v27  ;;  %v5107_v59 = vld [vmem:[%s5332_s26 + $0x60] ss:$16 sps:$4 sm:$0xff]  }
  0xdb   : > { %2755 = vmatpush1.bf16.msra.mxu0 %v5023_v2  ;;  %2924 = vmatpush1.bf16.msra.mxu1 %v5024_v19  ;;  %v5032_v2 = vld [vmem:[%s7311_s1 + $0x2a8] sm:$0xff]   ;;  %v5034_v19 = vld [vmem:[%s7311_s1 + $0x2b0] sm:$0xff]  }
  0xdc   : > { %2756 = vmatprep.subr.bf16.mxu0 %v7365_v27  ;;  %2925 = vmatprep.subr.bf16.mxu1 %v7365_v27 }
  0xde   : > { %2118 = vmatmul.mubr.bf16.gmra.mrb[72].mxu0 %v5099_v12  ;;  %2287 = vmatmul.mubr.bf16.gmra.mrb[72].mxu1 %v5100_v44  ;;  %v5110_v12 = vld [vmem:[%s5332_s26 + $0x8c] ss:$16 sps:$4 sm:$0xff]  }
  0xdf   : > { %2125 = vmatprep.mubr.bf16.mxu0 %v5101_v11  ;;  %2294 = vmatprep.mubr.bf16.mxu1 %v5102_v46  ;;  %v5035_v44 = vld [vmem:[%s7311_s1 + $0x238] sm:$0xff]   ;;  %v5037_v46 = vld [vmem:[%s7311_s1 + $0x240] sm:$0xff]  }
  0xe0   : > { %2757 = vmatpush1.bf16.msra.mxu0 %v5025_v38  ;;  %2926 = vmatpush1.bf16.msra.mxu1 %v5026_v8  ;;  %v5108_v38 = vld [vmem:[%s5332_s26 + $0x68] ss:$16 sps:$4 sm:$0xff]   ;;  %v5109_v8 = vld [vmem:[%s5332_s26 + $0x84] ss:$16 sps:$4 sm:$0xff]  }
  0xe1   : > { %2758 = vmatprep.subr.bf16.mxu0 %v7365_v27  ;;  %2927 = vmatprep.subr.bf16.mxu1 %v7365_v27  ;;  %v5036_v11 = vld [vmem:[%s7311_s1 + $0x2b8] sm:$0xff]  }
  0xe4   : > { %2759 = vmatpush1.bf16.msra.mxu0 %v5027_v23  ;;  %2928 = vmatpush1.bf16.msra.mxu1 %v5028_v54  ;;  %v5038_v23 = vld [vmem:[%s7311_s1 + $0x2c0] sm:$0xff]  }
  0xe5   : > { %2760 = vmatprep.subr.bf16.mxu0 %v7365_v27  ;;  %2929 = vmatprep.subr.bf16.mxu1 %v7365_v27  ;;  %v5111_v54 = vld [vmem:[%s5332_s26 + $0x80] ss:$16 sps:$4 sm:$0xff]  }
  0xe6   : > { %2126 = vmatmul.mubr.bf16.gmra.mrb[76].mxu0 %v5103_v22  ;;  %2295 = vmatmul.mubr.bf16.gmra.mrb[76].mxu1 %v5104_v6  ;;  %v5114_v22 = vld [vmem:[%s5332_s26 + $0xac] ss:$16 sps:$4 sm:$0xff]  }
  0xe7   : > { %2133 = vmatprep.mubr.bf16.mxu0 %v5105_v15  ;;  %2302 = vmatprep.mubr.bf16.mxu1 %v5106_v47  ;;  %v5039_v6 = vld [vmem:[%s7311_s1 + $0x248] sm:$0xff]   ;;  %v5041_v47 = vld [vmem:[%s7311_s1 + $0x250] sm:$0xff]  }
  0xe8   : > { %2761 = vmatpush1.bf16.msra.mxu0 %v5029_v10  ;;  %2930 = vmatpush1.bf16.msra.mxu1 %v5030_v39  ;;  %v5112_v10 = vld [vmem:[%s5332_s26 + $0x88] ss:$16 sps:$4 sm:$0xff]   ;;  %v5113_v39 = vld [vmem:[%s5332_s26 + $0xa4] ss:$16 sps:$4 sm:$0xff]  }
  0xe9   : > { %2762 = vmatprep.subr.bf16.mxu0 %v7365_v27  ;;  %2931 = vmatprep.subr.bf16.mxu1 %v7365_v27  ;;  %v5040_v15 = vld [vmem:[%s7311_s1 + $0x2c8] sm:$0xff]  }
  0xec   : > { %2763 = vmatpush1.bf16.msra.mxu0 %v5031_v48  ;;  %2932 = vmatpush1.bf16.msra.mxu1 %v5032_v2  ;;  %v5042_v48 = vld [vmem:[%s7311_s1 + $0x2d0] sm:$0xff]  }
  0xed   : > { %2764 = vmatprep.subr.bf16.mxu0 %v7365_v27  ;;  %2933 = vmatprep.subr.bf16.mxu1 %v7365_v27  ;;  %v5115_v2 = vld [vmem:[%s5332_s26 + $0xa0] ss:$16 sps:$4 sm:$0xff]  }
  0xee   : > { %2134 = vmatmul.mubr.bf16.gmra.mrb[80].mxu0 %v5107_v59  ;;  %2303 = vmatmul.mubr.bf16.gmra.mrb[80].mxu1 %v5108_v38  ;;  %v5118_v59 = vld [vmem:[%s5332_s26 + $0xcc] ss:$16 sps:$4 sm:$0xff]  }
  0xef   : > { %2141 = vmatprep.mubr.bf16.mxu0 %v5109_v8  ;;  %2310 = vmatprep.mubr.bf16.mxu1 %v5110_v12  ;;  %v5043_v38 = vld [vmem:[%s7311_s1 + $0x258] sm:$0xff]   ;;  %v5045_v12 = vld [vmem:[%s7311_s1 + $0x260] sm:$0xff]  }
  0xf0   : > { %2765 = vmatpush1.bf16.msra.mxu0 %v5033_v57  ;;  %2934 = vmatpush1.bf16.msra.mxu1 %v5034_v19  ;;  %v5116_v57 = vld [vmem:[%s5332_s26 + $0xa8] ss:$16 sps:$4 sm:$0xff]   ;;  %v5117_v19 = vld [vmem:[%s5332_s26 + $0xc4] ss:$16 sps:$4 sm:$0xff]  }
  0xf1   : > { %2766 = vmatprep.subr.bf16.mxu0 %v7365_v27  ;;  %2935 = vmatprep.subr.bf16.mxu1 %v7365_v27  ;;  %v5044_v8 = vld [vmem:[%s7311_s1 + $0x2d8] sm:$0xff]  }
  0xf4   : > { %2767 = vmatpush1.bf16.msra.mxu0 %v5035_v44  ;;  %2936 = vmatpush1.bf16.msra.mxu1 %v5036_v11  ;;  %v5046_v44 = vld [vmem:[%s7311_s1 + $0x2e0] sm:$0xff]  }
  0xf5   : > { %2768 = vmatprep.subr.bf16.mxu0 %v7365_v27  ;;  %2937 = vmatprep.subr.bf16.mxu1 %v7365_v27  ;;  %v5119_v11 = vld [vmem:[%s5332_s26 + $0xc0] ss:$16 sps:$4 sm:$0xff]  }
  0xf6   : > { %2142 = vmatmul.mubr.bf16.gmra.mrb[84].mxu0 %v5111_v54  ;;  %2311 = vmatmul.mubr.bf16.gmra.mrb[84].mxu1 %v5112_v10  ;;  %v5122_v54 = vld [vmem:[%s5332_s26 + $0xec] ss:$16 sps:$4 sm:$0xff]  }
  0xf7   : > { %2149 = vmatprep.mubr.bf16.mxu0 %v5113_v39  ;;  %2318 = vmatprep.mubr.bf16.mxu1 %v5114_v22  ;;  %v5047_v10 = vld [vmem:[%s7311_s1 + $0x268] sm:$0xff]   ;;  %v5049_v22 = vld [vmem:[%s7311_s1 + $0x270] sm:$0xff]  }
  0xf8   : > { %2769 = vmatpush1.bf16.msra.mxu0 %v5037_v46  ;;  %2938 = vmatpush1.bf16.msra.mxu1 %v5038_v23  ;;  %v5120_v46 = vld [vmem:[%s5332_s26 + $0xc8] ss:$16 sps:$4 sm:$0xff]   ;;  %v5121_v23 = vld [vmem:[%s5332_s26 + $0xe4] ss:$16 sps:$4 sm:$0xff]  }
  0xf9   : > { %2770 = vmatprep.subr.bf16.mxu0 %v7365_v27  ;;  %2939 = vmatprep.subr.bf16.mxu1 %v7365_v27  ;;  %v5048_v39 = vld [vmem:[%s7311_s1 + $0x2e8] sm:$0xff]  }
  0xfc   : > { %2771 = vmatpush1.bf16.msra.mxu0 %v5039_v6  ;;  %2940 = vmatpush1.bf16.msra.mxu1 %v5040_v15  ;;  %v5050_v6 = vld [vmem:[%s7311_s1 + $0x2f0] sm:$0xff]  }
  0xfd   : > { %2772 = vmatprep.subr.bf16.mxu0 %v7365_v27  ;;  %2941 = vmatprep.subr.bf16.mxu1 %v7365_v27  ;;  %v5123_v15 = vld [vmem:[%s5332_s26 + $0xe0] ss:$16 sps:$4 sm:$0xff]  }
  0xfe   : > { %2150 = vmatmul.mubr.bf16.gmra.mrb[88].mxu0 %v5115_v2  ;;  %2319 = vmatmul.mubr.bf16.gmra.mrb[88].mxu1 %v5116_v57  ;;  %v5126_v2 = vld [vmem:[%s5332_s26 + $0x10c] ss:$16 sps:$4 sm:$0xff]  }
  0xff   : > { %2157 = vmatprep.mubr.bf16.mxu0 %v5117_v19  ;;  %2326 = vmatprep.mubr.bf16.mxu1 %v5118_v59  ;;  %v5051_v57 = vld [vmem:[%s7311_s1 + $0x278] sm:$0xff]   ;;  %v5127_v59 = vld [vmem:[%s5332_s26 + $0x100] ss:$16 sps:$4 sm:$0xff]  }
 0x100   : > { %2773 = vmatpush1.bf16.msra.mxu0 %v5041_v47  ;;  %2942 = vmatpush1.bf16.msra.mxu1 %v5042_v48  ;;  %v5124_v47 = vld [vmem:[%s5332_s26 + $0xe8] ss:$16 sps:$4 sm:$0xff]   ;;  %v5125_v48 = vld [vmem:[%s5332_s26 + $0x104] ss:$16 sps:$4 sm:$0xff]  }
 0x101   : > { %2774 = vmatprep.subr.bf16.mxu0 %v7365_v27  ;;  %2943 = vmatprep.subr.bf16.mxu1 %v7365_v27  ;;  %v5052_v19 = vld [vmem:[%s7311_s1 + $0x2f8] sm:$0xff]  }
 0x104   : > { %2775 = vmatpush1.bf16.msra.mxu0 %v5043_v38  ;;  %2944 = vmatpush1.bf16.msra.mxu1 %v5044_v8  ;;  %v5128_v38 = vld [vmem:[%s5332_s26 + $0x108] ss:$16 sps:$4 sm:$0xff]   ;;  %v5129_v8 = vld [vmem:[%s5332_s26 + $0x124] ss:$16 sps:$4 sm:$0xff]  }
 0x105   : > { %2776 = vmatprep.subr.bf16.mxu0 %v7365_v27  ;;  %2945 = vmatprep.subr.bf16.mxu1 %v7365_v27 }
 0x106   : > { %2158 = vmatmul.mubr.bf16.gmra.mrb[92].mxu0 %v5119_v11  ;;  %2327 = vmatmul.mubr.bf16.gmra.mrb[92].mxu1 %v5120_v46  ;;  %v5132_v11 = vld [vmem:[%s5332_s26 + $0x128] ss:$16 sps:$4 sm:$0xff]   ;;  %v5133_v46 = vld [vmem:[%s5332_s26 + $0x144] ss:$16 sps:$4 sm:$0xff]  }
 0x107   : > { %2165 = vmatprep.mubr.bf16.mxu0 %v5121_v23  ;;  %2334 = vmatprep.mubr.bf16.mxu1 %v5122_v54  ;;  %v5134_v23 = vld [vmem:[%s5332_s26 + $0x14c] ss:$16 sps:$4 sm:$0xff]  }
 0x108   : > { %2777 = vmatpush1.bf16.msra.mxu0 %v5045_v12  ;;  %2946 = vmatpush1.bf16.msra.mxu1 %v5046_v44  ;;  %v5130_v12 = vld [vmem:[%s5332_s26 + $0x12c] ss:$16 sps:$4 sm:$0xff]   ;;  %v5131_v44 = vld [vmem:[%s5332_s26 + $0x120] ss:$16 sps:$4 sm:$0xff]  }
 0x109   : > { %2778 = vmatprep.subr.bf16.mxu0 %v7365_v27  ;;  %2947 = vmatprep.subr.bf16.mxu1 %v7365_v27 }
 0x10c   : > { %2779 = vmatpush1.bf16.msra.mxu0 %v5047_v10  ;;  %2948 = vmatpush1.bf16.msra.mxu1 %v5048_v39 }
 0x10d   : > { %2780 = vmatprep.subr.bf16.mxu0 %v7365_v27  ;;  %2949 = vmatprep.subr.bf16.mxu1 %v7365_v27 }
 0x10e   : > { %2166 = vmatmul.mubr.bf16.gmra.mrb[96].mxu0 %v5123_v15  ;;  %2335 = vmatmul.mubr.bf16.gmra.mrb[96].mxu1 %v5124_v47 }
 0x10f   : > { %2173 = vmatprep.mubr.bf16.mxu0 %v5125_v48  ;;  %2342 = vmatprep.mubr.bf16.mxu1 %v5126_v2 }
 0x110   : > { %2781 = vmatpush1.bf16.msra.mxu0 %v5049_v22  ;;  %2950 = vmatpush1.bf16.msra.mxu1 %v5050_v6 }
 0x111   : > { %2782 = vmatprep.subr.bf16.mxu0 %v7365_v27  ;;  %2951 = vmatprep.subr.bf16.mxu1 %v7365_v27 }
 0x114   : > { %2783 = vmatpush1.bf16.msra.mxu0 %v5051_v57  ;;  %2952 = vmatpush1.bf16.msra.mxu1 %v5052_v19  ;;  %v5135_v19 = vld [vmem:[%s5332_s26 + $0x140] ss:$16 sps:$4 sm:$0xff]  }
 0x115   : > { %3590 = vmatprep.subr.bf16.mxu0 %v7365_v27  ;;  %3759 = vmatprep.subr.bf16.mxu1 %v7365_v27 }
 0x116   : > { %2174 = vmatmul.mubr.bf16.gmra.mrb[100].mxu0 %v5127_v59  ;;  %2343 = vmatmul.mubr.bf16.gmra.mrb[100].mxu1 %v5128_v38  ;;  %v5136_v59 = vld [vmem:[%s5332_s26 + $0x148] ss:$16 sps:$4 sm:$0xff]   ;;  %v5137_v38 = vld [vmem:[%s5332_s26 + $0x164] ss:$16 sps:$4 sm:$0xff]  }
 0x117   : > { %2181 = vmatprep.mubr.bf16.mxu0 %v5129_v8  ;;  %2350 = vmatprep.mubr.bf16.mxu1 %v5130_v12  ;;  %v5138_v8 = vld [vmem:[%s5332_s26 + $0x16c] ss:$16 sps:$4 sm:$0xff]  }
 0x11e   : > { %2182 = vmatmul.mubr.bf16.gmra.mrb[104].mxu0 %v5131_v44  ;;  %2351 = vmatmul.mubr.bf16.gmra.mrb[104].mxu1 %v5132_v11 }
 0x11f   : > { %2189 = vmatprep.mubr.bf16.mxu0 %v5133_v46  ;;  %2358 = vmatprep.mubr.bf16.mxu1 %v5134_v23 }
 0x121   : > { %v1513_v54 = vpop.f32.mrb[0].mxu0  ;;  %v1682_v10 = vpop.f32.mrb[0].mxu1 }
 0x122   : > { %v1515_v39 = vpop.f32.mrb[1].mxu0  ;;  %v1684_v22 = vpop.f32.mrb[1].mxu1  ;;  %v6527_v15 = vadd.f32 %v1682_v10, %v1513_v54 }
 0x123   : > { %v1516_v6 = vpop.f32.mrb[2].mxu0  ;;  %v1685_v47 = vpop.f32.mrb[2].mxu1 }
 0x124   : > { %v1518_v48 = vpop.f32.mrb[3].mxu0  ;;  %v1687_v2 = vpop.f32.mrb[3].mxu1  ;;  %v6529_v57 = vadd.f32 %v1685_v47, %v1516_v6  ;;  %v5139_v47 = vld [vmem:[%s5332_s26 + $0x160] ss:$16 sps:$4 sm:$0xff]  }
 0x125   : > { %v5140_v48 = vld [vmem:[%s5332_s26 + $0x168] ss:$16 sps:$4 sm:$0xff]   ;;  %v5141_v2 = vld [vmem:[%s5332_s26 + $0x184] ss:$16 sps:$4 sm:$0xff]  }
 0x126   : > { %2190 = vmatmul.mubr.bf16.gmra.mrb[108].mxu0 %v5135_v19  ;;  %2359 = vmatmul.mubr.bf16.gmra.mrb[108].mxu1 %v5136_v59  ;;  %v5142_v19 = vld [vmem:[%s5332_s26 + $0x18c] ss:$16 sps:$4 sm:$0xff]  }
 0x127   : > { %2197 = vmatprep.mubr.bf16.mxu0 %v5137_v38  ;;  %2366 = vmatprep.mubr.bf16.mxu1 %v5138_v8 }
 0x129   : > { %v1521_v12 = vpop.f32.mrb[4].mxu0  ;;  %v1690_v44 = vpop.f32.mrb[4].mxu1 }
 0x12a   : > { %v1523_v11 = vpop.f32.mrb[5].mxu0  ;;  %v1692_v46 = vpop.f32.mrb[5].mxu1  ;;  %v6535_v54 = vadd.f32 %v1690_v44, %v1521_v12 }
 0x12b   : > { %v1524_v23 = vpop.f32.mrb[6].mxu0  ;;  %v1693_v10 = vpop.f32.mrb[6].mxu1 }
 0x12c   : > { %v1526_v39 = vpop.f32.mrb[7].mxu0  ;;  %v1695_v22 = vpop.f32.mrb[7].mxu1  ;;  %v6537_v6 = vadd.f32 %v1693_v10, %v1524_v23 }
 0x12d   : > { %v5143_v22 = vld [vmem:[%s5332_s26 + $0x180] ss:$16 sps:$4 sm:$0xff]  }
 0x12e   : > { %2198 = vmatmul.mubr.bf16.gmra.mrb[112].mxu0 %v5139_v47  ;;  %2367 = vmatmul.mubr.bf16.gmra.mrb[112].mxu1 %v5140_v48  ;;  %v5144_v47 = vld [vmem:[%s5332_s26 + $0x188] ss:$16 sps:$4 sm:$0xff]   ;;  %v5145_v48 = vld [vmem:[%s5332_s26 + $0x1a4] ss:$16 sps:$4 sm:$0xff]  }
 0x12f   : > { %2205 = vmatprep.mubr.bf16.mxu0 %v5141_v2  ;;  %2374 = vmatprep.mubr.bf16.mxu1 %v5142_v19  ;;  %v5146_v2 = vld [vmem:[%s5332_s26 + $0x1ac] ss:$16 sps:$4 sm:$0xff]  }
 0x131   : > { %v1529_v59 = vpop.f32.mrb[8].mxu0  ;;  %v1698_v38 = vpop.f32.mrb[8].mxu1 }
 0x132   : > { %v1531_v8 = vpop.f32.mrb[9].mxu0  ;;  %v1700_v12 = vpop.f32.mrb[9].mxu1  ;;  %v6543_v11 = vadd.f32 %v1698_v38, %v1529_v59 }
 0x133   : > { %v1532_v44 = vpop.f32.mrb[10].mxu0  ;;  %v1701_v46 = vpop.f32.mrb[10].mxu1 }
 0x134   : > { %v1534_v23 = vpop.f32.mrb[11].mxu0  ;;  %v1703_v10 = vpop.f32.mrb[11].mxu1  ;;  %v6545_v39 = vadd.f32 %v1701_v46, %v1532_v44 }
 0x136   : > { %2206 = vmatmul.mubr.bf16.gmra.mrb[116].mxu0 %v5143_v22  ;;  %2375 = vmatmul.mubr.bf16.gmra.mrb[116].mxu1 %v5144_v47  ;;  %v5147_v47 = vld [vmem:[%s5332_s26 + $0x1a0] ss:$16 sps:$4 sm:$0xff]  }
 0x137   : > { %2213 = vmatprep.mubr.bf16.mxu0 %v5145_v48  ;;  %2382 = vmatprep.mubr.bf16.mxu1 %v5146_v2  ;;  %v5149_v48 = vld [vmem:[%s5332_s26 + $0x1c4] ss:$16 sps:$4 sm:$0xff]   ;;  %v5150_v2 = vld [vmem:[%s5332_s26 + $0x1cc] ss:$16 sps:$4 sm:$0xff]  }
 0x139   : > { %v1537_v19 = vpop.f32.mrb[12].mxu0  ;;  %v1706_v59 = vpop.f32.mrb[12].mxu1 }
 0x13a   : > { %v1539_v38 = vpop.f32.mrb[13].mxu0  ;;  %v1708_v8 = vpop.f32.mrb[13].mxu1  ;;  %v6551_v23 = vadd.f32 %v1706_v59, %v1537_v19 }
 0x13b   : > { %v1540_v12 = vpop.f32.mrb[14].mxu0  ;;  %v1709_v44 = vpop.f32.mrb[14].mxu1 }
 0x13c   : > { %v1542_v46 = vpop.f32.mrb[15].mxu0  ;;  %v1711_v10 = vpop.f32.mrb[15].mxu1  ;;  %v6553_v22 = vadd.f32 %v1709_v44, %v1540_v12 }
 0x13e   : > { %2214 = vmatmul.mubr.bf16.gmra.mrb[120].mxu0 %v5147_v47  ;;  %2383 = vmatmul.mubr.bf16.gmra.mrb[120].mxu1 %v5148_v41  ;;  %v5151_v47 = vld [vmem:[%s5332_s26 + $0x1c0] ss:$16 sps:$4 sm:$0xff]  }
 0x13f   : > { %2221 = vmatprep.mubr.bf16.mxu0 %v5149_v48  ;;  %2390 = vmatprep.mubr.bf16.mxu1 %v5150_v2 }
 0x141   : > { %v1545_v5 = vpop.f32.mrb[16].mxu0  ;;  %v1714_v38 = vpop.f32.mrb[16].mxu1 }
 0x142   : > { %v1547_v8 = vpop.f32.mrb[17].mxu0  ;;  %v6559_v14 = vadd.f32 %v1714_v38, %v1545_v5  ;;  %v1716_v19 = vpop.f32.mrb[17].mxu1 }
 0x143   : > { %v1548_v59 = vpop.f32.mrb[18].mxu0  ;;  %v1717_v46 = vpop.f32.mrb[18].mxu1 }
 0x144   : > { %v1550_v10 = vpop.f32.mrb[19].mxu0  ;;  %v6561_v12 = vadd.f32 %v1717_v46, %v1548_v59  ;;  %v1719_v44 = vpop.f32.mrb[19].mxu1 }
 0x146   : > { %2222 = vmatmul.mubr.bf16.gmra.mrb[124].mxu0 %v5151_v47  ;;  %2391 = vmatmul.mubr.bf16.gmra.mrb[124].mxu1 %v6089_v28 }
 0x147   : > { %2229 = vmatprep.mubr.bf16.mxu0 %v6096_v63  ;;  %2398 = vmatprep.mubr.bf16.mxu1 %v6101_v9 }
 0x149   : > { %v1553_v41 = vpop.f32.mrb[20].mxu0  ;;  %v1722_v48 = vpop.f32.mrb[20].mxu1 }
 0x14a   : > { %v1555_v2 = vpop.f32.mrb[21].mxu0  ;;  %v6567_v5 = vadd.f32 %v1722_v48, %v1553_v41  ;;  %v1724_v38 = vpop.f32.mrb[21].mxu1 }
 0x14b   : > { %v1556_v8 = vpop.f32.mrb[22].mxu0  ;;  %v1725_v19 = vpop.f32.mrb[22].mxu1 }
 0x14c   : > { %v1558_v10 = vpop.f32.mrb[23].mxu0  ;;  %v6569_v59 = vadd.f32 %v1725_v19, %v1556_v8  ;;  %v1727_v46 = vpop.f32.mrb[23].mxu1 }
 0x14d   : > { %v5053_v46 = vld [vmem:[%s7311_s1 + $0x300] sm:$0xff]  }
 0x14e   : > { %2230 = vmatmul.mubr.bf16.gmra.mrb[128].mxu0 %v6116_v16  ;;  %2399 = vmatmul.mubr.bf16.gmra.mrb[128].mxu1 %v6123_v7 }
 0x14f   : > { %2237 = vmatprep.mubr.bf16.mxu0 %v6158_v43  ;;  %2406 = vmatprep.mubr.bf16.mxu1 %v6190_v21 }
 0x151   : > { %v1561_v63 = vpop.f32.mrb[24].mxu0  ;;  %v1730_v28 = vpop.f32.mrb[24].mxu1 }
 0x152   : > { %v1563_v9 = vpop.f32.mrb[25].mxu0  ;;  %v6575_v44 = vadd.f32 %v1730_v28, %v1561_v63  ;;  %v1732_v47 = vpop.f32.mrb[25].mxu1 }
 0x153   : > { %v1564_v41 = vpop.f32.mrb[26].mxu0  ;;  %v1733_v48 = vpop.f32.mrb[26].mxu1  ;;  %v5056_v9 = vld [vmem:[%s7311_s1 + $0x388] sm:$0xff]  }
 0x154   : > { %v1566_v2 = vpop.f32.mrb[27].mxu0  ;;  %v6577_v38 = vadd.f32 %v1733_v48, %v1564_v41  ;;  %v1735_v8 = vpop.f32.mrb[27].mxu1 }
 0x156   : > { %2238 = vmatmul.mubr.bf16.gmra.mrb[132].mxu0 %v6193_v36  ;;  %2407 = vmatmul.mubr.bf16.gmra.mrb[132].mxu1 %v6232_v1  ;;  %v5054_v36 = vld [vmem:[%s7311_s1 + $0x380] sm:$0xff]   ;;  %v5055_v1 = vld [vmem:[%s7311_s1 + $0x308] sm:$0xff]  }
 0x157   : > { %2784 = vmatprep.mubr.bf16.mxu0 %v5472_v32  ;;  %2953 = vmatprep.mubr.bf16.mxu1 %v5475_v35 }
 0x159   : > { %v1569_v16 = vpop.f32.mrb[28].mxu0  ;;  %v1738_v7 = vpop.f32.mrb[28].mxu1 }
 0x15a   : > { %v1571_v43 = vpop.f32.mrb[29].mxu0  ;;  %v6583_v21 = vadd.f32 %v1738_v7, %v1569_v16  ;;  %v1740_v19 = vpop.f32.mrb[29].mxu1 }
 0x15b   : > { %v1572_v10 = vpop.f32.mrb[30].mxu0  ;;  %v1741_v63 = vpop.f32.mrb[30].mxu1  ;;  %v5058_v43 = vld [vmem:[%s7311_s1 + $0x390] sm:$0xff]   ;;  %v7414_v19 = vld [vmem:[#allocation2_spill] sm:$0xff] }
 0x15c   : > { %v1574_v28 = vpop.f32.mrb[31].mxu0  ;;  %v6591_v32 = vadd.f32 %v1741_v63, %v1572_v10  ;;  %v1743_v35 = vpop.f32.mrb[31].mxu1  ;;  %v7415_v10 = vld [vmem:[#allocation3_spill] sm:$0xff] }
 0x15d   : > { %v5060_v28 = vld [vmem:[%s7311_s1 + $0x398] sm:$0xff]  }
 0x15e   : > { %2785 = vmatmul.mubr.bf16.vlgmr.msra.gmra.mrb[136].mxu0 %v5501_v50  ;;  %2954 = vmatmul.mubr.bf16.vlgmr.msra.gmra.mrb[136].mxu1 %v5504_v51 }
 0x15f   : > { %3591 = vmatpush1.bf16.msra.mxu0 %v5053_v46  ;;  %3760 = vmatpush1.bf16.msra.mxu1 %v5054_v36  ;;  %v5059_v46 = vld [vmem:[%s7311_s1 + $0x318] sm:$0xff]  }
 0x160   : > { %2792 = vmatprep.mubr.bf16.mxu0 %v5509_v53  ;;  %2961 = vmatprep.mubr.bf16.mxu1 %v5516_v58  ;;  %v5057_v58 = vld [vmem:[%s7311_s1 + $0x310] sm:$0xff]  }
 0x161   : > { %v1577_v47 = vpop.f32.mrb[32].mxu0  ;;  %3592 = vmatprep.subr.bf16.mxu0 %v7365_v27  ;;  %v1746_v50 = vpop.f32.mrb[32].mxu1  ;;  %3761 = vmatprep.subr.bf16.mxu1 %v7365_v27 }
 0x162   : > { %v1579_v41 = vpop.f32.mrb[33].mxu0  ;;  %v6605_v51 = vadd.f32 %v1746_v50, %v1577_v47  ;;  %v1748_v48 = vpop.f32.mrb[33].mxu1  ;;  %v5061_v50 = vld [vmem:[%s7311_s1 + $0x320] sm:$0xff]  }
 0x163   : > { %v1580_v2 = vpop.f32.mrb[34].mxu0  ;;  %3593 = vmatpush1.bf16.msra.mxu0 %v5055_v1  ;;  %v1749_v8 = vpop.f32.mrb[34].mxu1  ;;  %3762 = vmatpush1.bf16.msra.mxu1 %v5056_v9 }
 0x164   : > { %v1582_v53 = vpop.f32.mrb[35].mxu0  ;;  %3594 = vmatprep.subr.bf16.mxu0 %v7365_v27  ;;  %v6611_v16 = vadd.f32 %v1749_v8, %v1580_v2  ;;  %v1751_v7 = vpop.f32.mrb[35].mxu1  ;;  %3763 = vmatprep.subr.bf16.mxu1 %v7365_v27  ;;  %v5062_v2 = vld [vmem:[%s7311_s1 + $0x3a0] sm:$0xff]   ;;  %v7416_v8 = vld [vmem:[#allocation4_spill] sm:$0xff] }
 0x165   : > { %v7417_v53 = vld [vmem:[#allocation5_spill] sm:$0xff]  ;;  %v7419_v7 = vld [vmem:[#allocation7_spill] sm:$0xff] }
 0x166   : > { %2793 = vmatmul.mubr.bf16.gmra.mrb[140].mxu0 %v5567_v24  ;;  %2962 = vmatmul.mubr.bf16.gmra.mrb[140].mxu1 %v5578_v29 }
 0x167   : > { %2800 = vmatprep.mubr.bf16.mxu0 %v7414_v19  ;;  %2969 = vmatprep.mubr.bf16.mxu1 %v7415_v10  ;;  %v5064_v10 = vld [vmem:[%s7311_s1 + $0x3a8] sm:$0xff]  }
 0x168   : > { %3595 = vmatpush1.bf16.msra.mxu0 %v5057_v58  ;;  %3764 = vmatpush1.bf16.msra.mxu1 %v5058_v43  ;;  %v7418_v58 = vld [vmem:[#allocation6_spill] sm:$0xff]  ;;  %v5063_v43 = vld [vmem:[%s7311_s1 + $0x328] sm:$0xff]  }
 0x169   : > { %v1585_v63 = vpop.f32.mrb[36].mxu0  ;;  %3596 = vmatprep.subr.bf16.mxu0 %v7365_v27  ;;  %v1754_v24 = vpop.f32.mrb[36].mxu1  ;;  %3765 = vmatprep.subr.bf16.mxu1 %v7365_v27 }
 0x16a   : > { %v1587_v36 = vpop.f32.mrb[37].mxu0  ;;  %v6629_v29 = vadd.f32 %v1754_v24, %v1585_v63  ;;  %v1756_v35 = vpop.f32.mrb[37].mxu1 }
 0x16b   : > { %v1588_v1 = vpop.f32.mrb[38].mxu0  ;;  %v1757_v9 = vpop.f32.mrb[38].mxu1 }
 0x16c   : > { %v1590_v47 = vpop.f32.mrb[39].mxu0  ;;  %3597 = vmatpush1.bf16.msra.mxu0 %v5059_v46  ;;  %v6634_v41 = vadd.f32 %v1757_v9, %v1588_v1  ;;  %v1759_v48 = vpop.f32.mrb[39].mxu1  ;;  %3766 = vmatpush1.bf16.msra.mxu1 %v5060_v28  ;;  %v5065_v9 = vld [vmem:[%s7311_s1 + $0x330] sm:$0xff]  }
 0x16d   : > { %3598 = vmatprep.subr.bf16.mxu0 %v7365_v27  ;;  %3767 = vmatprep.subr.bf16.mxu1 %v7365_v27  ;;  %v5066_v48 = vld [vmem:[%s7311_s1 + $0x3b0] sm:$0xff]  }
 0x16e   : > { %2801 = vmatmul.mubr.bf16.gmra.mrb[144].mxu0 %v7416_v8  ;;  %2970 = vmatmul.mubr.bf16.gmra.mrb[144].mxu1 %v7417_v53  ;;  %v7421_v8 = vld [vmem:[#allocation9_spill] sm:$0xff]  ;;  %v7422_v53 = vld [vmem:[#allocation10_spill] sm:$0xff] }
 0x16f   : > { %2808 = vmatprep.mubr.bf16.mxu0 %v7418_v58  ;;  %2977 = vmatprep.mubr.bf16.mxu1 %v7419_v7  ;;  %v7423_v58 = vld [vmem:[#allocation11_spill] sm:$0xff]  ;;  %v5067_v7 = vld [vmem:[%s7311_s1 + $0x338] sm:$0xff]  }
 0x170   : > { %3599 = vmatpush1.bf16.msra.mxu0 %v5061_v50  ;;  %3768 = vmatpush1.bf16.msra.mxu1 %v5062_v2  ;;  %v7420_v2 = vld [vmem:[#allocation8_spill] sm:$0xff] }
 0x171   : > { %v1593_v19 = vpop.f32.mrb[40].mxu0  ;;  %3600 = vmatprep.subr.bf16.mxu0 %v7365_v27  ;;  %v1762_v46 = vpop.f32.mrb[40].mxu1  ;;  %3769 = vmatprep.subr.bf16.mxu1 %v7365_v27 }
 0x172   : > { %v1595_v63 = vpop.f32.mrb[41].mxu0  ;;  %v6653_v28 = vadd.f32 %v1762_v46, %v1593_v19  ;;  %v1764_v24 = vpop.f32.mrb[41].mxu1  ;;  %v5068_v19 = vld [vmem:[%s7311_s1 + $0x3b8] sm:$0xff]  }
 0x173   : > { %v1596_v36 = vpop.f32.mrb[42].mxu0  ;;  %v1765_v35 = vpop.f32.mrb[42].mxu1 }
 0x174   : > { %v1598_v1 = vpop.f32.mrb[43].mxu0  ;;  %3601 = vmatpush1.bf16.msra.mxu0 %v5063_v43  ;;  %v6658_v47 = vadd.f32 %v1765_v35, %v1596_v36  ;;  %v1767_v50 = vpop.f32.mrb[43].mxu1  ;;  %3770 = vmatpush1.bf16.msra.mxu1 %v5064_v10 }
 0x175   : > { %3602 = vmatprep.subr.bf16.mxu0 %v7365_v27  ;;  %3771 = vmatprep.subr.bf16.mxu1 %v7365_v27 }
 0x176   : > { %2809 = vmatmul.mubr.bf16.gmra.mrb[148].mxu0 %v7420_v2  ;;  %2978 = vmatmul.mubr.bf16.gmra.mrb[148].mxu1 %v7421_v8  ;;  %v5070_v2 = vld [vmem:[%s7311_s1 + $0x3c0] sm:$0xff]   ;;  %v7424_v8 = vld [vmem:[#allocation12_spill] sm:$0xff] }
 0x177   : > { %2816 = vmatprep.mubr.bf16.mxu0 %v7422_v53  ;;  %2985 = vmatprep.mubr.bf16.mxu1 %v7423_v58  ;;  %v7425_v53 = vld [vmem:[#allocation13_spill] sm:$0xff]  ;;  %v7426_v58 = vld [vmem:[#allocation14_spill] sm:$0xff] }
 0x178   : > { %3603 = vmatpush1.bf16.msra.mxu0 %v5065_v9  ;;  %3772 = vmatpush1.bf16.msra.mxu1 %v5066_v48  ;;  %v5069_v9 = vld [vmem:[%s7311_s1 + $0x340] sm:$0xff]  }
 0x179   : > { %v1601_v43 = vpop.f32.mrb[44].mxu0  ;;  %3604 = vmatprep.subr.bf16.mxu0 %v7365_v27  ;;  %v1770_v10 = vpop.f32.mrb[44].mxu1  ;;  %3773 = vmatprep.subr.bf16.mxu1 %v7365_v27 }
 0x17a   : > { %v1603_v46 = vpop.f32.mrb[45].mxu0  ;;  %v6677_v63 = vadd.f32 %v1770_v10, %v1601_v43  ;;  %v1772_v24 = vpop.f32.mrb[45].mxu1  ;;  %v5071_v43 = vld [vmem:[%s7311_s1 + $0x348] sm:$0xff]  }
 0x17b   : > { %v1604_v36 = vpop.f32.mrb[46].mxu0  ;;  %v1773_v35 = vpop.f32.mrb[46].mxu1  ;;  %v5072_v10 = vld [vmem:[%s7311_s1 + $0x3c8] sm:$0xff]  }
 0x17c   : > { %v1606_v1 = vpop.f32.mrb[47].mxu0  ;;  %3605 = vmatpush1.bf16.msra.mxu0 %v5067_v7  ;;  %v6682_v50 = vadd.f32 %v1773_v35, %v1604_v36  ;;  %v1775_v48 = vpop.f32.mrb[47].mxu1  ;;  %3774 = vmatpush1.bf16.msra.mxu1 %v5068_v19  ;;  %v7427_v7 = vld [vmem:[#allocation15_spill] sm:$0xff] }
 0x17d   : > { %3606 = vmatprep.subr.bf16.mxu0 %v7365_v27  ;;  %3775 = vmatprep.subr.bf16.mxu1 %v7365_v27 }
 0x17e   : > { %2817 = vmatmul.mubr.bf16.gmra.mrb[152].mxu0 %v7424_v8  ;;  %2986 = vmatmul.mubr.bf16.gmra.mrb[152].mxu1 %v7425_v53 }
 0x17f   : > { %2824 = vmatprep.mubr.bf16.mxu0 %v7426_v58  ;;  %2993 = vmatprep.mubr.bf16.mxu1 %v7427_v7  ;;  %v5074_v58 = vld [vmem:[%s7311_s1 + $0x3d0] sm:$0xff]  }
 0x180   : > { %3607 = vmatpush1.bf16.msra.mxu0 %v5069_v9  ;;  %3776 = vmatpush1.bf16.msra.mxu1 %v5070_v2  ;;  %v5073_v2 = vld [vmem:[%s7311_s1 + $0x350] sm:$0xff]  }
 0x181   : > { %v1609_v19 = vpop.f32.mrb[48].mxu0  ;;  %3608 = vmatprep.subr.bf16.mxu0 %v7365_v27  ;;  %v1778_v46 = vpop.f32.mrb[48].mxu1  ;;  %3777 = vmatprep.subr.bf16.mxu1 %v7365_v27  ;;  %v7428_v7 = vld [vmem:[#allocation16_spill] sm:$0xff] }
 0x182   : > { %v1611_v24 = vpop.f32.mrb[49].mxu0  ;;  %v6701_v36 = vadd.f32 %v1778_v46, %v1609_v19  ;;  %v1780_v35 = vpop.f32.mrb[49].mxu1  ;;  %v7429_v19 = vld [vmem:[#allocation17_spill] sm:$0xff]  ;;  %v7431_v46 = vld [vmem:[#allocation19_spill] sm:$0xff] }
 0x183   : > { %v1612_v1 = vpop.f32.mrb[50].mxu0  ;;  %v1781_v9 = vpop.f32.mrb[50].mxu1  ;;  %v5076_v35 = vld [vmem:[%s7311_s1 + $0x3d8] sm:$0xff]  }
 0x184   : > { %v1614_v48 = vpop.f32.mrb[51].mxu0  ;;  %3609 = vmatpush1.bf16.msra.mxu0 %v5071_v43  ;;  %v6706_v8 = vadd.f32 %v1781_v9, %v1612_v1  ;;  %v1783_v53 = vpop.f32.mrb[51].mxu1  ;;  %3778 = vmatpush1.bf16.msra.mxu1 %v5072_v10  ;;  %v7430_v43 = vld [vmem:[#allocation18_spill] sm:$0xff]  ;;  %v5075_v10 = vld [vmem:[%s7311_s1 + $0x358] sm:$0xff]  }
 0x185   : > { %3610 = vmatprep.subr.bf16.mxu0 %v7365_v27  ;;  %3779 = vmatprep.subr.bf16.mxu1 %v7365_v27 }
 0x186   : > { %2825 = vmatmul.mubr.bf16.gmra.mrb[156].mxu0 %v7428_v7  ;;  %2994 = vmatmul.mubr.bf16.gmra.mrb[156].mxu1 %v7429_v19 }
 0x187   : > { %2832 = vmatprep.mubr.bf16.mxu0 %v7430_v43  ;;  %3001 = vmatprep.mubr.bf16.mxu1 %v7431_v46 }
 0x188   : > { %3611 = vmatpush1.bf16.msra.mxu0 %v5073_v2  ;;  %3780 = vmatpush1.bf16.msra.mxu1 %v5074_v58  ;;  %v5077_v58 = vld [vmem:[%s7311_s1 + $0x360] sm:$0xff]  }
 0x189   : > { %v1617_v24 = vpop.f32.mrb[52].mxu0  ;;  %3612 = vmatprep.subr.bf16.mxu0 %v7365_v27  ;;  %v1786_v1 = vpop.f32.mrb[52].mxu1  ;;  %3781 = vmatprep.subr.bf16.mxu1 %v7365_v27 }
 0x18a   : > { %v1619_v9 = vpop.f32.mrb[53].mxu0  ;;  %v6725_v48 = vadd.f32 %v1786_v1, %v1617_v24  ;;  %v1788_v53 = vpop.f32.mrb[53].mxu1  ;;  %v5078_v24 = vld [vmem:[%s7311_s1 + $0x3e0] sm:$0xff]   ;;  %v7434_v1 = vld [vmem:[#allocation20_spill] sm:$0xff] }
 0x18b   : > { %v1620_v2 = vpop.f32.mrb[54].mxu0  ;;  %v1789_v7 = vpop.f32.mrb[54].mxu1  ;;  %v7435_v9 = vld [vmem:[#allocation21_spill] sm:$0xff]  ;;  %v7437_v53 = vld [vmem:[#allocation23_spill] sm:$0xff] }
 0x18c   : > { %7432 = vst [vmem:[#allocation2_spill] sm:$0xff] %v6725_v48  ;;  %v1622_v19 = vpop.f32.mrb[55].mxu0  ;;  %3613 = vmatpush1.bf16.msra.mxu0 %v5075_v10  ;;  %v6730_v43 = vadd.f32 %v1789_v7, %v1620_v2  ;;  %v1791_v46 = vpop.f32.mrb[55].mxu1  ;;  %3782 = vmatpush1.bf16.msra.mxu1 %v5076_v35  ;;  %v7436_v10 = vld [vmem:[#allocation22_spill] sm:$0xff]  ;;  %v5079_v35 = vld [vmem:[%s7311_s1 + $0x368] sm:$0xff]  }
 0x18d   : > { %3614 = vmatprep.subr.bf16.mxu0 %v7365_v27  ;;  %3783 = vmatprep.subr.bf16.mxu1 %v7365_v27  ;;  %v5080_v7 = vld [vmem:[%s7311_s1 + $0x3e8] sm:$0xff]  }
 0x18e   : > { %7433 = vst [vmem:[#allocation3_spill] sm:$0xff] %v6730_v43  ;;  %2833 = vmatmul.mubr.bf16.gmra.mrb[160].mxu0 %v7434_v1  ;;  %3002 = vmatmul.mubr.bf16.gmra.mrb[160].mxu1 %v7435_v9 }
 0x18f   : > { %2840 = vmatprep.mubr.bf16.mxu0 %v7436_v10  ;;  %3009 = vmatprep.mubr.bf16.mxu1 %v7437_v53 }
 0x190   : > { %3615 = vmatpush1.bf16.msra.mxu0 %v5077_v58  ;;  %3784 = vmatpush1.bf16.msra.mxu1 %v5078_v24  ;;  %v5085_v24 = vld [vmem:[%s7311_s1 + $0x370] sm:$0xff]  }
 0x191   : > { %v1625_v2 = vpop.f32.mrb[56].mxu0  ;;  %3616 = vmatprep.subr.bf16.mxu0 %v7365_v27  ;;  %v1794_v19 = vpop.f32.mrb[56].mxu1  ;;  %3785 = vmatprep.subr.bf16.mxu1 %v7365_v27 }
 0x192   : > { %v1627_v46 = vpop.f32.mrb[57].mxu0  ;;  %v6749_v1 = vadd.f32 %v1794_v19, %v1625_v2  ;;  %v1796_v9 = vpop.f32.mrb[57].mxu1  ;;  %v5086_v2 = vld [vmem:[%s7311_s1 + $0x3f0] sm:$0xff]  }
 0x193   : > { %v1628_v58 = vpop.f32.mrb[58].mxu0  ;;  %v1797_v10 = vpop.f32.mrb[58].mxu1 }
 0x194   : > { %v1630_v53 = vpop.f32.mrb[59].mxu0  ;;  %3617 = vmatpush1.bf16.msra.mxu0 %v5079_v35  ;;  %v6754_v43 = vadd.f32 %v1797_v10, %v1628_v58  ;;  %v1799_v48 = vpop.f32.mrb[59].mxu1  ;;  %3786 = vmatpush1.bf16.msra.mxu1 %v5080_v7 }
 0x195   : > { %3618 = vmatprep.subr.bf16.mxu0 %v7365_v27  ;;  %3787 = vmatprep.subr.bf16.mxu1 %v7365_v27  ;;  %v5091_v48 = vld [vmem:[%s7311_s1 + $0x378] sm:$0xff]   ;;  %v7439_v53 = vld [vmem:[#allocation24_spill] sm:$0xff] }
 0x196   : > { %2841 = vmatmul.mubr.bf16.gmra.mrb[164].mxu0 %v6035_v52  ;;  %3010 = vmatmul.mubr.bf16.gmra.mrb[164].mxu1 %v6045_v0  ;;  %v5092_v52 = vld [vmem:[%s7311_s1 + $0x3f8] sm:$0xff]  }
 0x197   : > { %2848 = vmatprep.mubr.bf16.mxu0 %v6049_v55  ;;  %3017 = vmatprep.mubr.bf16.mxu1 %v6058_v40 }
 0x198   : > { %3619 = vmatpush1.bf16.msra.mxu0 %v5085_v24  ;;  %3788 = vmatpush1.bf16.msra.mxu1 %v5086_v2  ;;  %v7440_v24 = vld [vmem:[#allocation25_spill] sm:$0xff]  ;;  %v7441_v2 = vld [vmem:[#allocation26_spill] sm:$0xff] }
 0x199   : > { %v1633_v35 = vpop.f32.mrb[60].mxu0  ;;  %3620 = vmatprep.subr.bf16.mxu0 %v7365_v27  ;;  %v1802_v7 = vpop.f32.mrb[60].mxu1  ;;  %3789 = vmatprep.subr.bf16.mxu1 %v7365_v27 }
 0x19a   : > { %v1635_v19 = vpop.f32.mrb[61].mxu0  ;;  %v6773_v0 = vadd.f32 %v1802_v7, %v1633_v35  ;;  %v1804_v55 = vpop.f32.mrb[61].mxu1 }
 0x19b   : > { %v1636_v40 = vpop.f32.mrb[62].mxu0  ;;  %v1805_v46 = vpop.f32.mrb[62].mxu1  ;;  %v7442_v19 = vld [vmem:[#allocation27_spill] sm:$0xff] }
 0x19c   : > { %7438 = vst [vmem:[#allocation4_spill] sm:$0xff] %v6773_v0  ;;  %v1638_v9 = vpop.f32.mrb[63].mxu0  ;;  %3621 = vmatpush1.bf16.msra.mxu0 %v5091_v48  ;;  %v6775_v58 = vadd.f32 %v1805_v46, %v1636_v40  ;;  %v1807_v10 = vpop.f32.mrb[63].mxu1  ;;  %3790 = vmatpush1.bf16.msra.mxu1 %v5092_v52 }
 0x19d   : > { %v7443_v10 = vld [vmem:[#allocation28_spill] sm:$0xff] }
 0x19e   : > { %2849 = vmatmul.mubr.bf16.gmra.mrb[168].mxu0 %v7439_v53  ;;  %3018 = vmatmul.mubr.bf16.gmra.mrb[168].mxu1 %v7440_v24  ;;  %v7444_v53 = vld [vmem:[#allocation29_spill] sm:$0xff] }
 0x19f   : > { %2856 = vmatprep.mubr.bf16.mxu0 %v7441_v2  ;;  %3025 = vmatprep.mubr.bf16.mxu1 %v7442_v19 }
 0x1a1   : > { %v1641_v27 = vpop.f32.mrb[64].mxu0  ;;  %v1810_v35 = vpop.f32.mrb[64].mxu1 }
 0x1a2   : > { %v1643_v7 = vpop.f32.mrb[65].mxu0  ;;  %v6781_v55 = vadd.f32 %v1810_v35, %v1641_v27  ;;  %v1812_v0 = vpop.f32.mrb[65].mxu1 }
 0x1a3   : > { %v1644_v9 = vpop.f32.mrb[66].mxu0  ;;  %v1813_v48 = vpop.f32.mrb[66].mxu1 }
 0x1a4   : > { %v1646_v40 = vpop.f32.mrb[67].mxu0  ;;  %v6783_v46 = vadd.f32 %v1813_v48, %v1644_v9  ;;  %v1815_v52 = vpop.f32.mrb[67].mxu1 }
 0x1a6   : > { %2857 = vmatmul.mubr.bf16.gmra.mrb[172].mxu0 %v6155_v60  ;;  %3026 = vmatmul.mubr.bf16.gmra.mrb[172].mxu1 %v7443_v10 }
 0x1a7   : > { %2864 = vmatprep.mubr.bf16.mxu0 %v7444_v53  ;;  %3033 = vmatprep.mubr.bf16.mxu1 %v6174_v3  ;;  %v7445_v3 = vld [vmem:[#allocation30_spill] sm:$0xff] }
 0x1a9   : > { %v2111_v24 = vpop.f32.mrb[68].mxu0  ;;  %v2280_v19 = vpop.f32.mrb[68].mxu1 }
 0x1aa   : > { %v2112_v2 = vadd.f32 %v2111_v24, %v6527_v15  ;;  %v2113_v27 = vpop.f32.mrb[69].mxu0  ;;  %v2282_v0 = vpop.f32.mrb[69].mxu1 }
 0x1ab   : > { %v2114_v35 = vpop.f32.mrb[70].mxu0  ;;  %v2283_v48 = vpop.f32.mrb[70].mxu1 }
 0x1ac   : > { %v6790_v7 = vadd.f32 %v2280_v19, %v2112_v2  ;;  %v2115_v9 = vadd.f32 %v2114_v35, %v6529_v57  ;;  %v2116_v40 = vpop.f32.mrb[71].mxu0  ;;  %v2285_v60 = vpop.f32.mrb[71].mxu1 }
 0x1ae   : > { %v6793_v52 = vadd.f32 %v2283_v48, %v2115_v9  ;;  %2865 = vmatmul.mubr.bf16.gmra.mrb[176].mxu0 %v6208_v49  ;;  %3034 = vmatmul.mubr.bf16.gmra.mrb[176].mxu1 %v6212_v30 }
 0x1af   : > { %2872 = vmatprep.mubr.bf16.mxu0 %v7445_v3  ;;  %3041 = vmatprep.mubr.bf16.mxu1 %v6220_v42 }
 0x1b1   : > { %v2119_v15 = vpop.f32.mrb[72].mxu0  ;;  %v2288_v53 = vpop.f32.mrb[72].mxu1 }
 0x1b2   : > { %v2120_v10 = vadd.f32 %v2119_v15, %v6535_v54  ;;  %v2121_v24 = vpop.f32.mrb[73].mxu0  ;;  %v2290_v2 = vpop.f32.mrb[73].mxu1  ;;  %v243_v15 = vld [vmem:[%s5332_s26 + $0x230] sm:$0xff] }
 0x1b3   : > { %v2122_v57 = vpop.f32.mrb[74].mxu0  ;;  %v2291_v0 = vpop.f32.mrb[74].mxu1  ;;  %v5153_v24 = vld [vmem:[%s5332_s26 + $0x228] sm:$0xff] }
 0x1b4   : > { %v6800_v19 = vadd.f32 %v2288_v53, %v2120_v10  ;;  %v2123_v27 = vadd.f32 %v2122_v57, %v6537_v6  ;;  %v2124_v35 = vpop.f32.mrb[75].mxu0  ;;  %v2293_v49 = vpop.f32.mrb[75].mxu1 }
 0x1b6   : > { %v6803_v30 = vadd.f32 %v2291_v0, %v2123_v27  ;;  %2873 = vmatmul.mubr.bf16.gmra.mrb[180].mxu0 %v6246_v31  ;;  %3042 = vmatmul.mubr.bf16.gmra.mrb[180].mxu1 %v6250_v62 }
 0x1b7   : > { %2880 = vmatprep.mubr.bf16.mxu0 %v6254_v18  ;;  %3049 = vmatprep.mubr.bf16.mxu1 %v6258_v20  ;;  %v244_v20 = vld [vmem:[%s5332_s26 + $0x238] sm:$0xff] }
 0x1b8   : > { %v6825_v2 = vcombine.high %v5153_v24, %v244_v20 }
 0x1b9   : > { %v2127_v42 = vpop.f32.mrb[76].mxu0  ;;  %v2296_v6 = vpop.f32.mrb[76].mxu1 }
 0x1ba   : > { %v2128_v54 = vadd.f32 %v2127_v42, %v6543_v11  ;;  %v2129_v9 = vpop.f32.mrb[77].mxu0  ;;  %v2298_v48 = vpop.f32.mrb[77].mxu1  ;;  %v5152_v11 = vld [vmem:[%s5332_s26 + $0x220] sm:$0xff] }
 0x1bb   : > { %v2130_v40 = vpop.f32.mrb[78].mxu0  ;;  %v2299_v3 = vpop.f32.mrb[78].mxu1  ;;  %v6821_v53 = vcombine.high %v5152_v11, %v243_v15  ;;  %v245_v9 = vld [vmem:[%s5332_s26 + $0x240] sm:$0x11] }
 0x1bc   : > { %v6810_v60 = vadd.f32 %v2296_v6, %v2128_v54  ;;  %v2131_v31 = vadd.f32 %v2130_v40, %v6545_v39  ;;  %v2132_v62 = vpop.f32.mrb[79].mxu0  ;;  %v2301_v18 = vpop.f32.mrb[79].mxu1  ;;  %v2516_v6 = vshll.u32 %v6825_v2, 16  ;;  %v246_v40 = vld [vmem:[%s5332_s26 + $0x248] sm:$0x11] }
 0x1be   : > { %v6814_v10 = vadd.f32 %v2299_v3, %v2131_v31  ;;  %2881 = vmatmul.mubr.bf16.gmra.mrb[184].mxu0 %v6280_v34  ;;  %3050 = vmatmul.mubr.bf16.gmra.mrb[184].mxu1 %v6284_v17  ;;  %v2506_v17 = vshll.u32 %v6821_v53, 16  ;;  %v6842_v3 = vcombine.low %v5153_v24, %v244_v20  ;;  %v2518_v18 = vrot.slane %v2516_v6, 1 }
 0x1bf   : > { %2888 = vmatprep.mubr.bf16.mxu0 %v6288_v13  ;;  %3057 = vmatprep.mubr.bf16.mxu1 %v6292_v25 }
 0x1c0   : > { %v2508_v31 = vrot.slane %v2506_v17, 1  ;;  %v2511_v20 = vshll.u32 %v6842_v3, 16 }
 0x1c1   : > { %v2135_v39 = vpop.f32.mrb[80].mxu0  ;;  %v2304_v27 = vpop.f32.mrb[80].mxu1 }
 0x1c2   : > { %v2136_v57 = vadd.f32 %v2135_v39, %v6551_v23  ;;  %v2137_v34 = vpop.f32.mrb[81].mxu0  ;;  %v2306_v0 = vpop.f32.mrb[81].mxu1  ;;  %v6837_v23 = vcombine.low %v5152_v11, %v243_v15  ;;  %v6847_v39 = vcombine.high %v246_v40, %v246_v40  ;;  %v2513_v6 = vrot.slane %v2511_v20, 1  ;;  %v7448_v20 = vld [vmem:[#allocation33_spill] sm:$0xff] }
 0x1c3   : > { %v2138_v35 = vpop.f32.mrb[82].mxu0  ;;  %v2307_v42 = vpop.f32.mrb[82].mxu1 }
 0x1c4   : > { %v6829_v13 = vadd.f32 %v2304_v27, %v2136_v57  ;;  %v2139_v49 = vadd.f32 %v2138_v35, %v6553_v22  ;;  %v2140_v25 = vpop.f32.mrb[83].mxu0  ;;  %v2309_v54 = vpop.f32.mrb[83].mxu1  ;;  %v6845_v22 = vcombine.high %v245_v9, %v245_v9  ;;  %v2501_v57 = vshll.u32 %v6837_v23, 16 }
 0x1c5   : > { %v2528_v35 = vshrl.u32 %v6821_v53, 16 }
 0x1c6   : > { %v6834_v48 = vadd.f32 %v2307_v42, %v2139_v49  ;;  %2889 = vmatmul.mubr.bf16.gmra.mrb[188].mxu0 %v6311_v33  ;;  %3058 = vmatmul.mubr.bf16.gmra.mrb[188].mxu1 %v6315_v45  ;;  %v2519_v49 = vsel %vm658_vm0, %v6333_v26, %v2518_v18  ;;  %v2544_v42 = vshrl.u32 %v6825_v2, 16  ;;  %v2503_v54 = vrot.slane %v2501_v57, 1 }
 0x1c7   : > { %2896 = vmatprep.mubr.bf16.mxu0 %v6318_v56  ;;  %3065 = vmatprep.mubr.bf16.mxu1 %v6321_v61  ;;  %v2509_v56 = vsel %vm658_vm0, %v6331_v4, %v2508_v31  ;;  %v2548_v4 = vshll.u32 %v6847_v39, 16 }
 0x1c9   : > { %v2143_v62 = vpop.f32.mrb[84].mxu0  ;;  %v2312_v15 = vpop.f32.mrb[84].mxu1 }
 0x1ca   : > { %v2144_v33 = vadd.f32 %v2143_v62, %v6559_v14  ;;  %v2145_v11 = vpop.f32.mrb[85].mxu0  ;;  %v2314_v45 = vpop.f32.mrb[85].mxu1  ;;  %v2532_v14 = vshll.u32 %v6845_v22, 16  ;;  %v6867_v62 = vcombine.low %v245_v9, %v245_v9  ;;  %v2514_v9 = vsel %vm658_vm0, %v7448_v20, %v2513_v6 }
 0x1cb   : > { %v2146_v27 = vpop.f32.mrb[86].mxu0  ;;  %v2315_v34 = vpop.f32.mrb[86].mxu1  ;;  %v6869_v11 = vcombine.low %v246_v40, %v246_v40  ;;  %v2546_v45 = vor.u32 %v2544_v42, %v2518_v18 }
 0x1cc   : > { %v6854_v61 = vadd.f32 %v2312_v15, %v2144_v33  ;;  %v2147_v24 = vadd.f32 %v2146_v27, %v6561_v12  ;;  %v2148_v0 = vpop.f32.mrb[87].mxu0  ;;  %v2317_v17 = vpop.f32.mrb[87].mxu1  ;;  %v7446_v12 = vld [vmem:[#allocation31_spill] sm:$0xff]  ;;  %v2530_v33 = vor.u32 %v2528_v35, %v2508_v31  ;;  %v2534_v15 = vrot.slane %v2532_v14, 1 }
 0x1cd   : > { %v2550_v27 = vrot.slane %v2548_v4, 1  ;;  %v2520_v31 = vshrl.u32 %v6837_v23, 16  ;;  %v2524_v40 = vshll.u32 %v6867_v62, 16  ;;  %v2536_v35 = vshrl.u32 %v6842_v3, 16 }
 0x1ce   : > { %v6863_v25 = vadd.f32 %v2315_v34, %v2147_v24  ;;  %2897 = vmatmul.mubr.bf16.gmra.mrb[192].mxu0 %v6336_v37  ;;  %3066 = vmatmul.mubr.bf16.gmra.mrb[192].mxu1 %v7446_v12  ;;  %v7447_v37 = vld [vmem:[#allocation32_spill] sm:$0xff]  ;;  %v2535_v42 = vsel %vm658_vm0, %v2530_v33, %v2534_v15  ;;  %v2540_v4 = vshll.u32 %v6869_v11, 16 }
 0x1cf   : > { %2904 = vmatprep.mubr.bf16.mxu0 %v2509_v56  ;;  %3073 = vmatprep.mubr.bf16.mxu1 %v2519_v49  ;;  %v2504_v57 = vsel %vm658_vm0, %v7447_v37, %v2503_v54  ;;  %v5155_v33 = vld [vmem:[%s5332_s26 + $0x44] ss:$16 sps:$4 sm:$0xff]  }
 0x1d0   : > { %v2542_v37 = vrot.slane %v2540_v4, 1  ;;  %v3194_v15 = vrot.slane %v5155_v33, 1 }
 0x1d1   : > { %v2151_v26 = vpop.f32.mrb[88].mxu0  ;;  %v2320_v34 = vpop.f32.mrb[88].mxu1 }
 0x1d2   : > { %v2152_v24 = vadd.f32 %v2151_v26, %v6567_v5  ;;  %v2153_v0 = vpop.f32.mrb[89].mxu0  ;;  %v2322_v17 = vpop.f32.mrb[89].mxu1  ;;  %v2551_v26 = vsel %vm658_vm0, %v2546_v45, %v2550_v27  ;;  %v5157_v27 = vld [vmem:[%s5332_s26 + $0x4c] ss:$16 sps:$4 sm:$0xff]  }
 0x1d3   : > { %v2154_v56 = vpop.f32.mrb[90].mxu0  ;;  %v2323_v14 = vpop.f32.mrb[90].mxu1  ;;  %v5154_v17 = vld [vmem:[%s5332_s26 + $0x24] ss:$16 sps:$4 sm:$0xff]  }
 0x1d4   : > { %v6879_v18 = vadd.f32 %v2320_v34, %v2152_v24  ;;  %v2155_v5 = vadd.f32 %v2154_v56, %v6569_v59  ;;  %v2156_v49 = vpop.f32.mrb[91].mxu0  ;;  %v2325_v12 = vpop.f32.mrb[91].mxu1  ;;  %v2522_v24 = vor.u32 %v2520_v31, %v2503_v54  ;;  %v2526_v59 = vrot.slane %v2524_v40, 1 }
 0x1d5   : > { %v2538_v34 = vor.u32 %v2536_v35, %v2513_v6  ;;  %v3193_v56 = vrot.slane %v5154_v17, 1  ;;  %v5156_v49 = vld [vmem:[%s5332_s26 + $0x2c] ss:$16 sps:$4 sm:$0xff]  }
 0x1d6   : > { %v6885_v0 = vadd.f32 %v2323_v14, %v2155_v5  ;;  %2905 = vmatmul.mubr.bf16.gmra.mrb[196].mxu0 %v2504_v57  ;;  %3074 = vmatmul.mubr.bf16.gmra.mrb[196].mxu1 %v2514_v9  ;;  %v3199_v45 = vrot.slane %v5156_v49, 1  ;;  %v3200_v5 = vrot.slane %v5157_v27, 1  ;;  %v2527_v6 = vsel %vm658_vm0, %v2522_v24, %v2526_v59  ;;  %v5158_v24 = vld [vmem:[%s5332_s26 + $0x20] ss:$16 sps:$4 sm:$0xff]   ;;  %v5160_v49 = vld [vmem:[%s5332_s26 + $0x28] ss:$16 sps:$4 sm:$0xff]  }
 0x1d7   : > { %2912 = vmatprep.mubr.bf16.mxu0 %v2535_v42  ;;  %3081 = vmatprep.mubr.bf16.mxu1 %v2551_v26  ;;  %v2543_v12 = vsel %vm658_vm0, %v2538_v34, %v2542_v37  ;;  %v5159_v59 = vld [vmem:[%s5332_s26 + $0x40] ss:$16 sps:$4 sm:$0xff]   ;;  %v3196_v27 = vrot.slane %v5160_v49, 1  ;;  %v5161_v34 = vld [vmem:[%s5332_s26 + $0x48] ss:$16 sps:$4 sm:$0xff]  }
 0x1d8   : > { %v3201_v17 = vsel %vm3189_vm1, %v3199_v45, %v3200_v5  ;;  %v3197_v37 = vrot.slane %v5161_v34, 1 }
 0x1d9   : > { %v2159_v20 = vpop.f32.mrb[92].mxu0  ;;  %v2328_v14 = vpop.f32.mrb[92].mxu1 }
 0x1da   : > { %v2160_v57 = vadd.f32 %v2159_v20, %v6575_v44  ;;  %v2161_v9 = vpop.f32.mrb[93].mxu0  ;;  %v2330_v54 = vpop.f32.mrb[93].mxu1  ;;  %v3195_v44 = vsel %vm3189_vm1, %v3193_v56, %v3194_v15  ;;  %v3191_v20 = vrot.slane %v5159_v59, 1  ;;  %v5162_v56 = vld [vmem:[%s5332_s26 + $0x64] ss:$16 sps:$4 sm:$0xff]  }
 0x1db   : > { %v2162_v31 = vpop.f32.mrb[94].mxu0  ;;  %v2331_v42 = vpop.f32.mrb[94].mxu1  ;;  %v5163_v9 = vld [vmem:[%s5332_s26 + $0x6c] ss:$16 sps:$4 sm:$0xff]   ;;  %v3322_v54 = vrot.slane %v6867_v62, 1 }
 0x1dc   : > { %v6893_v40 = vadd.f32 %v2328_v14, %v2160_v57  ;;  %v2163_v35 = vadd.f32 %v2162_v31, %v6577_v38  ;;  %v2164_v4 = vpop.f32.mrb[95].mxu0  ;;  %v2333_v26 = vpop.f32.mrb[95].mxu1  ;;  %v3190_v38 = vrot.slane %v5158_v24, 1  ;;  %v3204_v57 = vrot.slane %v5162_v56, 1 }
 0x1dd   : > { %v3208_v45 = vrot.slane %v5163_v9, 1  ;;  %v3326_v31 = vrot.slane %v6869_v11, 1  ;;  %v7349_v4 = vrot.slane %v6837_v23, 1  ;;  %v5165_v9 = vld [vmem:[%s5332_s26 + $0x68] ss:$16 sps:$4 sm:$0xff]  }
 0x1de   : > { %v6899_v33 = vadd.f32 %v2331_v42, %v2163_v35  ;;  %2913 = vmatmul.mubr.bf16.gmra.mrb[200].mxu0 %v2527_v6  ;;  %3082 = vmatmul.mubr.bf16.gmra.mrb[200].mxu1 %v2543_v12  ;;  %v7348_v12 = vrot.slane %v6842_v3, 1  ;;  %v3205_v49 = vsel %vm3189_vm1, %v3194_v15, %v3204_v57  ;;  %v5164_v15 = vld [vmem:[%s5332_s26 + $0x60] ss:$16 sps:$4 sm:$0xff]  }
 0x1df   : > { %3622 = vmatprep.mubr.bf16.mxu0 %v3195_v44  ;;  %3791 = vmatprep.mubr.bf16.mxu1 %v3201_v17  ;;  %v3192_v17 = vsel %vm3189_vm1, %v3190_v38, %v3191_v20  ;;  %v3209_v56 = vsel %vm3189_vm1, %v3200_v5, %v3208_v45  ;;  %v6924_v38 = vsel %vm3189_vm1, %v7349_v4, %v3322_v54  ;;  %v3206_v5 = vrot.slane %v5165_v9, 1 }
 0x1e1   : > { %v2167_v14 = vpop.f32.mrb[96].mxu0  ;;  %v2336_v35 = vpop.f32.mrb[96].mxu1 }
 0x1e2   : > { %v2168_v6 = vadd.f32 %v2167_v14, %v6583_v21  ;;  %v2169_v42 = vpop.f32.mrb[97].mxu0  ;;  %v2338_v44 = vpop.f32.mrb[97].mxu1  ;;  %v3198_v21 = vsel %vm3189_vm1, %v3196_v27, %v3197_v37  ;;  %v3202_v27 = vrot.slane %v5164_v15, 1  ;;  %v3207_v15 = vsel %vm3189_vm1, %v3197_v37, %v3206_v5  ;;  %v5171_v37 = vld [vmem:[%s5332_s26 + $0xac] ss:$16 sps:$4 sm:$0xff]  }
 0x1e3   : > { %v2170_v26 = vpop.f32.mrb[98].mxu0  ;;  %v2339_v62 = vpop.f32.mrb[98].mxu1  ;;  %v5167_v44 = vld [vmem:[%s5332_s26 + $0x8c] ss:$16 sps:$4 sm:$0xff]  }
 0x1e4   : > { %v6913_v24 = vadd.f32 %v2336_v35, %v2168_v6  ;;  %v2171_v59 = vadd.f32 %v2170_v26, %v6591_v32  ;;  %v2172_v11 = vpop.f32.mrb[99].mxu0  ;;  %v2341_v34 = vpop.f32.mrb[99].mxu1  ;;  %v6929_v32 = vsel %vm3189_vm1, %v7348_v12, %v3326_v31  ;;  %v5166_v6 = vld [vmem:[%s5332_s26 + $0x84] ss:$16 sps:$4 sm:$0xff]   ;;  %v3216_v26 = vrot.slane %v5167_v44, 1 }
 0x1e5   : > { %v3212_v35 = vrot.slane %v5166_v6, 1  ;;  %v3203_v11 = vsel %vm3189_vm1, %v3191_v20, %v3202_v27  ;;  %v5168_v20 = vld [vmem:[%s5332_s26 + $0x80] ss:$16 sps:$4 sm:$0xff]  }
 0x1e6   : > { %v6919_v14 = vadd.f32 %v2339_v62, %v2171_v59  ;;  %3623 = vmatmul.mubr.bf16.vlgmr.msra.gmra.mrb[204].mxu0 %v3192_v17  ;;  %3792 = vmatmul.mubr.bf16.vlgmr.msra.gmra.mrb[204].mxu1 %v3198_v21  ;;  %v3217_v6 = vsel %vm3189_vm1, %v3208_v45, %v3216_v26  ;;  %v3210_v44 = vrot.slane %v5168_v20, 1 }
 0x1e7   : > { %3630 = vmatprep.mubr.bf16.mxu0 %v3205_v49  ;;  %3799 = vmatprep.mubr.bf16.mxu1 %v3209_v56 }
 0x1e9   : > { %v2175_v42 = vpop.f32.mrb[100].mxu0  ;;  %v2344_v17 = vpop.f32.mrb[100].mxu1 }
 0x1ea   : > { %v2176_v54 = vadd.f32 %v2175_v42, %v6605_v51  ;;  %v2177_v59 = vpop.f32.mrb[101].mxu0  ;;  %v2346_v62 = vpop.f32.mrb[101].mxu1  ;;  %v3213_v51 = vsel %vm3189_vm1, %v3204_v57, %v3212_v35 }
 0x1eb   : > { %v2178_v31 = vpop.f32.mrb[102].mxu0  ;;  %v2347_v34 = vpop.f32.mrb[102].mxu1 }
 0x1ec   : > { %v6937_v21 = vadd.f32 %v2344_v17, %v2176_v54  ;;  %v2179_v49 = vadd.f32 %v2178_v31, %v6611_v16  ;;  %v2180_v56 = vpop.f32.mrb[103].mxu0  ;;  %v2349_v9 = vpop.f32.mrb[103].mxu1  ;;  %v5169_v16 = vld [vmem:[%s5332_s26 + $0x88] ss:$16 sps:$4 sm:$0xff]   ;;  %v5170_v17 = vld [vmem:[%s5332_s26 + $0xa4] ss:$16 sps:$4 sm:$0xff]  }
 0x1ed   : > { %v3214_v54 = vrot.slane %v5169_v16, 1  ;;  %v3220_v59 = vrot.slane %v5170_v17, 1  ;;  %v3224_v31 = vrot.slane %v5171_v37, 1 }
 0x1ee   : > { %v6943_v42 = vadd.f32 %v2347_v34, %v2179_v49  ;;  %3631 = vmatmul.mubr.bf16.gmra.mrb[208].mxu0 %v3203_v11  ;;  %3800 = vmatmul.mubr.bf16.gmra.mrb[208].mxu1 %v3207_v15  ;;  %v3211_v11 = vsel %vm3189_vm1, %v3202_v27, %v3210_v44  ;;  %v5172_v27 = vld [vmem:[%s5332_s26 + $0xa0] ss:$16 sps:$4 sm:$0xff]  }
 0x1ef   : > { %3638 = vmatprep.mubr.bf16.mxu0 %v3213_v51  ;;  %3807 = vmatprep.mubr.bf16.mxu1 %v3217_v6  ;;  %v3215_v20 = vsel %vm3189_vm1, %v3206_v5, %v3214_v54  ;;  %v3225_v17 = vsel %vm3189_vm1, %v3216_v26, %v3224_v31  ;;  %v3218_v37 = vrot.slane %v5172_v27, 1  ;;  %v5175_v5 = vld [vmem:[%s5332_s26 + $0xcc] ss:$16 sps:$4 sm:$0xff]  }
 0x1f1   : > { %v2183_v62 = vpop.f32.mrb[104].mxu0  ;;  %v2352_v56 = vpop.f32.mrb[104].mxu1 }
 0x1f2   : > { %v2184_v57 = vadd.f32 %v2183_v62, %v6629_v29  ;;  %v2185_v9 = vpop.f32.mrb[105].mxu0  ;;  %v2354_v45 = vpop.f32.mrb[105].mxu1  ;;  %v3221_v29 = vsel %vm3189_vm1, %v3212_v35, %v3220_v59 }
 0x1f3   : > { %v2186_v49 = vpop.f32.mrb[106].mxu0  ;;  %v2355_v51 = vpop.f32.mrb[106].mxu1 }
 0x1f4   : > { %v6951_v34 = vadd.f32 %v2352_v56, %v2184_v57  ;;  %v2187_v15 = vadd.f32 %v2186_v49, %v6634_v41  ;;  %v2188_v6 = vpop.f32.mrb[107].mxu0  ;;  %v2357_v16 = vpop.f32.mrb[107].mxu1  ;;  %v5173_v41 = vld [vmem:[%s5332_s26 + $0xa8] ss:$16 sps:$4 sm:$0xff]   ;;  %v5174_v56 = vld [vmem:[%s5332_s26 + $0xc4] ss:$16 sps:$4 sm:$0xff]  }
 0x1f5   : > { %v3222_v57 = vrot.slane %v5173_v41, 1  ;;  %v3228_v9 = vrot.slane %v5174_v56, 1  ;;  %v3232_v49 = vrot.slane %v5175_v5, 1 }
 0x1f6   : > { %v6957_v62 = vadd.f32 %v2355_v51, %v2187_v15  ;;  %3639 = vmatmul.mubr.bf16.gmra.mrb[212].mxu0 %v3211_v11  ;;  %3808 = vmatmul.mubr.bf16.gmra.mrb[212].mxu1 %v3215_v20  ;;  %v3219_v11 = vsel %vm3189_vm1, %v3210_v44, %v3218_v37  ;;  %v5176_v44 = vld [vmem:[%s5332_s26 + $0xc0] ss:$16 sps:$4 sm:$0xff]  }
 0x1f7   : > { %3646 = vmatprep.mubr.bf16.mxu0 %v3221_v29  ;;  %3815 = vmatprep.mubr.bf16.mxu1 %v3225_v17  ;;  %v3223_v27 = vsel %vm3189_vm1, %v3214_v54, %v3222_v57  ;;  %v3233_v56 = vsel %vm3189_vm1, %v3224_v31, %v3232_v49  ;;  %v3226_v5 = vrot.slane %v5176_v44, 1  ;;  %v5179_v54 = vld [vmem:[%s5332_s26 + $0xec] ss:$16 sps:$4 sm:$0xff]  }
 0x1f9   : > { %v2191_v45 = vpop.f32.mrb[108].mxu0  ;;  %v2360_v6 = vpop.f32.mrb[108].mxu1 }
 0x1fa   : > { %v2192_v35 = vadd.f32 %v2191_v45, %v6653_v28  ;;  %v2193_v16 = vpop.f32.mrb[109].mxu0  ;;  %v2362_v26 = vpop.f32.mrb[109].mxu1  ;;  %v3229_v28 = vsel %vm3189_vm1, %v3220_v59, %v3228_v9 }
 0x1fb   : > { %v2194_v15 = vpop.f32.mrb[110].mxu0  ;;  %v2363_v29 = vpop.f32.mrb[110].mxu1 }
 0x1fc   : > { %v6965_v51 = vadd.f32 %v2360_v6, %v2192_v35  ;;  %v2195_v20 = vadd.f32 %v2194_v15, %v6658_v47  ;;  %v2196_v17 = vpop.f32.mrb[111].mxu0  ;;  %v2365_v41 = vpop.f32.mrb[111].mxu1  ;;  %v5177_v47 = vld [vmem:[%s5332_s26 + $0xc8] ss:$16 sps:$4 sm:$0xff]   ;;  %v5178_v6 = vld [vmem:[%s5332_s26 + $0xe4] ss:$16 sps:$4 sm:$0xff]  }
 0x1fd   : > { %v3230_v35 = vrot.slane %v5177_v47, 1  ;;  %v3236_v16 = vrot.slane %v5178_v6, 1  ;;  %v3240_v15 = vrot.slane %v5179_v54, 1 }
 0x1fe   : > { %v6971_v45 = vadd.f32 %v2363_v29, %v2195_v20  ;;  %3647 = vmatmul.mubr.bf16.gmra.mrb[216].mxu0 %v3219_v11  ;;  %3816 = vmatmul.mubr.bf16.gmra.mrb[216].mxu1 %v3223_v27  ;;  %v3227_v11 = vsel %vm3189_vm1, %v3218_v37, %v3226_v5  ;;  %v5180_v37 = vld [vmem:[%s5332_s26 + $0xe0] ss:$16 sps:$4 sm:$0xff]  }
 0x1ff   : > { %3654 = vmatprep.mubr.bf16.mxu0 %v3229_v28  ;;  %3823 = vmatprep.mubr.bf16.mxu1 %v3233_v56  ;;  %v3231_v44 = vsel %vm3189_vm1, %v3222_v57, %v3230_v35  ;;  %v3241_v6 = vsel %vm3189_vm1, %v3232_v49, %v3240_v15  ;;  %v3234_v54 = vrot.slane %v5180_v37, 1  ;;  %v5183_v57 = vld [vmem:[%s5332_s26 + $0x10c] ss:$16 sps:$4 sm:$0xff]  }
 0x201   : > { %v2199_v26 = vpop.f32.mrb[112].mxu0  ;;  %v2368_v17 = vpop.f32.mrb[112].mxu1 }
 0x202   : > { %v2200_v59 = vadd.f32 %v2199_v26, %v6677_v63  ;;  %v2201_v41 = vpop.f32.mrb[113].mxu0  ;;  %v2370_v31 = vpop.f32.mrb[113].mxu1  ;;  %v3237_v63 = vsel %vm3189_vm1, %v3228_v9, %v3236_v16 }
 0x203   : > { %v2202_v20 = vpop.f32.mrb[114].mxu0  ;;  %v2371_v28 = vpop.f32.mrb[114].mxu1 }
 0x204   : > { %v6979_v29 = vadd.f32 %v2368_v17, %v2200_v59  ;;  %v2203_v27 = vadd.f32 %v2202_v20, %v6682_v50  ;;  %v2204_v56 = vpop.f32.mrb[115].mxu0  ;;  %v2373_v47 = vpop.f32.mrb[115].mxu1  ;;  %v5181_v50 = vld [vmem:[%s5332_s26 + $0xe8] ss:$16 sps:$4 sm:$0xff]   ;;  %v5182_v17 = vld [vmem:[%s5332_s26 + $0x104] ss:$16 sps:$4 sm:$0xff]  }
 0x205   : > { %v3238_v59 = vrot.slane %v5181_v50, 1  ;;  %v3244_v41 = vrot.slane %v5182_v17, 1  ;;  %v3248_v20 = vrot.slane %v5183_v57, 1 }
 0x206   : > { %v6985_v26 = vadd.f32 %v2371_v28, %v2203_v27  ;;  %3655 = vmatmul.mubr.bf16.gmra.mrb[220].mxu0 %v3227_v11  ;;  %3824 = vmatmul.mubr.bf16.gmra.mrb[220].mxu1 %v3231_v44  ;;  %v3235_v11 = vsel %vm3189_vm1, %v3226_v5, %v3234_v54  ;;  %v5184_v5 = vld [vmem:[%s5332_s26 + $0x100] ss:$16 sps:$4 sm:$0xff]  }
 0x207   : > { %3662 = vmatprep.mubr.bf16.mxu0 %v3237_v63  ;;  %3831 = vmatprep.mubr.bf16.mxu1 %v3241_v6  ;;  %v3239_v37 = vsel %vm3189_vm1, %v3230_v35, %v3238_v59  ;;  %v3249_v17 = vsel %vm3189_vm1, %v3240_v15, %v3248_v20  ;;  %v3242_v57 = vrot.slane %v5184_v5, 1  ;;  %v5187_v35 = vld [vmem:[%s5332_s26 + $0x12c] ss:$16 sps:$4 sm:$0xff]  }
 0x209   : > { %v2207_v31 = vpop.f32.mrb[116].mxu0  ;;  %v2376_v56 = vpop.f32.mrb[116].mxu1 }
 0x20a   : > { %v2208_v9 = vadd.f32 %v2207_v31, %v6701_v36  ;;  %v2209_v47 = vpop.f32.mrb[117].mxu0  ;;  %v2378_v49 = vpop.f32.mrb[117].mxu1  ;;  %v3245_v36 = vsel %vm3189_vm1, %v3236_v16, %v3244_v41 }
 0x20b   : > { %v2210_v27 = vpop.f32.mrb[118].mxu0  ;;  %v2379_v63 = vpop.f32.mrb[118].mxu1 }
 0x20c   : > { %v6993_v28 = vadd.f32 %v2376_v56, %v2208_v9  ;;  %v2211_v44 = vadd.f32 %v2210_v27, %v6706_v8  ;;  %v2212_v6 = vpop.f32.mrb[119].mxu0  ;;  %v2381_v50 = vpop.f32.mrb[119].mxu1  ;;  %v5185_v8 = vld [vmem:[%s5332_s26 + $0x108] ss:$16 sps:$4 sm:$0xff]   ;;  %v5186_v56 = vld [vmem:[%s5332_s26 + $0x124] ss:$16 sps:$4 sm:$0xff]  }
 0x20d   : > { %v3246_v9 = vrot.slane %v5185_v8, 1  ;;  %v3252_v47 = vrot.slane %v5186_v56, 1  ;;  %v3256_v27 = vrot.slane %v5187_v35, 1  ;;  %v7449_v6 = vld [vmem:[#allocation2_spill] sm:$0xff] }
 0x20e   : > { %v6999_v31 = vadd.f32 %v2379_v63, %v2211_v44  ;;  %3663 = vmatmul.mubr.bf16.gmra.mrb[224].mxu0 %v3235_v11  ;;  %3832 = vmatmul.mubr.bf16.gmra.mrb[224].mxu1 %v3239_v37  ;;  %v3243_v11 = vsel %vm3189_vm1, %v3234_v54, %v3242_v57  ;;  %v7450_v37 = vld [vmem:[#allocation3_spill] sm:$0xff]  ;;  %v5188_v54 = vld [vmem:[%s5332_s26 + $0x120] ss:$16 sps:$4 sm:$0xff]  }
 0x20f   : > { %3670 = vmatprep.mubr.bf16.mxu0 %v3245_v36  ;;  %3839 = vmatprep.mubr.bf16.mxu1 %v3249_v17  ;;  %v3247_v8 = vsel %vm3189_vm1, %v3238_v59, %v3246_v9  ;;  %v3253_v56 = vsel %vm3189_vm1, %v3244_v41, %v3252_v47  ;;  %v5191_v59 = vld [vmem:[%s5332_s26 + $0x14c] ss:$16 sps:$4 sm:$0xff]  }
 0x211   : > { %v2215_v49 = vpop.f32.mrb[120].mxu0  ;;  %v2384_v50 = vpop.f32.mrb[120].mxu1 }
 0x212   : > { %v2216_v16 = vadd.f32 %v2215_v49, %v7449_v6  ;;  %v2217_v12 = vpop.f32.mrb[121].mxu0  ;;  %v2386_v15 = vpop.f32.mrb[121].mxu1  ;;  %v3250_v6 = vrot.slane %v5188_v54, 1 }
 0x213   : > { %v2218_v44 = vpop.f32.mrb[122].mxu0  ;;  %v2387_v17 = vpop.f32.mrb[122].mxu1  ;;  %v3257_v12 = vsel %vm3189_vm1, %v3248_v20, %v3256_v27  ;;  %v5190_v15 = vld [vmem:[%s5332_s26 + $0x144] ss:$16 sps:$4 sm:$0xff]  }
 0x214   : > { %v7007_v63 = vadd.f32 %v2384_v50, %v2216_v16  ;;  %v2219_v36 = vadd.f32 %v2218_v44, %v7450_v37  ;;  %v2220_v5 = vpop.f32.mrb[123].mxu0  ;;  %v2389_v49 = vpop.f32.mrb[123].mxu1  ;;  %v5189_v16 = vld [vmem:[%s5332_s26 + $0x128] ss:$16 sps:$4 sm:$0xff]   ;;  %v3260_v44 = vrot.slane %v5190_v15, 1 }
 0x215   : > { %v3254_v50 = vrot.slane %v5189_v16, 1  ;;  %v3264_v5 = vrot.slane %v5191_v59, 1 }
 0x216   : > { %v7013_v35 = vadd.f32 %v2387_v17, %v2219_v36  ;;  %3671 = vmatmul.mubr.bf16.gmra.mrb[228].mxu0 %v3243_v11  ;;  %3840 = vmatmul.mubr.bf16.gmra.mrb[228].mxu1 %v3247_v8  ;;  %v3251_v11 = vsel %vm3189_vm1, %v3242_v57, %v3250_v6  ;;  %v5192_v57 = vld [vmem:[%s5332_s26 + $0x140] ss:$16 sps:$4 sm:$0xff]  }
 0x217   : > { %3678 = vmatprep.mubr.bf16.mxu0 %v3253_v56  ;;  %3847 = vmatprep.mubr.bf16.mxu1 %v3257_v12  ;;  %v3255_v54 = vsel %vm3189_vm1, %v3246_v9, %v3254_v50  ;;  %v5195_v9 = vld [vmem:[%s5332_s26 + $0x16c] ss:$16 sps:$4 sm:$0xff]  }
 0x219   : > { %v2223_v37 = vpop.f32.mrb[124].mxu0  ;;  %v2392_v49 = vpop.f32.mrb[124].mxu1 }
 0x21a   : > { %v2224_v41 = vadd.f32 %v2223_v37, %v6749_v1  ;;  %v2225_v4 = vpop.f32.mrb[125].mxu0  ;;  %v2394_v20 = vpop.f32.mrb[125].mxu1  ;;  %v3261_v1 = vsel %vm3189_vm1, %v3252_v47, %v3260_v44  ;;  %v3258_v37 = vrot.slane %v5192_v57, 1 }
 0x21b   : > { %v2226_v36 = vpop.f32.mrb[126].mxu0  ;;  %v2395_v56 = vpop.f32.mrb[126].mxu1  ;;  %v3265_v4 = vsel %vm3189_vm1, %v3256_v27, %v3264_v5 }
 0x21c   : > { %v7021_v17 = vadd.f32 %v2392_v49, %v2224_v41  ;;  %v2227_v8 = vadd.f32 %v2226_v36, %v6754_v43  ;;  %v2228_v12 = vpop.f32.mrb[127].mxu0  ;;  %v2397_v16 = vpop.f32.mrb[127].mxu1  ;;  %v5193_v43 = vld [vmem:[%s5332_s26 + $0x148] ss:$16 sps:$4 sm:$0xff]   ;;  %v5194_v41 = vld [vmem:[%s5332_s26 + $0x164] ss:$16 sps:$4 sm:$0xff]  }
 0x21d   : > { %v3262_v59 = vrot.slane %v5193_v43, 1  ;;  %v3268_v49 = vrot.slane %v5194_v41, 1  ;;  %v3272_v36 = vrot.slane %v5195_v9, 1  ;;  %v7452_v12 = vld [vmem:[#allocation4_spill] sm:$0xff] }
 0x21e   : > { %7451 = vst [vmem:[#allocation5_spill] sm:$0xff] %v7021_v17  ;;  %v7027_v15 = vadd.f32 %v2395_v56, %v2227_v8  ;;  %3679 = vmatmul.mubr.bf16.gmra.mrb[232].mxu0 %v3251_v11  ;;  %3848 = vmatmul.mubr.bf16.gmra.mrb[232].mxu1 %v3255_v54  ;;  %v3259_v11 = vsel %vm3189_vm1, %v3250_v6, %v3258_v37  ;;  %v5196_v6 = vld [vmem:[%s5332_s26 + $0x160] ss:$16 sps:$4 sm:$0xff]  }
 0x21f   : > { %3686 = vmatprep.mubr.bf16.mxu0 %v3261_v1  ;;  %3855 = vmatprep.mubr.bf16.mxu1 %v3265_v4  ;;  %v3263_v57 = vsel %vm3189_vm1, %v3254_v50, %v3262_v59  ;;  %v3269_v43 = vsel %vm3189_vm1, %v3260_v44, %v3268_v49  ;;  %v3266_v9 = vrot.slane %v5196_v6, 1  ;;  %v5199_v50 = vld [vmem:[%s5332_s26 + $0x18c] ss:$16 sps:$4 sm:$0xff]  }
 0x221   : > { %v2231_v20 = vpop.f32.mrb[128].mxu0  ;;  %v2400_v16 = vpop.f32.mrb[128].mxu1 }
 0x222   : > { %v2232_v47 = vadd.f32 %v2231_v20, %v7452_v12  ;;  %v2233_v17 = vpop.f32.mrb[129].mxu0  ;;  %v2402_v27 = vpop.f32.mrb[129].mxu1 }
 0x223   : > { %v2234_v8 = vpop.f32.mrb[130].mxu0  ;;  %v2403_v1 = vpop.f32.mrb[130].mxu1  ;;  %v3273_v17 = vsel %vm3189_vm1, %v3264_v5, %v3272_v36 }
 0x224   : > { %v7035_v56 = vadd.f32 %v2400_v16, %v2232_v47  ;;  %v2235_v54 = vadd.f32 %v2234_v8, %v6775_v58  ;;  %v2236_v4 = vpop.f32.mrb[131].mxu0  ;;  %v2405_v41 = vpop.f32.mrb[131].mxu1  ;;  %v5197_v58 = vld [vmem:[%s5332_s26 + $0x168] ss:$16 sps:$4 sm:$0xff]   ;;  %v5198_v47 = vld [vmem:[%s5332_s26 + $0x184] ss:$16 sps:$4 sm:$0xff]  }
 0x225   : > { %v3270_v12 = vrot.slane %v5197_v58, 1  ;;  %v3276_v16 = vrot.slane %v5198_v47, 1  ;;  %v3280_v8 = vrot.slane %v5199_v50, 1 }
 0x226   : > { %v7041_v20 = vadd.f32 %v2403_v1, %v2235_v54  ;;  %3687 = vmatmul.mubr.bf16.gmra.mrb[236].mxu0 %v3259_v11  ;;  %3856 = vmatmul.mubr.bf16.gmra.mrb[236].mxu1 %v3263_v57  ;;  %v3267_v11 = vsel %vm3189_vm1, %v3258_v37, %v3266_v9  ;;  %v5200_v37 = vld [vmem:[%s5332_s26 + $0x180] ss:$16 sps:$4 sm:$0xff]  }
 0x227   : > { %3694 = vmatprep.mubr.bf16.mxu0 %v3269_v43  ;;  %3863 = vmatprep.mubr.bf16.mxu1 %v3273_v17  ;;  %v3271_v6 = vsel %vm3189_vm1, %v3262_v59, %v3270_v12  ;;  %v3281_v47 = vsel %vm3189_vm1, %v3272_v36, %v3280_v8  ;;  %v3274_v50 = vrot.slane %v5200_v37, 1  ;;  %v5203_v59 = vld [vmem:[%s5332_s26 + $0x1ac] ss:$16 sps:$4 sm:$0xff]  }
 0x229   : > { %v2239_v27 = vpop.f32.mrb[132].mxu0  ;;  %v2408_v4 = vpop.f32.mrb[132].mxu1 }
 0x22a   : > { %v2240_v44 = vadd.f32 %v2239_v27, %v6781_v55  ;;  %v2241_v41 = vpop.f32.mrb[133].mxu0  ;;  %v2410_v5 = vpop.f32.mrb[133].mxu1  ;;  %v3277_v55 = vsel %vm3189_vm1, %v3268_v49, %v3276_v16 }
 0x22b   : > { %v2242_v54 = vpop.f32.mrb[134].mxu0  ;;  %v2411_v43 = vpop.f32.mrb[134].mxu1 }
 0x22c   : > { %v7049_v1 = vadd.f32 %v2408_v4, %v2240_v44  ;;  %v2243_v57 = vadd.f32 %v2242_v54, %v6783_v46  ;;  %v2244_v17 = vpop.f32.mrb[135].mxu0  ;;  %v2413_v58 = vpop.f32.mrb[135].mxu1  ;;  %v5201_v46 = vld [vmem:[%s5332_s26 + $0x188] ss:$16 sps:$4 sm:$0xff]   ;;  %v5202_v4 = vld [vmem:[%s5332_s26 + $0x1a4] ss:$16 sps:$4 sm:$0xff]  }
 0x22d   : > { %v3278_v44 = vrot.slane %v5201_v46, 1  ;;  %v3284_v41 = vrot.slane %v5202_v4, 1  ;;  %v3288_v54 = vrot.slane %v5203_v59, 1 }
 0x22e   : > { %v7055_v27 = vadd.f32 %v2411_v43, %v2243_v57  ;;  %3695 = vmatmul.mubr.bf16.gmra.mrb[240].mxu0 %v3267_v11  ;;  %3864 = vmatmul.mubr.bf16.gmra.mrb[240].mxu1 %v3271_v6  ;;  %v3275_v11 = vsel %vm3189_vm1, %v3266_v9, %v3274_v50  ;;  %v5204_v9 = vld [vmem:[%s5332_s26 + $0x1a0] ss:$16 sps:$4 sm:$0xff]  }
 0x22f   : > { %3702 = vmatprep.mubr.bf16.mxu0 %v3277_v55  ;;  %3871 = vmatprep.mubr.bf16.mxu1 %v3281_v47  ;;  %v3279_v55 = vsel %vm3189_vm1, %v3270_v12, %v3278_v44  ;;  %v3285_v47 = vsel %vm3189_vm1, %v3276_v16, %v3284_v41  ;;  %v5205_v12 = vld [vmem:[%s5332_s26 + $0x1a8] ss:$16 sps:$4 sm:$0xff]   ;;  %v5206_v16 = vld [vmem:[%s5332_s26 + $0x1c4] ss:$16 sps:$4 sm:$0xff]  }
 0x231   : > { %v2786_v5 = vpop.f32.mrb[136].mxu0  ;;  %v2955_v17 = vpop.f32.mrb[136].mxu1 }
 0x232   : > { %v2788_v49 = vpop.f32.mrb[137].mxu0  ;;  %v2956_v58 = vadd.f32 %v2955_v17, %v2786_v5  ;;  %v2957_v36 = vpop.f32.mrb[137].mxu1  ;;  %v3289_v5 = vsel %vm3189_vm1, %v3280_v8, %v3288_v54  ;;  %v3282_v17 = vrot.slane %v5204_v9, 1 }
 0x233   : > { %v2789_v57 = vpop.f32.mrb[138].mxu0  ;;  %v2958_v43 = vpop.f32.mrb[138].mxu1  ;;  %v3286_v49 = vrot.slane %v5205_v12, 1  ;;  %v3292_v36 = vrot.slane %v5206_v16, 1 }
 0x234   : > { %v2791_v6 = vpop.f32.mrb[139].mxu0  ;;  %v7065_v37 = vadd.f32 %v2956_v58, %v6790_v7  ;;  %v2959_v46 = vadd.f32 %v2958_v43, %v2789_v57  ;;  %v2960_v4 = vpop.f32.mrb[139].mxu1  ;;  %v5207_v58 = vld [vmem:[%s5332_s26 + $0x1cc] ss:$16 sps:$4 sm:$0xff]  }
 0x235   : > { %v3296_v6 = vrot.slane %v5207_v58, 1 }
 0x236   : > { %3703 = vmatmul.mubr.bf16.gmra.mrb[244].mxu0 %v3275_v11  ;;  %v7069_v59 = vadd.f32 %v2959_v46, %v6793_v52  ;;  %3872 = vmatmul.mubr.bf16.gmra.mrb[244].mxu1 %v3279_v55  ;;  %v3283_v52 = vsel %vm3189_vm1, %v3274_v50, %v3282_v17  ;;  %v3287_v46 = vsel %vm3189_vm1, %v3278_v44, %v3286_v49  ;;  %v5208_v50 = vld [vmem:[%s5332_s26 + $0x1c0] ss:$16 sps:$4 sm:$0xff]   ;;  %v5209_v44 = vld [vmem:[%s5332_s26 + $0x1c8] ss:$16 sps:$4 sm:$0xff]  }
 0x237   : > { %3710 = vmatprep.mubr.bf16.mxu0 %v3285_v47  ;;  %3879 = vmatprep.mubr.bf16.mxu1 %v3289_v5  ;;  %v3293_v5 = vsel %vm3189_vm1, %v3284_v41, %v3292_v36  ;;  %v5210_v41 = vld [vmem:[%s5332_s26 + $0x1e4] ss:$16 sps:$4 sm:$0xff]  }
 0x239   : > { %v2794_v7 = vpop.f32.mrb[140].mxu0  ;;  %v2963_v57 = vpop.f32.mrb[140].mxu1 }
 0x23a   : > { %v2796_v43 = vpop.f32.mrb[141].mxu0  ;;  %v2964_v4 = vadd.f32 %v2963_v57, %v2794_v7  ;;  %v2965_v8 = vpop.f32.mrb[141].mxu1  ;;  %v3297_v7 = vsel %vm3189_vm1, %v3288_v54, %v3296_v6  ;;  %v3290_v57 = vrot.slane %v5208_v50, 1 }
 0x23b   : > { %v2797_v11 = vpop.f32.mrb[142].mxu0  ;;  %v2966_v55 = vpop.f32.mrb[142].mxu1  ;;  %v3294_v43 = vrot.slane %v5209_v44, 1  ;;  %v3300_v8 = vrot.slane %v5210_v41, 1 }
 0x23c   : > { %v2799_v47 = vpop.f32.mrb[143].mxu0  ;;  %v7079_v9 = vadd.f32 %v2964_v4, %v6800_v19  ;;  %v2967_v12 = vadd.f32 %v2966_v55, %v2797_v11  ;;  %v2968_v16 = vpop.f32.mrb[143].mxu1  ;;  %v5211_v4 = vld [vmem:[%s5332_s26 + $0x1ec] ss:$16 sps:$4 sm:$0xff]  }
 0x23d   : > { %v3304_v47 = vrot.slane %v5211_v4, 1 }
 0x23e   : > { %3711 = vmatmul.mubr.bf16.gmra.mrb[248].mxu0 %v3283_v52  ;;  %v7083_v58 = vadd.f32 %v2967_v12, %v6803_v30  ;;  %3880 = vmatmul.mubr.bf16.gmra.mrb[248].mxu1 %v3287_v46  ;;  %v3291_v30 = vsel %vm3189_vm1, %v3282_v17, %v3290_v57  ;;  %v3295_v12 = vsel %vm3189_vm1, %v3286_v49, %v3294_v43  ;;  %v5212_v17 = vld [vmem:[%s5332_s26 + $0x1e0] ss:$16 sps:$4 sm:$0xff]  }
 0x23f   : > { %3718 = vmatprep.mubr.bf16.mxu0 %v3293_v5  ;;  %3887 = vmatprep.mubr.bf16.mxu1 %v3297_v7  ;;  %v3301_v7 = vsel %vm3189_vm1, %v3292_v36, %v3300_v8  ;;  %v5214_v36 = vld [vmem:[%s5332_s26 + $0x204] ss:$16 sps:$4 sm:$0xff]  }
 0x241   : > { %v2802_v19 = vpop.f32.mrb[144].mxu0  ;;  %v2971_v11 = vpop.f32.mrb[144].mxu1 }
 0x242   : > { %v2804_v55 = vpop.f32.mrb[145].mxu0  ;;  %v2972_v54 = vadd.f32 %v2971_v11, %v2802_v19  ;;  %v2973_v52 = vpop.f32.mrb[145].mxu1  ;;  %v3305_v19 = vsel %vm3189_vm1, %v3296_v6, %v3304_v47  ;;  %v3298_v11 = vrot.slane %v5212_v17, 1 }
 0x243   : > { %v2805_v16 = vpop.f32.mrb[146].mxu0  ;;  %v2974_v46 = vpop.f32.mrb[146].mxu1  ;;  %v5213_v55 = vld [vmem:[%s5332_s26 + $0x1e8] ss:$16 sps:$4 sm:$0xff]   ;;  %v3308_v52 = vrot.slane %v5214_v36, 1 }
 0x244   : > { %v2807_v5 = vpop.f32.mrb[147].mxu0  ;;  %v7093_v50 = vadd.f32 %v2972_v54, %v6810_v60  ;;  %v2975_v44 = vadd.f32 %v2974_v46, %v2805_v16  ;;  %v2976_v41 = vpop.f32.mrb[147].mxu1  ;;  %v3302_v49 = vrot.slane %v5213_v55, 1  ;;  %v5215_v54 = vld [vmem:[%s5332_s26 + $0x20c] ss:$16 sps:$4 sm:$0xff]   ;;  %v3299_v6 = vsel %vm3189_vm1, %v3290_v57, %v3298_v11 }
 0x245   : > { %v3312_v5 = vrot.slane %v5215_v54, 1 }
 0x246   : > { %3719 = vmatmul.mubr.bf16.gmra.mrb[252].mxu0 %v3291_v30  ;;  %v7097_v4 = vadd.f32 %v2975_v44, %v6814_v10  ;;  %3888 = vmatmul.mubr.bf16.gmra.mrb[252].mxu1 %v3295_v12  ;;  %v3303_v12 = vsel %vm3189_vm1, %v3294_v43, %v3302_v49  ;;  %v5217_v43 = vld [vmem:[%s5332_s26 + $0x208] ss:$16 sps:$4 sm:$0xff]  }
 0x247   : > { %3726 = vmatprep.mubr.bf16.mxu0 %v3301_v7  ;;  %3895 = vmatprep.mubr.bf16.mxu1 %v3305_v19  ;;  %v3309_v19 = vsel %vm3189_vm1, %v3300_v8, %v3308_v52  ;;  %v3313_v54 = vsel %vm3189_vm1, %v3304_v47, %v3312_v5  ;;  %v3316_v8 = vrot.slane %v6821_v53, 1 }
 0x249   : > { %v2810_v60 = vpop.f32.mrb[148].mxu0  ;;  %v2979_v16 = vpop.f32.mrb[148].mxu1 }
 0x24a   : > { %v2812_v46 = vpop.f32.mrb[149].mxu0  ;;  %v2980_v30 = vadd.f32 %v2979_v16, %v2810_v60  ;;  %v2981_v10 = vpop.f32.mrb[149].mxu1  ;;  %v5216_v60 = vld [vmem:[%s5332_s26 + $0x200] ss:$16 sps:$4 sm:$0xff]  }
 0x24b   : > { %v2813_v44 = vpop.f32.mrb[150].mxu0  ;;  %v2982_v7 = vpop.f32.mrb[150].mxu1  ;;  %v3306_v16 = vrot.slane %v5216_v60, 1  ;;  %v3310_v46 = vrot.slane %v5217_v43, 1 }
 0x24c   : > { %v2815_v41 = vpop.f32.mrb[151].mxu0  ;;  %v7107_v17 = vadd.f32 %v2980_v30, %v6829_v13  ;;  %v2983_v55 = vadd.f32 %v2982_v7, %v2813_v44  ;;  %v2984_v36 = vpop.f32.mrb[151].mxu1  ;;  %v3320_v13 = vrot.slane %v6825_v2, 1 }
 0x24e   : > { %3727 = vmatmul.mubr.bf16.gmra.mrb[0].mxu0 %v3299_v6  ;;  %v7111_v57 = vadd.f32 %v2983_v55, %v6834_v48  ;;  %3896 = vmatmul.mubr.bf16.gmra.mrb[0].mxu1 %v3303_v12  ;;  %v3307_v48 = vsel %vm3189_vm1, %v3298_v11, %v3306_v16  ;;  %v3317_v55 = vsel %vm3189_vm1, %v3308_v52, %v3316_v8  ;;  %v3324_v11 = vrot.slane %v6845_v22, 1 }
 0x24f   : > { %3734 = vmatprep.mubr.bf16.mxu0 %v3309_v19  ;;  %3903 = vmatprep.mubr.bf16.mxu1 %v3313_v54  ;;  %v3311_v19 = vsel %vm3189_vm1, %v3302_v49, %v3310_v46  ;;  %v3321_v2 = vsel %vm3189_vm1, %v3312_v5, %v3320_v13  ;;  %v3328_v49 = vrot.slane %v6847_v39, 1 }
 0x250   : > { %v3325_v22 = vsel %vm3189_vm1, %v3316_v8, %v3324_v11 }
 0x251   : > { %v2818_v10 = vpop.f32.mrb[152].mxu0  ;;  %v2987_v30 = vpop.f32.mrb[152].mxu1 }
 0x252   : > { %v2820_v44 = vpop.f32.mrb[153].mxu0  ;;  %v2988_v7 = vadd.f32 %v2987_v30, %v2818_v10  ;;  %v2989_v47 = vpop.f32.mrb[153].mxu1 }
 0x253   : > { %v2821_v6 = vpop.f32.mrb[154].mxu0  ;;  %v2990_v41 = vpop.f32.mrb[154].mxu1 }
 0x254   : > { %v2823_v12 = vpop.f32.mrb[155].mxu0  ;;  %v7121_v36 = vadd.f32 %v2988_v7, %v6854_v61  ;;  %v2991_v53 = vadd.f32 %v2990_v41, %v2821_v6  ;;  %v2992_v54 = vpop.f32.mrb[155].mxu1  ;;  %v7453_v7 = vrot.slane %v6837_v23, 1  ;;  %v7454_v6 = vrot.slane %v6842_v3, 1 }
 0x256   : > { %3735 = vmatmul.mubr.bf16.gmra.mrb[4].mxu0 %v3307_v48  ;;  %v7125_v60 = vadd.f32 %v2991_v53, %v6863_v25  ;;  %3904 = vmatmul.mubr.bf16.gmra.mrb[4].mxu1 %v3311_v19  ;;  %v3315_v5 = vsel %vm3189_vm1, %v3306_v16, %v7453_v7  ;;  %v3319_v48 = vsel %vm3189_vm1, %v3310_v46, %v7454_v6 }
 0x257   : > { %3742 = vmatprep.mubr.bf16.mxu0 %v3317_v55  ;;  %3911 = vmatprep.mubr.bf16.mxu1 %v3321_v2  ;;  %v3329_v19 = vsel %vm3189_vm1, %v3320_v13, %v3328_v49 }
 0x259   : > { %v2826_v43 = vpop.f32.mrb[156].mxu0  ;;  %v2995_v52 = vpop.f32.mrb[156].mxu1 }
 0x25a   : > { %v2828_v10 = vpop.f32.mrb[157].mxu0  ;;  %v2996_v61 = vadd.f32 %v2995_v52, %v2826_v43  ;;  %v2997_v30 = vpop.f32.mrb[157].mxu1 }
 0x25b   : > { %v2829_v44 = vpop.f32.mrb[158].mxu0  ;;  %v2998_v47 = vpop.f32.mrb[158].mxu1 }
 0x25c   : > { %v2831_v25 = vpop.f32.mrb[159].mxu0  ;;  %v7137_v41 = vadd.f32 %v2996_v61, %v6879_v18  ;;  %v2999_v39 = vadd.f32 %v2998_v47, %v2829_v44  ;;  %v3000_v12 = vpop.f32.mrb[159].mxu1 }
 0x25e   : > { %3743 = vmatmul.mubr.bf16.gmra.mrb[8].mxu0 %v3315_v5  ;;  %v7141_v23 = vadd.f32 %v2999_v39, %v6885_v0  ;;  %3912 = vmatmul.mubr.bf16.gmra.mrb[8].mxu1 %v3319_v48 }
 0x25f   : > { %3750 = vmatprep.mubr.bf16.mxu0 %v3325_v22  ;;  %3919 = vmatprep.mubr.bf16.mxu1 %v3329_v19 }
 0x261   : > { %v2834_v16 = vpop.f32.mrb[160].mxu0  ;;  %v3003_v3 = vpop.f32.mrb[160].mxu1 }
 0x262   : > { %v2836_v55 = vpop.f32.mrb[161].mxu0  ;;  %v3004_v46 = vadd.f32 %v3003_v3, %v2834_v16  ;;  %v3005_v53 = vpop.f32.mrb[161].mxu1 }
 0x263   : > { %v2837_v8 = vpop.f32.mrb[162].mxu0  ;;  %v3006_v54 = vpop.f32.mrb[162].mxu1 }
 0x264   : > { %v2839_v18 = vpop.f32.mrb[163].mxu0  ;;  %v7144_v2 = vadd.f32 %v3004_v46, %v6893_v40  ;;  %v3007_v11 = vadd.f32 %v3006_v54, %v2837_v8  ;;  %v3008_v13 = vpop.f32.mrb[163].mxu1 }
 0x266   : > { %3751 = vmatmul.mubr.bf16.gmra.mrb[12].mxu0 %v6924_v38  ;;  %v7148_v0 = vadd.f32 %v3007_v11, %v6899_v33  ;;  %3920 = vmatmul.mubr.bf16.gmra.mrb[12].mxu1 %v6929_v32 }
 0x269   : > { %v2842_v43 = vpop.f32.mrb[164].mxu0  ;;  %v3011_v49 = vpop.f32.mrb[164].mxu1 }
 0x26a   : > { %v2844_v52 = vpop.f32.mrb[165].mxu0  ;;  %v3012_v10 = vadd.f32 %v3011_v49, %v2842_v43  ;;  %v3013_v61 = vpop.f32.mrb[165].mxu1 }
 0x26b   : > { %v2845_v30 = vpop.f32.mrb[166].mxu0  ;;  %v3014_v44 = vpop.f32.mrb[166].mxu1 }
 0x26c   : > { %v2847_v7 = vpop.f32.mrb[167].mxu0  ;;  %v7152_v40 = vadd.f32 %v3012_v10, %v6913_v24  ;;  %v3015_v5 = vadd.f32 %v3014_v44, %v2845_v30  ;;  %v3016_v47 = vpop.f32.mrb[167].mxu1 }
 0x26e   : > { %v7155_v38 = vadd.f32 %v3015_v5, %v6919_v14 }
 0x271   : > { %v2850_v33 = vpop.f32.mrb[168].mxu0  ;;  %v3019_v25 = vpop.f32.mrb[168].mxu1 }
 0x272   : > { %v2852_v6 = vpop.f32.mrb[169].mxu0  ;;  %v3020_v32 = vadd.f32 %v3019_v25, %v2850_v33  ;;  %v3021_v48 = vpop.f32.mrb[169].mxu1 }
 0x273   : > { %v2853_v22 = vpop.f32.mrb[170].mxu0  ;;  %v3022_v39 = vpop.f32.mrb[170].mxu1 }
 0x274   : > { %v2855_v12 = vpop.f32.mrb[171].mxu0  ;;  %v7158_v19 = vadd.f32 %v3020_v32, %v6937_v21  ;;  %v3023_v16 = vadd.f32 %v3022_v39, %v2853_v22  ;;  %v3024_v3 = vpop.f32.mrb[171].mxu1 }
 0x276   : > { %v7161_v24 = vadd.f32 %v3023_v16, %v6943_v42 }
 0x279   : > { %v2858_v55 = vpop.f32.mrb[172].mxu0  ;;  %v3027_v46 = vpop.f32.mrb[172].mxu1 }
 0x27a   : > { %v2860_v14 = vpop.f32.mrb[173].mxu0  ;;  %v3028_v53 = vadd.f32 %v3027_v46, %v2858_v55  ;;  %v3029_v8 = vpop.f32.mrb[173].mxu1 }
 0x27b   : > { %v2861_v54 = vpop.f32.mrb[174].mxu0  ;;  %v3030_v18 = vpop.f32.mrb[174].mxu1 }
 0x27c   : > { %v2863_v11 = vpop.f32.mrb[175].mxu0  ;;  %v7164_v13 = vadd.f32 %v3028_v53, %v6951_v34  ;;  %v3031_v43 = vadd.f32 %v3030_v18, %v2861_v54  ;;  %v3032_v49 = vpop.f32.mrb[175].mxu1 }
 0x27e   : > { %v7167_v21 = vadd.f32 %v3031_v43, %v6957_v62 }
 0x281   : > { %v2866_v52 = vpop.f32.mrb[176].mxu0  ;;  %v3035_v10 = vpop.f32.mrb[176].mxu1 }
 0x282   : > { %v2868_v42 = vpop.f32.mrb[177].mxu0  ;;  %v3036_v61 = vadd.f32 %v3035_v10, %v2866_v52  ;;  %v3037_v30 = vpop.f32.mrb[177].mxu1 }
 0x283   : > { %v2869_v44 = vpop.f32.mrb[178].mxu0  ;;  %v3038_v7 = vpop.f32.mrb[178].mxu1 }
 0x284   : > { %v2871_v5 = vpop.f32.mrb[179].mxu0  ;;  %v7170_v47 = vadd.f32 %v3036_v61, %v6965_v51  ;;  %v3039_v33 = vadd.f32 %v3038_v7, %v2869_v44  ;;  %v3040_v25 = vpop.f32.mrb[179].mxu1 }
 0x286   : > { %v7173_v34 = vadd.f32 %v3039_v33, %v6971_v45 }
 0x289   : > { %v2874_v6 = vpop.f32.mrb[180].mxu0  ;;  %v3043_v32 = vpop.f32.mrb[180].mxu1 }
 0x28a   : > { %v2876_v62 = vpop.f32.mrb[181].mxu0  ;;  %v3044_v48 = vadd.f32 %v3043_v32, %v2874_v6  ;;  %v3045_v22 = vpop.f32.mrb[181].mxu1 }
 0x28b   : > { %v2877_v39 = vpop.f32.mrb[182].mxu0  ;;  %v3046_v12 = vpop.f32.mrb[182].mxu1 }
 0x28c   : > { %v2879_v16 = vpop.f32.mrb[183].mxu0  ;;  %v7176_v3 = vadd.f32 %v3044_v48, %v6979_v29  ;;  %v3047_v55 = vadd.f32 %v3046_v12, %v2877_v39  ;;  %v3048_v46 = vpop.f32.mrb[183].mxu1 }
 0x28d   : > { %v7455_v46 = vld [vmem:[#allocation5_spill] sm:$0xff] }
 0x28e   : > { %v7179_v51 = vadd.f32 %v3047_v55, %v6985_v26 }
 0x291   : > { %v2882_v14 = vpop.f32.mrb[184].mxu0  ;;  %v3051_v53 = vpop.f32.mrb[184].mxu1 }
 0x292   : > { %v2884_v45 = vpop.f32.mrb[185].mxu0  ;;  %v3052_v8 = vadd.f32 %v3051_v53, %v2882_v14  ;;  %v3053_v54 = vpop.f32.mrb[185].mxu1 }
 0x293   : > { %v2885_v18 = vpop.f32.mrb[186].mxu0  ;;  %v3054_v11 = vpop.f32.mrb[186].mxu1 }
 0x294   : > { %v2887_v43 = vpop.f32.mrb[187].mxu0  ;;  %v7182_v49 = vadd.f32 %v3052_v8, %v6993_v28  ;;  %v3055_v52 = vadd.f32 %v3054_v11, %v2885_v18  ;;  %v3056_v10 = vpop.f32.mrb[187].mxu1 }
 0x296   : > { %v7185_v29 = vadd.f32 %v3055_v52, %v6999_v31 }
 0x299   : > { %v2890_v42 = vpop.f32.mrb[188].mxu0  ;;  %v3059_v61 = vpop.f32.mrb[188].mxu1 }
 0x29a   : > { %v2892_v26 = vpop.f32.mrb[189].mxu0  ;;  %v3060_v30 = vadd.f32 %v3059_v61, %v2890_v42  ;;  %v3061_v44 = vpop.f32.mrb[189].mxu1 }
 0x29b   : > { %v2893_v7 = vpop.f32.mrb[190].mxu0  ;;  %v3062_v5 = vpop.f32.mrb[190].mxu1 }
 0x29c   : > { %v2895_v33 = vpop.f32.mrb[191].mxu0  ;;  %v7188_v25 = vadd.f32 %v3060_v30, %v7007_v63  ;;  %v3063_v6 = vadd.f32 %v3062_v5, %v2893_v7  ;;  %v3064_v32 = vpop.f32.mrb[191].mxu1 }
 0x29e   : > { %v7191_v28 = vadd.f32 %v3063_v6, %v7013_v35 }
 0x2a1   : > { %v2898_v62 = vpop.f32.mrb[192].mxu0  ;;  %v3067_v48 = vpop.f32.mrb[192].mxu1 }
 0x2a2   : > { %v2900_v31 = vpop.f32.mrb[193].mxu0  ;;  %v3068_v22 = vadd.f32 %v3067_v48, %v2898_v62  ;;  %v3069_v39 = vpop.f32.mrb[193].mxu1 }
 0x2a3   : > { %v2901_v12 = vpop.f32.mrb[194].mxu0  ;;  %v3070_v16 = vpop.f32.mrb[194].mxu1 }
 0x2a4   : > { %v2903_v55 = vpop.f32.mrb[195].mxu0  ;;  %v7194_v14 = vadd.f32 %v3068_v22, %v7455_v46  ;;  %v3071_v53 = vadd.f32 %v3070_v16, %v2901_v12  ;;  %v3072_v45 = vpop.f32.mrb[195].mxu1 }
 0x2a6   : > { %v7197_v63 = vadd.f32 %v3071_v53, %v7027_v15  ;;  %v7214_v53 = vld [vmem:[%s7312_s2] ss:$0 sm:$0xff] }
 0x2a9   : > { %v2906_v8 = vpop.f32.mrb[196].mxu0  ;;  %v3075_v54 = vpop.f32.mrb[196].mxu1 }
 0x2aa   : > { %v2908_v35 = vpop.f32.mrb[197].mxu0  ;;  %v3076_v18 = vadd.f32 %v3075_v54, %v2906_v8  ;;  %v3077_v11 = vpop.f32.mrb[197].mxu1 }
 0x2ab   : > { %v2909_v43 = vpop.f32.mrb[198].mxu0  ;;  %v3078_v52 = vpop.f32.mrb[198].mxu1 }
 0x2ac   : > { %v2911_v10 = vpop.f32.mrb[199].mxu0  ;;  %v7200_v42 = vadd.f32 %v3076_v18, %v7035_v56  ;;  %v3079_v61 = vadd.f32 %v3078_v52, %v2909_v43  ;;  %v3080_v26 = vpop.f32.mrb[199].mxu1 }
 0x2ae   : > { %v7203_v30 = vadd.f32 %v3079_v61, %v7041_v20 }
 0x2b1   : > { %v2914_v44 = vpop.f32.mrb[200].mxu0  ;;  %v3083_v7 = vpop.f32.mrb[200].mxu1 }
 0x2b2   : > { %v2916_v15 = vpop.f32.mrb[201].mxu0  ;;  %v3084_v5 = vadd.f32 %v3083_v7, %v2914_v44  ;;  %v3085_v33 = vpop.f32.mrb[201].mxu1 }
 0x2b3   : > { %v2917_v6 = vpop.f32.mrb[202].mxu0  ;;  %v3086_v32 = vpop.f32.mrb[202].mxu1 }
 0x2b4   : > { %v2919_v62 = vpop.f32.mrb[203].mxu0  ;;  %v7206_v48 = vadd.f32 %v3084_v5, %v7049_v1  ;;  %v3087_v31 = vadd.f32 %v3086_v32, %v2917_v6  ;;  %v3088_v22 = vpop.f32.mrb[203].mxu1 }
 0x2b6   : > { %v7209_v56 = vadd.f32 %v3087_v31, %v7055_v27 }
 0x2b9   : > { %v3624_v39 = vpop.f32.mrb[204].mxu0  ;;  %v3793_v20 = vpop.f32.mrb[204].mxu1 }
 0x2ba   : > { %v3626_v12 = vpop.f32.mrb[205].mxu0  ;;  %v3794_v16 = vadd.f32 %v3793_v20, %v3624_v39  ;;  %v3795_v55 = vpop.f32.mrb[205].mxu1 }
 0x2bb   : > { %v3627_v46 = vpop.f32.mrb[206].mxu0  ;;  %v3796_v45 = vpop.f32.mrb[206].mxu1 }
 0x2bc   : > { %v3629_v1 = vpop.f32.mrb[207].mxu0  ;;  %v3928_v8 = vadd.f32 %v3794_v16, %v7065_v37  ;;  %v3797_v54 = vadd.f32 %v3796_v45, %v3627_v46  ;;  %v3798_v35 = vpop.f32.mrb[207].mxu1 }
 0x2be   : > { %v3968_v27 = vadd.f32 %v7214_v53, %v3928_v8  ;;  %v3929_v18 = vadd.f32 %v3797_v54, %v7069_v59 }
 0x2c0   : > { %v3969_v11 = vadd.f32 %v7214_v53, %v3929_v18  ;;  %v4002_v61 = vmax.f32 %v3968_v27, 0.0 }
 0x2c1   : > { %v3632_v43 = vpop.f32.mrb[208].mxu0  ;;  %v3801_v52 = vpop.f32.mrb[208].mxu1 }
 0x2c2   : > { %v3634_v10 = vpop.f32.mrb[209].mxu0  ;;  %v4003_v26 = vmax.f32 %v3969_v11, 0.0  ;;  %v3802_v44 = vadd.f32 %v3801_v52, %v3632_v43  ;;  %v3803_v7 = vpop.f32.mrb[209].mxu1 }
 0x2c3   : > { %v3635_v15 = vpop.f32.mrb[210].mxu0  ;;  %v3804_v37 = vpop.f32.mrb[210].mxu1 }
 0x2c4   : > { %v3637_v5 = vpop.f32.mrb[211].mxu0  ;;  %v4742_v59 = vpack.c.bf16 %v4003_v26, %v4002_v61  ;;  %v3930_v33 = vadd.f32 %v3802_v44, %v7079_v9  ;;  %v3805_v6 = vadd.f32 %v3804_v37, %v3635_v15  ;;  %v3806_v32 = vpop.f32.mrb[211].mxu1 }
 0x2c6   : > { %4743 = vst [vmem:[%s7224_s10] sm:$0xff] %v4742_v59   ;;  %v3970_v62 = vadd.f32 %v7214_v53, %v3930_v33  ;;  %v3931_v31 = vadd.f32 %v3805_v6, %v7083_v58 }
 0x2c8   : > { %v3971_v22 = vadd.f32 %v7214_v53, %v3931_v31  ;;  %v4004_v16 = vmax.f32 %v3970_v62, 0.0 }
 0x2c9   : > { %v3640_v39 = vpop.f32.mrb[212].mxu0  ;;  %v3809_v20 = vpop.f32.mrb[212].mxu1 }
 0x2ca   : > { %v3642_v12 = vpop.f32.mrb[213].mxu0  ;;  %v4005_v55 = vmax.f32 %v3971_v22, 0.0  ;;  %v3810_v46 = vadd.f32 %v3809_v20, %v3640_v39  ;;  %v3811_v45 = vpop.f32.mrb[213].mxu1 }
 0x2cb   : > { %v3643_v1 = vpop.f32.mrb[214].mxu0  ;;  %v3812_v8 = vpop.f32.mrb[214].mxu1 }
 0x2cc   : > { %v3645_v9 = vpop.f32.mrb[215].mxu0  ;;  %v4747_v54 = vpack.c.bf16 %v4005_v55, %v4004_v16  ;;  %v3932_v35 = vadd.f32 %v3810_v46, %v7093_v50  ;;  %v3813_v27 = vadd.f32 %v3812_v8, %v3643_v1  ;;  %v3814_v18 = vpop.f32.mrb[215].mxu1 }
 0x2ce   : > { %4824 = vst [vmem:[%s7224_s10 + $0x8] sm:$0xff] %v4747_v54   ;;  %v3972_v58 = vadd.f32 %v7214_v53, %v3932_v35  ;;  %v3933_v11 = vadd.f32 %v3813_v27, %v7097_v4 }
 0x2d0   : > { %v3973_v43 = vadd.f32 %v7214_v53, %v3933_v11  ;;  %v4006_v26 = vmax.f32 %v3972_v58, 0.0 }
 0x2d1   : > { %v3648_v52 = vpop.f32.mrb[216].mxu0  ;;  %v3817_v10 = vpop.f32.mrb[216].mxu1 }
 0x2d2   : > { %v3650_v61 = vpop.f32.mrb[217].mxu0  ;;  %v4007_v44 = vmax.f32 %v3973_v43, 0.0  ;;  %v3818_v7 = vadd.f32 %v3817_v10, %v3648_v52  ;;  %v3819_v15 = vpop.f32.mrb[217].mxu1 }
 0x2d3   : > { %v3651_v37 = vpop.f32.mrb[218].mxu0  ;;  %v3820_v5 = vpop.f32.mrb[218].mxu1 }
 0x2d4   : > { %v3653_v50 = vpop.f32.mrb[219].mxu0  ;;  %v4752_v59 = vpack.c.bf16 %v4007_v44, %v4006_v26  ;;  %v3934_v33 = vadd.f32 %v3818_v7, %v7107_v17  ;;  %v3821_v6 = vadd.f32 %v3820_v5, %v3651_v37  ;;  %v3822_v32 = vpop.f32.mrb[219].mxu1 }
 0x2d6   : > { %4825 = vst [vmem:[%s7224_s10 + $0x10] sm:$0xff] %v4752_v59   ;;  %v3974_v4 = vadd.f32 %v7214_v53, %v3934_v33  ;;  %v3935_v62 = vadd.f32 %v3821_v6, %v7111_v57 }
 0x2d8   : > { %v3975_v31 = vadd.f32 %v7214_v53, %v3935_v62  ;;  %v4008_v12 = vmax.f32 %v3974_v4, 0.0 }
 0x2d9   : > { %v3656_v22 = vpop.f32.mrb[220].mxu0  ;;  %v3825_v39 = vpop.f32.mrb[220].mxu1 }
 0x2da   : > { %v3658_v20 = vpop.f32.mrb[221].mxu0  ;;  %v4009_v16 = vmax.f32 %v3975_v31, 0.0  ;;  %v3826_v55 = vadd.f32 %v3825_v39, %v3656_v22  ;;  %v3827_v46 = vpop.f32.mrb[221].mxu1 }
 0x2db   : > { %v3659_v45 = vpop.f32.mrb[222].mxu0  ;;  %v3828_v1 = vpop.f32.mrb[222].mxu1 }
 0x2dc   : > { %v3661_v17 = vpop.f32.mrb[223].mxu0  ;;  %v4757_v8 = vpack.c.bf16 %v4009_v16, %v4008_v12  ;;  %v3936_v9 = vadd.f32 %v3826_v55, %v7121_v36  ;;  %v3829_v54 = vadd.f32 %v3828_v1, %v3659_v45  ;;  %v3830_v35 = vpop.f32.mrb[223].mxu1 }
 0x2de   : > { %4826 = vst [vmem:[%s7224_s10 + $0x18] sm:$0xff] %v4757_v8   ;;  %v3976_v57 = vadd.f32 %v7214_v53, %v3936_v9  ;;  %v3937_v27 = vadd.f32 %v3829_v54, %v7125_v60 }
 0x2e0   : > { %v3977_v18 = vadd.f32 %v7214_v53, %v3937_v27  ;;  %v4010_v52 = vmax.f32 %v3976_v57, 0.0 }
 0x2e1   : > { %v3664_v58 = vpop.f32.mrb[224].mxu0  ;;  %v3833_v11 = vpop.f32.mrb[224].mxu1 }
 0x2e2   : > { %v3666_v43 = vpop.f32.mrb[225].mxu0  ;;  %v4011_v10 = vmax.f32 %v3977_v18, 0.0  ;;  %v3834_v61 = vadd.f32 %v3833_v11, %v3664_v58  ;;  %v3835_v26 = vpop.f32.mrb[225].mxu1 }
 0x2e3   : > { %v3667_v44 = vpop.f32.mrb[226].mxu0  ;;  %v3836_v7 = vpop.f32.mrb[226].mxu1 }
 0x2e4   : > { %v3669_v36 = vpop.f32.mrb[227].mxu0  ;;  %v4762_v15 = vpack.c.bf16 %v4011_v10, %v4010_v52  ;;  %v3938_v37 = vadd.f32 %v3834_v61, %v7137_v41  ;;  %v3837_v5 = vadd.f32 %v3836_v7, %v3667_v44  ;;  %v3838_v50 = vpop.f32.mrb[227].mxu1 }
 0x2e6   : > { %4827 = vst [vmem:[%s7224_s10 + $0x20] sm:$0xff] %v4762_v15   ;;  %v3978_v60 = vadd.f32 %v7214_v53, %v3938_v37  ;;  %v3939_v59 = vadd.f32 %v3837_v5, %v7141_v23 }
 0x2e8   : > { %v3979_v33 = vadd.f32 %v7214_v53, %v3939_v59  ;;  %v4012_v62 = vmax.f32 %v3978_v60, 0.0 }
 0x2e9   : > { %v3672_v6 = vpop.f32.mrb[228].mxu0  ;;  %v3841_v32 = vpop.f32.mrb[228].mxu1 }
 0x2ea   : > { %v3674_v4 = vpop.f32.mrb[229].mxu0  ;;  %v4013_v31 = vmax.f32 %v3979_v33, 0.0  ;;  %v3842_v22 = vadd.f32 %v3841_v32, %v3672_v6  ;;  %v3843_v39 = vpop.f32.mrb[229].mxu1 }
 0x2eb   : > { %v3675_v20 = vpop.f32.mrb[230].mxu0  ;;  %v3844_v12 = vpop.f32.mrb[230].mxu1 }
 0x2ec   : > { %v3677_v41 = vpop.f32.mrb[231].mxu0  ;;  %v4767_v16 = vpack.c.bf16 %v4013_v31, %v4012_v62  ;;  %v3940_v55 = vadd.f32 %v3842_v22, %v7144_v2  ;;  %v3845_v46 = vadd.f32 %v3844_v12, %v3675_v20  ;;  %v3846_v45 = vpop.f32.mrb[231].mxu1 }
 0x2ee   : > { %4828 = vst [vmem:[%s7224_s10 + $0x28] sm:$0xff] %v4767_v16   ;;  %v3980_v23 = vadd.f32 %v7214_v53, %v3940_v55  ;;  %v3941_v1 = vadd.f32 %v3845_v46, %v7148_v0 }
 0x2f0   : > { %v3981_v17 = vadd.f32 %v7214_v53, %v3941_v1  ;;  %v4014_v35 = vmax.f32 %v3980_v23, 0.0 }
 0x2f1   : > { %v3680_v8 = vpop.f32.mrb[232].mxu0  ;;  %v3849_v9 = vpop.f32.mrb[232].mxu1 }
 0x2f2   : > { %v3682_v54 = vpop.f32.mrb[233].mxu0  ;;  %v4015_v57 = vmax.f32 %v3981_v17, 0.0  ;;  %v3850_v27 = vadd.f32 %v3849_v9, %v3680_v8  ;;  %v3851_v18 = vpop.f32.mrb[233].mxu1 }
 0x2f3   : > { %v3683_v58 = vpop.f32.mrb[234].mxu0  ;;  %v3852_v11 = vpop.f32.mrb[234].mxu1 }
 0x2f4   : > { %v3685_v2 = vpop.f32.mrb[235].mxu0  ;;  %v4772_v43 = vpack.c.bf16 %v4015_v57, %v4014_v35  ;;  %v3942_v52 = vadd.f32 %v3850_v27, %v7152_v40  ;;  %v3853_v10 = vadd.f32 %v3852_v11, %v3683_v58  ;;  %v3854_v61 = vpop.f32.mrb[235].mxu1 }
 0x2f6   : > { %4829 = vst [vmem:[%s7224_s10 + $0x30] sm:$0xff] %v4772_v43   ;;  %v3982_v0 = vadd.f32 %v7214_v53, %v3942_v52  ;;  %v3943_v26 = vadd.f32 %v3853_v10, %v7155_v38 }
 0x2f8   : > { %v3983_v44 = vadd.f32 %v7214_v53, %v3943_v26  ;;  %v4016_v37 = vmax.f32 %v3982_v0, 0.0 }
 0x2f9   : > { %v3688_v7 = vpop.f32.mrb[236].mxu0  ;;  %v3857_v36 = vpop.f32.mrb[236].mxu1 }
 0x2fa   : > { %v3690_v15 = vpop.f32.mrb[237].mxu0  ;;  %v4017_v5 = vmax.f32 %v3983_v44, 0.0  ;;  %v3858_v50 = vadd.f32 %v3857_v36, %v3688_v7  ;;  %v3859_v60 = vpop.f32.mrb[237].mxu1 }
 0x2fb   : > { %v3691_v59 = vpop.f32.mrb[238].mxu0  ;;  %v3860_v33 = vpop.f32.mrb[238].mxu1 }
 0x2fc   : > { %v3693_v40 = vpop.f32.mrb[239].mxu0  ;;  %v4777_v6 = vpack.c.bf16 %v4017_v5, %v4016_v37  ;;  %v3944_v32 = vadd.f32 %v3858_v50, %v7158_v19  ;;  %v3861_v4 = vadd.f32 %v3860_v33, %v3691_v59  ;;  %v3862_v62 = vpop.f32.mrb[239].mxu1 }
 0x2fe   : > { %4830 = vst [vmem:[%s7224_s10 + $0x38] sm:$0xff] %v4777_v6   ;;  %v3984_v38 = vadd.f32 %v7214_v53, %v3944_v32  ;;  %v3945_v31 = vadd.f32 %v3861_v4, %v7161_v24 }
 0x300   : > { %v3985_v22 = vadd.f32 %v7214_v53, %v3945_v31  ;;  %v4018_v41 = vmax.f32 %v3984_v38, 0.0 }
 0x301   : > { %v3696_v39 = vpop.f32.mrb[240].mxu0  ;;  %v3865_v20 = vpop.f32.mrb[240].mxu1 }
 0x302   : > { %v3698_v12 = vpop.f32.mrb[241].mxu0  ;;  %v4019_v16 = vmax.f32 %v3985_v22, 0.0  ;;  %v3866_v55 = vadd.f32 %v3865_v20, %v3696_v39  ;;  %v3867_v46 = vpop.f32.mrb[241].mxu1 }
 0x303   : > { %v3699_v45 = vpop.f32.mrb[242].mxu0  ;;  %v3868_v23 = vpop.f32.mrb[242].mxu1 }
 0x304   : > { %v3701_v19 = vpop.f32.mrb[243].mxu0  ;;  %v4782_v1 = vpack.c.bf16 %v4019_v16, %v4018_v41  ;;  %v3946_v17 = vadd.f32 %v3866_v55, %v7164_v13  ;;  %v3869_v8 = vadd.f32 %v3868_v23, %v3699_v45  ;;  %v3870_v9 = vpop.f32.mrb[243].mxu1 }
 0x306   : > { %4831 = vst [vmem:[%s7224_s10 + $0x40] sm:$0xff] %v4782_v1   ;;  %v3986_v24 = vadd.f32 %v7214_v53, %v3946_v17  ;;  %v3947_v54 = vadd.f32 %v3869_v8, %v7167_v21 }
 0x308   : > { %v3987_v35 = vadd.f32 %v7214_v53, %v3947_v54  ;;  %v4020_v58 = vmax.f32 %v3986_v24, 0.0 }
 0x309   : > { %v3704_v57 = vpop.f32.mrb[244].mxu0  ;;  %v3873_v27 = vpop.f32.mrb[244].mxu1 }
 0x30a   : > { %v3706_v18 = vpop.f32.mrb[245].mxu0  ;;  %v4021_v11 = vmax.f32 %v3987_v35, 0.0  ;;  %v3874_v2 = vadd.f32 %v3873_v27, %v3704_v57  ;;  %v3875_v43 = vpop.f32.mrb[245].mxu1 }
 0x30b   : > { %v3707_v52 = vpop.f32.mrb[246].mxu0  ;;  %v3876_v10 = vpop.f32.mrb[246].mxu1 }
 0x30c   : > { %v3709_v13 = vpop.f32.mrb[247].mxu0  ;;  %v4787_v61 = vpack.c.bf16 %v4021_v11, %v4020_v58  ;;  %v3948_v0 = vadd.f32 %v3874_v2, %v7170_v47  ;;  %v3877_v26 = vadd.f32 %v3876_v10, %v3707_v52  ;;  %v3878_v44 = vpop.f32.mrb[247].mxu1 }
 0x30e   : > { %4832 = vst [vmem:[%s7224_s10 + $0x48] sm:$0xff] %v4787_v61   ;;  %v3988_v21 = vadd.f32 %v7214_v53, %v3948_v0  ;;  %v3949_v7 = vadd.f32 %v3877_v26, %v7173_v34 }
 0x310   : > { %v3989_v36 = vadd.f32 %v7214_v53, %v3949_v7  ;;  %v4022_v50 = vmax.f32 %v3988_v21, 0.0 }
 0x311   : > { %v3712_v15 = vpop.f32.mrb[248].mxu0  ;;  %v3881_v37 = vpop.f32.mrb[248].mxu1 }
 0x312   : > { %v3714_v5 = vpop.f32.mrb[249].mxu0  ;;  %v4023_v60 = vmax.f32 %v3989_v36, 0.0  ;;  %v3882_v59 = vadd.f32 %v3881_v37, %v3712_v15  ;;  %v3883_v33 = vpop.f32.mrb[249].mxu1 }
 0x313   : > { %v3715_v40 = vpop.f32.mrb[250].mxu0  ;;  %v3884_v6 = vpop.f32.mrb[250].mxu1 }
 0x314   : > { %v3717_v47 = vpop.f32.mrb[251].mxu0  ;;  %v4792_v32 = vpack.c.bf16 %v4023_v60, %v4022_v50  ;;  %v3950_v4 = vadd.f32 %v3882_v59, %v7176_v3  ;;  %v3885_v62 = vadd.f32 %v3884_v6, %v3715_v40  ;;  %v3886_v38 = vpop.f32.mrb[251].mxu1 }
 0x316   : > { %4833 = vst [vmem:[%s7224_s10 + $0x50] sm:$0xff] %v4792_v32   ;;  %v3990_v34 = vadd.f32 %v7214_v53, %v3950_v4  ;;  %v3951_v31 = vadd.f32 %v3885_v62, %v7179_v51 }
 0x318   : > { %v3991_v22 = vadd.f32 %v7214_v53, %v3951_v31  ;;  %v4024_v41 = vmax.f32 %v3990_v34, 0.0 }
 0x319   : > { %v3720_v39 = vpop.f32.mrb[252].mxu0  ;;  %v3889_v20 = vpop.f32.mrb[252].mxu1 }
 0x31a   : > { %v3722_v12 = vpop.f32.mrb[253].mxu0  ;;  %v4025_v16 = vmax.f32 %v3991_v22, 0.0  ;;  %v3890_v55 = vadd.f32 %v3889_v20, %v3720_v39  ;;  %v3891_v46 = vpop.f32.mrb[253].mxu1 }
 0x31b   : > { %v3723_v45 = vpop.f32.mrb[254].mxu0  ;;  %v3892_v23 = vpop.f32.mrb[254].mxu1 }
 0x31c   : > { %v3725_v3 = vpop.f32.mrb[255].mxu0  ;;  %v4797_v19 = vpack.c.bf16 %v4025_v16, %v4024_v41  ;;  %v3952_v1 = vadd.f32 %v3890_v55, %v7182_v49  ;;  %v3893_v17 = vadd.f32 %v3892_v23, %v3723_v45  ;;  %v3894_v8 = vpop.f32.mrb[255].mxu1 }
 0x31e   : > { %4834 = vst [vmem:[%s7224_s10 + $0x58] sm:$0xff] %v4797_v19   ;;  %v3992_v51 = vadd.f32 %v7214_v53, %v3952_v1  ;;  %v3953_v9 = vadd.f32 %v3893_v17, %v7185_v29 }
 0x320   : > { %v3993_v24 = vadd.f32 %v7214_v53, %v3953_v9  ;;  %v4026_v27 = vmax.f32 %v3992_v51, 0.0 }
 0x321   : > { %v3728_v54 = vpop.f32.mrb[0].mxu0  ;;  %v3897_v35 = vpop.f32.mrb[0].mxu1 }
 0x322   : > { %v3730_v57 = vpop.f32.mrb[1].mxu0  ;;  %v4027_v18 = vmax.f32 %v3993_v24, 0.0  ;;  %v3898_v58 = vadd.f32 %v3897_v35, %v3728_v54  ;;  %v3899_v11 = vpop.f32.mrb[1].mxu1 }
 0x323   : > { %v3731_v2 = vpop.f32.mrb[2].mxu0  ;;  %v3900_v43 = vpop.f32.mrb[2].mxu1 }
 0x324   : > { %v3733_v49 = vpop.f32.mrb[3].mxu0  ;;  %v4802_v52 = vpack.c.bf16 %v4027_v18, %v4026_v27  ;;  %v3954_v10 = vadd.f32 %v3898_v58, %v7188_v25  ;;  %v3901_v13 = vadd.f32 %v3900_v43, %v3731_v2  ;;  %v3902_v61 = vpop.f32.mrb[3].mxu1 }
 0x326   : > { %4835 = vst [vmem:[%s7224_s10 + $0x60] sm:$0xff] %v4802_v52   ;;  %v3994_v29 = vadd.f32 %v7214_v53, %v3954_v10  ;;  %v3955_v0 = vadd.f32 %v3901_v13, %v7191_v28 }
 0x328   : > { %v3995_v26 = vadd.f32 %v7214_v53, %v3955_v0  ;;  %v4028_v36 = vmax.f32 %v3994_v29, 0.0 }
 0x329   : > { %v3736_v44 = vpop.f32.mrb[4].mxu0  ;;  %v3905_v21 = vpop.f32.mrb[4].mxu1 }
 0x32a   : > { %v3738_v7 = vpop.f32.mrb[5].mxu0  ;;  %v4029_v15 = vmax.f32 %v3995_v26, 0.0  ;;  %v3906_v37 = vadd.f32 %v3905_v21, %v3736_v44  ;;  %v3907_v5 = vpop.f32.mrb[5].mxu1 }
 0x32b   : > { %v3739_v50 = vpop.f32.mrb[6].mxu0  ;;  %v3908_v60 = vpop.f32.mrb[6].mxu1 }
 0x32c   : > { %v3741_v25 = vpop.f32.mrb[7].mxu0  ;;  %v4807_v59 = vpack.c.bf16 %v4029_v15, %v4028_v36  ;;  %v3956_v33 = vadd.f32 %v3906_v37, %v7194_v14  ;;  %v3909_v40 = vadd.f32 %v3908_v60, %v3739_v50  ;;  %v3910_v6 = vpop.f32.mrb[7].mxu1 }
 0x32e   : > { %4836 = vst [vmem:[%s7224_s10 + $0x68] sm:$0xff] %v4807_v59   ;;  %v3996_v28 = vadd.f32 %v7214_v53, %v3956_v33  ;;  %v3957_v47 = vadd.f32 %v3909_v40, %v7197_v63 }
 0x330   : > { %v3997_v32 = vadd.f32 %v7214_v53, %v3957_v47  ;;  %v4030_v34 = vmax.f32 %v3996_v28, 0.0 }
 0x331   : > { %v3744_v4 = vpop.f32.mrb[8].mxu0  ;;  %v3913_v62 = vpop.f32.mrb[8].mxu1 }
 0x332   : > { %v3746_v38 = vpop.f32.mrb[9].mxu0  ;;  %v4031_v31 = vmax.f32 %v3997_v32, 0.0  ;;  %v3914_v22 = vadd.f32 %v3913_v62, %v3744_v4  ;;  %v3915_v39 = vpop.f32.mrb[9].mxu1 }
 0x333   : > { %v3747_v20 = vpop.f32.mrb[10].mxu0  ;;  %v3916_v12 = vpop.f32.mrb[10].mxu1 }
 0x334   : > { %v3749_v14 = vpop.f32.mrb[11].mxu0  ;;  %v4812_v41 = vpack.c.bf16 %v4031_v31, %v4030_v34  ;;  %v3958_v16 = vadd.f32 %v3914_v22, %v7200_v42  ;;  %v3917_v55 = vadd.f32 %v3916_v12, %v3747_v20  ;;  %v3918_v46 = vpop.f32.mrb[11].mxu1 }
 0x336   : > { %4837 = vst [vmem:[%s7224_s10 + $0x70] sm:$0xff] %v4812_v41   ;;  %v3998_v63 = vadd.f32 %v7214_v53, %v3958_v16  ;;  %v3959_v45 = vadd.f32 %v3917_v55, %v7203_v30 }
 0x338   : > { %v3999_v23 = vadd.f32 %v7214_v53, %v3959_v45  ;;  %v4032_v17 = vmax.f32 %v3998_v63, 0.0 }
 0x339   : > { %v3752_v3 = vpop.f32.mrb[12].mxu0  ;;  %v3921_v19 = vpop.f32.mrb[12].mxu1 }
 0x33a   : > { %v3754_v1 = vpop.f32.mrb[13].mxu0  ;;  %v4033_v8 = vmax.f32 %v3999_v23, 0.0  ;;  %v3922_v51 = vadd.f32 %v3921_v19, %v3752_v3  ;;  %v3923_v9 = vpop.f32.mrb[13].mxu1 }
 0x33b   : > { %v3755_v24 = vpop.f32.mrb[14].mxu0  ;;  %v3924_v42 = vpop.f32.mrb[14].mxu1 }
 0x33c   : > { %v3757_v54 = vpop.f32.mrb[15].mxu0  ;;  %v4817_v35 = vpack.c.bf16 %v4033_v8, %v4032_v17  ;;  %v3960_v57 = vadd.f32 %v3922_v51, %v7206_v48  ;;  %v3925_v27 = vadd.f32 %v3924_v42, %v3755_v24  ;;  %v3926_v18 = vpop.f32.mrb[15].mxu1 }
 0x33e   : > { %4838 = vst [vmem:[%s7224_s10 + $0x78] sm:$0xff] %v4817_v35   ;;  %v4000_v30 = vadd.f32 %v7214_v53, %v3960_v57  ;;  %v3961_v58 = vadd.f32 %v3925_v27, %v7209_v56 }
 0x340   : > { %v4001_v11 = vadd.f32 %v7214_v53, %v3961_v58  ;;  %v4034_v2 = vmax.f32 %v4000_v30, 0.0 }
 0x342   : > { %v4035_v43 = vmax.f32 %v4001_v11, 0.0 }
 0x344   : > { %v4822_v49 = vpack.c.bf16 %v4035_v43, %v4034_v2 }
 0x346   : > { %4839 = vst [vmem:[%s7224_s10 + $0x80] sm:$0xff] %v4822_v49  }
 0x347 PF: > { %s13_s12 = sadd.s32 1, %s5224_s12  }
 0x348   : > { %p10_p4 = scmp.ge.s32.totalorder %s13_s12, 4  }
 0x34a   :  { %12 = sbr.rel (!%p10_p4) target bundleno = 1 (0x1), region = 65 }

// kernel: a_call__.7
= control target key start
LH: loop header
LB: loop body
LE: loop exit
PB: predicated region body
PF: predicated region fallthrough
CT: control target
= control target key end

     0   :  { %s3474_s12 = smov 0   ;;  %s4411_s0 = inlined_call_operand.vmem [shape: bf16[2,82,512], index: 0, kind: input, shape index: {}]   ;;  %s4412_s1 = inlined_call_operand.vmem [shape: bf16[4,512,128], index: 1, kind: input, shape index: {}]   ;;  %s4413_s2 = inlined_call_operand.vmem [shape: f32[1,128], index: 2, kind: input, shape index: {}]   ;;  %s4414_s3 = inlined_call_operand.vmem [shape: bf16[2,72,128], index: 3, kind: output, shape index: {}]  }
   0x1 LB: > { %s2481_s13 = sadd.s32 4294967295, %s3452_s12   ;;  %p2485_p0 = scmp.ge.s32.totalorder %s3452_s12, 1  ;;  %s3452_s12 = sphi %s3474_s12, %s13_s12  }
   0x2   : > { %p137_p1 = scmp.lt.s32.totalorder %s3452_s12, 3 }
   0x4   : > { %p138_p2 = pnand %p2485_p0, %p137_p1 }
   0x5   : > { %v3274_v0 = vld [vmem:[%s4412_s1 + $0x140] sm:$0xff] (!%p138_p2)   ;;  %v3278_v4 = vld [vmem:[%s4412_s1 + $0x148] sm:$0xff] (!%p138_p2)   ;;  %v3282_v8 = vld [vmem:[%s4412_s1 + $0x150] sm:$0xff] (!%p138_p2)   ;;  %p161_p3 = scmp.lt.s32.totalorder (!%p138_p2), %s2481_s13, 1  ;;  %vm404_vm0 = vsmask.f32 (!%p138_p2), 7424 }
   0x6   : > { %141 = sbr.rel (%p138_p2) target bundleno = 418 (0x1a2), region = 32  ;;  %v3275_v1 = vld [vmem:[%s4412_s1 + $0x1c0] sm:$0xff] (!%p138_p2)   ;;  %2896 = vmatprep.subr.bf16.mxu0 (!%p138_p2), %v3274_v0  ;;  %v3279_v5 = vld [vmem:[%s4412_s1 + $0x1c8] sm:$0xff] (!%p138_p2)   ;;  %v3283_v9 = vld [vmem:[%s4412_s1 + $0x1d0] sm:$0xff] (!%p138_p2)   ;;  %vm1954_vm1 = vcmask (!%p138_p2), 1046528  }
   0x7   : > { %v3276_v2 = vld [vmem:[%s4412_s1 + $0x100] sm:$0xff] (!%p138_p2)   ;;  %2942 = vmatprep.subr.bf16.mxu1 (!%p138_p2), %v3275_v1  ;;  %v3280_v6 = vld [vmem:[%s4412_s1 + $0x108] sm:$0xff] (!%p138_p2)   ;;  %v3284_v10 = vld [vmem:[%s4412_s1 + $0x110] sm:$0xff] (!%p138_p2)  }
   0x8   : > { %v3277_v3 = vld [vmem:[%s4412_s1 + $0x180] sm:$0xff] (!%p138_p2)   ;;  %2897 = vmatpush3.bf16.msra.mxu0 (!%p138_p2), %v3276_v2  ;;  %v3281_v7 = vld [vmem:[%s4412_s1 + $0x188] sm:$0xff] (!%p138_p2)   ;;  %v3285_v11 = vld [vmem:[%s4412_s1 + $0x190] sm:$0xff] (!%p138_p2)  }
   0x9   : > { %2943 = vmatpush3.bf16.msra.mxu1 (!%p138_p2), %v3277_v3  ;;  %2898 = vmatprep.subr.bf16.mxu0 (!%p138_p2), %v3278_v4  ;;  %v3286_v12 = vld [vmem:[%s4412_s1 + $0x158] sm:$0xff] (!%p138_p2)   ;;  %v3290_v16 = vld [vmem:[%s4412_s1 + $0x160] sm:$0xff] (!%p138_p2)   ;;  %v3294_v20 = vld [vmem:[%s4412_s1 + $0x168] sm:$0xff] (!%p138_p2)  }
   0xa   : > { %2944 = vmatprep.subr.bf16.mxu1 (!%p138_p2), %v3279_v5  ;;  %v3287_v13 = vld [vmem:[%s4412_s1 + $0x1d8] sm:$0xff] (!%p138_p2)   ;;  %v3291_v17 = vld [vmem:[%s4412_s1 + $0x1e0] sm:$0xff] (!%p138_p2)   ;;  %v3295_v21 = vld [vmem:[%s4412_s1 + $0x1e8] sm:$0xff] (!%p138_p2)  }
   0xb   : > { %v3288_v14 = vld [vmem:[%s4412_s1 + $0x118] sm:$0xff] (!%p138_p2)   ;;  %v3292_v18 = vld [vmem:[%s4412_s1 + $0x120] sm:$0xff] (!%p138_p2)   ;;  %v3296_v22 = vld [vmem:[%s4412_s1 + $0x128] sm:$0xff] (!%p138_p2)  }
   0xc   : > { %2899 = vmatpush3.bf16.msra.mxu0 (!%p138_p2), %v3280_v6  ;;  %v3289_v15 = vld [vmem:[%s4412_s1 + $0x198] sm:$0xff] (!%p138_p2)   ;;  %v3293_v19 = vld [vmem:[%s4412_s1 + $0x1a0] sm:$0xff] (!%p138_p2)   ;;  %v3297_v23 = vld [vmem:[%s4412_s1 + $0x1a8] sm:$0xff] (!%p138_p2)  }
   0xd   : > { %2945 = vmatpush3.bf16.msra.mxu1 %v3281_v7  ;;  %2900 = vmatprep.subr.bf16.mxu0 %v3282_v8  ;;  %s4416_s13 = smov (!%p161_p3, %s2481_s13), 1  ;;  %v3298_v24 = vld [vmem:[%s4412_s1 + $0x170] sm:$0xff]   ;;  %v3302_v28 = vld [vmem:[%s4412_s1 + $0x178] sm:$0xff]   ;;  %v3314_v52 = vld [vmem:[%s4412_s1 + $0x40] sm:$0xff]  }
   0xe   : > { %2946 = vmatprep.subr.bf16.mxu1 %v3283_v9  ;;  %v3299_v25 = vld [vmem:[%s4412_s1 + $0x1f0] sm:$0xff]   ;;  %s3264_s16 = smul.u32 176, %s4416_s13  ;;  %v3303_v29 = vld [vmem:[%s4412_s1 + $0x1f8] sm:$0xff]   ;;  %v3315_v61 = vld [vmem:[%s4412_s1 + $0xc0] sm:$0xff]  }
   0xf   : > { %v3300_v26 = vld [vmem:[%s4412_s1 + $0x130] sm:$0xff]   ;;  %v3304_v30 = vld [vmem:[%s4412_s1 + $0x138] sm:$0xff]   ;;  %v3316_v9 = vld [vmem:[%s4412_s1] sm:$0xff]   ;;  %s3265_s5 = smul.u32 36, %s4416_s13 }
  0x10   : > { %2901 = vmatpush3.bf16.msra.mxu0 %v3284_v10  ;;  %v3301_v27 = vld [vmem:[%s4412_s1 + $0x1b0] sm:$0xff]   ;;  %s3582_s27 = scalar_lea.vmem %s4411_s0, %s3264_s16  ;;  %v3305_v31 = vld [vmem:[%s4412_s1 + $0x1b8] sm:$0xff]  }
  0x11   : > { %2947 = vmatpush3.bf16.msra.mxu1 %v3285_v11  ;;  %2902 = vmatprep.subr.bf16.mxu0 %v3286_v12  ;;  %v173_v32 = vld [vmem:[%s3582_s27] sm:$0xff]  ;;  %v175_v33 = vld [vmem:[%s3582_s27 + $0x10] sm:$0xff]  ;;  %v174_v37 = vld [vmem:[%s3582_s27 + $0x8] sm:$0xff]  ;;  %s4387_s8 = scalar_lea.vmem %s4414_s3, %s3265_s5 }
  0x12   : > { %2948 = vmatprep.subr.bf16.mxu1 %v3287_v13  ;;  %v177_v34 = vld [vmem:[%s3582_s27 + $0x20] sm:$0xff]  ;;  %v3594_v35 = vld [vmem:[%s3582_s27 + $0x30] sm:$0xff]  ;;  %v3596_v36 = vcombine.high %v173_v32, %v175_v33  ;;  %v176_v38 = vld [vmem:[%s3582_s27 + $0x18] sm:$0xff]  ;;  %v3600_v39 = vcombine.low %v173_v32, %v175_v33 }
  0x13   : > { %v3602_v40 = vcombine.high %v175_v33, %v177_v34  ;;  %v3604_v41 = vcombine.low %v175_v33, %v177_v34  ;;  %v3607_v42 = vcombine.high %v177_v34, %v3594_v35  ;;  %v178_v43 = vld [vmem:[%s3582_s27 + $0x28] sm:$0xff]  ;;  %v3611_v44 = vld [vmem:[%s3582_s27 + $0x38] sm:$0xff]  ;;  %v3613_v45 = vcombine.high %v174_v37, %v176_v38 }
  0x14   : > { %2903 = vmatpush3.bf16.msra.mxu0 %v3288_v14  ;;  %v3616_v46 = vcombine.low %v177_v34, %v3594_v35  ;;  %v3618_v47 = vcombine.low %v174_v37, %v176_v38  ;;  %v418_v48 = vshrl.u32 %v3596_v36, 16  ;;  %v420_v49 = vshll.u32 %v3596_v36, 16  ;;  %v3318_v13 = vld [vmem:[%s4412_s1 + $0x48] sm:$0xff]   ;;  %v3683_v33 = vld [vmem:[%s3582_s27 + $0x58] sm:$0xff] }
  0x15   : > { %2949 = vmatpush3.bf16.msra.mxu1 %v3289_v15  ;;  %2904 = vmatprep.subr.bf16.mxu0 %v3290_v16  ;;  %v3623_v50 = vcombine.high %v178_v43, %v3611_v44  ;;  %v406_v51 = vshrl.u32 %v3600_v39, 16  ;;  %v425_v53 = vshll.u32 %v3607_v42, 16  ;;  %v442_v54 = vshrl.u32 %v3613_v45, 16 }
  0x16   : > { %2950 = vmatprep.subr.bf16.mxu1 %v3291_v17  ;;  %v444_v55 = vshll.u32 %v3613_v45, 16  ;;  %v408_v56 = vshll.u32 %v3600_v39, 16  ;;  %v422_v57 = vrot.slane %v420_v49, 1  ;;  %v413_v59 = vshll.u32 %v3616_v46, 16 }
  0x17   : > { %v449_v58 = vshll.u32 %v3623_v50, 16  ;;  %v3636_v60 = vcombine.low %v178_v43, %v3611_v44  ;;  %v427_v62 = vrot.slane %v425_v53, 1  ;;  %v430_v1 = vshrl.u32 %v3618_v47, 16 }
  0x18   : > { %2905 = vmatpush3.bf16.msra.mxu0 %v3292_v18  ;;  %v446_v63 = vrot.slane %v444_v55, 1  ;;  %v410_v0 = vrot.slane %v408_v56, 1  ;;  %v423_v2 = vor.u32 %v422_v57, %v418_v48  ;;  %v415_v4 = vrot.slane %v413_v59, 1  ;;  %v3317_v18 = vld [vmem:[%s4412_s1 + $0x80] sm:$0xff]   ;;  %v3328_v55 = vld [vmem:[%s4412_s1 + $0x10] sm:$0xff]  }
  0x19   : > { %2951 = vmatpush3.bf16.msra.mxu1 %v3293_v19  ;;  %2906 = vmatprep.subr.bf16.mxu0 %v3294_v20  ;;  %v451_v3 = vrot.slane %v449_v58, 1  ;;  %v432_v5 = vshll.u32 %v3618_v47, 16  ;;  %v437_v8 = vshll.u32 %v3636_v60, 16  ;;  %v3647_v10 = vcombine.high %v176_v38, %v178_v43  ;;  %v3319_v20 = vld [vmem:[%s4412_s1 + $0xc8] sm:$0xff]  }
  0x1a   : > { %2952 = vmatprep.subr.bf16.mxu1 %v3295_v21  ;;  %v447_v6 = vor.u32 %v446_v63, %v442_v54  ;;  %v411_v7 = vor.u32 %v410_v0, %v406_v51  ;;  %v428_v11 = vsel %vm404_vm0, %v423_v2, %v427_v62  ;;  %v3653_v14 = vcombine.low %v176_v38, %v178_v43  ;;  %v3326_v51 = vld [vmem:[%s4412_s1 + $0x50] sm:$0xff]   ;;  %v185_v2 = vld [vmem:[%s3582_s27 + $0x60] sm:$0xff] }
  0x1b   : > { %v434_v12 = vrot.slane %v432_v5, 1  ;;  %805 = vmatprep.mubr.bf16.mxu0 %v428_v11  ;;  %v439_v17 = vrot.slane %v437_v8, 1  ;;  %v461_v21 = vshrl.u32 %v3607_v42, 16  ;;  %v3327_v54 = vld [vmem:[%s4412_s1 + $0xd0] sm:$0xff]  }
  0x1c   : > { %2907 = vmatpush3.bf16.msra.mxu0 %v3296_v22  ;;  %v452_v15 = vsel %vm404_vm0, %v447_v6, %v451_v3  ;;  %v416_v16 = vsel %vm404_vm0, %v411_v7, %v415_v4  ;;  %v3320_v22 = vld [vmem:[%s4412_s1 + $0x8] sm:$0xff]   ;;  %v3729_v7 = vld [vmem:[%s3582_s27 + $0x78] sm:$0xff] }
  0x1d   : > { %2953 = vmatpush3.bf16.msra.mxu1 %v3297_v23  ;;  %2908 = vmatprep.subr.bf16.mxu0 %v3298_v24  ;;  %v435_v19 = vor.u32 %v434_v12, %v430_v1  ;;  %v477_v23 = vshrl.u32 %v3623_v50, 16  ;;  %v463_v32 = vor.u32 %v461_v21, %v427_v62  ;;  %v3329_v1 = vld [vmem:[%s4412_s1 + $0x90] sm:$0xff]   ;;  %v186_v6 = vld [vmem:[%s3582_s27 + $0x68] sm:$0xff] }
  0x1e   : > { %2954 = vmatprep.subr.bf16.mxu1 %v3299_v25  ;;  %877 = vmatprep.mubr.bf16.mxu1 %v452_v15  ;;  %v3321_v25 = vld [vmem:[%s4412_s1 + $0x88] sm:$0xff]  }
  0x1f   : > { %v440_v24 = vsel %vm404_vm0, %v435_v19, %v439_v17  ;;  %v479_v43 = vor.u32 %v477_v23, %v451_v3  ;;  %v3333_v19 = vld [vmem:[%s4412_s1 + $0xd8] sm:$0xff]  }
  0x20   : > { %2909 = vmatpush3.bf16.msra.mxu0 %v3300_v26  ;;  %v181_v26 = vld [vmem:[%s3582_s27 + $0x40] sm:$0xff] }
  0x21   : > { %2955 = vmatpush3.bf16.msra.mxu1 %v3301_v27  ;;  %2910 = vmatprep.subr.bf16.mxu0 %v3302_v28  ;;  %v3674_v27 = vld [vmem:[%s3582_s27 + $0x50] sm:$0xff]  ;;  %v182_v28 = vld [vmem:[%s3582_s27 + $0x48] sm:$0xff]  ;;  %v3689_v37 = vcombine.high %v3594_v35, %v181_v26  ;;  %v3712_v57 = vcombine.low %v3594_v35, %v181_v26 }
  0x22   : > { %2956 = vmatprep.subr.bf16.mxu1 %v3303_v29  ;;  %v453_v29 = vshrl.u32 %v3616_v46, 16  ;;  %v3686_v34 = vcombine.low %v181_v26, %v3674_v27  ;;  %v3692_v38 = vcombine.high %v182_v28, %v3683_v33  ;;  %v3695_v49 = vcombine.low %v182_v28, %v3683_v33 }
  0x23   : > { %v3709_v56 = vcombine.high %v3611_v44, %v182_v28  ;;  %v3717_v62 = vcombine.low %v3611_v44, %v182_v28  ;;  %v3732_v44 = vcombine.high %v3674_v27, %v185_v2  ;;  %v3336_v28 = vld [vmem:[%s4412_s1 + $0x18] sm:$0xff]  }
  0x24   : > { %2911 = vmatpush3.bf16.msra.mxu0 %v3304_v30  ;;  %v469_v30 = vshrl.u32 %v3636_v60, 16  ;;  %v455_v48 = vor.u32 %v453_v29, %v415_v4  ;;  %v457_v53 = vshll.u32 %v3686_v34, 16  ;;  %v481_v58 = vshll.u32 %v3692_v38, 16  ;;  %v3724_v4 = vld [vmem:[%s3582_s27 + $0x70] sm:$0xff]  ;;  %v3337_v29 = vld [vmem:[%s4412_s1 + $0x98] sm:$0xff]  }
  0x25   : > { %2957 = vmatpush3.bf16.msra.mxu1 %v3305_v31  ;;  %2988 = vmatprep.subr.bf16.mxu0 %v3314_v52  ;;  %v3680_v31 = vcombine.high %v181_v26, %v3674_v27  ;;  %v3737_v11 = vcombine.high %v185_v2, %v3724_v4  ;;  %v509_v12 = vshrl.u32 %v3692_v38, 16  ;;  %v485_v23 = vshrl.u32 %v3686_v34, 16 }
  0x26   : > { %3034 = vmatprep.subr.bf16.mxu1 %v3315_v61  ;;  %v471_v59 = vor.u32 %v469_v30, %v439_v17  ;;  %v473_v61 = vshll.u32 %v3695_v49, 16  ;;  %v459_v0 = vrot.slane %v457_v53, 1  ;;  %v483_v35 = vrot.slane %v481_v58, 1  ;;  %v3339_v58 = vld [vmem:[%s4412_s1 + $0xe0] sm:$0xff]  }
  0x27   : > { %806 = vmatmul.mubr.bf16.vlgmr.msra.gmra.mrb[0].mxu0 %v416_v16  ;;  %v465_v52 = vshll.u32 %v3680_v31, 16  ;;  %v493_v5 = vshrl.u32 %v3680_v31, 16  ;;  %v501_v26 = vshrl.u32 %v3695_v49, 16  ;;  %v3768_v30 = vcombine.high %v3683_v33, %v186_v6 }
  0x28   : > { %2989 = vmatpush3.bf16.msra.mxu0 %v3316_v9  ;;  %878 = vmatmul.mubr.bf16.vlgmr.msra.gmra.mrb[0].mxu1 %v440_v24  ;;  %v475_v3 = vrot.slane %v473_v61, 1  ;;  %v460_v9 = vsel %vm404_vm0, %v455_v48, %v459_v0  ;;  %v484_v15 = vsel %vm404_vm0, %v479_v43, %v483_v35  ;;  %v511_v21 = vor.u32 %v509_v12, %v483_v35  ;;  %v3794_v35 = vld [vmem:[%s3582_s27 + $0x80] sm:$0xff] }
  0x29   : > { %2990 = vmatprep.subr.bf16.mxu0 %v3318_v13  ;;  %3035 = vmatpush3.bf16.msra.mxu1 %v3317_v18  ;;  %v467_v63 = vrot.slane %v465_v52, 1  ;;  %v3332_v13 = vld [vmem:[%s4412_s1 + $0x58] sm:$0xff]   ;;  %v3746_v18 = vcombine.high %v186_v6, %v3729_v7  ;;  %v487_v43 = vor.u32 %v485_v23, %v459_v0 }
  0x2a   : > { %3036 = vmatprep.subr.bf16.mxu1 %v3319_v20  ;;  %v476_v16 = vsel %vm404_vm0, %v471_v59, %v475_v3  ;;  %885 = vmatprep.mubr.bf16.mxu1 %v484_v15  ;;  %v497_v20 = vshll.u32 %v3737_v11, 16  ;;  %v503_v53 = vor.u32 %v501_v26, %v475_v3  ;;  %v3782_v59 = vcombine.low %v3683_v33, %v186_v6  ;;  %v3341_v33 = vld [vmem:[%s4412_s1 + $0xa0] sm:$0xff]   ;;  %v3347_v26 = vld [vmem:[%s4412_s1 + $0xe8] sm:$0xff]  }
  0x2b   : > { %v468_v8 = vsel %vm404_vm0, %v463_v32, %v467_v63  ;;  %v495_v17 = vor.u32 %v493_v5, %v467_v63  ;;  %v513_v24 = vshll.u32 %v3746_v18, 16  ;;  %v3340_v63 = vld [vmem:[%s4412_s1 + $0x20] sm:$0xff]   ;;  %v525_v3 = vshrl.u32 %v3737_v11, 16 }
  0x2c   : > { %2991 = vmatpush3.bf16.msra.mxu0 %v3320_v22  ;;  %813 = vmatprep.mubr.bf16.mxu0 %v468_v8  ;;  %v3753_v22 = vcombine.low %v185_v2, %v3724_v4  ;;  %v499_v32 = vrot.slane %v497_v20, 1  ;;  %v3802_v8 = vld [vmem:[%s3582_s27 + $0x88] sm:$0xff]  ;;  %v541_v12 = vshrl.u32 %v3746_v18, 16 }
  0x2d   : > { %2992 = vmatprep.subr.bf16.mxu0 %v3326_v51  ;;  %3037 = vmatpush3.bf16.msra.mxu1 %v3321_v25  ;;  %v3758_v25 = vcombine.low %v186_v6, %v3729_v7  ;;  %v3772_v51 = vcombine.low %v3674_v27, %v185_v2  ;;  %v515_v52 = vrot.slane %v513_v24, 1  ;;  %v3799_v6 = vld [vmem:[%s3582_s27 + $0x90] sm:$0xff]  ;;  %v3346_v20 = vld [vmem:[%s4412_s1 + $0x68] sm:$0xff]  }
  0x2e   : > { %3038 = vmatprep.subr.bf16.mxu1 %v3327_v54  ;;  %v489_v48 = vshll.u32 %v3753_v22, 16  ;;  %v500_v27 = vsel %vm404_vm0, %v495_v17, %v499_v32 }
  0x2f   : > { %814 = vmatmul.mubr.bf16.gmra.mrb[4].mxu0 %v460_v9  ;;  %v505_v54 = vshll.u32 %v3758_v25, 16  ;;  %v516_v0 = vsel %vm404_vm0, %v511_v21, %v515_v52  ;;  %v3805_v9 = vld [vmem:[%s3582_s27 + $0x98] sm:$0xff]  ;;  %v533_v15 = vshrl.u32 %v3758_v25, 16  ;;  %v527_v21 = vor.u32 %v525_v3, %v499_v32 }
  0x30   : > { %2993 = vmatpush3.bf16.msra.mxu0 %v3328_v55  ;;  %886 = vmatmul.mubr.bf16.gmra.mrb[4].mxu1 %v476_v16  ;;  %v3338_v55 = vld [vmem:[%s4412_s1 + $0x60] sm:$0xff]   ;;  %v491_v61 = vrot.slane %v489_v48, 1  ;;  %v2569_v16 = vcombine.high %v3794_v35, %v3799_v6  ;;  %v2571_v17 = vcombine.high %v3802_v8, %v3805_v9  ;;  %v543_v23 = vor.u32 %v541_v12, %v515_v52  ;;  %v3349_v52 = vld [vmem:[%s4412_s1 + $0xa8] sm:$0xff]  }
  0x31   : > { %2994 = vmatprep.subr.bf16.mxu0 %v3332_v13  ;;  %3039 = vmatpush3.bf16.msra.mxu1 %v3329_v1  ;;  %v507_v1 = vrot.slane %v505_v54, 1  ;;  %v517_v13 = vshrl.u32 %v3753_v22, 16  ;;  %v2570_v24 = vcombine.low %v3802_v8, %v3805_v9  ;;  %v3850_v3 = vcombine.low %v3729_v7, %v3802_v8 }
  0x32   : > { %3040 = vmatprep.subr.bf16.mxu1 %v3333_v19  ;;  %821 = vmatprep.mubr.bf16.mxu0 %v500_v27  ;;  %v492_v2 = vsel %vm404_vm0, %v487_v43, %v491_v61  ;;  %v2568_v19 = vcombine.low %v3794_v35, %v3799_v6 }
  0x33   : > { %893 = vmatprep.mubr.bf16.mxu1 %v516_v0  ;;  %v508_v5 = vsel %vm404_vm0, %v503_v53, %v507_v1  ;;  %v519_v43 = vor.u32 %v517_v13, %v491_v61  ;;  %v3348_v53 = vld [vmem:[%s4412_s1 + $0x28] sm:$0xff]   ;;  %v535_v54 = vor.u32 %v533_v15, %v507_v1  ;;  %v537_v32 = vshll.u32 %v2570_v24, 16  ;;  %v3350_v61 = vld [vmem:[%s4412_s1 + $0x70] sm:$0xff]  }
  0x34   : > { %2995 = vmatpush3.bf16.msra.mxu0 %v3336_v28  ;;  %v529_v28 = vshll.u32 %v2569_v16, 16  ;;  %v521_v48 = vshll.u32 %v2568_v19, 16  ;;  %v3351_v1 = vld [vmem:[%s4412_s1 + $0xf0] sm:$0xff]   ;;  %v552_v15 = vshrl.u32 %v2569_v16, 16 }
  0x35   : > { %2996 = vmatprep.subr.bf16.mxu0 %v3338_v55  ;;  %3041 = vmatpush3.bf16.msra.mxu1 %v3337_v29  ;;  %v545_v29 = vshll.u32 %v2571_v17, 16  ;;  %v539_v0 = vrot.slane %v537_v32, 1 }
  0x36   : > { %3042 = vmatprep.subr.bf16.mxu1 %v3339_v58  ;;  %v531_v55 = vrot.slane %v529_v28, 1  ;;  %v523_v27 = vrot.slane %v521_v48, 1  ;;  %v555_v28 = vshrl.u32 %v2570_v24, 16  ;;  %v1383_v48 = vshll.u32 %v3602_v40, 16 }
  0x37   : > { %822 = vmatmul.mubr.bf16.gmra.mrb[8].mxu0 %v492_v2  ;;  %v547_v58 = vrot.slane %v545_v29, 1  ;;  %v3846_v2 = vcombine.low %v3724_v4, %v3794_v35  ;;  %v3354_v29 = vld [vmem:[%s4412_s1 + $0x78] sm:$0xff]   ;;  %v1388_v24 = vshll.u32 %v3689_v37, 16 }
  0x38   : > { %2997 = vmatpush3.bf16.msra.mxu0 %v3340_v63  ;;  %894 = vmatmul.mubr.bf16.gmra.mrb[8].mxu1 %v508_v5  ;;  %v3835_v63 = vcombine.high %v3724_v4, %v3794_v35  ;;  %v532_v5 = vsel %vm404_vm0, %v527_v21, %v531_v55  ;;  %v524_v13 = vsel %vm404_vm0, %v519_v43, %v523_v27  ;;  %v1381_v43 = vshrl.u32 %v3602_v40, 16 }
  0x39   : > { %3043 = vmatpush3.bf16.msra.mxu1 %v3341_v33  ;;  %2998 = vmatprep.subr.bf16.mxu0 %v3346_v20  ;;  %v3842_v33 = vcombine.high %v3729_v7, %v3802_v8  ;;  %v548_v12 = vsel %vm404_vm0, %v543_v23, %v547_v58  ;;  %v3352_v20 = vld [vmem:[%s4412_s1 + $0x30] sm:$0xff]   ;;  %v540_v4 = vsel %vm404_vm0, %v535_v54, %v539_v0  ;;  %v549_v23 = vshrl.u32 %v2568_v19, 16  ;;  %v3356_v19 = vld [vmem:[%s4412_s1 + $0x38] sm:$0xff]  }
  0x3a   : > { %3044 = vmatprep.subr.bf16.mxu1 %v3347_v26  ;;  %829 = vmatprep.mubr.bf16.mxu0 %v532_v5  ;;  %v558_v26 = vshrl.u32 %v2571_v17, 16  ;;  %v3353_v7 = vld [vmem:[%s4412_s1 + $0xb0] sm:$0xff]   ;;  %v554_v21 = vor.u32 %v552_v15, %v531_v55  ;;  %v3355_v17 = vld [vmem:[%s4412_s1 + $0xf8] sm:$0xff]   ;;  %v1385_v32 = vrot.slane %v1383_v48, 1  ;;  %v3358_v55 = vld [vmem:[%s4412_s1 + $0x240] sm:$0xff]   ;;  %v1407_v5 = vshll.u32 %v3647_v10, 16 }
  0x3b   : > { %901 = vmatprep.mubr.bf16.mxu1 %v548_v12  ;;  %v3357_v54 = vld [vmem:[%s4412_s1 + $0xb8] sm:$0xff]   ;;  %v1412_v12 = vshll.u32 %v3709_v56, 16 }
  0x3c   : > { %2999 = vmatpush3.bf16.msra.mxu0 %v3348_v53  ;;  %v560_v16 = vor.u32 %v558_v26, %v547_v58  ;;  %v551_v53 = vor.u32 %v549_v23, %v523_v27  ;;  %v1390_v58 = vrot.slane %v1388_v24, 1  ;;  %v1405_v27 = vshrl.u32 %v3647_v10, 16  ;;  %v3361_v26 = vld [vmem:[%s4412_s1 + $0x280] sm:$0xff]  }
  0x3d   : > { %3045 = vmatpush3.bf16.msra.mxu1 %v3349_v52  ;;  %3000 = vmatprep.subr.bf16.mxu0 %v3350_v61  ;;  %v557_v52 = vor.u32 %v555_v28, %v539_v0  ;;  %v3359_v61 = vld [vmem:[%s4412_s1 + $0x2c0] sm:$0xff]   ;;  %v1414_v15 = vrot.slane %v1412_v12, 1  ;;  %v1376_v23 = vshll.u32 %v3712_v57, 16  ;;  %v3363_v28 = vld [vmem:[%s4412_s1 + $0x2c8] sm:$0xff]   ;;  %v1395_v24 = vshll.u32 %v3653_v14, 16 }
  0x3e   : > { %3046 = vmatprep.subr.bf16.mxu1 %v3351_v1  ;;  %v1386_v1 = vor.u32 %v1385_v32, %v1381_v43 }
  0x3f   : > { %830 = vmatmul.mubr.bf16.gmra.mrb[12].mxu0 %v524_v13  ;;  %v1409_v13 = vrot.slane %v1407_v5, 1  ;;  %v1378_v43 = vrot.slane %v1376_v23, 1  ;;  %v1397_v32 = vrot.slane %v1395_v24, 1  ;;  %v3371_v5 = vld [vmem:[%s4412_s1 + $0x2d8] sm:$0xff]  }
  0x40   : > { %902 = vmatmul.mubr.bf16.gmra.mrb[12].mxu1 %v540_v4  ;;  %3001 = vmatpush3.bf16.msra.mxu0 %v3352_v20  ;;  %v3886_v0 = vsel %vm404_vm0, %v1386_v1, %v1390_v58  ;;  %v3360_v20 = vld [vmem:[%s4412_s1 + $0x200] sm:$0xff]  }
  0x41   : > { %837 = vmatprep.mubr.bf16.mxu0 %v554_v21  ;;  %3047 = vmatpush3.bf16.msra.mxu1 %v3353_v7  ;;  %v1410_v4 = vor.u32 %v1409_v13, %v1405_v27  ;;  %v1369_v7 = vshrl.u32 %v3604_v41, 16  ;;  %v1371_v21 = vshll.u32 %v3604_v41, 16  ;;  %v3370_v27 = vld [vmem:[%s4412_s1 + $0x258] sm:$0xff]  }
  0x42   : > { %909 = vmatprep.mubr.bf16.mxu1 %v560_v16  ;;  %3002 = vmatprep.subr.bf16.mxu0 %v3354_v29  ;;  %v3364_v29 = vld [vmem:[%s4412_s1 + $0x208] sm:$0xff]  }
  0x43   : > { %3048 = vmatprep.subr.bf16.mxu1 %v3355_v17  ;;  %v1373_v16 = vrot.slane %v1371_v21, 1  ;;  %v3365_v17 = vld [vmem:[%s4412_s1 + $0x288] sm:$0xff]  }
  0x44   : > { %3003 = vmatpush3.bf16.msra.mxu0 %v3356_v19  ;;  %v1393_v19 = vshrl.u32 %v3653_v14, 16 }
  0x45   : > { %3049 = vmatpush3.bf16.msra.mxu1 %v3357_v54  ;;  %3080 = vmatprep.subr.bf16.mxu0 %v3358_v55  ;;  %v1374_v48 = vor.u32 %v1373_v16, %v1369_v7  ;;  %v1400_v54 = vshll.u32 %v3717_v62, 16  ;;  %v3373_v7 = vld [vmem:[%s4412_s1 + $0x298] sm:$0xff]   ;;  %v1420_v16 = vshll.u32 %v3772_v51, 16 }
  0x46   : > { %3126 = vmatprep.subr.bf16.mxu1 %v3359_v61  ;;  %v3369_v61 = vld [vmem:[%s4412_s1 + $0x290] sm:$0xff]   ;;  %v1398_v1 = vor.u32 %v1397_v32, %v1393_v19  ;;  %v1456_v32 = vshrl.u32 %v3732_v44, 16 }
  0x47   : > { %838 = vmatmul.mubr.bf16.gmra.mrb[16].mxu0 %v551_v53  ;;  %v3366_v53 = vld [vmem:[%s4412_s1 + $0x250] sm:$0xff]   ;;  %v1402_v55 = vrot.slane %v1400_v54, 1  ;;  %v1422_v19 = vrot.slane %v1420_v16, 1  ;;  %v3380_v54 = vld [vmem:[%s4412_s1 + $0x228] sm:$0xff]  }
  0x48   : > { %910 = vmatmul.mubr.bf16.gmra.mrb[16].mxu1 %v557_v52  ;;  %1165 = vmatprep.mubr.bf16.mxu0 %v3596_v36  ;;  %v3362_v36 = vld [vmem:[%s4412_s1 + $0x248] sm:$0xff]   ;;  %v3368_v52 = vld [vmem:[%s4412_s1 + $0x210] sm:$0xff]  }
  0x49   : > { %1237 = vmatprep.mubr.bf16.mxu1 %v3613_v45  ;;  %v3903_v45 = vsel %vm404_vm0, %v1410_v4, %v1414_v15  ;;  %v3946_v12 = vsel %vm404_vm0, %v1398_v1, %v1402_v55  ;;  %v3372_v4 = vld [vmem:[%s4412_s1 + $0x218] sm:$0xff]   ;;  %v1460_v1 = vshll.u32 %v3835_v63, 16 }
  0x4f   : > { %1166 = vmatmul.mubr.bf16.vlgmr.msra.gmra.mrb[20].mxu0 %v3600_v39  ;;  %v3923_v39 = vsel %vm404_vm0, %v1374_v48, %v1378_v43  ;;  %v3378_v48 = vld [vmem:[%s4412_s1 + $0x268] sm:$0xff]  }
  0x50   : > { %1238 = vmatmul.mubr.bf16.vlgmr.msra.gmra.mrb[20].mxu1 %v3618_v47  ;;  %3081 = vmatpush3.bf16.msra.mxu0 %v3360_v20  ;;  %v3367_v47 = vld [vmem:[%s4412_s1 + $0x2d0] sm:$0xff]   ;;  %v1440_v20 = vshrl.u32 %v3709_v56, 16 }
  0x51   : > { %3127 = vmatpush3.bf16.msra.mxu1 %v3361_v26  ;;  %3082 = vmatprep.subr.bf16.mxu0 %v3362_v36  ;;  %v1444_v36 = vshll.u32 %v3768_v30, 16 }
  0x52   : > { %3128 = vmatprep.subr.bf16.mxu1 %v3363_v28  ;;  %1173 = vmatprep.mubr.bf16.mxu0 %v3607_v42  ;;  %v1424_v42 = vshrl.u32 %v3689_v37, 16  ;;  %v1442_v21 = vor.u32 %v1440_v20, %v1414_v15  ;;  %v3375_v15 = vld [vmem:[%s4412_s1 + $0x2e0] sm:$0xff]   ;;  %v2607_v20 = vcombine.high %v3802_v8, %v3802_v8 }
  0x53   : > { %1245 = vmatprep.mubr.bf16.mxu1 %v3623_v50  ;;  %v1428_v50 = vshll.u32 %v3732_v44, 16  ;;  %v1446_v23 = vrot.slane %v1444_v36, 1 }
  0x54   : > { %3083 = vmatpush3.bf16.msra.mxu0 %v3364_v29  ;;  %v1426_v13 = vor.u32 %v1424_v42, %v1390_v58  ;;  %v3377_v29 = vld [vmem:[%s4412_s1 + $0x2a0] sm:$0xff]  }
  0x55   : > { %3129 = vmatpush3.bf16.msra.mxu1 %v3365_v17  ;;  %3084 = vmatprep.subr.bf16.mxu0 %v3366_v53  ;;  %v1430_v26 = vrot.slane %v1428_v50, 1  ;;  %v1432_v17 = vshrl.u32 %v3717_v62, 16  ;;  %v1436_v53 = vshll.u32 %v3782_v59, 16  ;;  %v2605_v50 = vcombine.high %v3794_v35, %v3794_v35 }
  0x56   : > { %3130 = vmatprep.subr.bf16.mxu1 %v3367_v47 }
  0x57   : > { %1174 = vmatmul.mubr.bf16.gmra.mrb[24].mxu0 %v3616_v46  ;;  %v3374_v46 = vld [vmem:[%s4412_s1 + $0x260] sm:$0xff]   ;;  %v3963_v58 = vsel %vm404_vm0, %v1426_v13, %v1430_v26  ;;  %v1434_v24 = vor.u32 %v1432_v17, %v1402_v55  ;;  %v1438_v55 = vrot.slane %v1436_v53, 1  ;;  %v1476_v13 = vshll.u32 %v3842_v33, 16 }
  0x58   : > { %1246 = vmatmul.mubr.bf16.gmra.mrb[24].mxu1 %v3636_v60  ;;  %3085 = vmatpush3.bf16.msra.mxu0 %v3368_v52  ;;  %v1416_v60 = vshrl.u32 %v3712_v57, 16  ;;  %v3381_v52 = vld [vmem:[%s4412_s1 + $0x2a8] sm:$0xff]   ;;  %v1468_v17 = vshll.u32 %v3850_v3, 16 }
  0x59   : > { %3131 = vmatpush3.bf16.msra.mxu1 %v3369_v61  ;;  %1181 = vmatprep.mubr.bf16.mxu0 %v3680_v31  ;;  %v3376_v31 = vld [vmem:[%s4412_s1 + $0x220] sm:$0xff]   ;;  %v1458_v61 = vor.u32 %v1456_v32, %v1430_v26  ;;  %v4010_v42 = vsel %vm404_vm0, %v1434_v24, %v1438_v55  ;;  %v4034_v36 = vrot.slane %v1476_v13, 1  ;;  %v2606_v24 = vcombine.low %v3802_v8, %v3802_v8 }
  0x5a   : > { %1253 = vmatprep.mubr.bf16.mxu1 %v3692_v38  ;;  %3086 = vmatprep.subr.bf16.mxu0 %v3370_v27  ;;  %v1418_v28 = vor.u32 %v1416_v60, %v1378_v43  ;;  %v3978_v38 = vsel %vm404_vm0, %v1442_v21, %v1446_v23  ;;  %v3379_v43 = vld [vmem:[%s4412_s1 + $0x2e8] sm:$0xff]   ;;  %v1472_v27 = vshrl.u32 %v3768_v30, 16  ;;  %v3390_v21 = vld [vmem:[%s4412_s1 + $0x278] sm:$0xff]   ;;  %v4070_v53 = vrot.slane %v1468_v17, 1  ;;  %v3404_v32 = vld [vmem:[%s4412_s1 + $0x300] sm:$0xff]  }
  0x5b   : > { %3132 = vmatprep.subr.bf16.mxu1 %v3371_v5  ;;  %v1959_v8 = vrot.slane %v3689_v37, 1  ;;  %v3406_v37 = vld [vmem:[%s4412_s1 + $0x348] sm:$0xff]  }
  0x5c   : > { %3087 = vmatpush3.bf16.msra.mxu0 %v3372_v4  ;;  %v3993_v47 = vsel %vm404_vm0, %v1418_v28, %v1422_v19  ;;  %v1474_v5 = vor.u32 %v1472_v27, %v1446_v23  ;;  %v3387_v4 = vld [vmem:[%s4412_s1 + $0x2b0] sm:$0xff]   ;;  %v3392_v23 = vld [vmem:[%s4412_s1 + $0x238] sm:$0xff]   ;;  %v1962_v27 = vrot.slane %v3717_v62, 1 }
  0x5d   : > { %3133 = vmatpush3.bf16.msra.mxu1 %v3373_v7  ;;  %3088 = vmatprep.subr.bf16.mxu0 %v3374_v46  ;;  %v1448_v7 = vshrl.u32 %v3772_v51, 16  ;;  %v3391_v46 = vld [vmem:[%s4412_s1 + $0x2f8] sm:$0xff]  }
  0x5e   : > { %3134 = vmatprep.subr.bf16.mxu1 %v3375_v15  ;;  %v1452_v15 = vshll.u32 %v3846_v2, 16  ;;  %v3393_v28 = vld [vmem:[%s4412_s1 + $0x2b8] sm:$0xff]  }
  0x5f   : > { %1182 = vmatmul.mubr.bf16.gmra.mrb[28].mxu0 %v3686_v34  ;;  %v3382_v34 = vld [vmem:[%s4412_s1 + $0x270] sm:$0xff]   ;;  %v1450_v60 = vor.u32 %v1448_v7, %v1422_v19  ;;  %v3403_v19 = vld [vmem:[%s4412_s1 + $0x3c0] sm:$0xff]  }
  0x60   : > { %1254 = vmatmul.mubr.bf16.gmra.mrb[28].mxu1 %v3695_v49  ;;  %3089 = vmatpush3.bf16.msra.mxu0 %v3376_v31  ;;  %v3383_v49 = vld [vmem:[%s4412_s1 + $0x2f0] sm:$0xff]   ;;  %v4047_v31 = vsel %vm404_vm0, %v1474_v5, %v4034_v36  ;;  %v4053_v16 = vrot.slane %v1452_v15, 1 }
  0x61   : > { %3135 = vmatpush3.bf16.msra.mxu1 %v3377_v29  ;;  %1189 = vmatprep.mubr.bf16.mxu0 %v3737_v11  ;;  %v4013_v11 = vrot.slane %v1460_v1, 1  ;;  %v3408_v1 = vld [vmem:[%s4412_s1 + $0x308] sm:$0xff]   ;;  %v3415_v5 = vld [vmem:[%s4412_s1 + $0x3d0] sm:$0xff]  }
  0x62   : > { %1261 = vmatprep.mubr.bf16.mxu1 %v3746_v18  ;;  %3090 = vmatprep.subr.bf16.mxu0 %v3378_v48  ;;  %v3386_v18 = vld [vmem:[%s4412_s1 + $0x230] sm:$0xff]   ;;  %v2604_v48 = vcombine.low %v3794_v35, %v3794_v35 }
  0x63   : > { %3136 = vmatprep.subr.bf16.mxu1 %v3379_v43  ;;  %v4028_v26 = vsel %vm404_vm0, %v1458_v61, %v4013_v11  ;;  %v4066_v43 = vsel %vm404_vm0, %v1450_v60, %v4053_v16  ;;  %v1956_v61 = vrot.slane %v3712_v57, 1  ;;  %v3417_v7 = vld [vmem:[%s4412_s1 + $0x390] sm:$0xff]   ;;  %v1504_v60 = vshrl.u32 %v3842_v33, 16 }
  0x64   : > { %3091 = vmatpush3.bf16.msra.mxu0 %v3380_v54  ;;  %v1958_v54 = vrot.slane %v3602_v40, 1  ;;  %v1965_v40 = vrot.slane %v3709_v56, 1  ;;  %v1961_v56 = vrot.slane %v3653_v14, 1  ;;  %v3414_v14 = vld [vmem:[%s4412_s1 + $0x350] sm:$0xff]   ;;  %v1975_v57 = vrot.slane %v3846_v2, 1 }
  0x65   : > { %3137 = vmatpush3.bf16.msra.mxu1 %v3381_v52  ;;  %3092 = vmatprep.subr.bf16.mxu0 %v3382_v34  ;;  %v1964_v52 = vrot.slane %v3647_v10, 1  ;;  %v3407_v10 = vld [vmem:[%s4412_s1 + $0x3c8] sm:$0xff]  }
  0x66   : > { %3138 = vmatprep.subr.bf16.mxu1 %v3383_v49  ;;  %v4133_v13 = vsel %vm1954_vm1, %v1961_v56, %v1962_v27 }
  0x67   : > { %1190 = vmatmul.mubr.bf16.gmra.mrb[32].mxu0 %v3753_v22  ;;  %v1464_v22 = vshrl.u32 %v3782_v59, 16  ;;  %v4099_v34 = vsel %vm1954_vm1, %v1964_v52, %v1965_v40 }
  0x68   : > { %1262 = vmatmul.mubr.bf16.gmra.mrb[32].mxu1 %v3758_v25  ;;  %1197 = vmatprep.mubr.bf16.mxu0 %v2605_v50  ;;  %v3402_v25 = vld [vmem:[%s4412_s1 + $0x340] sm:$0xff]  }
  0x69   : > { %1269 = vmatprep.mubr.bf16.mxu1 %v2607_v20  ;;  %3093 = vmatpush3.bf16.msra.mxu0 %v3386_v18  ;;  %v1466_v29 = vor.u32 %v1464_v22, %v1438_v55  ;;  %v3405_v55 = vld [vmem:[%s4412_s1 + $0x380] sm:$0xff]   ;;  %v194_v18 = vld [vmem:[%s3582_s27 + $0xa8] sm:$0x11]  ;;  %v1973_v20 = vrot.slane %v3768_v30, 1  ;;  %v3424_v22 = vld [vmem:[%s4412_s1 + $0x318] sm:$0xff]  }
  0x6a   : > { %3139 = vmatpush3.bf16.msra.mxu1 %v3387_v4  ;;  %3094 = vmatprep.subr.bf16.mxu0 %v3390_v21  ;;  %v193_v50 = vld [vmem:[%s3582_s27 + $0xa0] sm:$0x11]  ;;  %v1488_v21 = vshrl.u32 %v3835_v63, 16  ;;  %v4178_v17 = vcombine.low %v3805_v9, %v194_v18 }
  0x6b   : > { %3140 = vmatprep.subr.bf16.mxu1 %v3391_v46  ;;  %v4074_v35 = vsel %vm404_vm0, %v1466_v29, %v4070_v53  ;;  %v4151_v30 = vsel %vm1954_vm1, %v1965_v40, %v1973_v20  ;;  %v3421_v46 = vld [vmem:[%s4412_s1 + $0x3d8] sm:$0xff]   ;;  %v4161_v15 = vcombine.low %v3799_v6, %v193_v50 }
  0x6c   : > { %v1500_v52 = vshll.u32 %v4178_v17, 16 }
  0x6d   : > { %3095 = vmatpush3.bf16.msra.mxu0 %v3392_v23  ;;  %v1480_v23 = vshrl.u32 %v3846_v2, 16 }
  0x6e   : > { %3141 = vmatpush3.bf16.msra.mxu1 %v3393_v28  ;;  %3172 = vmatprep.subr.bf16.mxu0 %v3402_v25  ;;  %v3425_v25 = vld [vmem:[%s4412_s1 + $0x398] sm:$0xff]  }
  0x6f   : > { %1198 = vmatmul.mubr.bf16.gmra.mrb[36].mxu0 %v2604_v48  ;;  %3218 = vmatprep.subr.bf16.mxu1 %v3403_v19  ;;  %v1496_v48 = vshrl.u32 %v3850_v3, 16  ;;  %v1484_v19 = vshll.u32 %v4161_v15, 16 }
  0x70   : > { %1270 = vmatmul.mubr.bf16.gmra.mrb[36].mxu1 %v2606_v24  ;;  %1768 = vmatprep.mubr.bf16.mxu0 %v3886_v0  ;;  %v4088_v0 = vsel %vm1954_vm1, %v1958_v54, %v1959_v8  ;;  %v1967_v54 = vrot.slane %v3772_v51, 1  ;;  %v3429_v51 = vld [vmem:[%s4412_s1 + $0x3a0] sm:$0xff]  }
  0x71   : > { %1840 = vmatprep.mubr.bf16.mxu1 %v3903_v45  ;;  %v1955_v45 = vrot.slane %v3604_v41, 1  ;;  %v3409_v41 = vld [vmem:[%s4412_s1 + $0x388] sm:$0xff]  }
  0x73   : > { %v4113_v49 = vsel %vm1954_vm1, %v1955_v45, %v1956_v61 }
  0x77   : > { %1769 = vmatmul.mubr.bf16.vlgmr.msra.gmra.mrb[40].mxu0 %v3923_v39  ;;  %v1969_v39 = vrot.slane %v3732_v44, 1  ;;  %v3416_v44 = vld [vmem:[%s4412_s1 + $0x310] sm:$0xff]  }
  0x78   : > { %1841 = vmatmul.mubr.bf16.vlgmr.msra.gmra.mrb[40].mxu1 %v3946_v12  ;;  %3173 = vmatpush3.bf16.msra.mxu0 %v3404_v32  ;;  %v4128_v12 = vcombine.high %v3799_v6, %v193_v50  ;;  %v3426_v6 = vld [vmem:[%s4412_s1 + $0x360] sm:$0xff]   ;;  %v1971_v32 = vrot.slane %v3782_v59, 1 }
  0x79   : > { %3219 = vmatpush3.bf16.msra.mxu1 %v3405_v55  ;;  %3174 = vmatprep.subr.bf16.mxu0 %v3406_v37  ;;  %v4144_v4 = vsel %vm1954_vm1, %v1959_v8, %v1969_v39  ;;  %v1977_v55 = vrot.slane %v3835_v63, 1  ;;  %v3434_v37 = vld [vmem:[%s4412_s1 + $0x368] sm:$0xff]  }
  0x7a   : > { %3220 = vmatprep.subr.bf16.mxu1 %v3407_v10  ;;  %1776 = vmatprep.mubr.bf16.mxu0 %v3963_v58  ;;  %v4141_v58 = vcombine.high %v3805_v9, %v194_v18  ;;  %v1492_v28 = vshll.u32 %v4128_v12, 16  ;;  %v1490_v9 = vor.u32 %v1488_v21, %v4013_v11  ;;  %v4207_v59 = vsel %vm1954_vm1, %v1962_v27, %v1971_v32  ;;  %v3435_v10 = vld [vmem:[%s4412_s1 + $0x3e8] sm:$0xff]   ;;  %v3440_v21 = vld [vmem:[%s4412_s1 + $0x330] sm:$0xff]  }
  0x7b   : > { %1848 = vmatprep.mubr.bf16.mxu1 %v3978_v38  ;;  %v3420_v38 = vld [vmem:[%s4412_s1 + $0x358] sm:$0xff]   ;;  %v1981_v11 = vrot.slane %v3842_v33, 1  ;;  %v1978_v62 = vsel %vm1954_vm1, %v1969_v39, %v1977_v55  ;;  %v3436_v27 = vld [vmem:[%s4412_s1 + $0x328] sm:$0xff]   ;;  %v1515_v50 = vshrl.u32 %v4128_v12, 16  ;;  %v1498_v18 = vor.u32 %v1496_v48, %v4070_v53 }
  0x7c   : > { %3175 = vmatpush3.bf16.msra.mxu0 %v3408_v1  ;;  %v1508_v29 = vshll.u32 %v4141_v58, 16  ;;  %v1494_v24 = vrot.slane %v1492_v28, 1  ;;  %v4230_v1 = vsel %vm1954_vm1, %v1967_v54, %v1975_v57  ;;  %v3437_v39 = vld [vmem:[%s4412_s1 + $0x3a8] sm:$0xff]   ;;  %v3444_v28 = vld [vmem:[%s4412_s1 + $0x338] sm:$0xff]   ;;  %v1985_v48 = vrot.slane %v4128_v12, 1 }
  0x7d   : > { %3221 = vmatpush3.bf16.msra.mxu1 %v3409_v41  ;;  %3176 = vmatprep.subr.bf16.mxu0 %v3414_v14  ;;  %v1486_v41 = vrot.slane %v1484_v19, 1  ;;  %v1502_v14 = vrot.slane %v1500_v52, 1  ;;  %v1987_v12 = vrot.slane %v4178_v17, 1 }
  0x7e   : > { %3222 = vmatprep.subr.bf16.mxu1 %v3415_v5  ;;  %v1510_v8 = vrot.slane %v1508_v29, 1  ;;  %v1495_v40 = vsel %vm404_vm0, %v1490_v9, %v1494_v24  ;;  %v3439_v5 = vld [vmem:[%s4412_s1 + $0x3f0] sm:$0xff]  }
  0x7f   : > { %1777 = vmatmul.mubr.bf16.gmra.mrb[44].mxu0 %v3993_v47  ;;  %v3427_v47 = vld [vmem:[%s4412_s1 + $0x3e0] sm:$0xff]  }
  0x80   : > { %1849 = vmatmul.mubr.bf16.gmra.mrb[44].mxu1 %v4010_v42  ;;  %3177 = vmatpush3.bf16.msra.mxu0 %v3416_v44  ;;  %v3428_v42 = vld [vmem:[%s4412_s1 + $0x320] sm:$0xff]   ;;  %v1503_v44 = vsel %vm404_vm0, %v1498_v18, %v1502_v14 }
  0x81   : > { %3223 = vmatpush3.bf16.msra.mxu1 %v3417_v7  ;;  %1784 = vmatprep.mubr.bf16.mxu0 %v4028_v26  ;;  %v1506_v26 = vor.u32 %v1504_v60, %v4034_v36  ;;  %v1979_v36 = vrot.slane %v3850_v3, 1  ;;  %v1512_v60 = vshrl.u32 %v4161_v15, 16 }
  0x82   : > { %1856 = vmatprep.mubr.bf16.mxu1 %v4047_v31  ;;  %3178 = vmatprep.subr.bf16.mxu0 %v3420_v38  ;;  %v4198_v31 = vsel %vm1954_vm1, %v1956_v61, %v1967_v54  ;;  %v1982_v61 = vsel %vm1954_vm1, %v1973_v20, %v1981_v11  ;;  %v1517_v20 = vor.u32 %v1515_v50, %v1494_v24  ;;  %v3441_v38 = vld [vmem:[%s4412_s1 + $0x3b0] sm:$0xff]  }
  0x83   : > { %3224 = vmatprep.subr.bf16.mxu1 %v3421_v46  ;;  %v1511_v45 = vsel %vm404_vm0, %v1506_v26, %v1510_v8  ;;  %v4235_v56 = vsel %vm1954_vm1, %v1971_v32, %v1979_v36  ;;  %v3442_v46 = vld [vmem:[%s4412_s1 + $0x378] sm:$0xff]   ;;  %v1514_v29 = vor.u32 %v1512_v60, %v1486_v41  ;;  %v1988_v33 = vsel %vm1954_vm1, %v1979_v36, %v1987_v12 }
  0x84   : > { %3179 = vmatpush3.bf16.msra.mxu0 %v3424_v22  ;;  %v1518_v22 = vshrl.u32 %v4178_v17, 16 }
  0x85   : > { %3225 = vmatpush3.bf16.msra.mxu1 %v3425_v25  ;;  %3180 = vmatprep.subr.bf16.mxu0 %v3426_v6  ;;  %v3445_v25 = vld [vmem:[%s4412_s1 + $0x3b8] sm:$0xff]  }
  0x86   : > { %3226 = vmatprep.subr.bf16.mxu1 %v3427_v47  ;;  %v1520_v6 = vor.u32 %v1518_v22, %v1502_v14 }
  0x87   : > { %1785 = vmatmul.mubr.bf16.gmra.mrb[48].mxu0 %v4066_v43  ;;  %v1482_v43 = vor.u32 %v1480_v23, %v4053_v16  ;;  %v3438_v16 = vld [vmem:[%s4412_s1 + $0x370] sm:$0xff]   ;;  %v3443_v23 = vld [vmem:[%s4412_s1 + $0x3f8] sm:$0xff]  }
  0x88   : > { %1857 = vmatmul.mubr.bf16.gmra.mrb[48].mxu1 %v4074_v35  ;;  %3181 = vmatpush3.bf16.msra.mxu0 %v3428_v42  ;;  %v1521_v35 = vshrl.u32 %v4141_v58, 16 }
  0x89   : > { %3227 = vmatpush3.bf16.msra.mxu1 %v3429_v51  ;;  %1792 = vmatprep.mubr.bf16.mxu0 %v1495_v40  ;;  %v1487_v53 = vsel %vm404_vm0, %v1482_v43, %v1486_v41 }
  0x8a   : > { %1864 = vmatprep.mubr.bf16.mxu1 %v1511_v45  ;;  %3182 = vmatprep.subr.bf16.mxu0 %v3434_v37  ;;  %v1523_v7 = vor.u32 %v1521_v35, %v1510_v8 }
  0x8b   : > { %3228 = vmatprep.subr.bf16.mxu1 %v3435_v10 }
  0x8c   : > { %3183 = vmatpush3.bf16.msra.mxu0 %v3436_v27 }
  0x8d   : > { %3229 = vmatpush3.bf16.msra.mxu1 %v3437_v39  ;;  %3184 = vmatprep.subr.bf16.mxu0 %v3438_v16 }
  0x8e   : > { %3230 = vmatprep.subr.bf16.mxu1 %v3439_v5 }
  0x8f   : > { %1793 = vmatmul.mubr.bf16.gmra.mrb[52].mxu0 %v1487_v53 }
  0x90   : > { %1865 = vmatmul.mubr.bf16.gmra.mrb[52].mxu1 %v1503_v44  ;;  %1800 = vmatprep.mubr.bf16.mxu0 %v1517_v20 }
  0x91   : > { %1872 = vmatprep.mubr.bf16.mxu1 %v1523_v7  ;;  %3185 = vmatpush3.bf16.msra.mxu0 %v3440_v21 }
  0x92   : > { %3231 = vmatpush3.bf16.msra.mxu1 %v3441_v38  ;;  %3186 = vmatprep.subr.bf16.mxu0 %v3442_v46 }
  0x93   : > { %3232 = vmatprep.subr.bf16.mxu1 %v3443_v23 }
  0x95   : > { %3187 = vmatpush3.bf16.msra.mxu0 %v3444_v28 }
  0x96   : > { %3233 = vmatpush3.bf16.msra.mxu1 %v3445_v25 }
  0x97   : > { %1801 = vmatmul.mubr.bf16.gmra.mrb[56].mxu0 %v1514_v29 }
  0x98   : > { %1873 = vmatmul.mubr.bf16.gmra.mrb[56].mxu1 %v1520_v6  ;;  %2235 = vmatprep.mubr.bf16.mxu0 %v4088_v0  ;;  %v1989_v0 = vrot.slane %v4141_v58, 1 }
  0x99   : > { %2307 = vmatprep.mubr.bf16.mxu1 %v4099_v34  ;;  %v1986_v34 = vsel %vm1954_vm1, %v1977_v55, %v1985_v48 }
  0x9f   : > { %2236 = vmatmul.mubr.bf16.vlgmr.msra.gmra.mrb[60].mxu0 %v4113_v49  ;;  %v1990_v49 = vsel %vm1954_vm1, %v1981_v11, %v1989_v0 }
  0xa0   : > { %2308 = vmatmul.mubr.bf16.vlgmr.msra.gmra.mrb[60].mxu1 %v4133_v13  ;;  %2243 = vmatprep.mubr.bf16.mxu0 %v4144_v4  ;;  %v1983_v13 = vrot.slane %v4161_v15, 1 }
  0xa1   : > { %2315 = vmatprep.mubr.bf16.mxu1 %v4151_v30 }
  0xa2   : > { %v1984_v63 = vsel %vm1954_vm1, %v1975_v57, %v1983_v13 }
  0xa7   : > { %2244 = vmatmul.mubr.bf16.gmra.mrb[64].mxu0 %v4198_v31 }
  0xa8   : > { %2316 = vmatmul.mubr.bf16.gmra.mrb[64].mxu1 %v4207_v59  ;;  %2251 = vmatprep.mubr.bf16.mxu0 %v1978_v62 }
  0xa9   : > { %2323 = vmatprep.mubr.bf16.mxu1 %v1982_v61 }
  0xaf   : > { %2252 = vmatmul.mubr.bf16.gmra.mrb[68].mxu0 %v4230_v1 }
  0xb0   : > { %2324 = vmatmul.mubr.bf16.gmra.mrb[68].mxu1 %v4235_v56  ;;  %2259 = vmatprep.mubr.bf16.mxu0 %v1986_v34 }
  0xb1   : > { %2331 = vmatprep.mubr.bf16.mxu1 %v1990_v49 }
  0xb7   : > { %2260 = vmatmul.mubr.bf16.gmra.mrb[72].mxu0 %v1984_v63 }
  0xb8   : > { %2332 = vmatmul.mubr.bf16.gmra.mrb[72].mxu1 %v1988_v33  ;;  %2267 = vmatprep.mubr.bf16.mxu0 %v1985_v48 }
  0xb9   : > { %2339 = vmatprep.mubr.bf16.mxu1 %v1989_v0 }
  0xbf   : > { %2268 = vmatmul.mubr.bf16.gmra.mrb[76].mxu0 %v1983_v13 }
  0xc0   : > { %2340 = vmatmul.mubr.bf16.gmra.mrb[76].mxu1 %v1987_v12 }
  0xfa   : > { %v2912_v58 = vpop.f32.mrb[0].mxu0 }
  0xfb   : > { %v2913_v4 = vpop.f32.mrb[1].mxu0  ;;  %v2958_v47 = vpop.f32.mrb[0].mxu1 }
  0xfc   : > { %v2914_v30 = vadd.f32 %v2913_v4, %v2912_v58  ;;  %v2915_v15 = vpop.f32.mrb[2].mxu0  ;;  %v2959_v19 = vpop.f32.mrb[1].mxu1 }
  0xfd   : > { %v2916_v17 = vpop.f32.mrb[3].mxu0  ;;  %v2960_v42 = vadd.f32 %v2959_v19, %v2958_v47  ;;  %v2961_v9 = vpop.f32.mrb[2].mxu1 }
  0xfe   : > { %v2917_v2 = vadd.f32 %v2916_v17, %v2915_v15  ;;  %v2962_v24 = vpop.f32.mrb[3].mxu1 }
  0xff   : > { %v4302_v3 = vadd.f32 %v2960_v42, %v2914_v30  ;;  %v2963_v54 = vadd.f32 %v2962_v24, %v2961_v9 }
 0x101   : > { %v4304_v26 = vadd.f32 %v2963_v54, %v2917_v2 }
 0x102   : > { %v2918_v8 = vpop.f32.mrb[4].mxu0 }
 0x103   : > { %v2964_v32 = vpop.f32.mrb[4].mxu1  ;;  %v2919_v52 = vpop.f32.mrb[5].mxu0 }
 0x104   : > { %v2920_v31 = vadd.f32 %v2919_v52, %v2918_v8  ;;  %v2965_v55 = vpop.f32.mrb[5].mxu1  ;;  %v2921_v51 = vpop.f32.mrb[6].mxu0 }
 0x105   : > { %v2966_v59 = vadd.f32 %v2965_v55, %v2964_v32  ;;  %v2967_v11 = vpop.f32.mrb[6].mxu1  ;;  %v2922_v57 = vpop.f32.mrb[7].mxu0 }
 0x106   : > { %v2923_v36 = vadd.f32 %v2922_v57, %v2921_v51  ;;  %v2968_v40 = vpop.f32.mrb[7].mxu1 }
 0x107   : > { %v4306_v37 = vadd.f32 %v2966_v59, %v2920_v31  ;;  %v2969_v62 = vadd.f32 %v2968_v40, %v2967_v11 }
 0x109   : > { %v4308_v45 = vadd.f32 %v2969_v62, %v2923_v36 }
 0x10a   : > { %v2924_v10 = vpop.f32.mrb[8].mxu0 }
 0x10b   : > { %v2970_v61 = vpop.f32.mrb[8].mxu1  ;;  %v2925_v1 = vpop.f32.mrb[9].mxu0 }
 0x10c   : > { %v2926_v56 = vadd.f32 %v2925_v1, %v2924_v10  ;;  %v2971_v43 = vpop.f32.mrb[9].mxu1  ;;  %v2927_v41 = vpop.f32.mrb[10].mxu0 }
 0x10d   : > { %v2972_v27 = vadd.f32 %v2971_v43, %v2970_v61  ;;  %v2973_v50 = vpop.f32.mrb[10].mxu1  ;;  %v2928_v18 = vpop.f32.mrb[11].mxu0 }
 0x10e   : > { %v2929_v14 = vadd.f32 %v2928_v18, %v2927_v41  ;;  %v2974_v39 = vpop.f32.mrb[11].mxu1 }
 0x10f   : > { %v4310_v16 = vadd.f32 %v2972_v27, %v2926_v56  ;;  %v2975_v35 = vadd.f32 %v2974_v39, %v2973_v50 }
 0x111   : > { %v4312_v5 = vadd.f32 %v2975_v35, %v2929_v14 }
 0x112   : > { %v2930_v53 = vpop.f32.mrb[12].mxu0 }
 0x113   : > { %v2976_v20 = vpop.f32.mrb[12].mxu1  ;;  %v2931_v44 = vpop.f32.mrb[13].mxu0 }
 0x114   : > { %v2932_v7 = vadd.f32 %v2931_v44, %v2930_v53  ;;  %v2977_v21 = vpop.f32.mrb[13].mxu1  ;;  %v2933_v38 = vpop.f32.mrb[14].mxu0 }
 0x115   : > { %v2978_v46 = vadd.f32 %v2977_v21, %v2976_v20  ;;  %v2979_v60 = vpop.f32.mrb[14].mxu1  ;;  %v2934_v23 = vpop.f32.mrb[15].mxu0 }
 0x116   : > { %v2935_v22 = vadd.f32 %v2934_v23, %v2933_v38  ;;  %v2980_v28 = vpop.f32.mrb[15].mxu1 }
 0x117   : > { %v4314_v25 = vadd.f32 %v2978_v46, %v2932_v7  ;;  %v2981_v29 = vadd.f32 %v2980_v28, %v2979_v60 }
 0x119   : > { %v4316_v6 = vadd.f32 %v2981_v29, %v2935_v22 }
 0x11a   : > { %v2936_v48 = vpop.f32.mrb[16].mxu0 }
 0x11b   : > { %v2982_v0 = vpop.f32.mrb[16].mxu1  ;;  %v2937_v34 = vpop.f32.mrb[17].mxu0 }
 0x11c   : > { %v2938_v49 = vadd.f32 %v2937_v34, %v2936_v48  ;;  %v2983_v13 = vpop.f32.mrb[17].mxu1  ;;  %v2939_v12 = vpop.f32.mrb[18].mxu0 }
 0x11d   : > { %v2984_v63 = vadd.f32 %v2983_v13, %v2982_v0  ;;  %v2985_v33 = vpop.f32.mrb[18].mxu1  ;;  %v2940_v58 = vpop.f32.mrb[19].mxu0 }
 0x11e   : > { %v2986_v4 = vpop.f32.mrb[19].mxu1 }
 0x11f   : > { %v4318_v30 = vadd.f32 %v2984_v63, %v2938_v49 }
 0x122   : > { %v3004_v15 = vpop.f32.mrb[20].mxu0 }
 0x123   : > { %v3050_v47 = vpop.f32.mrb[20].mxu1  ;;  %v3005_v17 = vpop.f32.mrb[21].mxu0 }
 0x124   : > { %v3006_v19 = vadd.f32 %v3005_v17, %v3004_v15  ;;  %v3051_v2 = vpop.f32.mrb[21].mxu1  ;;  %v3007_v42 = vpop.f32.mrb[22].mxu0 }
 0x125   : > { %v3052_v9 = vadd.f32 %v3051_v2, %v3050_v47  ;;  %v3053_v24 = vpop.f32.mrb[22].mxu1  ;;  %v3008_v54 = vpop.f32.mrb[23].mxu0 }
 0x126   : > { %v1168_v8 = vadd.f32 %v3006_v19, %v4302_v3  ;;  %v3009_v32 = vadd.f32 %v3008_v54, %v3007_v42  ;;  %v3054_v52 = vpop.f32.mrb[23].mxu1 }
 0x127   : > { %v3055_v31 = vadd.f32 %v3054_v52, %v3053_v24 }
 0x128   : > { %v4321_v55 = vadd.f32 %v3052_v9, %v1168_v8  ;;  %v1171_v51 = vadd.f32 %v3009_v32, %v4304_v26 }
 0x12a   : > { %v4324_v59 = vadd.f32 %v3055_v31, %v1171_v51  ;;  %v3010_v11 = vpop.f32.mrb[24].mxu0 }
 0x12b   : > { %v3056_v57 = vpop.f32.mrb[24].mxu1  ;;  %v3011_v36 = vpop.f32.mrb[25].mxu0 }
 0x12c   : > { %v3012_v40 = vadd.f32 %v3011_v36, %v3010_v11  ;;  %v3057_v62 = vpop.f32.mrb[25].mxu1  ;;  %v3013_v10 = vpop.f32.mrb[26].mxu0 }
 0x12d   : > { %v3058_v61 = vadd.f32 %v3057_v62, %v3056_v57  ;;  %v3059_v1 = vpop.f32.mrb[26].mxu1  ;;  %v3014_v56 = vpop.f32.mrb[27].mxu0 }
 0x12e   : > { %v1176_v3 = vadd.f32 %v3012_v40, %v4306_v37  ;;  %v3015_v43 = vadd.f32 %v3014_v56, %v3013_v10  ;;  %v3060_v41 = vpop.f32.mrb[27].mxu1 }
 0x12f   : > { %v3061_v27 = vadd.f32 %v3060_v41, %v3059_v1 }
 0x130   : > { %v4327_v50 = vadd.f32 %v3058_v61, %v1176_v3  ;;  %v1179_v26 = vadd.f32 %v3015_v43, %v4308_v45 }
 0x132   : > { %v4330_v18 = vadd.f32 %v3061_v27, %v1179_v26  ;;  %v3016_v14 = vpop.f32.mrb[28].mxu0 }
 0x133   : > { %v3062_v39 = vpop.f32.mrb[28].mxu1  ;;  %v3017_v35 = vpop.f32.mrb[29].mxu0 }
 0x134   : > { %v3018_v53 = vadd.f32 %v3017_v35, %v3016_v14  ;;  %v3063_v20 = vpop.f32.mrb[29].mxu1  ;;  %v3019_v44 = vpop.f32.mrb[30].mxu0 }
 0x135   : > { %v3064_v7 = vadd.f32 %v3063_v20, %v3062_v39  ;;  %v3065_v21 = vpop.f32.mrb[30].mxu1  ;;  %v3020_v38 = vpop.f32.mrb[31].mxu0 }
 0x136   : > { %v1184_v37 = vadd.f32 %v3018_v53, %v4310_v16  ;;  %v3021_v46 = vadd.f32 %v3020_v38, %v3019_v44  ;;  %v3066_v60 = vpop.f32.mrb[31].mxu1 }
 0x137   : > { %v3067_v23 = vadd.f32 %v3066_v60, %v3065_v21 }
 0x138   : > { %v4333_v22 = vadd.f32 %v3064_v7, %v1184_v37  ;;  %v1187_v45 = vadd.f32 %v3021_v46, %v4312_v5 }
 0x13a   : > { %v4336_v28 = vadd.f32 %v3067_v23, %v1187_v45  ;;  %v3022_v29 = vpop.f32.mrb[32].mxu0 }
 0x13b   : > { %v3068_v48 = vpop.f32.mrb[32].mxu1  ;;  %v3023_v0 = vpop.f32.mrb[33].mxu0 }
 0x13c   : > { %v3024_v34 = vadd.f32 %v3023_v0, %v3022_v29  ;;  %v3069_v49 = vpop.f32.mrb[33].mxu1  ;;  %v3025_v13 = vpop.f32.mrb[34].mxu0 }
 0x13d   : > { %v3070_v12 = vadd.f32 %v3069_v49, %v3068_v48  ;;  %v3071_v63 = vpop.f32.mrb[34].mxu1  ;;  %v3026_v33 = vpop.f32.mrb[35].mxu0 }
 0x13e   : > { %v1192_v16 = vadd.f32 %v3024_v34, %v4314_v25  ;;  %v3027_v58 = vadd.f32 %v3026_v33, %v3025_v13  ;;  %v3072_v4 = vpop.f32.mrb[35].mxu1 }
 0x13f   : > { %v3073_v15 = vadd.f32 %v3072_v4, %v3071_v63 }
 0x140   : > { %v4339_v47 = vadd.f32 %v3070_v12, %v1192_v16  ;;  %v1195_v5 = vadd.f32 %v3027_v58, %v4316_v6 }
 0x142   : > { %v4342_v17 = vadd.f32 %v3073_v15, %v1195_v5  ;;  %v3028_v19 = vpop.f32.mrb[36].mxu0 }
 0x143   : > { %v3074_v2 = vpop.f32.mrb[36].mxu1  ;;  %v3029_v42 = vpop.f32.mrb[37].mxu0 }
 0x144   : > { %v3030_v9 = vadd.f32 %v3029_v42, %v3028_v19  ;;  %v3075_v24 = vpop.f32.mrb[37].mxu1  ;;  %v3031_v54 = vpop.f32.mrb[38].mxu0 }
 0x145   : > { %v3076_v8 = vadd.f32 %v3075_v24, %v3074_v2  ;;  %v3077_v32 = vpop.f32.mrb[38].mxu1  ;;  %v3032_v52 = vpop.f32.mrb[39].mxu0 }
 0x146   : > { %v1200_v25 = vadd.f32 %v3030_v9, %v4318_v30  ;;  %v3078_v31 = vpop.f32.mrb[39].mxu1 }
 0x148   : > { %v4345_v51 = vadd.f32 %v3076_v8, %v1200_v25 }
 0x14a   : > { %v3096_v11 = vpop.f32.mrb[40].mxu0 }
 0x14b   : > { %v3142_v57 = vpop.f32.mrb[40].mxu1  ;;  %v3097_v36 = vpop.f32.mrb[41].mxu0 }
 0x14c   : > { %v3098_v6 = vadd.f32 %v3097_v36, %v3096_v11  ;;  %v3143_v40 = vpop.f32.mrb[41].mxu1  ;;  %v3099_v62 = vpop.f32.mrb[42].mxu0 }
 0x14d   : > { %v3144_v10 = vadd.f32 %v3143_v40, %v3142_v57  ;;  %v3145_v61 = vpop.f32.mrb[42].mxu1  ;;  %v3100_v1 = vpop.f32.mrb[43].mxu0 }
 0x14e   : > { %v3101_v56 = vadd.f32 %v3100_v1, %v3099_v62  ;;  %v3146_v3 = vpop.f32.mrb[43].mxu1 }
 0x14f   : > { %v1843_v43 = vadd.f32 %v3144_v10, %v3098_v6  ;;  %v3147_v41 = vadd.f32 %v3146_v3, %v3145_v61 }
 0x151   : > { %v4348_v27 = vadd.f32 %v1843_v43, %v4321_v55  ;;  %v1846_v30 = vadd.f32 %v3147_v41, %v3101_v56 }
 0x152   : > { %v3102_v26 = vpop.f32.mrb[44].mxu0 }
 0x153   : > { %v4351_v14 = vadd.f32 %v1846_v30, %v4324_v59  ;;  %v3148_v39 = vpop.f32.mrb[44].mxu1  ;;  %v3103_v35 = vpop.f32.mrb[45].mxu0 }
 0x154   : > { %v3104_v53 = vadd.f32 %v3103_v35, %v3102_v26  ;;  %v3149_v20 = vpop.f32.mrb[45].mxu1  ;;  %v3105_v44 = vpop.f32.mrb[46].mxu0 }
 0x155   : > { %v3150_v7 = vadd.f32 %v3149_v20, %v3148_v39  ;;  %v3151_v21 = vpop.f32.mrb[46].mxu1  ;;  %v3106_v38 = vpop.f32.mrb[47].mxu0 }
 0x156   : > { %v3107_v37 = vadd.f32 %v3106_v38, %v3105_v44  ;;  %v3152_v46 = vpop.f32.mrb[47].mxu1 }
 0x157   : > { %v1851_v60 = vadd.f32 %v3150_v7, %v3104_v53  ;;  %v3153_v23 = vadd.f32 %v3152_v46, %v3151_v21 }
 0x159   : > { %v4354_v55 = vadd.f32 %v1851_v60, %v4327_v50  ;;  %v1854_v45 = vadd.f32 %v3153_v23, %v3107_v37  ;;  %v4377_v23 = vld [vmem:[%s4413_s2] ss:$0 sm:$0xff] }
 0x15a   : > { %v3108_v29 = vpop.f32.mrb[48].mxu0 }
 0x15b   : > { %v4357_v59 = vadd.f32 %v1854_v45, %v4330_v18  ;;  %v3154_v48 = vpop.f32.mrb[48].mxu1  ;;  %v3109_v0 = vpop.f32.mrb[49].mxu0 }
 0x15c   : > { %v3110_v34 = vadd.f32 %v3109_v0, %v3108_v29  ;;  %v3155_v49 = vpop.f32.mrb[49].mxu1  ;;  %v3111_v13 = vpop.f32.mrb[50].mxu0 }
 0x15d   : > { %v3156_v12 = vadd.f32 %v3155_v49, %v3154_v48  ;;  %v3157_v63 = vpop.f32.mrb[50].mxu1  ;;  %v3112_v33 = vpop.f32.mrb[51].mxu0 }
 0x15e   : > { %v3113_v16 = vadd.f32 %v3112_v33, %v3111_v13  ;;  %v3158_v58 = vpop.f32.mrb[51].mxu1 }
 0x15f   : > { %v1859_v4 = vadd.f32 %v3156_v12, %v3110_v34  ;;  %v3159_v15 = vadd.f32 %v3158_v58, %v3157_v63 }
 0x161   : > { %v4360_v50 = vadd.f32 %v1859_v4, %v4333_v22  ;;  %v1862_v5 = vadd.f32 %v3159_v15, %v3113_v16 }
 0x162   : > { %v3114_v19 = vpop.f32.mrb[52].mxu0 }
 0x163   : > { %v4363_v18 = vadd.f32 %v1862_v5, %v4336_v28  ;;  %v3160_v2 = vpop.f32.mrb[52].mxu1  ;;  %v3115_v42 = vpop.f32.mrb[53].mxu0 }
 0x164   : > { %v3116_v9 = vadd.f32 %v3115_v42, %v3114_v19  ;;  %v3161_v24 = vpop.f32.mrb[53].mxu1  ;;  %v3117_v54 = vpop.f32.mrb[54].mxu0 }
 0x165   : > { %v3162_v8 = vadd.f32 %v3161_v24, %v3160_v2  ;;  %v3163_v32 = vpop.f32.mrb[54].mxu1  ;;  %v3118_v52 = vpop.f32.mrb[55].mxu0 }
 0x166   : > { %v3119_v25 = vadd.f32 %v3118_v52, %v3117_v54  ;;  %v3164_v31 = vpop.f32.mrb[55].mxu1 }
 0x167   : > { %v1867_v11 = vadd.f32 %v3162_v8, %v3116_v9  ;;  %v3165_v57 = vadd.f32 %v3164_v31, %v3163_v32 }
 0x169   : > { %v4366_v22 = vadd.f32 %v1867_v11, %v4339_v47  ;;  %v1870_v36 = vadd.f32 %v3165_v57, %v3119_v25 }
 0x16a   : > { %v3120_v6 = vpop.f32.mrb[56].mxu0 }
 0x16b   : > { %v4369_v28 = vadd.f32 %v1870_v36, %v4342_v17  ;;  %v3166_v40 = vpop.f32.mrb[56].mxu1  ;;  %v3121_v62 = vpop.f32.mrb[57].mxu0 }
 0x16c   : > { %v3122_v10 = vadd.f32 %v3121_v62, %v3120_v6  ;;  %v3167_v61 = vpop.f32.mrb[57].mxu1  ;;  %v3123_v1 = vpop.f32.mrb[58].mxu0 }
 0x16d   : > { %v3168_v56 = vadd.f32 %v3167_v61, %v3166_v40  ;;  %v3169_v3 = vpop.f32.mrb[58].mxu1  ;;  %v3124_v43 = vpop.f32.mrb[59].mxu0 }
 0x16e   : > { %v3170_v41 = vpop.f32.mrb[59].mxu1 }
 0x16f   : > { %v1875_v30 = vadd.f32 %v3168_v56, %v3122_v10 }
 0x171   : > { %v4372_v26 = vadd.f32 %v1875_v30, %v4345_v51 }
 0x172   : > { %v3188_v47 = vpop.f32.mrb[60].mxu0 }
 0x173   : > { %v3234_v39 = vpop.f32.mrb[60].mxu1  ;;  %v3189_v35 = vpop.f32.mrb[61].mxu0 }
 0x174   : > { %v3190_v53 = vadd.f32 %v3189_v35, %v3188_v47  ;;  %v3235_v20 = vpop.f32.mrb[61].mxu1  ;;  %v3191_v17 = vpop.f32.mrb[62].mxu0 }
 0x175   : > { %v3236_v44 = vadd.f32 %v3235_v20, %v3234_v39  ;;  %v3237_v7 = vpop.f32.mrb[62].mxu1  ;;  %v3192_v21 = vpop.f32.mrb[63].mxu0 }
 0x176   : > { %v3193_v38 = vadd.f32 %v3192_v21, %v3191_v17  ;;  %v3238_v37 = vpop.f32.mrb[63].mxu1 }
 0x177   : > { %v2310_v46 = vadd.f32 %v3236_v44, %v3190_v53  ;;  %v3239_v60 = vadd.f32 %v3238_v37, %v3237_v7 }
 0x179   : > { %v2347_v51 = vadd.f32 %v2310_v46, %v4348_v27  ;;  %v2313_v45 = vadd.f32 %v3239_v60, %v3193_v38 }
 0x17a   : > { %v3194_v29 = vpop.f32.mrb[64].mxu0 }
 0x17b   : > { %v2362_v48 = vadd.f32 %v4377_v23, %v2347_v51  ;;  %v2348_v0 = vadd.f32 %v2313_v45, %v4351_v14  ;;  %v3240_v34 = vpop.f32.mrb[64].mxu1  ;;  %v3195_v49 = vpop.f32.mrb[65].mxu0 }
 0x17c   : > { %v3196_v13 = vadd.f32 %v3195_v49, %v3194_v29  ;;  %v3241_v12 = vpop.f32.mrb[65].mxu1  ;;  %v3197_v63 = vpop.f32.mrb[66].mxu0 }
 0x17d   : > { %v2363_v33 = vadd.f32 %v4377_v23, %v2348_v0  ;;  %v3242_v16 = vadd.f32 %v3241_v12, %v3240_v34  ;;  %v3243_v58 = vpop.f32.mrb[66].mxu1  ;;  %v3198_v4 = vpop.f32.mrb[67].mxu0  ;;  %v2371_v27 = vmax.f32 %v2362_v48, 0.0 }
 0x17e   : > { %v3199_v15 = vadd.f32 %v3198_v4, %v3197_v63  ;;  %v3244_v5 = vpop.f32.mrb[67].mxu1 }
 0x17f   : > { %v2372_v19 = vmax.f32 %v2363_v33, 0.0  ;;  %v2318_v2 = vadd.f32 %v3242_v16, %v3196_v13  ;;  %v3245_v42 = vadd.f32 %v3244_v5, %v3243_v58 }
 0x181   : > { %v2876_v14 = vpack.c.bf16 %v2372_v19, %v2371_v27  ;;  %v2349_v9 = vadd.f32 %v2318_v2, %v4354_v55  ;;  %v2321_v24 = vadd.f32 %v3245_v42, %v3199_v15 }
 0x182   : > { %v3200_v54 = vpop.f32.mrb[68].mxu0 }
 0x183   : > { %2877 = vst [vmem:[%s4387_s8] sm:$0xff] %v2876_v14   ;;  %v2364_v8 = vadd.f32 %v4377_v23, %v2349_v9  ;;  %v2350_v32 = vadd.f32 %v2321_v24, %v4357_v59  ;;  %v3246_v52 = vpop.f32.mrb[68].mxu1  ;;  %v3201_v25 = vpop.f32.mrb[69].mxu0 }
 0x184   : > { %v3202_v31 = vadd.f32 %v3201_v25, %v3200_v54  ;;  %v3247_v11 = vpop.f32.mrb[69].mxu1  ;;  %v3203_v57 = vpop.f32.mrb[70].mxu0 }
 0x185   : > { %v2365_v36 = vadd.f32 %v4377_v23, %v2350_v32  ;;  %v3248_v6 = vadd.f32 %v3247_v11, %v3246_v52  ;;  %v3249_v40 = vpop.f32.mrb[70].mxu1  ;;  %v3204_v62 = vpop.f32.mrb[71].mxu0  ;;  %v2373_v61 = vmax.f32 %v2364_v8, 0.0 }
 0x186   : > { %v3205_v10 = vadd.f32 %v3204_v62, %v3203_v57  ;;  %v3250_v55 = vpop.f32.mrb[71].mxu1 }
 0x187   : > { %v2374_v1 = vmax.f32 %v2365_v36, 0.0  ;;  %v2326_v56 = vadd.f32 %v3248_v6, %v3202_v31  ;;  %v3251_v3 = vadd.f32 %v3250_v55, %v3249_v40 }
 0x189   : > { %v2881_v43 = vpack.c.bf16 %v2374_v1, %v2373_v61  ;;  %v2351_v59 = vadd.f32 %v2326_v56, %v4360_v50  ;;  %v2329_v41 = vadd.f32 %v3251_v3, %v3205_v10 }
 0x18a   : > { %v3206_v30 = vpop.f32.mrb[72].mxu0 }
 0x18b   : > { %2893 = vst [vmem:[%s4387_s8 + $0x8] sm:$0xff] %v2881_v43   ;;  %v2366_v47 = vadd.f32 %v4377_v23, %v2351_v59  ;;  %v2352_v39 = vadd.f32 %v2329_v41, %v4363_v18  ;;  %v3252_v35 = vpop.f32.mrb[72].mxu1  ;;  %v3207_v53 = vpop.f32.mrb[73].mxu0 }
 0x18c   : > { %v3208_v20 = vadd.f32 %v3207_v53, %v3206_v30  ;;  %v3253_v17 = vpop.f32.mrb[73].mxu1  ;;  %v3209_v44 = vpop.f32.mrb[74].mxu0 }
 0x18d   : > { %v2367_v7 = vadd.f32 %v4377_v23, %v2352_v39  ;;  %v3254_v21 = vadd.f32 %v3253_v17, %v3252_v35  ;;  %v3255_v38 = vpop.f32.mrb[74].mxu1  ;;  %v3210_v37 = vpop.f32.mrb[75].mxu0  ;;  %v2375_v60 = vmax.f32 %v2366_v47, 0.0 }
 0x18e   : > { %v3211_v46 = vadd.f32 %v3210_v37, %v3209_v44  ;;  %v3256_v50 = vpop.f32.mrb[75].mxu1 }
 0x18f   : > { %v2376_v51 = vmax.f32 %v2367_v7, 0.0  ;;  %v2334_v45 = vadd.f32 %v3254_v21, %v3208_v20  ;;  %v3257_v29 = vadd.f32 %v3256_v50, %v3255_v38 }
 0x191   : > { %v2886_v48 = vpack.c.bf16 %v2376_v51, %v2375_v60  ;;  %v2353_v18 = vadd.f32 %v2334_v45, %v4366_v22  ;;  %v2337_v0 = vadd.f32 %v3257_v29, %v3211_v46 }
 0x192   : > { %v3212_v34 = vpop.f32.mrb[76].mxu0 }
 0x193   : > { %2894 = vst [vmem:[%s4387_s8 + $0x10] sm:$0xff] %v2886_v48   ;;  %v2368_v49 = vadd.f32 %v4377_v23, %v2353_v18  ;;  %v2354_v13 = vadd.f32 %v2337_v0, %v4369_v28  ;;  %v3258_v12 = vpop.f32.mrb[76].mxu1  ;;  %v3213_v63 = vpop.f32.mrb[77].mxu0 }
 0x194   : > { %v3214_v33 = vadd.f32 %v3213_v63, %v3212_v34  ;;  %v3259_v16 = vpop.f32.mrb[77].mxu1  ;;  %v3215_v58 = vpop.f32.mrb[78].mxu0 }
 0x195   : > { %v2369_v4 = vadd.f32 %v4377_v23, %v2354_v13  ;;  %v3260_v15 = vadd.f32 %v3259_v16, %v3258_v12  ;;  %v3261_v5 = vpop.f32.mrb[78].mxu1  ;;  %v3216_v27 = vpop.f32.mrb[79].mxu0  ;;  %v2377_v19 = vmax.f32 %v2368_v49, 0.0 }
 0x196   : > { %v3262_v22 = vpop.f32.mrb[79].mxu1 }
 0x197   : > { %v2378_v2 = vmax.f32 %v2369_v4, 0.0  ;;  %v2342_v42 = vadd.f32 %v3260_v15, %v3214_v33 }
 0x199   : > { %v2891_v14 = vpack.c.bf16 %v2378_v2, %v2377_v19  ;;  %v2355_v9 = vadd.f32 %v2342_v42, %v4372_v26 }
 0x19b   : > { %2895 = vst [vmem:[%s4387_s8 + $0x18] sm:$0xff] %v2891_v14   ;;  %v2370_v28 = vadd.f32 %v4377_v23, %v2355_v9 }
 0x19d   : > { %v2379_v24 = vmax.f32 %v2370_v28, 0.0 }
 0x19f   : > { %v2872_v54 = vpack.c.bf16 %v2379_v24, %v2379_v24 }
 0x1a1   : > { %2425 = vst [vmem:[%s4387_s8 + $0x20] sm:$0xf] %v2872_v54 }
 0x1a2 PF: > { %s13_s12 = sadd.s32 1, %s3452_s12  }
 0x1a3   : > { %p10_p4 = scmp.ge.s32.totalorder %s13_s12, 4  }
 0x1a5   :  { %12 = sbr.rel (!%p10_p4) target bundleno = 1 (0x1), region = 65 }

// kernel: a_call__.8
= control target key start
LH: loop header
LB: loop body
LE: loop exit
PB: predicated region body
PF: predicated region fallthrough
CT: control target
= control target key end

     0   :  { %s2630_s12 = smov 0   ;;  %s3192_s0 = inlined_call_operand.vmem [shape: bf16[2,26,512], index: 0, kind: input, shape index: {}]   ;;  %s3193_s1 = inlined_call_operand.vmem [shape: bf16[4,512,128], index: 1, kind: input, shape index: {}]   ;;  %s3194_s2 = inlined_call_operand.vmem [shape: f32[1,128], index: 2, kind: input, shape index: {}]   ;;  %s3195_s3 = inlined_call_operand.vmem [shape: bf16[2,20,128], index: 3, kind: output, shape index: {}]  }
   0x1 LB: > { %s1872_s13 = sadd.s32 4294967295, %s2608_s12   ;;  %p1876_p0 = scmp.ge.s32.totalorder %s2608_s12, 1  ;;  %s2608_s12 = sphi %s2630_s12, %s13_s12  }
   0x2   : > { %p137_p1 = scmp.lt.s32.totalorder %s2608_s12, 3 }
   0x4   : > { %p138_p2 = pnand %p1876_p0, %p137_p1 }
   0x5   : > { %v2460_v0 = vld [vmem:[%s3193_s1 + $0x140] sm:$0xff] (!%p138_p2)   ;;  %v2464_v4 = vld [vmem:[%s3193_s1 + $0x148] sm:$0xff] (!%p138_p2)   ;;  %v2468_v8 = vld [vmem:[%s3193_s1 + $0x150] sm:$0xff] (!%p138_p2)   ;;  %p161_p3 = scmp.lt.s32.totalorder (!%p138_p2), %s1872_s13, 1  ;;  %vm336_vm0 = vsmask.f32 (!%p138_p2), 7424 }
   0x6   : > { %141 = sbr.rel (%p138_p2) target bundleno = 371 (0x173), region = 32  ;;  %v2461_v1 = vld [vmem:[%s3193_s1 + $0x1c0] sm:$0xff] (!%p138_p2)   ;;  %2227 = vmatprep.subr.bf16.mxu0 (!%p138_p2), %v2460_v0  ;;  %v2465_v5 = vld [vmem:[%s3193_s1 + $0x1c8] sm:$0xff] (!%p138_p2)   ;;  %v2469_v9 = vld [vmem:[%s3193_s1 + $0x1d0] sm:$0xff] (!%p138_p2)   ;;  %vm1064_vm1 = vsmask.f32 (!%p138_p2), 5376 }
   0x7   : > { %v2462_v2 = vld [vmem:[%s3193_s1 + $0x100] sm:$0xff] (!%p138_p2)   ;;  %2255 = vmatprep.subr.bf16.mxu1 (!%p138_p2), %v2461_v1  ;;  %v2466_v6 = vld [vmem:[%s3193_s1 + $0x108] sm:$0xff] (!%p138_p2)   ;;  %v2470_v10 = vld [vmem:[%s3193_s1 + $0x110] sm:$0xff] (!%p138_p2)   ;;  %vm1477_vm2 = vcmask (!%p138_p2), 1044480  }
   0x8   : > { %v2463_v3 = vld [vmem:[%s3193_s1 + $0x180] sm:$0xff] (!%p138_p2)   ;;  %2228 = vmatpush3.bf16.msra.mxu0 (!%p138_p2), %v2462_v2  ;;  %v2467_v7 = vld [vmem:[%s3193_s1 + $0x188] sm:$0xff] (!%p138_p2)   ;;  %v2471_v11 = vld [vmem:[%s3193_s1 + $0x190] sm:$0xff] (!%p138_p2)  }
   0x9   : > { %2256 = vmatpush3.bf16.msra.mxu1 (!%p138_p2), %v2463_v3  ;;  %2229 = vmatprep.subr.bf16.mxu0 (!%p138_p2), %v2464_v4  ;;  %v2472_v12 = vld [vmem:[%s3193_s1 + $0x158] sm:$0xff] (!%p138_p2)   ;;  %v2476_v16 = vld [vmem:[%s3193_s1 + $0x160] sm:$0xff] (!%p138_p2)   ;;  %v2480_v20 = vld [vmem:[%s3193_s1 + $0x168] sm:$0xff] (!%p138_p2)  }
   0xa   : > { %2257 = vmatprep.subr.bf16.mxu1 (!%p138_p2), %v2465_v5  ;;  %v2473_v13 = vld [vmem:[%s3193_s1 + $0x1d8] sm:$0xff] (!%p138_p2)   ;;  %v2477_v17 = vld [vmem:[%s3193_s1 + $0x1e0] sm:$0xff] (!%p138_p2)   ;;  %v2481_v21 = vld [vmem:[%s3193_s1 + $0x1e8] sm:$0xff] (!%p138_p2)  }
   0xb   : > { %v2474_v14 = vld [vmem:[%s3193_s1 + $0x118] sm:$0xff] (!%p138_p2)   ;;  %v2478_v18 = vld [vmem:[%s3193_s1 + $0x120] sm:$0xff] (!%p138_p2)   ;;  %v2482_v22 = vld [vmem:[%s3193_s1 + $0x128] sm:$0xff] (!%p138_p2)  }
   0xc   : > { %2230 = vmatpush3.bf16.msra.mxu0 (!%p138_p2), %v2466_v6  ;;  %v2475_v15 = vld [vmem:[%s3193_s1 + $0x198] sm:$0xff] (!%p138_p2)   ;;  %v2479_v19 = vld [vmem:[%s3193_s1 + $0x1a0] sm:$0xff] (!%p138_p2)   ;;  %v2483_v23 = vld [vmem:[%s3193_s1 + $0x1a8] sm:$0xff] (!%p138_p2)  }
   0xd   : > { %2258 = vmatpush3.bf16.msra.mxu1 %v2467_v7  ;;  %2231 = vmatprep.subr.bf16.mxu0 %v2468_v8  ;;  %s3197_s13 = smov (!%p161_p3, %s1872_s13), 1  ;;  %v2484_v24 = vld [vmem:[%s3193_s1 + $0x170] sm:$0xff]   ;;  %v2488_v28 = vld [vmem:[%s3193_s1 + $0x178] sm:$0xff]   ;;  %v2502_v44 = vld [vmem:[%s3193_s1 + $0x40] sm:$0xff]  }
   0xe   : > { %2259 = vmatprep.subr.bf16.mxu1 %v2469_v9  ;;  %v2485_v25 = vld [vmem:[%s3193_s1 + $0x1f0] sm:$0xff]   ;;  %s2218_s18 = sshll.u32 %s3197_s13, 6  ;;  %v2489_v29 = vld [vmem:[%s3193_s1 + $0x1f8] sm:$0xff]   ;;  %v2503_v56 = vld [vmem:[%s3193_s1 + $0xc0] sm:$0xff]   ;;  %s2451_s4 = smul.u32 12, %s3197_s13 }
   0xf   : > { %v2486_v26 = vld [vmem:[%s3193_s1 + $0x130] sm:$0xff]   ;;  %s2738_s27 = scalar_lea.vmem %s3192_s0, %s2218_s18  ;;  %v2490_v30 = vld [vmem:[%s3193_s1 + $0x138] sm:$0xff]   ;;  %v2504_v61 = vld [vmem:[%s3193_s1] sm:$0xff]  }
  0x10   : > { %2232 = vmatpush3.bf16.msra.mxu0 %v2470_v10  ;;  %v2487_v27 = vld [vmem:[%s3193_s1 + $0x1b0] sm:$0xff]   ;;  %v2491_v31 = vld [vmem:[%s3193_s1 + $0x1b8] sm:$0xff]   ;;  %v2747_v32 = vld [vmem:[%s2738_s27 + $0x20] sm:$0xff]  ;;  %s170_s7 = scalar_lea.vmem %s3195_s3, %s2451_s4 }
  0x11   : > { %2260 = vmatpush3.bf16.msra.mxu1 %v2471_v11  ;;  %2233 = vmatprep.subr.bf16.mxu0 %v2472_v12  ;;  %v2750_v33 = vld [vmem:[%s2738_s27 + $0x4] ss:$16 sps:$4 sm:$0xff]   ;;  %v2754_v34 = vcombine.high %v2747_v32, %v2747_v32  ;;  %v2758_v35 = vcombine.low %v2747_v32, %v2747_v32  ;;  %v2761_v36 = vld [vmem:[%s2738_s27 + $0x28] sm:$0xff]  ;;  %v2767_v38 = vld [vmem:[%s2738_s27] ss:$16 sps:$4 sm:$0xff]  }
  0x12   : > { %2261 = vmatprep.subr.bf16.mxu1 %v2473_v13  ;;  %v2764_v37 = vld [vmem:[%s2738_s27 + $0xc] ss:$16 sps:$4 sm:$0xff]   ;;  %v350_v39 = vshrl.u32 %v2750_v33, 16  ;;  %v352_v40 = vshll.u32 %v2750_v33, 16  ;;  %v2774_v42 = vcombine.high %v2761_v36, %v2761_v36  ;;  %v2777_v43 = vld [vmem:[%s2738_s27 + $0x8] ss:$16 sps:$4 sm:$0xff]   ;;  %v2794_v55 = vcombine.low %v2761_v36, %v2761_v36 }
  0x13   : > { %v357_v41 = vshll.u32 %v2754_v34, 16  ;;  %v374_v45 = vshrl.u32 %v2764_v37, 16  ;;  %v376_v46 = vshll.u32 %v2764_v37, 16  ;;  %v338_v47 = vshrl.u32 %v2767_v38, 16  ;;  %v2505_v9 = vld [vmem:[%s3193_s1 + $0x80] sm:$0xff]   ;;  %v2506_v10 = vld [vmem:[%s3193_s1 + $0x48] sm:$0xff]  }
  0x14   : > { %2234 = vmatpush3.bf16.msra.mxu0 %v2474_v14  ;;  %v340_v48 = vshll.u32 %v2767_v38, 16  ;;  %v354_v49 = vrot.slane %v352_v40, 1  ;;  %v381_v51 = vshll.u32 %v2774_v42, 16  ;;  %v345_v52 = vshll.u32 %v2758_v35, 16  ;;  %v2507_v13 = vld [vmem:[%s3193_s1 + $0xc8] sm:$0xff]  }
  0x15   : > { %2262 = vmatpush3.bf16.msra.mxu1 %v2475_v15  ;;  %2235 = vmatprep.subr.bf16.mxu0 %v2476_v16  ;;  %v359_v50 = vrot.slane %v357_v41, 1  ;;  %v378_v53 = vrot.slane %v376_v46, 1  ;;  %v362_v60 = vshrl.u32 %v2777_v43, 16  ;;  %v364_v0 = vshll.u32 %v2777_v43, 16  ;;  %v2508_v15 = vld [vmem:[%s3193_s1 + $0x8] sm:$0xff]  }
  0x16   : > { %2263 = vmatprep.subr.bf16.mxu1 %v2477_v17  ;;  %v342_v54 = vrot.slane %v340_v48, 1  ;;  %v355_v57 = vor.u32 %v354_v49, %v350_v39  ;;  %v383_v58 = vrot.slane %v381_v51, 1  ;;  %v347_v59 = vrot.slane %v345_v52, 1  ;;  %v2517_v49 = vld [vmem:[%s3193_s1 + $0x98] sm:$0xff]   ;;  %v2518_v51 = vld [vmem:[%s3193_s1 + $0x60] sm:$0xff]  }
  0x17   : > { %v379_v62 = vor.u32 %v378_v53, %v374_v45  ;;  %v369_v1 = vshll.u32 %v2794_v55, 16  ;;  %v2806_v3 = vrot.slane %v338_v47, 2  ;;  %v2808_v4 = vrot.slane %v362_v60, 2  ;;  %v2519_v52 = vld [vmem:[%s3193_s1 + $0xe0] sm:$0xff]  }
  0x18   : > { %2236 = vmatpush3.bf16.msra.mxu0 %v2478_v18  ;;  %v343_v63 = vor.u32 %v342_v54, %v338_v47  ;;  %v360_v2 = vsel %vm336_vm0, %v355_v57, %v359_v50  ;;  %v366_v7 = vrot.slane %v364_v0, 1  ;;  %v388_v11 = vshrl.u32 %v2754_v34, 16  ;;  %v2516_v47 = vld [vmem:[%s3193_s1 + $0x18] sm:$0xff]   ;;  %v2520_v53 = vld [vmem:[%s3193_s1 + $0x20] sm:$0xff]   ;;  %v2523_v57 = vld [vmem:[%s3193_s1 + $0xe8] sm:$0xff]  }
  0x19   : > { %2264 = vmatpush3.bf16.msra.mxu1 %v2479_v19  ;;  %2237 = vmatprep.subr.bf16.mxu0 %v2480_v20  ;;  %v384_v5 = vsel %vm336_vm0, %v379_v62, %v383_v58  ;;  %v371_v8 = vrot.slane %v369_v1, 1  ;;  %v394_v14 = vshrl.u32 %v2774_v42, 16  ;;  %v385_v17 = vshrl.u32 %v2758_v35, 16  ;;  %v2509_v19 = vld [vmem:[%s3193_s1 + $0x88] sm:$0xff]   ;;  %v2521_v54 = vld [vmem:[%s3193_s1 + $0xa0] sm:$0xff]   ;;  %v2528_v62 = vld [vmem:[%s3193_s1 + $0x30] sm:$0xff]  }
  0x1a   : > { %2265 = vmatprep.subr.bf16.mxu1 %v2481_v21  ;;  %629 = vmatprep.mubr.bf16.mxu0 %v360_v2  ;;  %v348_v6 = vsel %vm336_vm0, %v343_v63, %v347_v59  ;;  %v367_v12 = vor.u32 %v366_v7, %v362_v60  ;;  %v390_v16 = vor.u32 %v388_v11, %v359_v50  ;;  %v391_v21 = vshrl.u32 %v2794_v55, 16  ;;  %v2526_v60 = vld [vmem:[%s3193_s1 + $0x70] sm:$0xff]   ;;  %v2531_v1 = vld [vmem:[%s3193_s1 + $0xf8] sm:$0xff]   ;;  %v2535_v7 = vld [vmem:[%s3193_s1 + $0x2c0] sm:$0xff]  }
  0x1b   : > { %677 = vmatprep.mubr.bf16.mxu1 %v384_v5  ;;  %v396_v20 = vor.u32 %v394_v14, %v383_v58  ;;  %v2861_v41 = vrot.slane %v340_v48, 3  ;;  %v2524_v58 = vld [vmem:[%s3193_s1 + $0x28] sm:$0xff]   ;;  %v2529_v63 = vld [vmem:[%s3193_s1 + $0xb0] sm:$0xff]   ;;  %v2532_v2 = vld [vmem:[%s3193_s1 + $0x38] sm:$0xff]  }
  0x1c   : > { %2238 = vmatpush3.bf16.msra.mxu0 %v2482_v22  ;;  %v372_v18 = vsel %vm336_vm0, %v367_v12, %v371_v8  ;;  %v2510_v22 = vld [vmem:[%s3193_s1 + $0x50] sm:$0xff]   ;;  %v2533_v5 = vld [vmem:[%s3193_s1 + $0xb8] sm:$0xff]   ;;  %v2539_v11 = vld [vmem:[%s3193_s1 + $0x2c8] sm:$0xff]  }
  0x1d   : > { %2266 = vmatpush3.bf16.msra.mxu1 %v2483_v23  ;;  %2239 = vmatprep.subr.bf16.mxu0 %v2484_v24  ;;  %v387_v23 = vor.u32 %v385_v17, %v347_v59  ;;  %v2835_v24 = vrot.slane %v350_v39, 2  ;;  %v2514_v39 = vld [vmem:[%s3193_s1 + $0x58] sm:$0xff]   ;;  %v1067_v48 = vor.u32 %v2861_v41, %v2806_v3  ;;  %v2525_v59 = vld [vmem:[%s3193_s1 + $0xa8] sm:$0xff]   ;;  %v2542_v14 = vld [vmem:[%s3193_s1 + $0x250] sm:$0xff]  }
  0x1e   : > { %2267 = vmatprep.subr.bf16.mxu1 %v2485_v25  ;;  %v2511_v25 = vld [vmem:[%s3193_s1 + $0xd0] sm:$0xff]   ;;  %v2540_v12 = vld [vmem:[%s3193_s1 + $0x208] sm:$0xff]   ;;  %v2546_v17 = vld [vmem:[%s3193_s1 + $0x258] sm:$0xff]  }
  0x1f   : > { %v2578_v3 = vld [vmem:[%s3193_s1 + $0x350] sm:$0xff]  }
  0x20   : > { %2240 = vmatpush3.bf16.msra.mxu0 %v2486_v26  ;;  %v2840_v26 = vrot.slane %v352_v40, 3  ;;  %v393_v40 = vor.u32 %v391_v21, %v371_v8  ;;  %v2536_v8 = vld [vmem:[%s3193_s1 + $0x200] sm:$0xff]   ;;  %v2580_v41 = vld [vmem:[%s3193_s1 + $0x310] sm:$0xff]  }
  0x21   : > { %2268 = vmatpush3.bf16.msra.mxu1 %v2487_v27  ;;  %2241 = vmatprep.subr.bf16.mxu0 %v2488_v28  ;;  %v2512_v27 = vld [vmem:[%s3193_s1 + $0x10] sm:$0xff]   ;;  %v2845_v28 = vrot.slane %v374_v45, 2  ;;  %v2552_v21 = vld [vmem:[%s3193_s1 + $0x220] sm:$0xff]  }
  0x22   : > { %2269 = vmatprep.subr.bf16.mxu1 %v2489_v29  ;;  %v2513_v29 = vld [vmem:[%s3193_s1 + $0x90] sm:$0xff]  }
  0x24   : > { %2242 = vmatpush3.bf16.msra.mxu0 %v2490_v30  ;;  %v1079_v30 = vor.u32 %v2840_v26, %v2835_v24  ;;  %v2576_v26 = vld [vmem:[%s3193_s1 + $0x308] sm:$0xff]  }
  0x25   : > { %2270 = vmatpush3.bf16.msra.mxu1 %v2491_v31  ;;  %2283 = vmatprep.subr.bf16.mxu0 %v2502_v44  ;;  %v2854_v31 = vrot.slane %v376_v46, 3  ;;  %v2515_v44 = vld [vmem:[%s3193_s1 + $0xd8] sm:$0xff]   ;;  %v2868_v46 = vrot.slane %v364_v0, 3 }
  0x26   : > { %2311 = vmatprep.subr.bf16.mxu1 %v2503_v56  ;;  %v2522_v56 = vld [vmem:[%s3193_s1 + $0x68] sm:$0xff]   ;;  %v2530_v0 = vld [vmem:[%s3193_s1 + $0x78] sm:$0xff]  }
  0x27   : > { %630 = vmatmul.mubr.bf16.vlgmr.msra.gmra.mrb[0].mxu0 %v348_v6  ;;  %v1103_v45 = vor.u32 %v2854_v31, %v2845_v28  ;;  %v1091_v50 = vor.u32 %v2868_v46, %v2808_v4  ;;  %v2534_v6 = vld [vmem:[%s3193_s1 + $0x240] sm:$0xff]   ;;  %v2577_v28 = vld [vmem:[%s3193_s1 + $0x388] sm:$0xff]   ;;  %v1481_v4 = vrot.slane %v2750_v33, 3  ;;  %v1487_v31 = vrot.slane %v2764_v37, 3 }
  0x28   : > { %2284 = vmatpush3.bf16.msra.mxu0 %v2504_v61  ;;  %678 = vmatmul.mubr.bf16.vlgmr.msra.gmra.mrb[0].mxu1 %v372_v18  ;;  %v2527_v61 = vld [vmem:[%s3193_s1 + $0xf0] sm:$0xff]   ;;  %v2547_v18 = vld [vmem:[%s3193_s1 + $0x2d8] sm:$0xff]  }
  0x29   : > { %2285 = vmatprep.subr.bf16.mxu0 %v2506_v10  ;;  %637 = vmatprep.mubr.bf16.mxu0 %v390_v16  ;;  %v2538_v10 = vld [vmem:[%s3193_s1 + $0x248] sm:$0xff]   ;;  %v2544_v16 = vld [vmem:[%s3193_s1 + $0x210] sm:$0xff]  }
  0x2a   : > { %2312 = vmatpush3.bf16.msra.mxu1 %v2505_v9  ;;  %685 = vmatprep.mubr.bf16.mxu1 %v396_v20  ;;  %v2537_v9 = vld [vmem:[%s3193_s1 + $0x280] sm:$0xff]  }
  0x2b   : > { %2313 = vmatprep.subr.bf16.mxu1 %v2507_v13  ;;  %v2541_v13 = vld [vmem:[%s3193_s1 + $0x288] sm:$0xff]   ;;  %v2551_v20 = vld [vmem:[%s3193_s1 + $0x2e0] sm:$0xff]  }
  0x2c   : > { %2286 = vmatpush3.bf16.msra.mxu0 %v2508_v15  ;;  %v2543_v15 = vld [vmem:[%s3193_s1 + $0x2d0] sm:$0xff]  }
  0x2d   : > { %2287 = vmatprep.subr.bf16.mxu0 %v2510_v22  ;;  %v2554_v22 = vld [vmem:[%s3193_s1 + $0x268] sm:$0xff]  }
  0x2e   : > { %2314 = vmatpush3.bf16.msra.mxu1 %v2509_v19  ;;  %v2550_v19 = vld [vmem:[%s3193_s1 + $0x260] sm:$0xff]  }
  0x2f   : > { %638 = vmatmul.mubr.bf16.gmra.mrb[4].mxu0 %v387_v23  ;;  %2315 = vmatprep.subr.bf16.mxu1 %v2511_v25  ;;  %v2555_v23 = vld [vmem:[%s3193_s1 + $0x2e8] sm:$0xff]  }
  0x30   : > { %2288 = vmatpush3.bf16.msra.mxu0 %v2512_v27  ;;  %925 = vmatprep.mubr.bf16.mxu0 %v2750_v33  ;;  %v2556_v25 = vld [vmem:[%s3193_s1 + $0x228] sm:$0xff]   ;;  %v2581_v33 = vld [vmem:[%s3193_s1 + $0x390] sm:$0xff]  }
  0x31   : > { %2289 = vmatprep.subr.bf16.mxu0 %v2514_v39  ;;  %686 = vmatmul.mubr.bf16.gmra.mrb[4].mxu1 %v393_v40  ;;  %v2557_v27 = vld [vmem:[%s3193_s1 + $0x2a8] sm:$0xff]   ;;  %v2559_v39 = vld [vmem:[%s3193_s1 + $0x2f0] sm:$0xff]  }
  0x32   : > { %2316 = vmatpush3.bf16.msra.mxu1 %v2513_v29  ;;  %973 = vmatprep.mubr.bf16.mxu1 %v2764_v37  ;;  %v2558_v29 = vld [vmem:[%s3193_s1 + $0x270] sm:$0xff]   ;;  %v2582_v37 = vld [vmem:[%s3193_s1 + $0x358] sm:$0xff]  }
  0x33   : > { %2317 = vmatprep.subr.bf16.mxu1 %v2515_v44  ;;  %v2560_v40 = vld [vmem:[%s3193_s1 + $0x230] sm:$0xff]  }
  0x34   : > { %2290 = vmatpush3.bf16.msra.mxu0 %v2516_v47  ;;  %v2561_v44 = vld [vmem:[%s3193_s1 + $0x2b0] sm:$0xff]   ;;  %v2562_v47 = vld [vmem:[%s3193_s1 + $0x278] sm:$0xff]  }
  0x35   : > { %2291 = vmatprep.subr.bf16.mxu0 %v2518_v51  ;;  %v2564_v51 = vld [vmem:[%s3193_s1 + $0x238] sm:$0xff]  }
  0x36   : > { %2318 = vmatpush3.bf16.msra.mxu1 %v2517_v49  ;;  %v2563_v49 = vld [vmem:[%s3193_s1 + $0x2f8] sm:$0xff]  }
  0x37   : > { %2319 = vmatprep.subr.bf16.mxu1 %v2519_v52  ;;  %v2565_v52 = vld [vmem:[%s3193_s1 + $0x2b8] sm:$0xff]  }
  0x38   : > { %2292 = vmatpush3.bf16.msra.mxu0 %v2520_v53  ;;  %v179_v53 = vld [vmem:[%s2738_s27 + $0x30] sm:$0x11] }
  0x39   : > { %2293 = vmatprep.subr.bf16.mxu0 %v2522_v56  ;;  %v3035_v56 = vcombine.low %v2747_v32, %v179_v53 }
  0x3a   : > { %2320 = vmatpush3.bf16.msra.mxu1 %v2521_v54  ;;  %v180_v54 = vld [vmem:[%s2738_s27 + $0x38] sm:$0x11] }
  0x3b   : > { %2321 = vmatprep.subr.bf16.mxu1 %v2523_v57  ;;  %v3038_v57 = vcombine.high %v2747_v32, %v179_v53  ;;  %v2596_v53 = vld [vmem:[%s3193_s1 + $0x330] sm:$0xff]  }
  0x3c   : > { %2294 = vmatpush3.bf16.msra.mxu0 %v2524_v58  ;;  %v3041_v58 = vcombine.low %v2761_v36, %v180_v54 }
  0x3d   : > { %2295 = vmatprep.subr.bf16.mxu0 %v2526_v60  ;;  %v2570_v60 = vld [vmem:[%s3193_s1 + $0x340] sm:$0xff]   ;;  %v1081_v32 = vshrl.u32 %v3038_v57, 16 }
  0x3e   : > { %2322 = vmatpush3.bf16.msra.mxu1 %v2525_v59  ;;  %v3044_v59 = vcombine.high %v2761_v36, %v180_v54  ;;  %v2597_v54 = vld [vmem:[%s3193_s1 + $0x3b0] sm:$0xff]  }
  0x3f   : > { %2323 = vmatprep.subr.bf16.mxu1 %v2527_v61  ;;  %v2571_v61 = vld [vmem:[%s3193_s1 + $0x3c0] sm:$0xff]  }
  0x40   : > { %2296 = vmatpush3.bf16.msra.mxu0 %v2528_v62  ;;  %v1084_v62 = vshll.u32 %v3038_v57, 16  ;;  %v1108_v36 = vshll.u32 %v3044_v59, 16  ;;  %v1488_v46 = vrot.slane %v3044_v59, 3 }
  0x41   : > { %2297 = vmatprep.subr.bf16.mxu0 %v2530_v0  ;;  %v1069_v0 = vshrl.u32 %v3035_v56, 16 }
  0x42   : > { %2324 = vmatpush3.bf16.msra.mxu1 %v2529_v63  ;;  %v1105_v63 = vshrl.u32 %v3044_v59, 16  ;;  %v2598_v59 = vld [vmem:[%s3193_s1 + $0x378] sm:$0xff]  }
  0x43   : > { %2325 = vmatprep.subr.bf16.mxu1 %v2531_v1  ;;  %v1072_v1 = vshll.u32 %v3035_v56, 16 }
  0x44   : > { %2298 = vmatpush3.bf16.msra.mxu0 %v2532_v2  ;;  %v1093_v2 = vshrl.u32 %v3041_v58, 16 }
  0x45   : > { %2339 = vmatprep.subr.bf16.mxu0 %v2534_v6  ;;  %v1083_v6 = vrot.slane %v1081_v32, 2  ;;  %v2601_v32 = vld [vmem:[%s3193_s1 + $0x3b8] sm:$0xff]  }
  0x46   : > { %2326 = vmatpush3.bf16.msra.mxu1 %v2533_v5  ;;  %v1096_v5 = vshll.u32 %v3041_v58, 16 }
  0x47   : > { %926 = vmatmul.mubr.bf16.vlgmr.msra.gmra.mrb[8].mxu0 %v2767_v38  ;;  %2367 = vmatprep.subr.bf16.mxu1 %v2535_v7  ;;  %v1086_v7 = vrot.slane %v1084_v62, 3  ;;  %v1478_v62 = vrot.slane %v2767_v38, 3 }
  0x48   : > { %2340 = vmatpush3.bf16.msra.mxu0 %v2536_v8  ;;  %933 = vmatprep.mubr.bf16.mxu0 %v2754_v34  ;;  %v2545_v34 = vld [vmem:[%s3193_s1 + $0x290] sm:$0xff]   ;;  %v1107_v8 = vrot.slane %v1105_v63, 2  ;;  %v1479_v63 = vrot.slane %v3035_v56, 3 }
  0x49   : > { %2341 = vmatprep.subr.bf16.mxu0 %v2538_v10  ;;  %974 = vmatmul.mubr.bf16.vlgmr.msra.gmra.mrb[8].mxu1 %v2777_v43  ;;  %v1071_v10 = vrot.slane %v1069_v0, 2  ;;  %v1485_v0 = vrot.slane %v3041_v58, 3 }
  0x4a   : > { %2368 = vmatpush3.bf16.msra.mxu1 %v2537_v9  ;;  %981 = vmatprep.mubr.bf16.mxu1 %v2774_v42  ;;  %v2548_v42 = vld [vmem:[%s3193_s1 + $0x218] sm:$0xff]   ;;  %v1110_v9 = vrot.slane %v1108_v36, 3  ;;  %v1484_v36 = vrot.slane %v2777_v43, 3 }
  0x4b   : > { %2369 = vmatprep.subr.bf16.mxu1 %v2539_v11  ;;  %v1074_v11 = vrot.slane %v1072_v1, 3  ;;  %v1480_v1 = vsel %vm1477_vm2, %v1478_v62, %v1479_v63 }
  0x4c   : > { %2342 = vmatpush3.bf16.msra.mxu0 %v2540_v12  ;;  %v1095_v12 = vrot.slane %v1093_v2, 2  ;;  %v1486_v2 = vsel %vm1477_vm2, %v1484_v36, %v1485_v0 }
  0x4d   : > { %2343 = vmatprep.subr.bf16.mxu0 %v2542_v14  ;;  %v2572_v14 = vld [vmem:[%s3193_s1 + $0x300] sm:$0xff]  }
  0x4e   : > { %2370 = vmatpush3.bf16.msra.mxu1 %v2541_v13  ;;  %v1098_v13 = vrot.slane %v1096_v5, 3 }
  0x4f   : > { %934 = vmatmul.mubr.bf16.gmra.mrb[12].mxu0 %v2758_v35  ;;  %2371 = vmatprep.subr.bf16.mxu1 %v2543_v15  ;;  %v2549_v35 = vld [vmem:[%s3193_s1 + $0x298] sm:$0xff]   ;;  %v2573_v15 = vld [vmem:[%s3193_s1 + $0x380] sm:$0xff]  }
  0x50   : > { %2344 = vmatpush3.bf16.msra.mxu0 %v2544_v16  ;;  %v1087_v16 = vor.u32 %v1086_v7, %v1083_v6 }
  0x51   : > { %2345 = vmatprep.subr.bf16.mxu0 %v2546_v17  ;;  %982 = vmatmul.mubr.bf16.gmra.mrb[12].mxu1 %v2794_v55  ;;  %v2553_v55 = vld [vmem:[%s3193_s1 + $0x2a0] sm:$0xff]   ;;  %v1075_v17 = vor.u32 %v1074_v11, %v1071_v10 }
  0x52   : > { %2372 = vmatpush3.bf16.msra.mxu1 %v2545_v34  ;;  %v1111_v34 = vor.u32 %v1110_v9, %v1107_v8 }
  0x53   : > { %2373 = vmatprep.subr.bf16.mxu1 %v2547_v18  ;;  %v1099_v18 = vor.u32 %v1098_v13, %v1095_v12 }
  0x54   : > { %2346 = vmatpush3.bf16.msra.mxu0 %v2548_v42  ;;  %v2574_v42 = vld [vmem:[%s3193_s1 + $0x348] sm:$0xff]  }
  0x55   : > { %2347 = vmatprep.subr.bf16.mxu0 %v2550_v19  ;;  %v1112_v19 = vsel %vm1064_vm1, %v1103_v45, %v1111_v34  ;;  %v1100_v24 = vsel %vm1064_vm1, %v1091_v50, %v1099_v18  ;;  %v1482_v45 = vrot.slane %v3038_v57, 3  ;;  %v2584_v50 = vld [vmem:[%s3193_s1 + $0x318] sm:$0xff]  }
  0x56   : > { %2374 = vmatpush3.bf16.msra.mxu1 %v2549_v35  ;;  %v1088_v35 = vsel %vm1064_vm1, %v1079_v30, %v1087_v16  ;;  %1393 = vmatprep.mubr.bf16.mxu1 %v1112_v19  ;;  %v2579_v30 = vld [vmem:[%s3193_s1 + $0x3d0] sm:$0xff]  }
  0x57   : > { %2375 = vmatprep.subr.bf16.mxu1 %v2551_v20  ;;  %v2575_v20 = vld [vmem:[%s3193_s1 + $0x3c8] sm:$0xff]   ;;  %1345 = vmatprep.mubr.bf16.mxu0 %v1088_v35 }
  0x58   : > { %2348 = vmatpush3.bf16.msra.mxu0 %v2552_v21  ;;  %v1076_v21 = vsel %vm1064_vm1, %v1067_v48, %v1075_v17  ;;  %v2583_v48 = vld [vmem:[%s3193_s1 + $0x3d8] sm:$0xff]  }
  0x59   : > { %2349 = vmatprep.subr.bf16.mxu0 %v2554_v22  ;;  %v1483_v22 = vsel %vm1477_vm2, %v1481_v4, %v1482_v45 }
  0x5a   : > { %2376 = vmatpush3.bf16.msra.mxu1 %v2553_v55  ;;  %v2585_v55 = vld [vmem:[%s3193_s1 + $0x398] sm:$0xff]  }
  0x5b   : > { %2377 = vmatprep.subr.bf16.mxu1 %v2555_v23  ;;  %v1489_v23 = vsel %vm1477_vm2, %v1487_v31, %v1488_v46 }
  0x5c   : > { %2350 = vmatpush3.bf16.msra.mxu0 %v2556_v25  ;;  %v2586_v25 = vld [vmem:[%s3193_s1 + $0x360] sm:$0xff]  }
  0x5d   : > { %2351 = vmatprep.subr.bf16.mxu0 %v2558_v29  ;;  %v2588_v29 = vld [vmem:[%s3193_s1 + $0x320] sm:$0xff]  }
  0x5e   : > { %2378 = vmatpush3.bf16.msra.mxu1 %v2557_v27  ;;  %v2587_v27 = vld [vmem:[%s3193_s1 + $0x3e0] sm:$0xff]  }
  0x5f   : > { %2379 = vmatprep.subr.bf16.mxu1 %v2559_v39  ;;  %v2589_v39 = vld [vmem:[%s3193_s1 + $0x3a0] sm:$0xff]  }
  0x60   : > { %2352 = vmatpush3.bf16.msra.mxu0 %v2560_v40  ;;  %v2590_v40 = vld [vmem:[%s3193_s1 + $0x368] sm:$0xff]  }
  0x61   : > { %2353 = vmatprep.subr.bf16.mxu0 %v2562_v47  ;;  %v2592_v47 = vld [vmem:[%s3193_s1 + $0x328] sm:$0xff]  }
  0x62   : > { %2380 = vmatpush3.bf16.msra.mxu1 %v2561_v44  ;;  %v2591_v44 = vld [vmem:[%s3193_s1 + $0x3e8] sm:$0xff]  }
  0x63   : > { %2381 = vmatprep.subr.bf16.mxu1 %v2563_v49  ;;  %v2593_v49 = vld [vmem:[%s3193_s1 + $0x3a8] sm:$0xff]  }
  0x64   : > { %2354 = vmatpush3.bf16.msra.mxu0 %v2564_v51  ;;  %v2594_v51 = vld [vmem:[%s3193_s1 + $0x370] sm:$0xff]  }
  0x65   : > { %2395 = vmatprep.subr.bf16.mxu0 %v2570_v60  ;;  %v2599_v60 = vld [vmem:[%s3193_s1 + $0x3f8] sm:$0xff]  }
  0x66   : > { %2382 = vmatpush3.bf16.msra.mxu1 %v2565_v52  ;;  %v2595_v52 = vld [vmem:[%s3193_s1 + $0x3f0] sm:$0xff]  }
  0x67   : > { %2423 = vmatprep.subr.bf16.mxu1 %v2571_v61  ;;  %1346 = vmatmul.mubr.bf16.vlgmr.msra.gmra.mrb[16].mxu0 %v1076_v21  ;;  %v2600_v61 = vld [vmem:[%s3193_s1 + $0x338] sm:$0xff]  }
  0x68   : > { %2396 = vmatpush3.bf16.msra.mxu0 %v2572_v14  ;;  %1353 = vmatprep.mubr.bf16.mxu0 %v1087_v16 }
  0x69   : > { %1394 = vmatmul.mubr.bf16.vlgmr.msra.gmra.mrb[16].mxu1 %v1100_v24  ;;  %2397 = vmatprep.subr.bf16.mxu0 %v2574_v42 }
  0x6a   : > { %2424 = vmatpush3.bf16.msra.mxu1 %v2573_v15  ;;  %1401 = vmatprep.mubr.bf16.mxu1 %v1111_v34 }
  0x6b   : > { %2425 = vmatprep.subr.bf16.mxu1 %v2575_v20 }
  0x6c   : > { %2398 = vmatpush3.bf16.msra.mxu0 %v2576_v26 }
  0x6d   : > { %2399 = vmatprep.subr.bf16.mxu0 %v2578_v3 }
  0x6e   : > { %2426 = vmatpush3.bf16.msra.mxu1 %v2577_v28 }
  0x6f   : > { %2427 = vmatprep.subr.bf16.mxu1 %v2579_v30  ;;  %1354 = vmatmul.mubr.bf16.gmra.mrb[20].mxu0 %v1075_v17 }
  0x70   : > { %2400 = vmatpush3.bf16.msra.mxu0 %v2580_v41  ;;  %1722 = vmatprep.mubr.bf16.mxu0 %v1483_v22 }
  0x71   : > { %1402 = vmatmul.mubr.bf16.gmra.mrb[20].mxu1 %v1099_v18  ;;  %2401 = vmatprep.subr.bf16.mxu0 %v2582_v37 }
  0x72   : > { %2428 = vmatpush3.bf16.msra.mxu1 %v2581_v33  ;;  %1770 = vmatprep.mubr.bf16.mxu1 %v1489_v23 }
  0x73   : > { %2429 = vmatprep.subr.bf16.mxu1 %v2583_v48 }
  0x74   : > { %2402 = vmatpush3.bf16.msra.mxu0 %v2584_v50 }
  0x75   : > { %2403 = vmatprep.subr.bf16.mxu0 %v2586_v25 }
  0x76   : > { %2430 = vmatpush3.bf16.msra.mxu1 %v2585_v55 }
  0x77   : > { %2431 = vmatprep.subr.bf16.mxu1 %v2587_v27 }
  0x78   : > { %2404 = vmatpush3.bf16.msra.mxu0 %v2588_v29 }
  0x79   : > { %2405 = vmatprep.subr.bf16.mxu0 %v2590_v40 }
  0x7a   : > { %2432 = vmatpush3.bf16.msra.mxu1 %v2589_v39 }
  0x7b   : > { %2433 = vmatprep.subr.bf16.mxu1 %v2591_v44 }
  0x7c   : > { %2406 = vmatpush3.bf16.msra.mxu0 %v2592_v47 }
  0x7d   : > { %2407 = vmatprep.subr.bf16.mxu0 %v2594_v51 }
  0x7e   : > { %2434 = vmatpush3.bf16.msra.mxu1 %v2593_v49 }
  0x7f   : > { %2435 = vmatprep.subr.bf16.mxu1 %v2595_v52 }
  0x80   : > { %2408 = vmatpush3.bf16.msra.mxu0 %v2596_v53 }
  0x81   : > { %2409 = vmatprep.subr.bf16.mxu0 %v2598_v59 }
  0x82   : > { %2436 = vmatpush3.bf16.msra.mxu1 %v2597_v54 }
  0x83   : > { %2437 = vmatprep.subr.bf16.mxu1 %v2599_v60 }
  0x84   : > { %2410 = vmatpush3.bf16.msra.mxu0 %v2600_v61 }
  0x86   : > { %2438 = vmatpush3.bf16.msra.mxu1 %v2601_v32 }
  0x87   : > { %1723 = vmatmul.mubr.bf16.vlgmr.msra.gmra.mrb[24].mxu0 %v1480_v1 }
  0x88   : > { %1730 = vmatprep.mubr.bf16.mxu0 %v1482_v45 }
  0x89   : > { %1771 = vmatmul.mubr.bf16.vlgmr.msra.gmra.mrb[24].mxu1 %v1486_v2 }
  0x8a   : > { %1778 = vmatprep.mubr.bf16.mxu1 %v1488_v46 }
  0x8f   : > { %1731 = vmatmul.mubr.bf16.gmra.mrb[28].mxu0 %v1479_v63 }
  0x91   : > { %1779 = vmatmul.mubr.bf16.gmra.mrb[28].mxu1 %v1485_v0 }
  0xfa   : > { %v2243_v38 = vpop.f32.mrb[0].mxu0 }
  0xfb   : > { %v2244_v43 = vpop.f32.mrb[1].mxu0  ;;  %v2271_v6 = vpop.f32.mrb[0].mxu1 }
  0xfc   : > { %v2245_v56 = vadd.f32 %v2244_v43, %v2243_v38  ;;  %v2246_v58 = vpop.f32.mrb[2].mxu0  ;;  %v2272_v8 = vpop.f32.mrb[1].mxu1 }
  0xfd   : > { %v2247_v5 = vpop.f32.mrb[3].mxu0  ;;  %v2273_v9 = vadd.f32 %v2272_v8, %v2271_v6  ;;  %v2274_v10 = vpop.f32.mrb[2].mxu1 }
  0xfe   : > { %v2248_v7 = vadd.f32 %v2247_v5, %v2246_v58  ;;  %v2275_v11 = vpop.f32.mrb[3].mxu1 }
  0xff   : > { %v680_v12 = vadd.f32 %v2273_v9, %v2245_v56  ;;  %v2276_v13 = vadd.f32 %v2275_v11, %v2274_v10 }
 0x101   : > { %v683_v57 = vadd.f32 %v2276_v13, %v2248_v7 }
 0x102   : > { %v2249_v14 = vpop.f32.mrb[4].mxu0 }
 0x103   : > { %v2250_v15 = vpop.f32.mrb[5].mxu0 }
 0x104   : > { %v2251_v16 = vadd.f32 %v2250_v15, %v2249_v14  ;;  %v2252_v34 = vpop.f32.mrb[6].mxu0  ;;  %v2277_v18 = vpop.f32.mrb[4].mxu1 }
 0x105   : > { %v2253_v17 = vpop.f32.mrb[7].mxu0  ;;  %v2278_v42 = vpop.f32.mrb[5].mxu1 }
 0x106   : > { %v2279_v35 = vadd.f32 %v2278_v42, %v2277_v18  ;;  %v2280_v19 = vpop.f32.mrb[6].mxu1 }
 0x107   : > { %v2281_v20 = vpop.f32.mrb[7].mxu1 }
 0x108   : > { %v688_v21 = vadd.f32 %v2279_v35, %v2251_v16 }
 0x11a   : > { %v2299_v24 = vpop.f32.mrb[8].mxu0 }
 0x11b   : > { %v2300_v26 = vpop.f32.mrb[9].mxu0 }
 0x11c   : > { %v2301_v28 = vadd.f32 %v2300_v26, %v2299_v24  ;;  %v2302_v3 = vpop.f32.mrb[10].mxu0  ;;  %v2327_v30 = vpop.f32.mrb[8].mxu1 }
 0x11d   : > { %v2303_v4 = vpop.f32.mrb[11].mxu0  ;;  %v2328_v45 = vpop.f32.mrb[9].mxu1 }
 0x11e   : > { %v928_v31 = vadd.f32 %v2301_v28, %v680_v12  ;;  %v2304_v41 = vadd.f32 %v2303_v4, %v2302_v3  ;;  %v2329_v33 = vadd.f32 %v2328_v45, %v2327_v30  ;;  %v2330_v46 = vpop.f32.mrb[10].mxu1  ;;  %v2212_v30 = vld [vmem:[%s3194_s2] ss:$0 sm:$0xff] }
 0x11f   : > { %v2331_v48 = vpop.f32.mrb[11].mxu1 }
 0x120   : > { %v931_v37 = vadd.f32 %v2304_v41, %v683_v57  ;;  %v976_v50 = vadd.f32 %v2329_v33, %v928_v31  ;;  %v2332_v55 = vadd.f32 %v2331_v48, %v2330_v46 }
 0x122   : > { %v2305_v22 = vpop.f32.mrb[12].mxu0  ;;  %v979_v25 = vadd.f32 %v2332_v55, %v931_v37 }
 0x123   : > { %v2306_v23 = vpop.f32.mrb[13].mxu0 }
 0x124   : > { %v2307_v27 = vadd.f32 %v2306_v23, %v2305_v22  ;;  %v2308_v29 = vpop.f32.mrb[14].mxu0  ;;  %v2333_v44 = vpop.f32.mrb[12].mxu1 }
 0x125   : > { %v2309_v39 = vpop.f32.mrb[15].mxu0  ;;  %v2334_v47 = vpop.f32.mrb[13].mxu1 }
 0x126   : > { %v936_v40 = vadd.f32 %v2307_v27, %v688_v21  ;;  %v2335_v49 = vadd.f32 %v2334_v47, %v2333_v44  ;;  %v2336_v51 = vpop.f32.mrb[14].mxu1 }
 0x127   : > { %v2337_v52 = vpop.f32.mrb[15].mxu1 }
 0x128   : > { %v984_v53 = vadd.f32 %v2335_v49, %v936_v40 }
 0x13a   : > { %v2355_v54 = vpop.f32.mrb[16].mxu0 }
 0x13b   : > { %v2356_v60 = vpop.f32.mrb[17].mxu0 }
 0x13c   : > { %v2383_v59 = vpop.f32.mrb[16].mxu1  ;;  %v2357_v32 = vadd.f32 %v2356_v60, %v2355_v54  ;;  %v2358_v63 = vpop.f32.mrb[18].mxu0 }
 0x13d   : > { %v2384_v61 = vpop.f32.mrb[17].mxu1  ;;  %v2359_v0 = vpop.f32.mrb[19].mxu0 }
 0x13e   : > { %v2385_v62 = vadd.f32 %v2384_v61, %v2383_v59  ;;  %v2386_v36 = vpop.f32.mrb[18].mxu1  ;;  %v2360_v38 = vadd.f32 %v2359_v0, %v2358_v63 }
 0x13f   : > { %v2387_v1 = vpop.f32.mrb[19].mxu1 }
 0x140   : > { %v1396_v2 = vadd.f32 %v2385_v62, %v2357_v32  ;;  %v2388_v43 = vadd.f32 %v2387_v1, %v2386_v36 }
 0x142   : > { %v1409_v56 = vadd.f32 %v1396_v2, %v976_v50  ;;  %v1399_v58 = vadd.f32 %v2388_v43, %v2360_v38  ;;  %v2361_v6 = vpop.f32.mrb[20].mxu0 }
 0x143   : > { %v2362_v8 = vpop.f32.mrb[21].mxu0 }
 0x144   : > { %v1410_v5 = vadd.f32 %v1399_v58, %v979_v25  ;;  %v2389_v7 = vpop.f32.mrb[20].mxu1  ;;  %v2363_v10 = vadd.f32 %v2362_v8, %v2361_v6  ;;  %v2364_v12 = vpop.f32.mrb[22].mxu0 }
 0x145   : > { %v2390_v9 = vpop.f32.mrb[21].mxu1  ;;  %v2365_v14 = vpop.f32.mrb[23].mxu0 }
 0x146   : > { %v2391_v11 = vadd.f32 %v2390_v9, %v2389_v7  ;;  %v2392_v13 = vpop.f32.mrb[22].mxu1 }
 0x147   : > { %v2393_v15 = vpop.f32.mrb[23].mxu1 }
 0x148   : > { %v1404_v57 = vadd.f32 %v2391_v11, %v2363_v10 }
 0x14a   : > { %v1411_v16 = vadd.f32 %v1404_v57, %v984_v53 }
 0x15a   : > { %v2411_v34 = vpop.f32.mrb[24].mxu0 }
 0x15b   : > { %v2412_v18 = vpop.f32.mrb[25].mxu0 }
 0x15c   : > { %v2439_v17 = vpop.f32.mrb[24].mxu1  ;;  %v2413_v35 = vadd.f32 %v2412_v18, %v2411_v34  ;;  %v2414_v20 = vpop.f32.mrb[26].mxu0 }
 0x15d   : > { %v2440_v42 = vpop.f32.mrb[25].mxu1  ;;  %v2415_v24 = vpop.f32.mrb[27].mxu0 }
 0x15e   : > { %v2441_v19 = vadd.f32 %v2440_v42, %v2439_v17  ;;  %v2442_v21 = vpop.f32.mrb[26].mxu1  ;;  %v2416_v3 = vadd.f32 %v2415_v24, %v2414_v20 }
 0x15f   : > { %v2443_v26 = vpop.f32.mrb[27].mxu1 }
 0x160   : > { %v1773_v28 = vadd.f32 %v2441_v19, %v2413_v35  ;;  %v2444_v4 = vadd.f32 %v2443_v26, %v2442_v21 }
 0x162   : > { %v1786_v31 = vadd.f32 %v1773_v28, %v1409_v56  ;;  %v1776_v41 = vadd.f32 %v2444_v4, %v2416_v3  ;;  %v2417_v46 = vpop.f32.mrb[28].mxu0 }
 0x163   : > { %v2418_v48 = vpop.f32.mrb[29].mxu0 }
 0x164   : > { %v1795_v45 = vadd.f32 %v2212_v30, %v1786_v31  ;;  %v1787_v33 = vadd.f32 %v1776_v41, %v1410_v5  ;;  %v2445_v37 = vpop.f32.mrb[28].mxu1  ;;  %v2419_v22 = vadd.f32 %v2418_v48, %v2417_v46  ;;  %v2420_v25 = vpop.f32.mrb[30].mxu0 }
 0x165   : > { %v2446_v50 = vpop.f32.mrb[29].mxu1  ;;  %v2421_v29 = vpop.f32.mrb[31].mxu0 }
 0x166   : > { %v1796_v55 = vadd.f32 %v2212_v30, %v1787_v33  ;;  %v2447_v23 = vadd.f32 %v2446_v50, %v2445_v37  ;;  %v2448_v27 = vpop.f32.mrb[30].mxu1  ;;  %v1798_v40 = vmax.f32 %v1795_v45, 0.0 }
 0x167   : > { %v2449_v39 = vpop.f32.mrb[31].mxu1 }
 0x168   : > { %v1799_v44 = vmax.f32 %v1796_v55, 0.0  ;;  %v1781_v47 = vadd.f32 %v2447_v23, %v2419_v22 }
 0x16a   : > { %v2225_v49 = vpack.c.bf16 %v1799_v44, %v1798_v40  ;;  %v1788_v51 = vadd.f32 %v1781_v47, %v1411_v16 }
 0x16c   : > { %v1797_v52 = vadd.f32 %v2212_v30, %v1788_v51  ;;  %2226 = vst [vmem:[%s170_s7] sm:$0xff] %v2225_v49  }
 0x16e   : > { %v1800_v53 = vmax.f32 %v1797_v52, 0.0 }
 0x170   : > { %v2221_v54 = vpack.c.bf16 %v1800_v53, %v1800_v53 }
 0x172   : > { %1816 = vst [vmem:[%s170_s7 + $0x8] sm:$0x3] %v2221_v54 }
 0x173 PF: > { %s13_s12 = sadd.s32 1, %s2608_s12  }
 0x174   : > { %p10_p4 = scmp.ge.s32.totalorder %s13_s12, 4  }
 0x176   :  { %12 = sbr.rel (!%p10_p4) target bundleno = 1 (0x1), region = 65 }

// kernel: a_call__.9
= control target key start
LH: loop header
LB: loop body
LE: loop exit
PB: predicated region body
PF: predicated region fallthrough
CT: control target
= control target key end

     0   :  { %s2374_s12 = smov 0   ;;  %s2828_s0 = inlined_call_operand.vmem [shape: bf16[2,10,512], index: 0, kind: input, shape index: {}]   ;;  %s2829_s1 = inlined_call_operand.vmem [shape: bf16[4,512,128], index: 1, kind: input, shape index: {}]   ;;  %s2830_s2 = inlined_call_operand.vmem [shape: f32[1,128], index: 2, kind: input, shape index: {}]   ;;  %s2831_s3 = inlined_call_operand.vmem [shape: f32[2,6,128], index: 3, kind: output, shape index: {}]  }
   0x1 LB: > { %s1686_s13 = sadd.s32 4294967295, %s2352_s12   ;;  %p1690_p0 = scmp.ge.s32.totalorder %s2352_s12, 1  ;;  %s2352_s12 = sphi %s2374_s12, %s13_s12  }
   0x2   : > { %p137_p1 = scmp.lt.s32.totalorder %s2352_s12, 3 }
   0x4   : > { %p138_p2 = pnand %p1690_p0, %p137_p1 }
   0x5   : > { %v2210_v0 = vld [vmem:[%s2829_s1 + $0x140] sm:$0xff] (!%p138_p2)   ;;  %v2214_v4 = vld [vmem:[%s2829_s1 + $0x148] sm:$0xff] (!%p138_p2)   ;;  %v2218_v8 = vld [vmem:[%s2829_s1 + $0x150] sm:$0xff] (!%p138_p2)   ;;  %p160_p3 = scmp.lt.s32.totalorder (!%p138_p2), %s1686_s13, 1 }
   0x6   : > { %141 = sbr.rel (%p138_p2) target bundleno = 360 (0x168), region = 32  ;;  %v2211_v1 = vld [vmem:[%s2829_s1 + $0x1c0] sm:$0xff] (!%p138_p2)   ;;  %2026 = vmatprep.subr.bf16.mxu0 (!%p138_p2), %v2210_v0  ;;  %v2215_v5 = vld [vmem:[%s2829_s1 + $0x1c8] sm:$0xff] (!%p138_p2)   ;;  %v2219_v9 = vld [vmem:[%s2829_s1 + $0x1d0] sm:$0xff] (!%p138_p2)  }
   0x7   : > { %v2212_v2 = vld [vmem:[%s2829_s1 + $0x100] sm:$0xff] (!%p138_p2)   ;;  %2048 = vmatprep.subr.bf16.mxu1 (!%p138_p2), %v2211_v1  ;;  %v2216_v6 = vld [vmem:[%s2829_s1 + $0x108] sm:$0xff] (!%p138_p2)   ;;  %v2220_v10 = vld [vmem:[%s2829_s1 + $0x110] sm:$0xff] (!%p138_p2)  }
   0x8   : > { %v2213_v3 = vld [vmem:[%s2829_s1 + $0x180] sm:$0xff] (!%p138_p2)   ;;  %2027 = vmatpush3.bf16.msra.mxu0 (!%p138_p2), %v2212_v2  ;;  %v2217_v7 = vld [vmem:[%s2829_s1 + $0x188] sm:$0xff] (!%p138_p2)   ;;  %v2221_v11 = vld [vmem:[%s2829_s1 + $0x190] sm:$0xff] (!%p138_p2)  }
   0x9   : > { %2049 = vmatpush3.bf16.msra.mxu1 (!%p138_p2), %v2213_v3  ;;  %2028 = vmatprep.subr.bf16.mxu0 (!%p138_p2), %v2214_v4  ;;  %v2222_v12 = vld [vmem:[%s2829_s1 + $0x158] sm:$0xff] (!%p138_p2)   ;;  %v2226_v16 = vld [vmem:[%s2829_s1 + $0x160] sm:$0xff] (!%p138_p2)   ;;  %v2230_v20 = vld [vmem:[%s2829_s1 + $0x168] sm:$0xff] (!%p138_p2)  }
   0xa   : > { %2050 = vmatprep.subr.bf16.mxu1 (!%p138_p2), %v2215_v5  ;;  %v2223_v13 = vld [vmem:[%s2829_s1 + $0x1d8] sm:$0xff] (!%p138_p2)   ;;  %v2227_v17 = vld [vmem:[%s2829_s1 + $0x1e0] sm:$0xff] (!%p138_p2)   ;;  %v2231_v21 = vld [vmem:[%s2829_s1 + $0x1e8] sm:$0xff] (!%p138_p2)  }
   0xb   : > { %v2224_v14 = vld [vmem:[%s2829_s1 + $0x118] sm:$0xff] (!%p138_p2)   ;;  %v2228_v18 = vld [vmem:[%s2829_s1 + $0x120] sm:$0xff] (!%p138_p2)   ;;  %v2232_v22 = vld [vmem:[%s2829_s1 + $0x128] sm:$0xff] (!%p138_p2)  }
   0xc   : > { %2029 = vmatpush3.bf16.msra.mxu0 (!%p138_p2), %v2216_v6  ;;  %v2225_v15 = vld [vmem:[%s2829_s1 + $0x198] sm:$0xff] (!%p138_p2)   ;;  %v2229_v19 = vld [vmem:[%s2829_s1 + $0x1a0] sm:$0xff] (!%p138_p2)   ;;  %v2233_v23 = vld [vmem:[%s2829_s1 + $0x1a8] sm:$0xff] (!%p138_p2)  }
   0xd   : > { %2051 = vmatpush3.bf16.msra.mxu1 %v2217_v7  ;;  %2030 = vmatprep.subr.bf16.mxu0 %v2218_v8  ;;  %s2833_s13 = smov (!%p160_p3, %s1686_s13), 1  ;;  %v2234_v24 = vld [vmem:[%s2829_s1 + $0x170] sm:$0xff]   ;;  %v2238_v28 = vld [vmem:[%s2829_s1 + $0x178] sm:$0xff]   ;;  %v2246_v38 = vld [vmem:[%s2829_s1 + $0x40] sm:$0xff]  }
   0xe   : > { %2052 = vmatprep.subr.bf16.mxu1 %v2219_v9  ;;  %v2235_v25 = vld [vmem:[%s2829_s1 + $0x1f0] sm:$0xff]   ;;  %s2025_s18 = sshll.u32 %s2833_s13, 5  ;;  %v2239_v29 = vld [vmem:[%s2829_s1 + $0x1f8] sm:$0xff]   ;;  %v2247_v39 = vld [vmem:[%s2829_s1 + $0xc0] sm:$0xff]   ;;  %s1693_s4 = sshll.u32 %s2833_s13, 3 }
   0xf   : > { %v2236_v26 = vld [vmem:[%s2829_s1 + $0x130] sm:$0xff]   ;;  %s2482_s27 = scalar_lea.vmem %s2828_s0, %s2025_s18  ;;  %v2240_v30 = vld [vmem:[%s2829_s1 + $0x138] sm:$0xff]   ;;  %v2248_v50 = vld [vmem:[%s2829_s1] sm:$0xff]   ;;  %s168_s7 = scalar_lea.vmem %s2831_s3, %s1693_s4 }
  0x10   : > { %2031 = vmatpush3.bf16.msra.mxu0 %v2220_v10  ;;  %v2237_v27 = vld [vmem:[%s2829_s1 + $0x1b0] sm:$0xff]   ;;  %v2241_v31 = vld [vmem:[%s2829_s1 + $0x1b8] sm:$0xff]   ;;  %v2491_v32 = vld [vmem:[%s2482_s27] sm:$0xff] }
  0x11   : > { %2053 = vmatpush3.bf16.msra.mxu1 %v2221_v11  ;;  %2032 = vmatprep.subr.bf16.mxu0 %v2222_v12  ;;  %v2494_v33 = vld [vmem:[%s2482_s27 + $0x8] sm:$0xff]  ;;  %v1759_v34 = vcombine.high %v2491_v32, %v2491_v32  ;;  %v2502_v36 = vcombine.low %v2491_v32, %v2491_v32  ;;  %v2249_v51 = vld [vmem:[%s2829_s1 + $0x80] sm:$0xff]   ;;  %v2254_v62 = vld [vmem:[%s2829_s1 + $0x50] sm:$0xff]  }
  0x12   : > { %2054 = vmatprep.subr.bf16.mxu1 %v2223_v13  ;;  %v1761_v35 = vcombine.high %v2494_v33, %v2494_v33  ;;  %v2506_v37 = vcombine.low %v2494_v33, %v2494_v33  ;;  %v2250_v56 = vld [vmem:[%s2829_s1 + $0x48] sm:$0xff]   ;;  %v2255_v63 = vld [vmem:[%s2829_s1 + $0xd0] sm:$0xff]   ;;  %v2258_v2 = vld [vmem:[%s2829_s1 + $0x58] sm:$0xff]  }
  0x13   : > { %v322_v40 = vshrl.u32 %v1759_v34, 16  ;;  %v324_v41 = vshll.u32 %v1759_v34, 16  ;;  %v315_v44 = vshrl.u32 %v2502_v36, 16  ;;  %v317_v45 = vshll.u32 %v2502_v36, 16  ;;  %v2251_v59 = vld [vmem:[%s2829_s1 + $0xc8] sm:$0xff]   ;;  %v2256_v0 = vld [vmem:[%s2829_s1 + $0x10] sm:$0xff]  }
  0x14   : > { %2033 = vmatpush3.bf16.msra.mxu0 %v2224_v14  ;;  %v336_v42 = vshrl.u32 %v1761_v35, 16  ;;  %v338_v43 = vshll.u32 %v1761_v35, 16  ;;  %v329_v46 = vshrl.u32 %v2506_v37, 16  ;;  %v331_v47 = vshll.u32 %v2506_v37, 16  ;;  %v2252_v60 = vld [vmem:[%s2829_s1 + $0x8] sm:$0xff]   ;;  %v2257_v1 = vld [vmem:[%s2829_s1 + $0x90] sm:$0xff]  }
  0x15   : > { %2055 = vmatpush3.bf16.msra.mxu1 %v2225_v15  ;;  %2034 = vmatprep.subr.bf16.mxu0 %v2226_v16  ;;  %v326_v48 = vrot.slane %v324_v41, 1  ;;  %v319_v52 = vrot.slane %v317_v45, 1  ;;  %v2253_v61 = vld [vmem:[%s2829_s1 + $0x88] sm:$0xff]   ;;  %v2259_v3 = vld [vmem:[%s2829_s1 + $0xd8] sm:$0xff]   ;;  %v2262_v6 = vld [vmem:[%s2829_s1 + $0x60] sm:$0xff]  }
  0x16   : > { %2056 = vmatprep.subr.bf16.mxu1 %v2227_v17  ;;  %v340_v49 = vrot.slane %v338_v43, 1  ;;  %v333_v53 = vrot.slane %v331_v47, 1  ;;  %v2260_v4 = vld [vmem:[%s2829_s1 + $0x18] sm:$0xff]   ;;  %v2263_v7 = vld [vmem:[%s2829_s1 + $0xe0] sm:$0xff]   ;;  %v2266_v10 = vld [vmem:[%s2829_s1 + $0x68] sm:$0xff]  }
  0x17   : > { %v327_v54 = vor.u32 %v326_v48, %v322_v40  ;;  %v320_v57 = vor.u32 %v319_v52, %v315_v44  ;;  %v2261_v5 = vld [vmem:[%s2829_s1 + $0x98] sm:$0xff]   ;;  %v2264_v8 = vld [vmem:[%s2829_s1 + $0x20] sm:$0xff]   ;;  %v2267_v11 = vld [vmem:[%s2829_s1 + $0xe8] sm:$0xff]  }
  0x18   : > { %2035 = vmatpush3.bf16.msra.mxu0 %v2228_v18  ;;  %v341_v55 = vor.u32 %v340_v49, %v336_v42  ;;  %v334_v58 = vor.u32 %v333_v53, %v329_v46  ;;  %v2265_v9 = vld [vmem:[%s2829_s1 + $0xa0] sm:$0xff]   ;;  %v2268_v12 = vld [vmem:[%s2829_s1 + $0x28] sm:$0xff]   ;;  %v2270_v14 = vld [vmem:[%s2829_s1 + $0x70] sm:$0xff]  }
  0x19   : > { %2057 = vmatpush3.bf16.msra.mxu1 %v2229_v19  ;;  %2036 = vmatprep.subr.bf16.mxu0 %v2230_v20  ;;  %v2269_v13 = vld [vmem:[%s2829_s1 + $0xa8] sm:$0xff]   ;;  %v2271_v15 = vld [vmem:[%s2829_s1 + $0xf0] sm:$0xff]   ;;  %v2274_v18 = vld [vmem:[%s2829_s1 + $0x78] sm:$0xff]  }
  0x1a   : > { %2058 = vmatprep.subr.bf16.mxu1 %v2231_v21  ;;  %570 = vmatprep.mubr.bf16.mxu0 %v327_v54  ;;  %v2272_v16 = vld [vmem:[%s2829_s1 + $0x30] sm:$0xff]   ;;  %v2275_v19 = vld [vmem:[%s2829_s1 + $0xf8] sm:$0xff]   ;;  %v2294_v40 = vld [vmem:[%s2829_s1 + $0x260] sm:$0xff]  }
  0x1b   : > { %610 = vmatprep.mubr.bf16.mxu1 %v341_v55  ;;  %v2273_v17 = vld [vmem:[%s2829_s1 + $0xb0] sm:$0xff]   ;;  %v2276_v20 = vld [vmem:[%s2829_s1 + $0x38] sm:$0xff]   ;;  %v2295_v41 = vld [vmem:[%s2829_s1 + $0x2e0] sm:$0xff]  }
  0x1c   : > { %2037 = vmatpush3.bf16.msra.mxu0 %v2232_v22  ;;  %v2277_v21 = vld [vmem:[%s2829_s1 + $0xb8] sm:$0xff]   ;;  %v2278_v22 = vld [vmem:[%s2829_s1 + $0x240] sm:$0xff]   ;;  %v2298_v44 = vld [vmem:[%s2829_s1 + $0x268] sm:$0xff]  }
  0x1d   : > { %2059 = vmatpush3.bf16.msra.mxu1 %v2233_v23  ;;  %2038 = vmatprep.subr.bf16.mxu0 %v2234_v24  ;;  %v2279_v23 = vld [vmem:[%s2829_s1 + $0x2c0] sm:$0xff]   ;;  %v2299_v45 = vld [vmem:[%s2829_s1 + $0x2e8] sm:$0xff]   ;;  %v2302_v48 = vld [vmem:[%s2829_s1 + $0x270] sm:$0xff]  }
  0x1e   : > { %2060 = vmatprep.subr.bf16.mxu1 %v2235_v25  ;;  %v2280_v24 = vld [vmem:[%s2829_s1 + $0x200] sm:$0xff]   ;;  %v2300_v46 = vld [vmem:[%s2829_s1 + $0x228] sm:$0xff]   ;;  %v2303_v49 = vld [vmem:[%s2829_s1 + $0x2f0] sm:$0xff]  }
  0x1f   : > { %v2281_v25 = vld [vmem:[%s2829_s1 + $0x280] sm:$0xff]   ;;  %v2301_v47 = vld [vmem:[%s2829_s1 + $0x2a8] sm:$0xff]   ;;  %v2306_v52 = vld [vmem:[%s2829_s1 + $0x278] sm:$0xff]  }
  0x20   : > { %2039 = vmatpush3.bf16.msra.mxu0 %v2236_v26  ;;  %v2282_v26 = vld [vmem:[%s2829_s1 + $0x248] sm:$0xff]   ;;  %v2296_v42 = vld [vmem:[%s2829_s1 + $0x220] sm:$0xff]   ;;  %v2307_v53 = vld [vmem:[%s2829_s1 + $0x2f8] sm:$0xff]  }
  0x21   : > { %2061 = vmatpush3.bf16.msra.mxu1 %v2237_v27  ;;  %2040 = vmatprep.subr.bf16.mxu0 %v2238_v28  ;;  %v2283_v27 = vld [vmem:[%s2829_s1 + $0x2c8] sm:$0xff]   ;;  %v2297_v43 = vld [vmem:[%s2829_s1 + $0x2a0] sm:$0xff]   ;;  %v2308_v54 = vld [vmem:[%s2829_s1 + $0x238] sm:$0xff]  }
  0x22   : > { %2062 = vmatprep.subr.bf16.mxu1 %v2239_v29  ;;  %v2284_v28 = vld [vmem:[%s2829_s1 + $0x208] sm:$0xff]   ;;  %v2309_v55 = vld [vmem:[%s2829_s1 + $0x2b8] sm:$0xff]  }
  0x23   : > { %v2285_v29 = vld [vmem:[%s2829_s1 + $0x288] sm:$0xff]  }
  0x24   : > { %2041 = vmatpush3.bf16.msra.mxu0 %v2240_v30  ;;  %v2286_v30 = vld [vmem:[%s2829_s1 + $0x250] sm:$0xff]  }
  0x25   : > { %2063 = vmatpush3.bf16.msra.mxu1 %v2241_v31  ;;  %2070 = vmatprep.subr.bf16.mxu0 %v2246_v38  ;;  %v2287_v31 = vld [vmem:[%s2829_s1 + $0x2d0] sm:$0xff]   ;;  %v2292_v38 = vld [vmem:[%s2829_s1 + $0x218] sm:$0xff]  }
  0x26   : > { %2092 = vmatprep.subr.bf16.mxu1 %v2247_v39  ;;  %v2293_v39 = vld [vmem:[%s2829_s1 + $0x298] sm:$0xff]  }
  0x27   : > { %571 = vmatmul.mubr.bf16.vlgmr.msra.gmra.mrb[0].mxu0 %v320_v57  ;;  %v174_v57 = vld [vmem:[%s2482_s27 + $0x18] sm:$0x11] }
  0x28   : > { %611 = vmatmul.mubr.bf16.vlgmr.msra.gmra.mrb[0].mxu1 %v334_v58  ;;  %2071 = vmatpush3.bf16.msra.mxu0 %v2248_v50  ;;  %v2304_v50 = vld [vmem:[%s2829_s1 + $0x230] sm:$0xff]  }
  0x29   : > { %2093 = vmatpush3.bf16.msra.mxu1 %v2249_v51  ;;  %2072 = vmatprep.subr.bf16.mxu0 %v2250_v56  ;;  %v2305_v51 = vld [vmem:[%s2829_s1 + $0x2b0] sm:$0xff]  }
  0x2a   : > { %2094 = vmatprep.subr.bf16.mxu1 %v2251_v59  ;;  %846 = vmatprep.mubr.bf16.mxu0 %v1759_v34  ;;  %v2288_v34 = vld [vmem:[%s2829_s1 + $0x210] sm:$0xff]  }
  0x2b   : > { %886 = vmatprep.mubr.bf16.mxu1 %v1761_v35  ;;  %v2289_v35 = vld [vmem:[%s2829_s1 + $0x290] sm:$0xff]  }
  0x2c   : > { %2073 = vmatpush3.bf16.msra.mxu0 %v2252_v60  ;;  %v173_v56 = vld [vmem:[%s2482_s27 + $0x10] sm:$0x11]  ;;  %v2713_v60 = vcombine.low %v2494_v33, %v174_v57 }
  0x2d   : > { %2095 = vmatpush3.bf16.msra.mxu1 %v2253_v61  ;;  %2074 = vmatprep.subr.bf16.mxu0 %v2254_v62  ;;  %v2709_v58 = vcombine.low %v2491_v32, %v173_v56  ;;  %v1891_v59 = vcombine.high %v2491_v32, %v173_v56  ;;  %v2314_v61 = vld [vmem:[%s2829_s1 + $0x340] sm:$0xff]   ;;  %v1893_v62 = vcombine.high %v2494_v33, %v174_v57 }
  0x2e   : > { %2096 = vmatprep.subr.bf16.mxu1 %v2255_v63  ;;  %v2315_v63 = vld [vmem:[%s2829_s1 + $0x3c0] sm:$0xff]  }
  0x2f   : > { %v973_v32 = vshll.u32 %v2709_v58, 16 }
  0x30   : > { %2075 = vmatpush3.bf16.msra.mxu0 %v2256_v0  ;;  %v978_v0 = vshrl.u32 %v1891_v59, 16 }
  0x31   : > { %2097 = vmatpush3.bf16.msra.mxu1 %v2257_v1  ;;  %2076 = vmatprep.subr.bf16.mxu0 %v2258_v2  ;;  %v981_v1 = vshll.u32 %v1891_v59, 16  ;;  %v970_v2 = vshrl.u32 %v2709_v58, 16 }
  0x32   : > { %2098 = vmatprep.subr.bf16.mxu1 %v2259_v3  ;;  %v994_v3 = vshrl.u32 %v1893_v62, 16 }
  0x33   : > { %v983_v33 = vrot.slane %v981_v1, 2 }
  0x34   : > { %2077 = vmatpush3.bf16.msra.mxu0 %v2260_v4  ;;  %v997_v4 = vshll.u32 %v1893_v62, 16 }
  0x35   : > { %2099 = vmatpush3.bf16.msra.mxu1 %v2261_v5  ;;  %2078 = vmatprep.subr.bf16.mxu0 %v2262_v6  ;;  %v986_v5 = vshrl.u32 %v2713_v60, 16  ;;  %v989_v6 = vshll.u32 %v2713_v60, 16 }
  0x36   : > { %2100 = vmatprep.subr.bf16.mxu1 %v2263_v7  ;;  %v980_v7 = vrot.slane %v978_v0, 1 }
  0x38   : > { %2079 = vmatpush3.bf16.msra.mxu0 %v2264_v8  ;;  %v972_v8 = vrot.slane %v970_v2, 1 }
  0x39   : > { %2101 = vmatpush3.bf16.msra.mxu1 %v2265_v9  ;;  %2080 = vmatprep.subr.bf16.mxu0 %v2266_v10  ;;  %v975_v9 = vrot.slane %v973_v32, 2  ;;  %v2316_v10 = vld [vmem:[%s2829_s1 + $0x300] sm:$0xff]  }
  0x3a   : > { %2102 = vmatprep.subr.bf16.mxu1 %v2267_v11  ;;  %v996_v11 = vrot.slane %v994_v3, 1 }
  0x3c   : > { %2081 = vmatpush3.bf16.msra.mxu0 %v2268_v12  ;;  %v999_v12 = vrot.slane %v997_v4, 2 }
  0x3d   : > { %2103 = vmatpush3.bf16.msra.mxu1 %v2269_v13  ;;  %2082 = vmatprep.subr.bf16.mxu0 %v2270_v14  ;;  %v988_v13 = vrot.slane %v986_v5, 1  ;;  %v991_v14 = vrot.slane %v989_v6, 2 }
  0x3e   : > { %2104 = vmatprep.subr.bf16.mxu1 %v2271_v15  ;;  %v2317_v15 = vld [vmem:[%s2829_s1 + $0x380] sm:$0xff]  }
  0x40   : > { %2083 = vmatpush3.bf16.msra.mxu0 %v2272_v16  ;;  %v984_v16 = vor.u32 %v983_v33, %v980_v7 }
  0x41   : > { %2105 = vmatpush3.bf16.msra.mxu1 %v2273_v17  ;;  %2084 = vmatprep.subr.bf16.mxu0 %v2274_v18  ;;  %v976_v17 = vor.u32 %v975_v9, %v972_v8  ;;  %v1000_v18 = vor.u32 %v999_v12, %v996_v11 }
  0x42   : > { %2106 = vmatprep.subr.bf16.mxu1 %v2275_v19  ;;  %v992_v19 = vor.u32 %v991_v14, %v988_v13 }
  0x44   : > { %2085 = vmatpush3.bf16.msra.mxu0 %v2276_v20  ;;  %v2318_v20 = vld [vmem:[%s2829_s1 + $0x348] sm:$0xff]  }
  0x45   : > { %2107 = vmatpush3.bf16.msra.mxu1 %v2277_v21  ;;  %2114 = vmatprep.subr.bf16.mxu0 %v2278_v22  ;;  %v2319_v21 = vld [vmem:[%s2829_s1 + $0x3c8] sm:$0xff]   ;;  %v1344_v22 = vrot.slane %v1891_v59, 2 }
  0x46   : > { %2136 = vmatprep.subr.bf16.mxu1 %v2279_v23  ;;  %v2320_v23 = vld [vmem:[%s2829_s1 + $0x308] sm:$0xff]  }
  0x47   : > { %847 = vmatmul.mubr.bf16.vlgmr.msra.gmra.mrb[4].mxu0 %v2502_v36  ;;  %v2290_v36 = vld [vmem:[%s2829_s1 + $0x258] sm:$0xff]  }
  0x48   : > { %887 = vmatmul.mubr.bf16.vlgmr.msra.gmra.mrb[4].mxu1 %v2506_v37  ;;  %2115 = vmatpush3.bf16.msra.mxu0 %v2280_v24  ;;  %v2291_v37 = vld [vmem:[%s2829_s1 + $0x2d8] sm:$0xff]   ;;  %v1346_v24 = vrot.slane %v1893_v62, 2 }
  0x49   : > { %2137 = vmatpush3.bf16.msra.mxu1 %v2281_v25  ;;  %2116 = vmatprep.subr.bf16.mxu0 %v2282_v26  ;;  %v2321_v25 = vld [vmem:[%s2829_s1 + $0x388] sm:$0xff]   ;;  %v2322_v26 = vld [vmem:[%s2829_s1 + $0x350] sm:$0xff]  }
  0x4a   : > { %2138 = vmatprep.subr.bf16.mxu1 %v2283_v27  ;;  %1229 = vmatprep.mubr.bf16.mxu0 %v984_v16  ;;  %v2323_v27 = vld [vmem:[%s2829_s1 + $0x3d0] sm:$0xff]  }
  0x4b   : > { %1269 = vmatprep.mubr.bf16.mxu1 %v1000_v18 }
  0x4c   : > { %2117 = vmatpush3.bf16.msra.mxu0 %v2284_v28  ;;  %v2324_v28 = vld [vmem:[%s2829_s1 + $0x310] sm:$0xff]  }
  0x4d   : > { %2139 = vmatpush3.bf16.msra.mxu1 %v2285_v29  ;;  %2118 = vmatprep.subr.bf16.mxu0 %v2286_v30  ;;  %v2325_v29 = vld [vmem:[%s2829_s1 + $0x390] sm:$0xff]   ;;  %v2326_v30 = vld [vmem:[%s2829_s1 + $0x358] sm:$0xff]  }
  0x4e   : > { %2140 = vmatprep.subr.bf16.mxu1 %v2287_v31  ;;  %v2327_v31 = vld [vmem:[%s2829_s1 + $0x3d8] sm:$0xff]  }
  0x50   : > { %2119 = vmatpush3.bf16.msra.mxu0 %v2288_v34  ;;  %v2328_v34 = vld [vmem:[%s2829_s1 + $0x318] sm:$0xff]  }
  0x51   : > { %2141 = vmatpush3.bf16.msra.mxu1 %v2289_v35  ;;  %2120 = vmatprep.subr.bf16.mxu0 %v2290_v36  ;;  %v2329_v35 = vld [vmem:[%s2829_s1 + $0x398] sm:$0xff]   ;;  %v2330_v36 = vld [vmem:[%s2829_s1 + $0x360] sm:$0xff]  }
  0x52   : > { %2142 = vmatprep.subr.bf16.mxu1 %v2291_v37  ;;  %v2331_v37 = vld [vmem:[%s2829_s1 + $0x3e0] sm:$0xff]  }
  0x54   : > { %2121 = vmatpush3.bf16.msra.mxu0 %v2292_v38  ;;  %v2332_v38 = vld [vmem:[%s2829_s1 + $0x320] sm:$0xff]  }
  0x55   : > { %2143 = vmatpush3.bf16.msra.mxu1 %v2293_v39  ;;  %2122 = vmatprep.subr.bf16.mxu0 %v2294_v40  ;;  %v2333_v39 = vld [vmem:[%s2829_s1 + $0x3a0] sm:$0xff]   ;;  %v2334_v40 = vld [vmem:[%s2829_s1 + $0x368] sm:$0xff]  }
  0x56   : > { %2144 = vmatprep.subr.bf16.mxu1 %v2295_v41  ;;  %v2335_v41 = vld [vmem:[%s2829_s1 + $0x3e8] sm:$0xff]  }
  0x58   : > { %2123 = vmatpush3.bf16.msra.mxu0 %v2296_v42  ;;  %v2336_v42 = vld [vmem:[%s2829_s1 + $0x328] sm:$0xff]  }
  0x59   : > { %2145 = vmatpush3.bf16.msra.mxu1 %v2297_v43  ;;  %2124 = vmatprep.subr.bf16.mxu0 %v2298_v44  ;;  %v2337_v43 = vld [vmem:[%s2829_s1 + $0x3a8] sm:$0xff]   ;;  %v2338_v44 = vld [vmem:[%s2829_s1 + $0x370] sm:$0xff]  }
  0x5a   : > { %2146 = vmatprep.subr.bf16.mxu1 %v2299_v45  ;;  %v2339_v45 = vld [vmem:[%s2829_s1 + $0x3f0] sm:$0xff]  }
  0x5c   : > { %2125 = vmatpush3.bf16.msra.mxu0 %v2300_v46  ;;  %v2340_v46 = vld [vmem:[%s2829_s1 + $0x330] sm:$0xff]  }
  0x5d   : > { %2147 = vmatpush3.bf16.msra.mxu1 %v2301_v47  ;;  %2126 = vmatprep.subr.bf16.mxu0 %v2302_v48  ;;  %v2341_v47 = vld [vmem:[%s2829_s1 + $0x3b0] sm:$0xff]   ;;  %v2342_v48 = vld [vmem:[%s2829_s1 + $0x378] sm:$0xff]  }
  0x5e   : > { %2148 = vmatprep.subr.bf16.mxu1 %v2303_v49  ;;  %v2343_v49 = vld [vmem:[%s2829_s1 + $0x3f8] sm:$0xff]  }
  0x60   : > { %2127 = vmatpush3.bf16.msra.mxu0 %v2304_v50  ;;  %v2344_v50 = vld [vmem:[%s2829_s1 + $0x338] sm:$0xff]  }
  0x61   : > { %2149 = vmatpush3.bf16.msra.mxu1 %v2305_v51  ;;  %2128 = vmatprep.subr.bf16.mxu0 %v2306_v52  ;;  %v2345_v51 = vld [vmem:[%s2829_s1 + $0x3b8] sm:$0xff]   ;;  %v1343_v52 = vrot.slane %v2709_v58, 2 }
  0x62   : > { %2150 = vmatprep.subr.bf16.mxu1 %v2307_v53  ;;  %v1345_v53 = vrot.slane %v2713_v60, 2 }
  0x64   : > { %2129 = vmatpush3.bf16.msra.mxu0 %v2308_v54 }
  0x65   : > { %2151 = vmatpush3.bf16.msra.mxu1 %v2309_v55  ;;  %2158 = vmatprep.subr.bf16.mxu0 %v2314_v61 }
  0x66   : > { %2180 = vmatprep.subr.bf16.mxu1 %v2315_v63 }
  0x67   : > { %1230 = vmatmul.mubr.bf16.vlgmr.msra.gmra.mrb[8].mxu0 %v976_v17 }
  0x68   : > { %1270 = vmatmul.mubr.bf16.vlgmr.msra.gmra.mrb[8].mxu1 %v992_v19  ;;  %2159 = vmatpush3.bf16.msra.mxu0 %v2316_v10 }
  0x69   : > { %2181 = vmatpush3.bf16.msra.mxu1 %v2317_v15  ;;  %2160 = vmatprep.subr.bf16.mxu0 %v2318_v20 }
  0x6a   : > { %2182 = vmatprep.subr.bf16.mxu1 %v2319_v21  ;;  %1575 = vmatprep.mubr.bf16.mxu0 %v1344_v22 }
  0x6b   : > { %1615 = vmatprep.mubr.bf16.mxu1 %v1346_v24 }
  0x6c   : > { %2161 = vmatpush3.bf16.msra.mxu0 %v2320_v23 }
  0x6d   : > { %2183 = vmatpush3.bf16.msra.mxu1 %v2321_v25  ;;  %2162 = vmatprep.subr.bf16.mxu0 %v2322_v26 }
  0x6e   : > { %2184 = vmatprep.subr.bf16.mxu1 %v2323_v27 }
  0x70   : > { %2163 = vmatpush3.bf16.msra.mxu0 %v2324_v28 }
  0x71   : > { %2185 = vmatpush3.bf16.msra.mxu1 %v2325_v29  ;;  %2164 = vmatprep.subr.bf16.mxu0 %v2326_v30 }
  0x72   : > { %2186 = vmatprep.subr.bf16.mxu1 %v2327_v31 }
  0x74   : > { %2165 = vmatpush3.bf16.msra.mxu0 %v2328_v34 }
  0x75   : > { %2187 = vmatpush3.bf16.msra.mxu1 %v2329_v35  ;;  %2166 = vmatprep.subr.bf16.mxu0 %v2330_v36  ;;  %v2022_v36 = vld [vmem:[%s2830_s2] ss:$0 sm:$0xff] }
  0x76   : > { %2188 = vmatprep.subr.bf16.mxu1 %v2331_v37 }
  0x78   : > { %2167 = vmatpush3.bf16.msra.mxu0 %v2332_v38 }
  0x79   : > { %2189 = vmatpush3.bf16.msra.mxu1 %v2333_v39  ;;  %2168 = vmatprep.subr.bf16.mxu0 %v2334_v40 }
  0x7a   : > { %2190 = vmatprep.subr.bf16.mxu1 %v2335_v41 }
  0x7c   : > { %2169 = vmatpush3.bf16.msra.mxu0 %v2336_v42 }
  0x7d   : > { %2191 = vmatpush3.bf16.msra.mxu1 %v2337_v43  ;;  %2170 = vmatprep.subr.bf16.mxu0 %v2338_v44 }
  0x7e   : > { %2192 = vmatprep.subr.bf16.mxu1 %v2339_v45 }
  0x80   : > { %2171 = vmatpush3.bf16.msra.mxu0 %v2340_v46 }
  0x81   : > { %2193 = vmatpush3.bf16.msra.mxu1 %v2341_v47  ;;  %2172 = vmatprep.subr.bf16.mxu0 %v2342_v48 }
  0x82   : > { %2194 = vmatprep.subr.bf16.mxu1 %v2343_v49 }
  0x84   : > { %2173 = vmatpush3.bf16.msra.mxu0 %v2344_v50 }
  0x85   : > { %2195 = vmatpush3.bf16.msra.mxu1 %v2345_v51 }
  0x87   : > { %1576 = vmatmul.mubr.bf16.vlgmr.msra.gmra.mrb[12].mxu0 %v1343_v52 }
  0x88   : > { %1616 = vmatmul.mubr.bf16.vlgmr.msra.gmra.mrb[12].mxu1 %v1345_v53 }
  0xfa   : > { %v2042_v54 = vpop.f32.mrb[0].mxu0 }
  0xfb   : > { %v2064_v55 = vpop.f32.mrb[0].mxu1  ;;  %v2043_v56 = vpop.f32.mrb[1].mxu0 }
  0xfc   : > { %v2065_v57 = vpop.f32.mrb[1].mxu1  ;;  %v2044_v59 = vadd.f32 %v2043_v56, %v2042_v54  ;;  %v2045_v62 = vpop.f32.mrb[2].mxu0 }
  0xfd   : > { %v2066_v61 = vadd.f32 %v2065_v57, %v2064_v55  ;;  %v2067_v63 = vpop.f32.mrb[2].mxu1  ;;  %v2046_v0 = vpop.f32.mrb[3].mxu0 }
  0xfe   : > { %v2068_v1 = vpop.f32.mrb[3].mxu1 }
  0xff   : > { %v613_v2 = vadd.f32 %v2066_v61, %v2044_v59 }
 0x11a   : > { %v2086_v32 = vpop.f32.mrb[4].mxu0 }
 0x11b   : > { %v2108_v3 = vpop.f32.mrb[4].mxu1  ;;  %v2087_v58 = vpop.f32.mrb[5].mxu0 }
 0x11c   : > { %v2109_v4 = vpop.f32.mrb[5].mxu1  ;;  %v2088_v5 = vadd.f32 %v2087_v58, %v2086_v32  ;;  %v2089_v6 = vpop.f32.mrb[6].mxu0 }
 0x11d   : > { %v2110_v60 = vadd.f32 %v2109_v4, %v2108_v3  ;;  %v2111_v7 = vpop.f32.mrb[6].mxu1  ;;  %v2090_v33 = vpop.f32.mrb[7].mxu0 }
 0x11e   : > { %v2112_v8 = vpop.f32.mrb[7].mxu1  ;;  %v849_v9 = vadd.f32 %v2088_v5, %v613_v2 }
 0x120   : > { %v889_v10 = vadd.f32 %v2110_v60, %v849_v9 }
 0x13a   : > { %v2130_v11 = vpop.f32.mrb[8].mxu0 }
 0x13b   : > { %v2152_v12 = vpop.f32.mrb[8].mxu1  ;;  %v2131_v13 = vpop.f32.mrb[9].mxu0 }
 0x13c   : > { %v2132_v14 = vadd.f32 %v2131_v13, %v2130_v11  ;;  %v2153_v15 = vpop.f32.mrb[9].mxu1  ;;  %v2133_v16 = vpop.f32.mrb[10].mxu0 }
 0x13d   : > { %v2154_v17 = vadd.f32 %v2153_v15, %v2152_v12  ;;  %v2155_v18 = vpop.f32.mrb[10].mxu1  ;;  %v2134_v19 = vpop.f32.mrb[11].mxu0 }
 0x13e   : > { %v2156_v20 = vpop.f32.mrb[11].mxu1 }
 0x13f   : > { %v1272_v21 = vadd.f32 %v2154_v17, %v2132_v14 }
 0x141   : > { %v1277_v22 = vadd.f32 %v1272_v21, %v889_v10 }
 0x15a   : > { %v2174_v23 = vpop.f32.mrb[12].mxu0 }
 0x15b   : > { %v2196_v24 = vpop.f32.mrb[12].mxu1  ;;  %v2175_v25 = vpop.f32.mrb[13].mxu0 }
 0x15c   : > { %v2176_v26 = vadd.f32 %v2175_v25, %v2174_v23  ;;  %v2197_v27 = vpop.f32.mrb[13].mxu1  ;;  %v2177_v28 = vpop.f32.mrb[14].mxu0 }
 0x15d   : > { %v2198_v29 = vadd.f32 %v2197_v27, %v2196_v24  ;;  %v2199_v30 = vpop.f32.mrb[14].mxu1  ;;  %v2178_v31 = vpop.f32.mrb[15].mxu0 }
 0x15e   : > { %v2200_v34 = vpop.f32.mrb[15].mxu1 }
 0x15f   : > { %v1618_v35 = vadd.f32 %v2198_v29, %v2176_v26 }
 0x161   : > { %v1623_v37 = vadd.f32 %v1618_v35, %v1277_v22 }
 0x163   : > { %v1630_v38 = vadd.f32 %v2022_v36, %v1623_v37 }
 0x165   : > { %v1631_v39 = vmax.f32 %v1630_v38, 0.0 }
 0x167   : > { %1632 = vst [vmem:[%s168_s7] sm:$0x3f] %v1631_v39 }
 0x168 PF: > { %s13_s12 = sadd.s32 1, %s2352_s12  }
 0x169   : > { %p10_p4 = scmp.ge.s32.totalorder %s13_s12, 4  }
 0x16b   :  { %12 = sbr.rel (!%p10_p4) target bundleno = 1 (0x1), region = 65 }

</bundles_post_ra>
